<compile_context>
chip_gen: v7x
topology: tpu7x:2x2x1
jax: 0.10.0
libtpu: 0.0.40
codegen_flags: <defaults>
</compile_context>

<pallas_src>
import functools
import math

import jax
import jax.numpy as jnp
from jax.experimental import pallas as pl
from jax.experimental.pallas import tpu as pltpu

F32 = jnp.float32
BF16 = jnp.bfloat16

# ---- BERT config (hidden must be 768 because fc_1 = Linear(768, 32)) ----
VOCAB = 128
HIDDEN = 768
LAYERS = 2
HEADS = 12
HEAD_DIM = HIDDEN // HEADS
INTER = 3072
MAX_POS = 64
TYPE_VOCAB = 2
LN_EPS = 1e-12

# 48 MiB scoped VMEM: fits v7x (64 MiB physical); v5e/v6e (128 MiB) have headroom.
VMEM_LIMIT = 48 << 20


def _cparams(dims):
    return pltpu.CompilerParams(dimension_semantics=dims,
                                vmem_limit_bytes=VMEM_LIMIT)


def _gelu(x):
    # TODO(synk): original BERT uses the erf-based GELU; tanh approximation used here.
    c = math.sqrt(2.0 / math.pi)
    return 0.5 * x * (1.0 + jnp.tanh(c * (x + 0.044715 * x * x * x)))


def _layernorm(y, g, b, eps):
    mu = jnp.mean(y, axis=-1, keepdims=True)
    yc = y - mu
    var = jnp.mean(yc * yc, axis=-1, keepdims=True)
    return yc * jax.lax.rsqrt(var + eps) * g + b


# ---------------- Pallas kernels ----------------

def _linear_kernel(x_ref, w_ref, b_ref, o_ref):
    x = x_ref[...].astype(BF16)
    acc = jnp.dot(x, w_ref[...], preferred_element_type=jnp.float32)
    o_ref[...] = (acc + b_ref[...]).astype(o_ref.dtype)


def linear_tiled(x, w, b, tn=256):
    """y = x @ w + b; x:[M,K] f32, w:[K,N] bf16. Tiled over N, parallel grid."""
    M, K = x.shape
    N = w.shape[1]
    assert N % tn == 0
    return pl.pallas_call(
        _linear_kernel,
        out_shape=jax.ShapeDtypeStruct((M, N), F32),
        grid=(N // tn,),
        in_specs=[
            pl.BlockSpec((M, K), lambda j: (0, 0)),
            pl.BlockSpec((K, tn), lambda j: (0, j)),
            pl.BlockSpec((1, tn), lambda j: (0, j)),
        ],
        out_specs=pl.BlockSpec((M, tn), lambda j: (0, j)),
        compiler_params=_cparams(("parallel",)),
    )(x, w, b.reshape(1, N))


def _layernorm_kernel(x_ref, g_ref, b_ref, o_ref, *, eps):
    o_ref[...] = _layernorm(x_ref[...], g_ref[...], b_ref[...], eps).astype(o_ref.dtype)


def layernorm(x, g, b, eps=LN_EPS):
    M, H = x.shape
    return pl.pallas_call(
        functools.partial(_layernorm_kernel, eps=eps),
        out_shape=jax.ShapeDtypeStruct((M, H), x.dtype),
        grid=(1,),
        in_specs=[
            pl.BlockSpec((M, H), lambda i: (0, 0)),
            pl.BlockSpec((1, H), lambda i: (0, 0)),
            pl.BlockSpec((1, H), lambda i: (0, 0)),
        ],
        out_specs=pl.BlockSpec((M, H), lambda i: (0, 0)),
        compiler_params=_cparams(("arbitrary",)),
    )(x, g.reshape(1, H), b.reshape(1, H))


def _attn_block_kernel(qkv_ref, mask_ref, res_ref, wao_ref, bao_ref, g_ref, be_ref,
                       o_ref, *, scale, eps):
    """Per-batch: multi-head attention + output proj + residual + LayerNorm."""
    qkv = qkv_ref[0]                                        # [S, 3H] f32
    bias = (1.0 - mask_ref[0]) * (-10000.0)                 # [1, S] additive mask
    parts = []
    for h in range(HEADS):
        lo = h * HEAD_DIM
        q = qkv[:, lo:lo + HEAD_DIM] * scale                # pre-scale q (S*D elems)
        k = qkv[:, HIDDEN + lo:HIDDEN + lo + HEAD_DIM]
        v = qkv[:, 2 * HIDDEN + lo:2 * HIDDEN + lo + HEAD_DIM]
        s = jax.lax.dot_general(q, k, (((1,), (1,)), ((), ())),
                                preferred_element_type=jnp.float32) + bias   # [S, S]
        m = jnp.max(s, axis=-1, keepdims=True)
        p = jnp.exp(s - m)
        p = p * pl.reciprocal(jnp.sum(p, axis=-1, keepdims=True), approx=True)
        parts.append(jnp.dot(p, v, preferred_element_type=jnp.float32))
    ctx = jnp.concatenate(parts, axis=-1)                   # [S, H] lane-dense
    attn = jnp.dot(ctx.astype(BF16), wao_ref[...],
                   preferred_element_type=jnp.float32) + bao_ref[...]
    y = attn + res_ref[0]
    o_ref[0] = _layernorm(y, g_ref[...], be_ref[...], eps).astype(o_ref.dtype)


def attention_block(qkv, mask_b, h_res, w_ao, b_ao, g, be, scale):
    """qkv:[B,S,3H] f32, mask_b:[B,1,S] f32, h_res:[B,S,H] f32, w_ao bf16."""
    B, S, _ = qkv.shape
    return pl.pallas_call(
        functools.partial(_attn_block_kernel, scale=scale, eps=LN_EPS),
        out_shape=jax.ShapeDtypeStruct((B, S, HIDDEN), F32),
        grid=(B,),
        in_specs=[
            pl.BlockSpec((1, S, 3 * HIDDEN), lambda b: (b, 0, 0)),
            pl.BlockSpec((1, 1, S), lambda b: (b, 0, 0)),
            pl.BlockSpec((1, S, HIDDEN), lambda b: (b, 0, 0)),
            pl.BlockSpec((HIDDEN, HIDDEN), lambda b: (0, 0)),
            pl.BlockSpec((1, HIDDEN), lambda b: (0, 0)),
            pl.BlockSpec((1, HIDDEN), lambda b: (0, 0)),
            pl.BlockSpec((1, HIDDEN), lambda b: (0, 0)),
        ],
        out_specs=pl.BlockSpec((1, S, HIDDEN), lambda b: (b, 0, 0)),
        compiler_params=_cparams(("parallel",)),
    )(qkv, mask_b, h_res, w_ao, b_ao.reshape(1, HIDDEN),
      g.reshape(1, HIDDEN), be.reshape(1, HIDDEN))


def _ffn_kernel(x_ref, wi_ref, bi_ref, wo_ref, bo_ref, g_ref, be_ref,
                o_ref, acc_ref, *, eps):
    """Fused FFN: gelu(x@Wi+bi)@Wo + bo + residual + LayerNorm, reduced over INTER."""
    j = pl.program_id(0)

    @pl.when(j == 0)
    def _():
        acc_ref[...] = jnp.zeros_like(acc_ref)

    xb = x_ref[...].astype(BF16)
    inter = jnp.dot(xb, wi_ref[...], preferred_element_type=jnp.float32) + bi_ref[...]
    inter = _gelu(inter)
    acc_ref[...] += jnp.dot(inter.astype(BF16), wo_ref[...],
                            preferred_element_type=jnp.float32)

    @pl.when(j == pl.num_programs(0) - 1)
    def _():
        y = acc_ref[...] + bo_ref[...] + x_ref[...]
        o_ref[...] = _layernorm(y, g_ref[...], be_ref[...], eps).astype(o_ref.dtype)


def ffn_block(x, w_i, b_i, w_o, b_o, g, be, tj=512):
    M, H = x.shape
    assert INTER % tj == 0
    return pl.pallas_call(
        functools.partial(_ffn_kernel, eps=LN_EPS),
        out_shape=jax.ShapeDtypeStruct((M, H), F32),
        grid=(INTER // tj,),
        in_specs=[
            pl.BlockSpec((M, H), lambda j: (0, 0)),
            pl.BlockSpec((H, tj), lambda j: (0, j)),
            pl.BlockSpec((1, tj), lambda j: (0, j)),
            pl.BlockSpec((tj, H), lambda j: (j, 0)),
            pl.BlockSpec((1, H), lambda j: (0, 0)),
            pl.BlockSpec((1, H), lambda j: (0, 0)),
            pl.BlockSpec((1, H), lambda j: (0, 0)),
        ],
        out_specs=pl.BlockSpec((M, H), lambda j: (0, 0)),
        scratch_shapes=[pltpu.VMEM((M, H), jnp.float32)],
        compiler_params=_cparams(("arbitrary",)),
    )(x, w_i, b_i.reshape(1, INTER), w_o, b_o.reshape(1, H),
      g.reshape(1, H), be.reshape(1, H))


def _head_kernel(cls_ref, wp_ref, bp_ref, w1_ref, b1_ref, w2_ref, b2_ref, o_ref):
    """Fused pooler (tanh) + fc_1 + fc_2."""
    cls = cls_ref[...].astype(BF16)
    pooled = jnp.tanh(jnp.dot(cls, wp_ref[...],
                              preferred_element_type=jnp.float32) + bp_ref[...])
    h1 = jnp.dot(pooled.astype(BF16), w1_ref[...],
                 preferred_element_type=jnp.float32) + b1_ref[...]
    out = jnp.dot(h1.astype(BF16), w2_ref[...],
                  preferred_element_type=jnp.float32) + b2_ref[...]
    o_ref[...] = out.astype(o_ref.dtype)


def head_block(cls, w_pool, b_pool, w_fc1, b_fc1, w_fc2, b_fc2):
    B = cls.shape[0]
    return pl.pallas_call(
        _head_kernel,
        out_shape=jax.ShapeDtypeStruct((B, 2), F32),
        grid=(1,),
        in_specs=[
            pl.BlockSpec((B, HIDDEN), lambda i: (0, 0)),
            pl.BlockSpec((HIDDEN, HIDDEN), lambda i: (0, 0)),
            pl.BlockSpec((1, HIDDEN), lambda i: (0, 0)),
            pl.BlockSpec((HIDDEN, 32), lambda i: (0, 0)),
            pl.BlockSpec((1, 32), lambda i: (0, 0)),
            pl.BlockSpec((32, 2), lambda i: (0, 0)),
            pl.BlockSpec((1, 2), lambda i: (0, 0)),
        ],
        out_specs=pl.BlockSpec((B, 2), lambda i: (0, 0)),
        compiler_params=_cparams(("arbitrary",)),
    )(cls, w_pool, b_pool.reshape(1, HIDDEN), w_fc1, b_fc1.reshape(1, 32),
      w_fc2, b_fc2.reshape(1, 2))


# ---------------- Parameters ----------------

def init_params(key):
    keys = iter(jax.random.split(key, 64))

    def nrm(shape, dtype=F32):
        return (0.02 * jax.random.normal(next(keys), shape)).astype(dtype)

    p = {
        "word_emb": nrm((VOCAB, HIDDEN)),
        "pos_emb": nrm((MAX_POS, HIDDEN)),
        "type_emb": nrm((TYPE_VOCAB, HIDDEN)),
        "emb_ln_g": jnp.ones((HIDDEN,), F32),
        "emb_ln_b": jnp.zeros((HIDDEN,), F32),
        "layers": [],
        "w_pool": nrm((HIDDEN, HIDDEN), BF16),
        "b_pool": jnp.zeros((HIDDEN,), F32),
        "w_fc1": nrm((HIDDEN, 32), BF16),
        "b_fc1": jnp.zeros((32,), F32),
        "w_fc2": nrm((32, 2), BF16),
        "b_fc2": jnp.zeros((2,), F32),
    }
    for _ in range(LAYERS):
        p["layers"].append({
            "w_qkv": nrm((HIDDEN, 3 * HIDDEN), BF16),
            "b_qkv": jnp.zeros((3 * HIDDEN,), F32),
            "w_ao": nrm((HIDDEN, HIDDEN), BF16),
            "b_ao": jnp.zeros((HIDDEN,), F32),
            "ln1_g": jnp.ones((HIDDEN,), F32),
            "ln1_b": jnp.zeros((HIDDEN,), F32),
            "w_i": nrm((HIDDEN, INTER), BF16),
            "b_i": jnp.zeros((INTER,), F32),
            "w_o": nrm((INTER, HIDDEN), BF16),
            "b_o": jnp.zeros((HIDDEN,), F32),
            "ln2_g": jnp.ones((HIDDEN,), F32),
            "ln2_b": jnp.zeros((HIDDEN,), F32),
        })
    return p


# ---------------- Forward (mirrors Model.forward) ----------------

def model_forward(params, x):
    context = x[0]          # [B, S] token ids
    types = x[1]            # [B, S] token type ids
    mask = x[2]             # [B, S] attention mask
    B, S = context.shape
    assert S <= MAX_POS, "sequence length exceeds positional embedding table"

    # BERT embeddings (gathers are glue; LayerNorm in Pallas).
    h = (jnp.take(params["word_emb"], context, axis=0)
         + params["pos_emb"][None, :S, :]
         + jnp.take(params["type_emb"], types, axis=0))
    h = h.reshape(B * S, HIDDEN).astype(F32)
    h = layernorm(h, params["emb_ln_g"], params["emb_ln_b"])

    # Raw mask [B,1,S]; the -10000 additive bias is built inside the attention kernel.
    mask_b = mask.astype(F32).reshape(B, 1, S)
    scale = 1.0 / math.sqrt(HEAD_DIM)

    for lyr in params["layers"]:
        qkv = linear_tiled(h, lyr["w_qkv"], lyr["b_qkv"], tn=256)       # [B*S, 3H]
        h = attention_block(qkv.reshape(B, S, 3 * HIDDEN), mask_b,
                            h.reshape(B, S, HIDDEN),
                            lyr["w_ao"], lyr["b_ao"], lyr["ln1_g"], lyr["ln1_b"],
                            scale).reshape(B * S, HIDDEN)
        h = ffn_block(h, lyr["w_i"], lyr["b_i"], lyr["w_o"], lyr["b_o"],
                      lyr["ln2_g"], lyr["ln2_b"], tj=512)

    # Pooler (tanh Linear on [CLS]) -> fc_1 -> fc_2, all in one kernel.
    cls = h.reshape(B, S, HIDDEN)[:, 0, :]                              # [B, 768]
    return head_block(cls, params["w_pool"], params["b_pool"],
                      params["w_fc1"], params["b_fc1"],
                      params["w_fc2"], params["b_fc2"])                 # [B, 2]


if __name__ == "__main__":
    key = jax.random.PRNGKey(0)
    pkey, ckey = jax.random.split(key)
    params = init_params(pkey)

    B, S = 2, 8
    context = jax.random.randint(ckey, (B, S), 0, VOCAB, dtype=jnp.int32)
    types = jnp.zeros((B, S), jnp.int32).at[:, S // 2:].set(1)
    mask = jnp.ones((B, S), jnp.int32).at[1, S - 2:].set(0)
    x = jnp.stack([context, types, mask])                               # [3, B, S]

    fwd = jax.jit(functools.partial(model_forward, params))
    out = fwd(x)
    jax.block_until_ready(out)
    assert out.shape == (B, 2) and out.dtype == F32
    print("KERNEL_OK")
</pallas_src>

<mosaic_0001>
module attributes {stable_mosaic.version = 11 : i64} {
  func.func @_linear_kernel(%arg0: i32, %arg1: memref<16x768xf32, #tpu.memory_space<vmem>>, %arg2: memref<768x256xbf16, #tpu.memory_space<vmem>>, %arg3: memref<1x256xf32, #tpu.memory_space<vmem>>, %arg4: memref<16x256xf32, #tpu.memory_space<vmem>>) attributes {dimension_semantics = [#tpu.dimension_semantics<parallel>], iteration_bounds = array<i64: 9>, scalar_prefetch = 0 : i64, scratch_operands = 0 : i64, tpu.core_type = #tpu.core_type<tc>, window_params = [{pipeline_mode = #tpu.pipeline_mode<synchronous>, transform_indices = @transform_0, window_bounds = array<i64: 16, 768>}, {transform_indices = @transform_1, window_bounds = array<i64: 768, 256>}, {transform_indices = @transform_2, window_bounds = array<i64: 1, 256>}, {transform_indices = @transform_3, window_bounds = array<i64: 16, 256>}]} {
    %c0 = arith.constant 0 : index
    %c0_0 = arith.constant 0 : index
    %0 = vector.load %arg1[%c0, %c0_0] : memref<16x768xf32, #tpu.memory_space<vmem>>, vector<16x768xf32>
    %1 = arith.truncf %0 : vector<16x768xf32> to vector<16x768xbf16>
    %c0_1 = arith.constant 0 : index
    %c0_2 = arith.constant 0 : index
    %2 = vector.load %arg2[%c0_1, %c0_2] : memref<768x256xbf16, #tpu.memory_space<vmem>>, vector<768x256xbf16>
    %cst = arith.constant dense<0.000000e+00> : vector<16x256xf32>
    %3 = tpu.matmul %1, %2, %cst {dimension_numbers = #tpu.dot_dimension_numbers<[1], [0], [0], [1], [0, 0, 1, 1], [], []>} : vector<16x768xbf16>, vector<768x256xbf16>, vector<16x256xf32> -> vector<16x256xf32>
    %c0_3 = arith.constant 0 : index
    %c0_4 = arith.constant 0 : index
    %4 = vector.load %arg3[%c0_3, %c0_4] : memref<1x256xf32, #tpu.memory_space<vmem>>, vector<1x256xf32>
    %5 = vector.broadcast %4 : vector<1x256xf32> to vector<16x256xf32>
    %6 = arith.addf %3, %5 : vector<16x256xf32>
    %c0_5 = arith.constant 0 : index
    %c0_6 = arith.constant 0 : index
    %7 = vector.load %arg4[%c0_5, %c0_6] : memref<16x256xf32, #tpu.memory_space<vmem>>, vector<16x256xf32>
    tpu.vector_store %arg4[%c0_5, %c0_6], %6 {strides = array<i32>} : memref<16x256xf32, #tpu.memory_space<vmem>>, vector<16x256xf32>,
    return
  }
  func.func @transform_0(%arg0: i32) -> (i32, i32) {
    %c0_i32 = arith.constant 0 : i32
    %c0_i32_0 = arith.constant 0 : i32
    %c0_i32_1 = arith.constant 0 : i32
    return %c0_i32, %c0_i32_0 : i32, i32
  }
  func.func @transform_1(%arg0: i32) -> (i32, i32) {
    %c0_i32 = arith.constant 0 : i32
    %c0_i32_0 = arith.constant 0 : i32
    return %c0_i32, %arg0 : i32, i32
  }
  func.func @transform_2(%arg0: i32) -> (i32, i32) {
    %c0_i32 = arith.constant 0 : i32
    %c0_i32_0 = arith.constant 0 : i32
    return %c0_i32, %arg0 : i32, i32
  }
  func.func @transform_3(%arg0: i32) -> (i32, i32) {
    %c0_i32 = arith.constant 0 : i32
    %c0_i32_0 = arith.constant 0 : i32
    return %c0_i32, %arg0 : i32, i32
  }
}

module attributes {stable_mosaic.version = 11 : i64} {
  func.func @_layernorm_kernel(%arg0: i32, %arg1: memref<16x768xf32, #tpu.memory_space<vmem>>, %arg2: memref<1x768xf32, #tpu.memory_space<vmem>>, %arg3: memref<1x768xf32, #tpu.memory_space<vmem>>, %arg4: memref<16x768xf32, #tpu.memory_space<vmem>>) attributes {dimension_semantics = [#tpu.dimension_semantics<arbitrary>], iteration_bounds = array<i64: 1>, scalar_prefetch = 0 : i64, scratch_operands = 0 : i64, tpu.core_type = #tpu.core_type<tc>, window_params = [{pipeline_mode = #tpu.pipeline_mode<synchronous>, transform_indices = @transform_0, window_bounds = array<i64: 16, 768>}, {pipeline_mode = #tpu.pipeline_mode<synchronous>, transform_indices = @transform_1, window_bounds = array<i64: 1, 768>}, {pipeline_mode = #tpu.pipeline_mode<synchronous>, transform_indices = @transform_2, window_bounds = array<i64: 1, 768>}, {pipeline_mode = #tpu.pipeline_mode<synchronous>, transform_indices = @transform_3, window_bounds = array<i64: 16, 768>}]} {
    %c0 = arith.constant 0 : index
    %c0_0 = arith.constant 0 : index
    %0 = vector.load %arg1[%c0, %c0_0] : memref<16x768xf32, #tpu.memory_space<vmem>>, vector<16x768xf32>
    %c0_1 = arith.constant 0 : index
    %c0_2 = arith.constant 0 : index
    %1 = vector.load %arg2[%c0_1, %c0_2] : memref<1x768xf32, #tpu.memory_space<vmem>>, vector<1x768xf32>
    %c0_3 = arith.constant 0 : index
    %c0_4 = arith.constant 0 : index
    %2 = vector.load %arg3[%c0_3, %c0_4] : memref<1x768xf32, #tpu.memory_space<vmem>>, vector<1x768xf32>
    %cst = arith.constant dense<0.000000e+00> : vector<16xf32>
    %3 = vector.multi_reduction <add>, %0, %cst [1] : vector<16x768xf32> to vector<16xf32>
    %4 = vector.shape_cast %3 : vector<16xf32> to vector<16x1xf32>
    %cst_5 = arith.constant 7.680000e+02 : f32
    %5 = vector.broadcast %cst_5 : f32 to vector<16x1xf32>
    %6 = arith.divf %4, %5 : vector<16x1xf32>
    %7 = vector.broadcast %6 : vector<16x1xf32> to vector<16x768xf32>
    %8 = arith.subf %0, %7 : vector<16x768xf32>
    %9 = arith.mulf %8, %8 : vector<16x768xf32>
    %cst_6 = arith.constant dense<0.000000e+00> : vector<16xf32>
    %10 = vector.multi_reduction <add>, %9, %cst_6 [1] : vector<16x768xf32> to vector<16xf32>
    %11 = vector.shape_cast %10 : vector<16xf32> to vector<16x1xf32>
    %cst_7 = arith.constant 7.680000e+02 : f32
    %12 = vector.broadcast %cst_7 : f32 to vector<16x1xf32>
    %13 = arith.divf %11, %12 : vector<16x1xf32>
    %cst_8 = arith.constant 9.99999996E-13 : f32
    %14 = vector.broadcast %cst_8 : f32 to vector<16x1xf32>
    %15 = arith.addf %13, %14 : vector<16x1xf32>
    %16 = math.rsqrt %15 : vector<16x1xf32>
    %17 = vector.broadcast %16 : vector<16x1xf32> to vector<16x768xf32>
    %18 = arith.mulf %8, %17 : vector<16x768xf32>
    %19 = vector.broadcast %1 : vector<1x768xf32> to vector<16x768xf32>
    %20 = arith.mulf %18, %19 : vector<16x768xf32>
    %21 = vector.broadcast %2 : vector<1x768xf32> to vector<16x768xf32>
    %22 = arith.addf %20, %21 : vector<16x768xf32>
    %c0_9 = arith.constant 0 : index
    %c0_10 = arith.constant 0 : index
    %23 = vector.load %arg4[%c0_9, %c0_10] : memref<16x768xf32, #tpu.memory_space<vmem>>, vector<16x768xf32>
    tpu.vector_store %arg4[%c0_9, %c0_10], %22 {strides = array<i32>} : memref<16x768xf32, #tpu.memory_space<vmem>>, vector<16x768xf32>,
    return
  }
  func.func @transform_0(%arg0: i32) -> (i32, i32) {
    %c0_i32 = arith.constant 0 : i32
    %c0_i32_0 = arith.constant 0 : i32
    %c0_i32_1 = arith.constant 0 : i32
    return %c0_i32, %c0_i32_0 : i32, i32
  }
  func.func @transform_1(%arg0: i32) -> (i32, i32) {
    %c0_i32 = arith.constant 0 : i32
    %c0_i32_0 = arith.constant 0 : i32
    %c0_i32_1 = arith.constant 0 : i32
    return %c0_i32, %c0_i32_0 : i32, i32
  }
  func.func @transform_2(%arg0: i32) -> (i32, i32) {
    %c0_i32 = arith.constant 0 : i32
    %c0_i32_0 = arith.constant 0 : i32
    %c0_i32_1 = arith.constant 0 : i32
    return %c0_i32, %c0_i32_0 : i32, i32
  }
  func.func @transform_3(%arg0: i32) -> (i32, i32) {
    %c0_i32 = arith.constant 0 : i32
    %c0_i32_0 = arith.constant 0 : i32
    %c0_i32_1 = arith.constant 0 : i32
    return %c0_i32, %c0_i32_0 : i32, i32
  }
}

module attributes {stable_mosaic.version = 11 : i64} {
  func.func @_attn_block_kernel(%arg0: i32, %arg1: memref<1x8x2304xf32, #tpu.memory_space<vmem>>, %arg2: memref<1x1x8xf32, #tpu.memory_space<vmem>>, %arg3: memref<1x8x768xf32, #tpu.memory_space<vmem>>, %arg4: memref<768x768xbf16, #tpu.memory_space<vmem>>, %arg5: memref<1x768xf32, #tpu.memory_space<vmem>>, %arg6: memref<1x768xf32, #tpu.memory_space<vmem>>, %arg7: memref<1x768xf32, #tpu.memory_space<vmem>>, %arg8: memref<1x8x768xf32, #tpu.memory_space<vmem>>) attributes {dimension_semantics = [#tpu.dimension_semantics<parallel>], iteration_bounds = array<i64: 2>, scalar_prefetch = 0 : i64, scratch_operands = 0 : i64, tpu.core_type = #tpu.core_type<tc>, window_params = [{transform_indices = @transform_0, window_bounds = array<i64: 1, 8, 2304>}, {transform_indices = @transform_1, window_bounds = array<i64: 1, 1, 8>}, {transform_indices = @transform_2, window_bounds = array<i64: 1, 8, 768>}, {pipeline_mode = #tpu.pipeline_mode<synchronous>, transform_indices = @transform_3, window_bounds = array<i64: 768, 768>}, {pipeline_mode = #tpu.pipeline_mode<synchronous>, transform_indices = @transform_4, window_bounds = array<i64: 1, 768>}, {pipeline_mode = #tpu.pipeline_mode<synchronous>, transform_indices = @transform_5, window_bounds = array<i64: 1, 768>}, {pipeline_mode = #tpu.pipeline_mode<synchronous>, transform_indices = @transform_6, window_bounds = array<i64: 1, 768>}, {transform_indices = @transform_7, window_bounds = array<i64: 1, 8, 768>}]} {
    %c0 = arith.constant 0 : index
    %c0_0 = arith.constant 0 : index
    %c0_1 = arith.constant 0 : index
    %0 = vector.load %arg1[%c0, %c0_0, %c0_1] : memref<1x8x2304xf32, #tpu.memory_space<vmem>>, vector<1x8x2304xf32>
    %1 = vector.shape_cast %0 : vector<1x8x2304xf32> to vector<8x2304xf32>
    %c0_2 = arith.constant 0 : index
    %c0_3 = arith.constant 0 : index
    %c0_4 = arith.constant 0 : index
    %2 = vector.load %arg2[%c0_2, %c0_3, %c0_4] : memref<1x1x8xf32, #tpu.memory_space<vmem>>, vector<1x1x8xf32>
    %3 = vector.shape_cast %2 : vector<1x1x8xf32> to vector<1x8xf32>
    %cst = arith.constant 1.000000e+00 : f32
    %4 = vector.broadcast %cst : f32 to vector<1x8xf32>
    %5 = arith.subf %4, %3 : vector<1x8xf32>
    %cst_5 = arith.constant -1.000000e+04 : f32
    %6 = vector.broadcast %cst_5 : f32 to vector<1x8xf32>
    %7 = arith.mulf %5, %6 : vector<1x8xf32>
    %8 = vector.extract_strided_slice %1 {offsets = [0, 0], sizes = [8, 64], strides = [1, 1]} : vector<8x2304xf32> to vector<8x64xf32>
    %cst_6 = arith.constant 1.250000e-01 : f32
    %9 = vector.broadcast %cst_6 : f32 to vector<8x64xf32>
    %10 = arith.mulf %8, %9 : vector<8x64xf32>
    %11 = vector.extract_strided_slice %1 {offsets = [0, 768], sizes = [8, 64], strides = [1, 1]} : vector<8x2304xf32> to vector<8x64xf32>
    %12 = vector.extract_strided_slice %1 {offsets = [0, 1536], sizes = [8, 64], strides = [1, 1]} : vector<8x2304xf32> to vector<8x64xf32>
    %cst_7 = arith.constant dense<0.000000e+00> : vector<8x8xf32>
    %13 = tpu.matmul %10, %11, %cst_7 {dimension_numbers = #tpu.dot_dimension_numbers<[1], [1], [0], [0], [0, 0, 1, 0], [], []>} : vector<8x64xf32>, vector<8x64xf32>, vector<8x8xf32> -> vector<8x8xf32>
    %14 = vector.broadcast %7 : vector<1x8xf32> to vector<8x8xf32>
    %15 = arith.addf %13, %14 : vector<8x8xf32>
    %cst_8 = arith.constant dense<0xFF800000> : vector<8xf32>
    %16 = vector.multi_reduction <maximumf>, %15, %cst_8 [1] : vector<8x8xf32> to vector<8xf32>
    %17 = vector.shape_cast %16 : vector<8xf32> to vector<8x1xf32>
    %18 = vector.broadcast %17 : vector<8x1xf32> to vector<8x8xf32>
    %19 = arith.subf %15, %18 : vector<8x8xf32>
    %20 = math.exp %19 : vector<8x8xf32>
    %cst_9 = arith.constant dense<0.000000e+00> : vector<8xf32>
    %21 = vector.multi_reduction <add>, %20, %cst_9 [1] : vector<8x8xf32> to vector<8xf32>
    %22 = vector.shape_cast %21 : vector<8xf32> to vector<8x1xf32>
    %23 = tpu.reciprocal %22 {approx = true} : vector<8x1xf32> -> vector<8x1xf32>
    %24 = vector.broadcast %23 : vector<8x1xf32> to vector<8x8xf32>
    %25 = arith.mulf %20, %24 : vector<8x8xf32>
    %cst_10 = arith.constant dense<0.000000e+00> : vector<8x64xf32>
    %26 = tpu.matmul %25, %12, %cst_10 {dimension_numbers = #tpu.dot_dimension_numbers<[1], [0], [0], [1], [0, 0, 1, 1], [], []>} : vector<8x8xf32>, vector<8x64xf32>, vector<8x64xf32> -> vector<8x64xf32>
    %27 = vector.extract_strided_slice %1 {offsets = [0, 64], sizes = [8, 64], strides = [1, 1]} : vector<8x2304xf32> to vector<8x64xf32>
    %cst_11 = arith.constant 1.250000e-01 : f32
    %28 = vector.broadcast %cst_11 : f32 to vector<8x64xf32>
    %29 = arith.mulf %27, %28 : vector<8x64xf32>
    %30 = vector.extract_strided_slice %1 {offsets = [0, 832], sizes = [8, 64], strides = [1, 1]} : vector<8x2304xf32> to vector<8x64xf32>
    %31 = vector.extract_strided_slice %1 {offsets = [0, 1600], sizes = [8, 64], strides = [1, 1]} : vector<8x2304xf32> to vector<8x64xf32>
    %cst_12 = arith.constant dense<0.000000e+00> : vector<8x8xf32>
    %32 = tpu.matmul %29, %30, %cst_12 {dimension_numbers = #tpu.dot_dimension_numbers<[1], [1], [0], [0], [0, 0, 1, 0], [], []>} : vector<8x64xf32>, vector<8x64xf32>, vector<8x8xf32> -> vector<8x8xf32>
    %33 = vector.broadcast %7 : vector<1x8xf32> to vector<8x8xf32>
    %34 = arith.addf %32, %33 : vector<8x8xf32>
    %cst_13 = arith.constant dense<0xFF800000> : vector<8xf32>
    %35 = vector.multi_reduction <maximumf>, %34, %cst_13 [1] : vector<8x8xf32> to vector<8xf32>
    %36 = vector.shape_cast %35 : vector<8xf32> to vector<8x1xf32>
    %37 = vector.broadcast %36 : vector<8x1xf32> to vector<8x8xf32>
    %38 = arith.subf %34, %37 : vector<8x8xf32>
    %39 = math.exp %38 : vector<8x8xf32>
    %cst_14 = arith.constant dense<0.000000e+00> : vector<8xf32>
    %40 = vector.multi_reduction <add>, %39, %cst_14 [1] : vector<8x8xf32> to vector<8xf32>
    %41 = vector.shape_cast %40 : vector<8xf32> to vector<8x1xf32>
    %42 = tpu.reciprocal %41 {approx = true} : vector<8x1xf32> -> vector<8x1xf32>
    %43 = vector.broadcast %42 : vector<8x1xf32> to vector<8x8xf32>
    %44 = arith.mulf %39, %43 : vector<8x8xf32>
    %cst_15 = arith.constant dense<0.000000e+00> : vector<8x64xf32>
    %45 = tpu.matmul %44, %31, %cst_15 {dimension_numbers = #tpu.dot_dimension_numbers<[1], [0], [0], [1], [0, 0, 1, 1], [], []>} : vector<8x8xf32>, vector<8x64xf32>, vector<8x64xf32> -> vector<8x64xf32>
    %46 = vector.extract_strided_slice %1 {offsets = [0, 128], sizes = [8, 64], strides = [1, 1]} : vector<8x2304xf32> to vector<8x64xf32>
    %cst_16 = arith.constant 1.250000e-01 : f32
    %47 = vector.broadcast %cst_16 : f32 to vector<8x64xf32>
    %48 = arith.mulf %46, %47 : vector<8x64xf32>
    %49 = vector.extract_strided_slice %1 {offsets = [0, 896], sizes = [8, 64], strides = [1, 1]} : vector<8x2304xf32> to vector<8x64xf32>
    %50 = vector.extract_strided_slice %1 {offsets = [0, 1664], sizes = [8, 64], strides = [1, 1]} : vector<8x2304xf32> to vector<8x64xf32>
    %cst_17 = arith.constant dense<0.000000e+00> : vector<8x8xf32>
    %51 = tpu.matmul %48, %49, %cst_17 {dimension_numbers = #tpu.dot_dimension_numbers<[1], [1], [0], [0], [0, 0, 1, 0], [], []>} : vector<8x64xf32>, vector<8x64xf32>, vector<8x8xf32> -> vector<8x8xf32>
    %52 = vector.broadcast %7 : vector<1x8xf32> to vector<8x8xf32>
    %53 = arith.addf %51, %52 : vector<8x8xf32>
    %cst_18 = arith.constant dense<0xFF800000> : vector<8xf32>
    %54 = vector.multi_reduction <maximumf>, %53, %cst_18 [1] : vector<8x8xf32> to vector<8xf32>
    %55 = vector.shape_cast %54 : vector<8xf32> to vector<8x1xf32>
    %56 = vector.broadcast %55 : vector<8x1xf32> to vector<8x8xf32>
    %57 = arith.subf %53, %56 : vector<8x8xf32>
    %58 = math.exp %57 : vector<8x8xf32>
    %cst_19 = arith.constant dense<0.000000e+00> : vector<8xf32>
    %59 = vector.multi_reduction <add>, %58, %cst_19 [1] : vector<8x8xf32> to vector<8xf32>
    %60 = vector.shape_cast %59 : vector<8xf32> to vector<8x1xf32>
    %61 = tpu.reciprocal %60 {approx = true} : vector<8x1xf32> -> vector<8x1xf32>
    %62 = vector.broadcast %61 : vector<8x1xf32> to vector<8x8xf32>
    %63 = arith.mulf %58, %62 : vector<8x8xf32>
    %cst_20 = arith.constant dense<0.000000e+00> : vector<8x64xf32>
    %64 = tpu.matmul %63, %50, %cst_20 {dimension_numbers = #tpu.dot_dimension_numbers<[1], [0], [0], [1], [0, 0, 1, 1], [], []>} : vector<8x8xf32>, vector<8x64xf32>, vector<8x64xf32> -> vector<8x64xf32>
    %65 = vector.extract_strided_slice %1 {offsets = [0, 192], sizes = [8, 64], strides = [1, 1]} : vector<8x2304xf32> to vector<8x64xf32>
    %cst_21 = arith.constant 1.250000e-01 : f32
    %66 = vector.broadcast %cst_21 : f32 to vector<8x64xf32>
    %67 = arith.mulf %65, %66 : vector<8x64xf32>
    %68 = vector.extract_strided_slice %1 {offsets = [0, 960], sizes = [8, 64], strides = [1, 1]} : vector<8x2304xf32> to vector<8x64xf32>
    %69 = vector.extract_strided_slice %1 {offsets = [0, 1728], sizes = [8, 64], strides = [1, 1]} : vector<8x2304xf32> to vector<8x64xf32>
    %cst_22 = arith.constant dense<0.000000e+00> : vector<8x8xf32>
    %70 = tpu.matmul %67, %68, %cst_22 {dimension_numbers = #tpu.dot_dimension_numbers<[1], [1], [0], [0], [0, 0, 1, 0], [], []>} : vector<8x64xf32>, vector<8x64xf32>, vector<8x8xf32> -> vector<8x8xf32>
    %71 = vector.broadcast %7 : vector<1x8xf32> to vector<8x8xf32>
    %72 = arith.addf %70, %71 : vector<8x8xf32>
    %cst_23 = arith.constant dense<0xFF800000> : vector<8xf32>
    %73 = vector.multi_reduction <maximumf>, %72, %cst_23 [1] : vector<8x8xf32> to vector<8xf32>
    %74 = vector.shape_cast %73 : vector<8xf32> to vector<8x1xf32>
    %75 = vector.broadcast %74 : vector<8x1xf32> to vector<8x8xf32>
    %76 = arith.subf %72, %75 : vector<8x8xf32>
    %77 = math.exp %76 : vector<8x8xf32>
    %cst_24 = arith.constant dense<0.000000e+00> : vector<8xf32>
    %78 = vector.multi_reduction <add>, %77, %cst_24 [1] : vector<8x8xf32> to vector<8xf32>
    %79 = vector.shape_cast %78 : vector<8xf32> to vector<8x1xf32>
    %80 = tpu.reciprocal %79 {approx = true} : vector<8x1xf32> -> vector<8x1xf32>
    %81 = vector.broadcast %80 : vector<8x1xf32> to vector<8x8xf32>
    %82 = arith.mulf %77, %81 : vector<8x8xf32>
    %cst_25 = arith.constant dense<0.000000e+00> : vector<8x64xf32>
    %83 = tpu.matmul %82, %69, %cst_25 {dimension_numbers = #tpu.dot_dimension_numbers<[1], [0], [0], [1], [0, 0, 1, 1], [], []>} : vector<8x8xf32>, vector<8x64xf32>, vector<8x64xf32> -> vector<8x64xf32>
    %84 = vector.extract_strided_slice %1 {offsets = [0, 256], sizes = [8, 64], strides = [1, 1]} : vector<8x2304xf32> to vector<8x64xf32>
    %cst_26 = arith.constant 1.250000e-01 : f32
    %85 = vector.broadcast %cst_26 : f32 to vector<8x64xf32>
    %86 = arith.mulf %84, %85 : vector<8x64xf32>
    %87 = vector.extract_strided_slice %1 {offsets = [0, 1024], sizes = [8, 64], strides = [1, 1]} : vector<8x2304xf32> to vector<8x64xf32>
    %88 = vector.extract_strided_slice %1 {offsets = [0, 1792], sizes = [8, 64], strides = [1, 1]} : vector<8x2304xf32> to vector<8x64xf32>
    %cst_27 = arith.constant dense<0.000000e+00> : vector<8x8xf32>
    %89 = tpu.matmul %86, %87, %cst_27 {dimension_numbers = #tpu.dot_dimension_numbers<[1], [1], [0], [0], [0, 0, 1, 0], [], []>} : vector<8x64xf32>, vector<8x64xf32>, vector<8x8xf32> -> vector<8x8xf32>
    %90 = vector.broadcast %7 : vector<1x8xf32> to vector<8x8xf32>
    %91 = arith.addf %89, %90 : vector<8x8xf32>
    %cst_28 = arith.constant dense<0xFF800000> : vector<8xf32>
    %92 = vector.multi_reduction <maximumf>, %91, %cst_28 [1] : vector<8x8xf32> to vector<8xf32>
    %93 = vector.shape_cast %92 : vector<8xf32> to vector<8x1xf32>
    %94 = vector.broadcast %93 : vector<8x1xf32> to vector<8x8xf32>
    %95 = arith.subf %91, %94 : vector<8x8xf32>
    %96 = math.exp %95 : vector<8x8xf32>
    %cst_29 = arith.constant dense<0.000000e+00> : vector<8xf32>
    %97 = vector.multi_reduction <add>, %96, %cst_29 [1] : vector<8x8xf32> to vector<8xf32>
    %98 = vector.shape_cast %97 : vector<8xf32> to vector<8x1xf32>
    %99 = tpu.reciprocal %98 {approx = true} : vector<8x1xf32> -> vector<8x1xf32>
    %100 = vector.broadcast %99 : vector<8x1xf32> to vector<8x8xf32>
    %101 = arith.mulf %96, %100 : vector<8x8xf32>
    %cst_30 = arith.constant dense<0.000000e+00> : vector<8x64xf32>
    %102 = tpu.matmul %101, %88, %cst_30 {dimension_numbers = #tpu.dot_dimension_numbers<[1], [0], [0], [1], [0, 0, 1, 1], [], []>} : vector<8x8xf32>, vector<8x64xf32>, vector<8x64xf32> -> vector<8x64xf32>
    %103 = vector.extract_strided_slice %1 {offsets = [0, 320], sizes = [8, 64], strides = [1, 1]} : vector<8x2304xf32> to vector<8x64xf32>
    %cst_31 = arith.constant 1.250000e-01 : f32
    %104 = vector.broadcast %cst_31 : f32 to vector<8x64xf32>
    %105 = arith.mulf %103, %104 : vector<8x64xf32>
    %106 = vector.extract_strided_slice %1 {offsets = [0, 1088], sizes = [8, 64], strides = [1, 1]} : vector<8x2304xf32> to vector<8x64xf32>
    %107 = vector.extract_strided_slice %1 {offsets = [0, 1856], sizes = [8, 64], strides = [1, 1]} : vector<8x2304xf32> to vector<8x64xf32>
    %cst_32 = arith.constant dense<0.000000e+00> : vector<8x8xf32>
    %108 = tpu.matmul %105, %106, %cst_32 {dimension_numbers = #tpu.dot_dimension_numbers<[1], [1], [0], [0], [0, 0, 1, 0], [], []>} : vector<8x64xf32>, vector<8x64xf32>, vector<8x8xf32> -> vector<8x8xf32>
    %109 = vector.broadcast %7 : vector<1x8xf32> to vector<8x8xf32>
    %110 = arith.addf %108, %109 : vector<8x8xf32>
    %cst_33 = arith.constant dense<0xFF800000> : vector<8xf32>
    %111 = vector.multi_reduction <maximumf>, %110, %cst_33 [1] : vector<8x8xf32> to vector<8xf32>
    %112 = vector.shape_cast %111 : vector<8xf32> to vector<8x1xf32>
    %113 = vector.broadcast %112 : vector<8x1xf32> to vector<8x8xf32>
    %114 = arith.subf %110, %113 : vector<8x8xf32>
    %115 = math.exp %114 : vector<8x8xf32>
    %cst_34 = arith.constant dense<0.000000e+00> : vector<8xf32>
    %116 = vector.multi_reduction <add>, %115, %cst_34 [1] : vector<8x8xf32> to vector<8xf32>
    %117 = vector.shape_cast %116 : vector<8xf32> to vector<8x1xf32>
    %118 = tpu.reciprocal %117 {approx = true} : vector<8x1xf32> -> vector<8x1xf32>
    %119 = vector.broadcast %118 : vector<8x1xf32> to vector<8x8xf32>
    %120 = arith.mulf %115, %119 : vector<8x8xf32>
    %cst_35 = arith.constant dense<0.000000e+00> : vector<8x64xf32>
    %121 = tpu.matmul %120, %107, %cst_35 {dimension_numbers = #tpu.dot_dimension_numbers<[1], [0], [0], [1], [0, 0, 1, 1], [], []>} : vector<8x8xf32>, vector<8x64xf32>, vector<8x64xf32> -> vector<8x64xf32>
    %122 = vector.extract_strided_slice %1 {offsets = [0, 384], sizes = [8, 64], strides = [1, 1]} : vector<8x2304xf32> to vector<8x64xf32>
    %cst_36 = arith.constant 1.250000e-01 : f32
    %123 = vector.broadcast %cst_36 : f32 to vector<8x64xf32>
    %124 = arith.mulf %122, %123 : vector<8x64xf32>
    %125 = vector.extract_strided_slice %1 {offsets = [0, 1152], sizes = [8, 64], strides = [1, 1]} : vector<8x2304xf32> to vector<8x64xf32>
    %126 = vector.extract_strided_slice %1 {offsets = [0, 1920], sizes = [8, 64], strides = [1, 1]} : vector<8x2304xf32> to vector<8x64xf32>
    %cst_37 = arith.constant dense<0.000000e+00> : vector<8x8xf32>
    %127 = tpu.matmul %124, %125, %cst_37 {dimension_numbers = #tpu.dot_dimension_numbers<[1], [1], [0], [0], [0, 0, 1, 0], [], []>} : vector<8x64xf32>, vector<8x64xf32>, vector<8x8xf32> -> vector<8x8xf32>
    %128 = vector.broadcast %7 : vector<1x8xf32> to vector<8x8xf32>
    %129 = arith.addf %127, %128 : vector<8x8xf32>
    %cst_38 = arith.constant dense<0xFF800000> : vector<8xf32>
    %130 = vector.multi_reduction <maximumf>, %129, %cst_38 [1] : vector<8x8xf32> to vector<8xf32>
    %131 = vector.shape_cast %130 : vector<8xf32> to vector<8x1xf32>
    %132 = vector.broadcast %131 : vector<8x1xf32> to vector<8x8xf32>
    %133 = arith.subf %129, %132 : vector<8x8xf32>
    %134 = math.exp %133 : vector<8x8xf32>
    %cst_39 = arith.constant dense<0.000000e+00> : vector<8xf32>
    %135 = vector.multi_reduction <add>, %134, %cst_39 [1] : vector<8x8xf32> to vector<8xf32>
    %136 = vector.shape_cast %135 : vector<8xf32> to vector<8x1xf32>
    %137 = tpu.reciprocal %136 {approx = true} : vector<8x1xf32> -> vector<8x1xf32>
    %138 = vector.broadcast %137 : vector<8x1xf32> to vector<8x8xf32>
    %139 = arith.mulf %134, %138 : vector<8x8xf32>
    %cst_40 = arith.constant dense<0.000000e+00> : vector<8x64xf32>
    %140 = tpu.matmul %139, %126, %cst_40 {dimension_numbers = #tpu.dot_dimension_numbers<[1], [0], [0], [1], [0, 0, 1, 1], [], []>} : vector<8x8xf32>, vector<8x64xf32>, vector<8x64xf32> -> vector<8x64xf32>
    %141 = vector.extract_strided_slice %1 {offsets = [0, 448], sizes = [8, 64], strides = [1, 1]} : vector<8x2304xf32> to vector<8x64xf32>
    %cst_41 = arith.constant 1.250000e-01 : f32
    %142 = vector.broadcast %cst_41 : f32 to vector<8x64xf32>
    %143 = arith.mulf %141, %142 : vector<8x64xf32>
    %144 = vector.extract_strided_slice %1 {offsets = [0, 1216], sizes = [8, 64], strides = [1, 1]} : vector<8x2304xf32> to vector<8x64xf32>
    %145 = vector.extract_strided_slice %1 {offsets = [0, 1984], sizes = [8, 64], strides = [1, 1]} : vector<8x2304xf32> to vector<8x64xf32>
    %cst_42 = arith.constant dense<0.000000e+00> : vector<8x8xf32>
    %146 = tpu.matmul %143, %144, %cst_42 {dimension_numbers = #tpu.dot_dimension_numbers<[1], [1], [0], [0], [0, 0, 1, 0], [], []>} : vector<8x64xf32>, vector<8x64xf32>, vector<8x8xf32> -> vector<8x8xf32>
    %147 = vector.broadcast %7 : vector<1x8xf32> to vector<8x8xf32>
    %148 = arith.addf %146, %147 : vector<8x8xf32>
    %cst_43 = arith.constant dense<0xFF800000> : vector<8xf32>
    %149 = vector.multi_reduction <maximumf>, %148, %cst_43 [1] : vector<8x8xf32> to vector<8xf32>
    %150 = vector.shape_cast %149 : vector<8xf32> to vector<8x1xf32>
    %151 = vector.broadcast %150 : vector<8x1xf32> to vector<8x8xf32>
    %152 = arith.subf %148, %151 : vector<8x8xf32>
    %153 = math.exp %152 : vector<8x8xf32>
    %cst_44 = arith.constant dense<0.000000e+00> : vector<8xf32>
    %154 = vector.multi_reduction <add>, %153, %cst_44 [1] : vector<8x8xf32> to vector<8xf32>
    %155 = vector.shape_cast %154 : vector<8xf32> to vector<8x1xf32>
    %156 = tpu.reciprocal %155 {approx = true} : vector<8x1xf32> -> vector<8x1xf32>
    %157 = vector.broadcast %156 : vector<8x1xf32> to vector<8x8xf32>
    %158 = arith.mulf %153, %157 : vector<8x8xf32>
    %cst_45 = arith.constant dense<0.000000e+00> : vector<8x64xf32>
    %159 = tpu.matmul %158, %145, %cst_45 {dimension_numbers = #tpu.dot_dimension_numbers<[1], [0], [0], [1], [0, 0, 1, 1], [], []>} : vector<8x8xf32>, vector<8x64xf32>, vector<8x64xf32> -> vector<8x64xf32>
    %160 = vector.extract_strided_slice %1 {offsets = [0, 512], sizes = [8, 64], strides = [1, 1]} : vector<8x2304xf32> to vector<8x64xf32>
    %cst_46 = arith.constant 1.250000e-01 : f32
    %161 = vector.broadcast %cst_46 : f32 to vector<8x64xf32>
    %162 = arith.mulf %160, %161 : vector<8x64xf32>
    %163 = vector.extract_strided_slice %1 {offsets = [0, 1280], sizes = [8, 64], strides = [1, 1]} : vector<8x2304xf32> to vector<8x64xf32>
    %164 = vector.extract_strided_slice %1 {offsets = [0, 2048], sizes = [8, 64], strides = [1, 1]} : vector<8x2304xf32> to vector<8x64xf32>
    %cst_47 = arith.constant dense<0.000000e+00> : vector<8x8xf32>
    %165 = tpu.matmul %162, %163, %cst_47 {dimension_numbers = #tpu.dot_dimension_numbers<[1], [1], [0], [0], [0, 0, 1, 0], [], []>} : vector<8x64xf32>, vector<8x64xf32>, vector<8x8xf32> -> vector<8x8xf32>
    %166 = vector.broadcast %7 : vector<1x8xf32> to vector<8x8xf32>
    %167 = arith.addf %165, %166 : vector<8x8xf32>
    %cst_48 = arith.constant dense<0xFF800000> : vector<8xf32>
    %168 = vector.multi_reduction <maximumf>, %167, %cst_48 [1] : vector<8x8xf32> to vector<8xf32>
    %169 = vector.shape_cast %168 : vector<8xf32> to vector<8x1xf32>
    %170 = vector.broadcast %169 : vector<8x1xf32> to vector<8x8xf32>
    %171 = arith.subf %167, %170 : vector<8x8xf32>
    %172 = math.exp %171 : vector<8x8xf32>
    %cst_49 = arith.constant dense<0.000000e+00> : vector<8xf32>
    %173 = vector.multi_reduction <add>, %172, %cst_49 [1] : vector<8x8xf32> to vector<8xf32>
    %174 = vector.shape_cast %173 : vector<8xf32> to vector<8x1xf32>
    %175 = tpu.reciprocal %174 {approx = true} : vector<8x1xf32> -> vector<8x1xf32>
    %176 = vector.broadcast %175 : vector<8x1xf32> to vector<8x8xf32>
    %177 = arith.mulf %172, %176 : vector<8x8xf32>
    %cst_50 = arith.constant dense<0.000000e+00> : vector<8x64xf32>
    %178 = tpu.matmul %177, %164, %cst_50 {dimension_numbers = #tpu.dot_dimension_numbers<[1], [0], [0], [1], [0, 0, 1, 1], [], []>} : vector<8x8xf32>, vector<8x64xf32>, vector<8x64xf32> -> vector<8x64xf32>
    %179 = vector.extract_strided_slice %1 {offsets = [0, 576], sizes = [8, 64], strides = [1, 1]} : vector<8x2304xf32> to vector<8x64xf32>
    %cst_51 = arith.constant 1.250000e-01 : f32
    %180 = vector.broadcast %cst_51 : f32 to vector<8x64xf32>
    %181 = arith.mulf %179, %180 : vector<8x64xf32>
    %182 = vector.extract_strided_slice %1 {offsets = [0, 1344], sizes = [8, 64], strides = [1, 1]} : vector<8x2304xf32> to vector<8x64xf32>
    %183 = vector.extract_strided_slice %1 {offsets = [0, 2112], sizes = [8, 64], strides = [1, 1]} : vector<8x2304xf32> to vector<8x64xf32>
    %cst_52 = arith.constant dense<0.000000e+00> : vector<8x8xf32>
    %184 = tpu.matmul %181, %182, %cst_52 {dimension_numbers = #tpu.dot_dimension_numbers<[1], [1], [0], [0], [0, 0, 1, 0], [], []>} : vector<8x64xf32>, vector<8x64xf32>, vector<8x8xf32> -> vector<8x8xf32>
    %185 = vector.broadcast %7 : vector<1x8xf32> to vector<8x8xf32>
    %186 = arith.addf %184, %185 : vector<8x8xf32>
    %cst_53 = arith.constant dense<0xFF800000> : vector<8xf32>
    %187 = vector.multi_reduction <maximumf>, %186, %cst_53 [1] : vector<8x8xf32> to vector<8xf32>
    %188 = vector.shape_cast %187 : vector<8xf32> to vector<8x1xf32>
    %189 = vector.broadcast %188 : vector<8x1xf32> to vector<8x8xf32>
    %190 = arith.subf %186, %189 : vector<8x8xf32>
    %191 = math.exp %190 : vector<8x8xf32>
    %cst_54 = arith.constant dense<0.000000e+00> : vector<8xf32>
    %192 = vector.multi_reduction <add>, %191, %cst_54 [1] : vector<8x8xf32> to vector<8xf32>
    %193 = vector.shape_cast %192 : vector<8xf32> to vector<8x1xf32>
    %194 = tpu.reciprocal %193 {approx = true} : vector<8x1xf32> -> vector<8x1xf32>
    %195 = vector.broadcast %194 : vector<8x1xf32> to vector<8x8xf32>
    %196 = arith.mulf %191, %195 : vector<8x8xf32>
    %cst_55 = arith.constant dense<0.000000e+00> : vector<8x64xf32>
    %197 = tpu.matmul %196, %183, %cst_55 {dimension_numbers = #tpu.dot_dimension_numbers<[1], [0], [0], [1], [0, 0, 1, 1], [], []>} : vector<8x8xf32>, vector<8x64xf32>, vector<8x64xf32> -> vector<8x64xf32>
    %198 = vector.extract_strided_slice %1 {offsets = [0, 640], sizes = [8, 64], strides = [1, 1]} : vector<8x2304xf32> to vector<8x64xf32>
    %cst_56 = arith.constant 1.250000e-01 : f32
    %199 = vector.broadcast %cst_56 : f32 to vector<8x64xf32>
    %200 = arith.mulf %198, %199 : vector<8x64xf32>
    %201 = vector.extract_strided_slice %1 {offsets = [0, 1408], sizes = [8, 64], strides = [1, 1]} : vector<8x2304xf32> to vector<8x64xf32>
    %202 = vector.extract_strided_slice %1 {offsets = [0, 2176], sizes = [8, 64], strides = [1, 1]} : vector<8x2304xf32> to vector<8x64xf32>
    %cst_57 = arith.constant dense<0.000000e+00> : vector<8x8xf32>
    %203 = tpu.matmul %200, %201, %cst_57 {dimension_numbers = #tpu.dot_dimension_numbers<[1], [1], [0], [0], [0, 0, 1, 0], [], []>} : vector<8x64xf32>, vector<8x64xf32>, vector<8x8xf32> -> vector<8x8xf32>
    %204 = vector.broadcast %7 : vector<1x8xf32> to vector<8x8xf32>
    %205 = arith.addf %203, %204 : vector<8x8xf32>
    %cst_58 = arith.constant dense<0xFF800000> : vector<8xf32>
    %206 = vector.multi_reduction <maximumf>, %205, %cst_58 [1] : vector<8x8xf32> to vector<8xf32>
    %207 = vector.shape_cast %206 : vector<8xf32> to vector<8x1xf32>
    %208 = vector.broadcast %207 : vector<8x1xf32> to vector<8x8xf32>
    %209 = arith.subf %205, %208 : vector<8x8xf32>
    %210 = math.exp %209 : vector<8x8xf32>
    %cst_59 = arith.constant dense<0.000000e+00> : vector<8xf32>
    %211 = vector.multi_reduction <add>, %210, %cst_59 [1] : vector<8x8xf32> to vector<8xf32>
    %212 = vector.shape_cast %211 : vector<8xf32> to vector<8x1xf32>
    %213 = tpu.reciprocal %212 {approx = true} : vector<8x1xf32> -> vector<8x1xf32>
    %214 = vector.broadcast %213 : vector<8x1xf32> to vector<8x8xf32>
    %215 = arith.mulf %210, %214 : vector<8x8xf32>
    %cst_60 = arith.constant dense<0.000000e+00> : vector<8x64xf32>
    %216 = tpu.matmul %215, %202, %cst_60 {dimension_numbers = #tpu.dot_dimension_numbers<[1], [0], [0], [1], [0, 0, 1, 1], [], []>} : vector<8x8xf32>, vector<8x64xf32>, vector<8x64xf32> -> vector<8x64xf32>
    %217 = vector.extract_strided_slice %1 {offsets = [0, 704], sizes = [8, 64], strides = [1, 1]} : vector<8x2304xf32> to vector<8x64xf32>
    %cst_61 = arith.constant 1.250000e-01 : f32
    %218 = vector.broadcast %cst_61 : f32 to vector<8x64xf32>
    %219 = arith.mulf %217, %218 : vector<8x64xf32>
    %220 = vector.extract_strided_slice %1 {offsets = [0, 1472], sizes = [8, 64], strides = [1, 1]} : vector<8x2304xf32> to vector<8x64xf32>
    %221 = vector.extract_strided_slice %1 {offsets = [0, 2240], sizes = [8, 64], strides = [1, 1]} : vector<8x2304xf32> to vector<8x64xf32>
    %cst_62 = arith.constant dense<0.000000e+00> : vector<8x8xf32>
    %222 = tpu.matmul %219, %220, %cst_62 {dimension_numbers = #tpu.dot_dimension_numbers<[1], [1], [0], [0], [0, 0, 1, 0], [], []>} : vector<8x64xf32>, vector<8x64xf32>, vector<8x8xf32> -> vector<8x8xf32>
    %223 = vector.broadcast %7 : vector<1x8xf32> to vector<8x8xf32>
    %224 = arith.addf %222, %223 : vector<8x8xf32>
    %cst_63 = arith.constant dense<0xFF800000> : vector<8xf32>
    %225 = vector.multi_reduction <maximumf>, %224, %cst_63 [1] : vector<8x8xf32> to vector<8xf32>
    %226 = vector.shape_cast %225 : vector<8xf32> to vector<8x1xf32>
    %227 = vector.broadcast %226 : vector<8x1xf32> to vector<8x8xf32>
    %228 = arith.subf %224, %227 : vector<8x8xf32>
    %229 = math.exp %228 : vector<8x8xf32>
    %cst_64 = arith.constant dense<0.000000e+00> : vector<8xf32>
    %230 = vector.multi_reduction <add>, %229, %cst_64 [1] : vector<8x8xf32> to vector<8xf32>
    %231 = vector.shape_cast %230 : vector<8xf32> to vector<8x1xf32>
    %232 = tpu.reciprocal %231 {approx = true} : vector<8x1xf32> -> vector<8x1xf32>
    %233 = vector.broadcast %232 : vector<8x1xf32> to vector<8x8xf32>
    %234 = arith.mulf %229, %233 : vector<8x8xf32>
    %cst_65 = arith.constant dense<0.000000e+00> : vector<8x64xf32>
    %235 = tpu.matmul %234, %221, %cst_65 {dimension_numbers = #tpu.dot_dimension_numbers<[1], [0], [0], [1], [0, 0, 1, 1], [], []>} : vector<8x8xf32>, vector<8x64xf32>, vector<8x64xf32> -> vector<8x64xf32>
    %236 = tpu.concatenate %26, %45, %64, %83, %102, %121, %140, %159, %178, %197, %216, %235 in 1 : vector<8x64xf32>, vector<8x64xf32>, vector<8x64xf32>, vector<8x64xf32>, vector<8x64xf32>, vector<8x64xf32>, vector<8x64xf32>, vector<8x64xf32>, vector<8x64xf32>, vector<8x64xf32>, vector<8x64xf32>, vector<8x64xf32> -> vector<8x768xf32>
    %237 = arith.truncf %236 : vector<8x768xf32> to vector<8x768xbf16>
    %c0_66 = arith.constant 0 : index
    %c0_67 = arith.constant 0 : index
    %238 = vector.load %arg4[%c0_66, %c0_67] : memref<768x768xbf16, #tpu.memory_space<vmem>>, vector<768x768xbf16>
    %cst_68 = arith.constant dense<0.000000e+00> : vector<8x768xf32>
    %239 = tpu.matmul %237, %238, %cst_68 {dimension_numbers = #tpu.dot_dimension_numbers<[1], [0], [0], [1], [0, 0, 1, 1], [], []>} : vector<8x768xbf16>, vector<768x768xbf16>, vector<8x768xf32> -> vector<8x768xf32>
    %c0_69 = arith.constant 0 : index
    %c0_70 = arith.constant 0 : index
    %240 = vector.load %arg5[%c0_69, %c0_70] : memref<1x768xf32, #tpu.memory_space<vmem>>, vector<1x768xf32>
    %241 = vector.broadcast %240 : vector<1x768xf32> to vector<8x768xf32>
    %242 = arith.addf %239, %241 : vector<8x768xf32>
    %c0_71 = arith.constant 0 : index
    %c0_72 = arith.constant 0 : index
    %c0_73 = arith.constant 0 : index
    %243 = vector.load %arg3[%c0_71, %c0_72, %c0_73] : memref<1x8x768xf32, #tpu.memory_space<vmem>>, vector<1x8x768xf32>
    %244 = vector.shape_cast %243 : vector<1x8x768xf32> to vector<8x768xf32>
    %245 = arith.addf %242, %244 : vector<8x768xf32>
    %c0_74 = arith.constant 0 : index
    %c0_75 = arith.constant 0 : index
    %246 = vector.load %arg6[%c0_74, %c0_75] : memref<1x768xf32, #tpu.memory_space<vmem>>, vector<1x768xf32>
    %c0_76 = arith.constant 0 : index
    %c0_77 = arith.constant 0 : index
    %247 = vector.load %arg7[%c0_76, %c0_77] : memref<1x768xf32, #tpu.memory_space<vmem>>, vector<1x768xf32>
    %cst_78 = arith.constant dense<0.000000e+00> : vector<8xf32>
    %248 = vector.multi_reduction <add>, %245, %cst_78 [1] : vector<8x768xf32> to vector<8xf32>
    %249 = vector.shape_cast %248 : vector<8xf32> to vector<8x1xf32>
    %cst_79 = arith.constant 7.680000e+02 : f32
    %250 = vector.broadcast %cst_79 : f32 to vector<8x1xf32>
    %251 = arith.divf %249, %250 : vector<8x1xf32>
    %252 = vector.broadcast %251 : vector<8x1xf32> to vector<8x768xf32>
    %253 = arith.subf %245, %252 : vector<8x768xf32>
    %254 = arith.mulf %253, %253 : vector<8x768xf32>
    %cst_80 = arith.constant dense<0.000000e+00> : vector<8xf32>
    %255 = vector.multi_reduction <add>, %254, %cst_80 [1] : vector<8x768xf32> to vector<8xf32>
    %256 = vector.shape_cast %255 : vector<8xf32> to vector<8x1xf32>
    %cst_81 = arith.constant 7.680000e+02 : f32
    %257 = vector.broadcast %cst_81 : f32 to vector<8x1xf32>
    %258 = arith.divf %256, %257 : vector<8x1xf32>
    %cst_82 = arith.constant 9.99999996E-13 : f32
    %259 = vector.broadcast %cst_82 : f32 to vector<8x1xf32>
    %260 = arith.addf %258, %259 : vector<8x1xf32>
    %261 = math.rsqrt %260 : vector<8x1xf32>
    %262 = vector.broadcast %261 : vector<8x1xf32> to vector<8x768xf32>
    %263 = arith.mulf %253, %262 : vector<8x768xf32>
    %264 = vector.broadcast %246 : vector<1x768xf32> to vector<8x768xf32>
    %265 = arith.mulf %263, %264 : vector<8x768xf32>
    %266 = vector.broadcast %247 : vector<1x768xf32> to vector<8x768xf32>
    %267 = arith.addf %265, %266 : vector<8x768xf32>
    %c0_83 = arith.constant 0 : index
    %c0_84 = arith.constant 0 : index
    %c0_85 = arith.constant 0 : index
    %268 = vector.load %arg8[%c0_83, %c0_84, %c0_85] : memref<1x8x768xf32, #tpu.memory_space<vmem>>, vector<1x8x768xf32>
    %269 = vector.shape_cast %268 : vector<1x8x768xf32> to vector<8x768xf32>
    %270 = vector.shape_cast %267 : vector<8x768xf32> to vector<1x8x768xf32>
    tpu.vector_store %arg8[%c0_83, %c0_84, %c0_85], %270 {strides = array<i32>} : memref<1x8x768xf32, #tpu.memory_space<vmem>>, vector<1x8x768xf32>,
    return
  }
  func.func @transform_0(%arg0: i32) -> (i32, i32, i32) {
    %c0_i32 = arith.constant 0 : i32
    %c0_i32_0 = arith.constant 0 : i32
    %c0_i32_1 = arith.constant 0 : i32
    return %arg0, %c0_i32, %c0_i32_0 : i32, i32, i32
  }
  func.func @transform_1(%arg0: i32) -> (i32, i32, i32) {
    %c0_i32 = arith.constant 0 : i32
    %c0_i32_0 = arith.constant 0 : i32
    %c0_i32_1 = arith.constant 0 : i32
    return %arg0, %c0_i32, %c0_i32_0 : i32, i32, i32
  }
  func.func @transform_2(%arg0: i32) -> (i32, i32, i32) {
    %c0_i32 = arith.constant 0 : i32
    %c0_i32_0 = arith.constant 0 : i32
    %c0_i32_1 = arith.constant 0 : i32
    return %arg0, %c0_i32, %c0_i32_0 : i32, i32, i32
  }
  func.func @transform_3(%arg0: i32) -> (i32, i32) {
    %c0_i32 = arith.constant 0 : i32
    %c0_i32_0 = arith.constant 0 : i32
    %c0_i32_1 = arith.constant 0 : i32
    return %c0_i32, %c0_i32_0 : i32, i32
  }
  func.func @transform_4(%arg0: i32) -> (i32, i32) {
    %c0_i32 = arith.constant 0 : i32
    %c0_i32_0 = arith.constant 0 : i32
    %c0_i32_1 = arith.constant 0 : i32
    return %c0_i32, %c0_i32_0 : i32, i32
  }
  func.func @transform_5(%arg0: i32) -> (i32, i32) {
    %c0_i32 = arith.constant 0 : i32
    %c0_i32_0 = arith.constant 0 : i32
    %c0_i32_1 = arith.constant 0 : i32
    return %c0_i32, %c0_i32_0 : i32, i32
  }
  func.func @transform_6(%arg0: i32) -> (i32, i32) {
    %c0_i32 = arith.constant 0 : i32
    %c0_i32_0 = arith.constant 0 : i32
    %c0_i32_1 = arith.constant 0 : i32
    return %c0_i32, %c0_i32_0 : i32, i32
  }
  func.func @transform_7(%arg0: i32) -> (i32, i32, i32) {
    %c0_i32 = arith.constant 0 : i32
    %c0_i32_0 = arith.constant 0 : i32
    %c0_i32_1 = arith.constant 0 : i32
    return %arg0, %c0_i32, %c0_i32_0 : i32, i32, i32
  }
}

module attributes {stable_mosaic.version = 11 : i64} {
  func.func @_ffn_kernel(%arg0: i32, %arg1: memref<16x768xf32, #tpu.memory_space<vmem>>, %arg2: memref<768x512xbf16, #tpu.memory_space<vmem>>, %arg3: memref<1x512xf32, #tpu.memory_space<vmem>>, %arg4: memref<512x768xbf16, #tpu.memory_space<vmem>>, %arg5: memref<1x768xf32, #tpu.memory_space<vmem>>, %arg6: memref<1x768xf32, #tpu.memory_space<vmem>>, %arg7: memref<1x768xf32, #tpu.memory_space<vmem>>, %arg8: memref<16x768xf32, #tpu.memory_space<vmem>>, %arg9: memref<16x768xf32, #tpu.memory_space<vmem>>) attributes {dimension_semantics = [#tpu.dimension_semantics<arbitrary>], iteration_bounds = array<i64: 6>, scalar_prefetch = 0 : i64, scratch_operands = 1 : i64, tpu.core_type = #tpu.core_type<tc>, window_params = [{pipeline_mode = #tpu.pipeline_mode<synchronous>, transform_indices = @transform_0, window_bounds = array<i64: 16, 768>}, {transform_indices = @transform_1, window_bounds = array<i64: 768, 512>}, {transform_indices = @transform_2, window_bounds = array<i64: 1, 512>}, {transform_indices = @transform_3, window_bounds = array<i64: 512, 768>}, {pipeline_mode = #tpu.pipeline_mode<synchronous>, transform_indices = @transform_4, window_bounds = array<i64: 1, 768>}, {pipeline_mode = #tpu.pipeline_mode<synchronous>, transform_indices = @transform_5, window_bounds = array<i64: 1, 768>}, {pipeline_mode = #tpu.pipeline_mode<synchronous>, transform_indices = @transform_6, window_bounds = array<i64: 1, 768>}, {pipeline_mode = #tpu.pipeline_mode<synchronous>, transform_indices = @transform_7, window_bounds = array<i64: 16, 768>}]} {
    %c0_i32 = arith.constant 0 : i32
    %0 = arith.cmpi eq, %arg0, %c0_i32 : i32
    %1 = arith.extui %0 : i1 to i32
    %c0_i32_0 = arith.constant 0 : i32
    %2 = arith.cmpi ne, %1, %c0_i32_0 : i32
    scf.if %2 {
      %cst_18 = arith.constant 0.000000e+00 : f32
      %32 = vector.broadcast %cst_18 : f32 to vector<16x768xf32>
      %c0_19 = arith.constant 0 : index
      %c0_20 = arith.constant 0 : index
      %33 = vector.load %arg9[%c0_19, %c0_20] : memref<16x768xf32, #tpu.memory_space<vmem>>, vector<16x768xf32>
      tpu.vector_store %arg9[%c0_19, %c0_20], %32 {strides = array<i32>} : memref<16x768xf32, #tpu.memory_space<vmem>>, vector<16x768xf32>,
    } else {
    }
    %c0 = arith.constant 0 : index
    %c0_1 = arith.constant 0 : index
    %3 = vector.load %arg1[%c0, %c0_1] : memref<16x768xf32, #tpu.memory_space<vmem>>, vector<16x768xf32>
    %4 = arith.truncf %3 : vector<16x768xf32> to vector<16x768xbf16>
    %c0_2 = arith.constant 0 : index
    %c0_3 = arith.constant 0 : index
    %5 = vector.load %arg2[%c0_2, %c0_3] : memref<768x512xbf16, #tpu.memory_space<vmem>>, vector<768x512xbf16>
    %cst = arith.constant dense<0.000000e+00> : vector<16x512xf32>
    %6 = tpu.matmul %4, %5, %cst {dimension_numbers = #tpu.dot_dimension_numbers<[1], [0], [0], [1], [0, 0, 1, 1], [], []>} : vector<16x768xbf16>, vector<768x512xbf16>, vector<16x512xf32> -> vector<16x512xf32>
    %c0_4 = arith.constant 0 : index
    %c0_5 = arith.constant 0 : index
    %7 = vector.load %arg3[%c0_4, %c0_5] : memref<1x512xf32, #tpu.memory_space<vmem>>, vector<1x512xf32>
    %8 = vector.broadcast %7 : vector<1x512xf32> to vector<16x512xf32>
    %9 = arith.addf %6, %8 : vector<16x512xf32>
    %cst_6 = arith.constant 5.000000e-01 : f32
    %10 = vector.broadcast %cst_6 : f32 to vector<16x512xf32>
    %11 = arith.mulf %10, %9 : vector<16x512xf32>
    %cst_7 = arith.constant 4.471500e-02 : f32
    %12 = vector.broadcast %cst_7 : f32 to vector<16x512xf32>
    %13 = arith.mulf %12, %9 : vector<16x512xf32>
    %14 = arith.mulf %13, %9 : vector<16x512xf32>
    %15 = arith.mulf %14, %9 : vector<16x512xf32>
    %16 = arith.addf %9, %15 : vector<16x512xf32>
    %cst_8 = arith.constant 0.797884583 : f32
    %17 = vector.broadcast %cst_8 : f32 to vector<16x512xf32>
    %18 = arith.mulf %17, %16 : vector<16x512xf32>
    %19 = math.tanh %18 : vector<16x512xf32>
    %cst_9 = arith.constant 1.000000e+00 : f32
    %20 = vector.broadcast %cst_9 : f32 to vector<16x512xf32>
    %21 = arith.addf %20, %19 : vector<16x512xf32>
    %22 = arith.mulf %11, %21 : vector<16x512xf32>
    %c0_10 = arith.constant 0 : index
    %c0_11 = arith.constant 0 : index
    %23 = vector.load %arg9[%c0_10, %c0_11] : memref<16x768xf32, #tpu.memory_space<vmem>>, vector<16x768xf32>
    %24 = arith.truncf %22 : vector<16x512xf32> to vector<16x512xbf16>
    %c0_12 = arith.constant 0 : index
    %c0_13 = arith.constant 0 : index
    %25 = vector.load %arg4[%c0_12, %c0_13] : memref<512x768xbf16, #tpu.memory_space<vmem>>, vector<512x768xbf16>
    %cst_14 = arith.constant dense<0.000000e+00> : vector<16x768xf32>
    %26 = tpu.matmul %24, %25, %cst_14 {dimension_numbers = #tpu.dot_dimension_numbers<[1], [0], [0], [1], [0, 0, 1, 1], [], []>} : vector<16x512xbf16>, vector<512x768xbf16>, vector<16x768xf32> -> vector<16x768xf32>
    %27 = arith.addf %23, %26 : vector<16x768xf32>
    %c0_15 = arith.constant 0 : index
    %c0_16 = arith.constant 0 : index
    %28 = vector.load %arg9[%c0_15, %c0_16] : memref<16x768xf32, #tpu.memory_space<vmem>>, vector<16x768xf32>
    tpu.vector_store %arg9[%c0_15, %c0_16], %27 {strides = array<i32>} : memref<16x768xf32, #tpu.memory_space<vmem>>, vector<16x768xf32>,
    %c5_i32 = arith.constant 5 : i32
    %29 = arith.cmpi eq, %arg0, %c5_i32 : i32
    %30 = arith.extui %29 : i1 to i32
    %c0_i32_17 = arith.constant 0 : i32
    %31 = arith.cmpi ne, %30, %c0_i32_17 : i32
    scf.if %31 {
      %c0_18 = arith.constant 0 : index
      %c0_19 = arith.constant 0 : index
      %32 = vector.load %arg9[%c0_18, %c0_19] : memref<16x768xf32, #tpu.memory_space<vmem>>, vector<16x768xf32>
      %c0_20 = arith.constant 0 : index
      %c0_21 = arith.constant 0 : index
      %33 = vector.load %arg5[%c0_20, %c0_21] : memref<1x768xf32, #tpu.memory_space<vmem>>, vector<1x768xf32>
      %34 = vector.broadcast %33 : vector<1x768xf32> to vector<16x768xf32>
      %35 = arith.addf %32, %34 : vector<16x768xf32>
      %c0_22 = arith.constant 0 : index
      %c0_23 = arith.constant 0 : index
      %36 = vector.load %arg1[%c0_22, %c0_23] : memref<16x768xf32, #tpu.memory_space<vmem>>, vector<16x768xf32>
      %37 = arith.addf %35, %36 : vector<16x768xf32>
      %c0_24 = arith.constant 0 : index
      %c0_25 = arith.constant 0 : index
      %38 = vector.load %arg6[%c0_24, %c0_25] : memref<1x768xf32, #tpu.memory_space<vmem>>, vector<1x768xf32>
      %c0_26 = arith.constant 0 : index
      %c0_27 = arith.constant 0 : index
      %39 = vector.load %arg7[%c0_26, %c0_27] : memref<1x768xf32, #tpu.memory_space<vmem>>, vector<1x768xf32>
      %cst_28 = arith.constant dense<0.000000e+00> : vector<16xf32>
      %40 = vector.multi_reduction <add>, %37, %cst_28 [1] : vector<16x768xf32> to vector<16xf32>
      %41 = vector.shape_cast %40 : vector<16xf32> to vector<16x1xf32>
      %cst_29 = arith.constant 7.680000e+02 : f32
      %42 = vector.broadcast %cst_29 : f32 to vector<16x1xf32>
      %43 = arith.divf %41, %42 : vector<16x1xf32>
      %44 = vector.broadcast %43 : vector<16x1xf32> to vector<16x768xf32>
      %45 = arith.subf %37, %44 : vector<16x768xf32>
      %46 = arith.mulf %45, %45 : vector<16x768xf32>
      %cst_30 = arith.constant dense<0.000000e+00> : vector<16xf32>
      %47 = vector.multi_reduction <add>, %46, %cst_30 [1] : vector<16x768xf32> to vector<16xf32>
      %48 = vector.shape_cast %47 : vector<16xf32> to vector<16x1xf32>
      %cst_31 = arith.constant 7.680000e+02 : f32
      %49 = vector.broadcast %cst_31 : f32 to vector<16x1xf32>
      %50 = arith.divf %48, %49 : vector<16x1xf32>
      %cst_32 = arith.constant 9.99999996E-13 : f32
      %51 = vector.broadcast %cst_32 : f32 to vector<16x1xf32>
      %52 = arith.addf %50, %51 : vector<16x1xf32>
      %53 = math.rsqrt %52 : vector<16x1xf32>
      %54 = vector.broadcast %53 : vector<16x1xf32> to vector<16x768xf32>
      %55 = arith.mulf %45, %54 : vector<16x768xf32>
      %56 = vector.broadcast %38 : vector<1x768xf32> to vector<16x768xf32>
      %57 = arith.mulf %55, %56 : vector<16x768xf32>
      %58 = vector.broadcast %39 : vector<1x768xf32> to vector<16x768xf32>
      %59 = arith.addf %57, %58 : vector<16x768xf32>
      %c0_33 = arith.constant 0 : index
      %c0_34 = arith.constant 0 : index
      %60 = vector.load %arg8[%c0_33, %c0_34] : memref<16x768xf32, #tpu.memory_space<vmem>>, vector<16x768xf32>
      tpu.vector_store %arg8[%c0_33, %c0_34], %59 {strides = array<i32>} : memref<16x768xf32, #tpu.memory_space<vmem>>, vector<16x768xf32>,
    } else {
    }
    return
  }
  func.func @transform_0(%arg0: i32) -> (i32, i32) {
    %c0_i32 = arith.constant 0 : i32
    %c0_i32_0 = arith.constant 0 : i32
    %c0_i32_1 = arith.constant 0 : i32
    return %c0_i32, %c0_i32_0 : i32, i32
  }
  func.func @transform_1(%arg0: i32) -> (i32, i32) {
    %c0_i32 = arith.constant 0 : i32
    %c0_i32_0 = arith.constant 0 : i32
    return %c0_i32, %arg0 : i32, i32
  }
  func.func @transform_2(%arg0: i32) -> (i32, i32) {
    %c0_i32 = arith.constant 0 : i32
    %c0_i32_0 = arith.constant 0 : i32
    return %c0_i32, %arg0 : i32, i32
  }
  func.func @transform_3(%arg0: i32) -> (i32, i32) {
    %c0_i32 = arith.constant 0 : i32
    %c0_i32_0 = arith.constant 0 : i32
    return %arg0, %c0_i32 : i32, i32
  }
  func.func @transform_4(%arg0: i32) -> (i32, i32) {
    %c0_i32 = arith.constant 0 : i32
    %c0_i32_0 = arith.constant 0 : i32
    %c0_i32_1 = arith.constant 0 : i32
    return %c0_i32, %c0_i32_0 : i32, i32
  }
  func.func @transform_5(%arg0: i32) -> (i32, i32) {
    %c0_i32 = arith.constant 0 : i32
    %c0_i32_0 = arith.constant 0 : i32
    %c0_i32_1 = arith.constant 0 : i32
    return %c0_i32, %c0_i32_0 : i32, i32
  }
  func.func @transform_6(%arg0: i32) -> (i32, i32) {
    %c0_i32 = arith.constant 0 : i32
    %c0_i32_0 = arith.constant 0 : i32
    %c0_i32_1 = arith.constant 0 : i32
    return %c0_i32, %c0_i32_0 : i32, i32
  }
  func.func @transform_7(%arg0: i32) -> (i32, i32) {
    %c0_i32 = arith.constant 0 : i32
    %c0_i32_0 = arith.constant 0 : i32
    %c0_i32_1 = arith.constant 0 : i32
    return %c0_i32, %c0_i32_0 : i32, i32
  }
}

module attributes {stable_mosaic.version = 11 : i64} {
  func.func @_head_kernel(%arg0: i32, %arg1: memref<2x768xf32, #tpu.memory_space<vmem>>, %arg2: memref<768x768xbf16, #tpu.memory_space<vmem>>, %arg3: memref<1x768xf32, #tpu.memory_space<vmem>>, %arg4: memref<768x32xbf16, #tpu.memory_space<vmem>>, %arg5: memref<1x32xf32, #tpu.memory_space<vmem>>, %arg6: memref<32x2xbf16, #tpu.memory_space<vmem>>, %arg7: memref<1x2xf32, #tpu.memory_space<vmem>>, %arg8: memref<2x2xf32, #tpu.memory_space<vmem>>) attributes {dimension_semantics = [#tpu.dimension_semantics<arbitrary>], iteration_bounds = array<i64: 1>, scalar_prefetch = 0 : i64, scratch_operands = 0 : i64, tpu.core_type = #tpu.core_type<tc>, window_params = [{pipeline_mode = #tpu.pipeline_mode<synchronous>, transform_indices = @transform_0, window_bounds = array<i64: 2, 768>}, {pipeline_mode = #tpu.pipeline_mode<synchronous>, transform_indices = @transform_1, window_bounds = array<i64: 768, 768>}, {pipeline_mode = #tpu.pipeline_mode<synchronous>, transform_indices = @transform_2, window_bounds = array<i64: 1, 768>}, {pipeline_mode = #tpu.pipeline_mode<synchronous>, transform_indices = @transform_3, window_bounds = array<i64: 768, 32>}, {pipeline_mode = #tpu.pipeline_mode<synchronous>, transform_indices = @transform_4, window_bounds = array<i64: 1, 32>}, {pipeline_mode = #tpu.pipeline_mode<synchronous>, transform_indices = @transform_5, window_bounds = array<i64: 32, 2>}, {pipeline_mode = #tpu.pipeline_mode<synchronous>, transform_indices = @transform_6, window_bounds = array<i64: 1, 2>}, {pipeline_mode = #tpu.pipeline_mode<synchronous>, transform_indices = @transform_7, window_bounds = array<i64: 2, 2>}]} {
    %c0 = arith.constant 0 : index
    %c0_0 = arith.constant 0 : index
    %0 = vector.load %arg1[%c0, %c0_0] : memref<2x768xf32, #tpu.memory_space<vmem>>, vector<2x768xf32>
    %1 = arith.truncf %0 : vector<2x768xf32> to vector<2x768xbf16>
    %c0_1 = arith.constant 0 : index
    %c0_2 = arith.constant 0 : index
    %2 = vector.load %arg2[%c0_1, %c0_2] : memref<768x768xbf16, #tpu.memory_space<vmem>>, vector<768x768xbf16>
    %cst = arith.constant dense<0.000000e+00> : vector<2x768xf32>
    %3 = tpu.matmul %1, %2, %cst {dimension_numbers = #tpu.dot_dimension_numbers<[1], [0], [0], [1], [0, 0, 1, 1], [], []>} : vector<2x768xbf16>, vector<768x768xbf16>, vector<2x768xf32> -> vector<2x768xf32>
    %c0_3 = arith.constant 0 : index
    %c0_4 = arith.constant 0 : index
    %4 = vector.load %arg3[%c0_3, %c0_4] : memref<1x768xf32, #tpu.memory_space<vmem>>, vector<1x768xf32>
    %5 = vector.broadcast %4 : vector<1x768xf32> to vector<2x768xf32>
    %6 = arith.addf %3, %5 : vector<2x768xf32>
    %7 = math.tanh %6 : vector<2x768xf32>
    %8 = arith.truncf %7 : vector<2x768xf32> to vector<2x768xbf16>
    %c0_5 = arith.constant 0 : index
    %c0_6 = arith.constant 0 : index
    %9 = vector.load %arg4[%c0_5, %c0_6] : memref<768x32xbf16, #tpu.memory_space<vmem>>, vector<768x32xbf16>
    %cst_7 = arith.constant dense<0.000000e+00> : vector<2x32xf32>
    %10 = tpu.matmul %8, %9, %cst_7 {dimension_numbers = #tpu.dot_dimension_numbers<[1], [0], [0], [1], [0, 0, 1, 1], [], []>} : vector<2x768xbf16>, vector<768x32xbf16>, vector<2x32xf32> -> vector<2x32xf32>
    %c0_8 = arith.constant 0 : index
    %c0_9 = arith.constant 0 : index
    %11 = vector.load %arg5[%c0_8, %c0_9] : memref<1x32xf32, #tpu.memory_space<vmem>>, vector<1x32xf32>
    %12 = vector.broadcast %11 : vector<1x32xf32> to vector<2x32xf32>
    %13 = arith.addf %10, %12 : vector<2x32xf32>
    %14 = arith.truncf %13 : vector<2x32xf32> to vector<2x32xbf16>
    %c0_10 = arith.constant 0 : index
    %c0_11 = arith.constant 0 : index
    %15 = vector.load %arg6[%c0_10, %c0_11] : memref<32x2xbf16, #tpu.memory_space<vmem>>, vector<32x2xbf16>
    %cst_12 = arith.constant dense<0.000000e+00> : vector<2x2xf32>
    %16 = tpu.matmul %14, %15, %cst_12 {dimension_numbers = #tpu.dot_dimension_numbers<[1], [0], [0], [1], [0, 0, 1, 1], [], []>} : vector<2x32xbf16>, vector<32x2xbf16>, vector<2x2xf32> -> vector<2x2xf32>
    %c0_13 = arith.constant 0 : index
    %c0_14 = arith.constant 0 : index
    %17 = vector.load %arg7[%c0_13, %c0_14] : memref<1x2xf32, #tpu.memory_space<vmem>>, vector<1x2xf32>
    %18 = vector.broadcast %17 : vector<1x2xf32> to vector<2x2xf32>
    %19 = arith.addf %16, %18 : vector<2x2xf32>
    %c0_15 = arith.constant 0 : index
    %c0_16 = arith.constant 0 : index
    %20 = vector.load %arg8[%c0_15, %c0_16] : memref<2x2xf32, #tpu.memory_space<vmem>>, vector<2x2xf32>
    tpu.vector_store %arg8[%c0_15, %c0_16], %19 {strides = array<i32>} : memref<2x2xf32, #tpu.memory_space<vmem>>, vector<2x2xf32>,
    return
  }
  func.func @transform_0(%arg0: i32) -> (i32, i32) {
    %c0_i32 = arith.constant 0 : i32
    %c0_i32_0 = arith.constant 0 : i32
    %c0_i32_1 = arith.constant 0 : i32
    return %c0_i32, %c0_i32_0 : i32, i32
  }
  func.func @transform_1(%arg0: i32) -> (i32, i32) {
    %c0_i32 = arith.constant 0 : i32
    %c0_i32_0 = arith.constant 0 : i32
    %c0_i32_1 = arith.constant 0 : i32
    return %c0_i32, %c0_i32_0 : i32, i32
  }
  func.func @transform_2(%arg0: i32) -> (i32, i32) {
    %c0_i32 = arith.constant 0 : i32
    %c0_i32_0 = arith.constant 0 : i32
    %c0_i32_1 = arith.constant 0 : i32
    return %c0_i32, %c0_i32_0 : i32, i32
  }
  func.func @transform_3(%arg0: i32) -> (i32, i32) {
    %c0_i32 = arith.constant 0 : i32
    %c0_i32_0 = arith.constant 0 : i32
    %c0_i32_1 = arith.constant 0 : i32
    return %c0_i32, %c0_i32_0 : i32, i32
  }
  func.func @transform_4(%arg0: i32) -> (i32, i32) {
    %c0_i32 = arith.constant 0 : i32
    %c0_i32_0 = arith.constant 0 : i32
    %c0_i32_1 = arith.constant 0 : i32
    return %c0_i32, %c0_i32_0 : i32, i32
  }
  func.func @transform_5(%arg0: i32) -> (i32, i32) {
    %c0_i32 = arith.constant 0 : i32
    %c0_i32_0 = arith.constant 0 : i32
    %c0_i32_1 = arith.constant 0 : i32
    return %c0_i32, %c0_i32_0 : i32, i32
  }
  func.func @transform_6(%arg0: i32) -> (i32, i32) {
    %c0_i32 = arith.constant 0 : i32
    %c0_i32_0 = arith.constant 0 : i32
    %c0_i32_1 = arith.constant 0 : i32
    return %c0_i32, %c0_i32_0 : i32, i32
  }
  func.func @transform_7(%arg0: i32) -> (i32, i32) {
    %c0_i32 = arith.constant 0 : i32
    %c0_i32_0 = arith.constant 0 : i32
    %c0_i32_1 = arith.constant 0 : i32
    return %c0_i32, %c0_i32_0 : i32, i32
  }
}

</mosaic_0001>

<bundles_post_ra>
// kernel: model_forward.8
= control target key start
LH: loop header
LB: loop body
LE: loop exit
PB: predicated region body
PF: predicated region fallthrough
CT: control target
= control target key end

     0   :  { %v102_v61 = vlaneseq  ;;  %s360_s0 = inlined_call_operand.vmem [shape: f32[16,768], index: 0, kind: input, shape index: {}]   ;;  %s361_s1 = inlined_call_operand.vmem [shape: f32[1,768], index: 1, kind: input, shape index: {}]   ;;  %s362_s2 = inlined_call_operand.vmem [shape: f32[1,768], index: 2, kind: input, shape index: {}]   ;;  %s363_s3 = inlined_call_operand.vmem [shape: f32[16,768], index: 3, kind: output, shape index: {}]  }
   0x1   :  { %v14_v0 = vld [vmem:[%s360_s0] sm:$0xff]  ;;  %v15_v1 = vld [vmem:[%s360_s0 + $0x8] sm:$0xff]  ;;  %v16_v2 = vld [vmem:[%s360_s0 + $0x10] sm:$0xff] }
   0x2   :  { %v17_v3 = vld [vmem:[%s360_s0 + $0x18] sm:$0xff]  ;;  %v28_v4 = vadd.f32 %v15_v1, %v14_v0  ;;  %v20_v5 = vld [vmem:[%s360_s0 + $0x30] sm:$0xff]  ;;  %v22_v7 = vld [vmem:[%s360_s0 + $0x40] sm:$0xff] }
   0x3   :  { %v21_v6 = vld [vmem:[%s360_s0 + $0x38] sm:$0xff]  ;;  %v18_v10 = vld [vmem:[%s360_s0 + $0x20] sm:$0xff]  ;;  %v23_v11 = vld [vmem:[%s360_s0 + $0x48] sm:$0xff] }
   0x4   :  { %v29_v8 = vadd.f32 %v28_v4, %v16_v2  ;;  %v35_v9 = vadd.f32 %v21_v6, %v20_v5  ;;  %v19_v14 = vld [vmem:[%s360_s0 + $0x28] sm:$0xff]  ;;  %v24_v15 = vld [vmem:[%s360_s0 + $0x50] sm:$0xff]  ;;  %v25_v18 = vld [vmem:[%s360_s0 + $0x58] sm:$0xff] }
   0x6   :  { %v30_v12 = vadd.f32 %v29_v8, %v17_v3  ;;  %v36_v13 = vadd.f32 %v35_v9, %v22_v7 }
   0x8   :  { %v31_v16 = vadd.f32 %v30_v12, %v18_v10  ;;  %v37_v17 = vadd.f32 %v36_v13, %v23_v11 }
   0xa   :  { %v32_v19 = vadd.f32 %v31_v16, %v19_v14  ;;  %v38_v20 = vadd.f32 %v37_v17, %v24_v15 }
   0xc   :  { %33 = vadd.xlane.f32.xlu0 %v32_v19  ;;  %v39_v21 = vadd.f32 %v38_v20, %v25_v18 }
  0x10   :  { %40 = vadd.xlane.f32.xlu0 %v39_v21 }
  0x99   :  { %v34_v22 = vpop.xlane.xlu0 %33 }
  0x9a   :  { %v43_v23 = vmul.f32 0.0013020834, %v34_v22 }
  0x9c   :  { %v263_v24 = vsub.f32 %v14_v0, %v43_v23  ;;  %v265_v25 = vsub.f32 %v15_v1, %v43_v23  ;;  %v267_v26 = vsub.f32 %v16_v2, %v43_v23  ;;  %v269_v28 = vsub.f32 %v17_v3, %v43_v23 }
  0x9d   :  { %v41_v27 = vpop.xlane.xlu0 %40  ;;  %v275_v32 = vsub.f32 %v18_v10, %v43_v23  ;;  %v50_v38 = vsub.f32 %v19_v14, %v43_v23  ;;  %v103_v1 = vshrl.u32 %v102_v61, 7 }
  0x9e   :  { %v44_v29 = vmul.f32 0.0013020834, %v41_v27  ;;  %v57_v30 = vmul.f32 %v263_v24, %v263_v24  ;;  %v58_v31 = vmul.f32 %v265_v25, %v265_v25  ;;  %v59_v33 = vmul.f32 %v267_v26, %v267_v26 }
  0x9f   :  { %v60_v39 = vmul.f32 %v269_v28, %v269_v28  ;;  %v61_v44 = vmul.f32 %v275_v32, %v275_v32  ;;  %v62_v49 = vmul.f32 %v50_v38, %v50_v38  ;;  %v104_v4 = vsub.s32 0, %v103_v1 }
  0xa0   :  { %v69_v34 = vadd.f32 %v58_v31, %v57_v30  ;;  %v279_v35 = vsub.f32 %v20_v5, %v44_v29  ;;  %v281_v36 = vsub.f32 %v21_v6, %v44_v29  ;;  %v283_v37 = vsub.f32 %v22_v7, %v44_v29  ;;  %v26_v6 = vld [vmem:[%s361_s1] sm:$0x3f] }
  0xa1   :  { %v287_v41 = vsub.f32 %v23_v11, %v44_v29  ;;  %v295_v46 = vsub.f32 %v24_v15, %v44_v29  ;;  %v299_v51 = vsub.f32 %v25_v18, %v44_v29  ;;  %v108_v5 = vsub.s32 1, %v103_v1  ;;  %v27_v11 = vld [vmem:[%s362_s2] sm:$0x3f] }
  0xa2   :  { %v70_v40 = vadd.f32 %v69_v34, %v59_v33  ;;  %v63_v42 = vmul.f32 %v279_v35, %v279_v35  ;;  %v64_v43 = vmul.f32 %v281_v36, %v281_v36  ;;  %v65_v47 = vmul.f32 %v283_v37, %v283_v37 }
  0xa3   :  { %v66_v52 = vmul.f32 %v287_v41, %v287_v41  ;;  %v67_v55 = vmul.f32 %v295_v46, %v295_v46  ;;  %v68_v57 = vmul.f32 %v299_v51, %v299_v51  ;;  %v112_v7 = vsub.s32 2, %v103_v1 }
  0xa4   :  { %v71_v45 = vadd.f32 %v70_v40, %v60_v39  ;;  %v76_v48 = vadd.f32 %v64_v43, %v63_v42  ;;  %v116_v8 = vsub.s32 3, %v103_v1  ;;  %v120_v9 = vsub.s32 4, %v103_v1 }
  0xa5   :  { %v124_v10 = vsub.s32 5, %v103_v1  ;;  %v105_v12 = vrot.slane %v26_v6, %v104_v4  ;;  %v109_v13 = vrot.slane %v26_v6, %v108_v5  ;;  %v113_v14 = vrot.slane %v26_v6, %v112_v7 }
  0xa6   :  { %v72_v50 = vadd.f32 %v71_v45, %v61_v44  ;;  %v77_v53 = vadd.f32 %v76_v48, %v65_v47  ;;  %v117_v15 = vrot.slane %v26_v6, %v116_v8  ;;  %v121_v16 = vrot.slane %v26_v6, %v120_v9 }
  0xa7   :  { %v125_v17 = vrot.slane %v26_v6, %v124_v10  ;;  %v148_v19 = vrot.slane %v27_v11, %v104_v4  ;;  %v152_v20 = vrot.slane %v27_v11, %v108_v5  ;;  %v156_v21 = vrot.slane %v27_v11, %v112_v7 }
  0xa8   :  { %v73_v54 = vadd.f32 %v72_v50, %v62_v49  ;;  %v78_v56 = vadd.f32 %v77_v53, %v66_v52  ;;  %v160_v22 = vrot.slane %v27_v11, %v116_v8  ;;  %v164_v31 = vrot.slane %v27_v11, %v120_v9 }
  0xa9   :  { %v168_v33 = vrot.slane %v27_v11, %v124_v10 }
  0xaa   :  { %74 = vadd.xlane.f32.xlu1 %v73_v54  ;;  %v79_v58 = vadd.f32 %v78_v56, %v67_v55 }
  0xac   :  { %v80_v59 = vadd.f32 %v79_v58, %v68_v57 }
  0xae   :  { %81 = vadd.xlane.f32.xlu1 %v80_v59 }
 0x137   :  { %v75_v60 = vpop.xlane.xlu1 %74 }
 0x138   :  { %v83_v62 = vmul.f32 0.0013020834, %v75_v60 }
 0x13a   :  { %v85_v63 = vadd.f32 1e-12, %v83_v62 }
 0x13b   :  { %v82_v0 = vpop.xlane.xlu1 %81 }
 0x13c   :  { %203 = vrsqrt.f32 %v85_v63  ;;  %v84_v2 = vmul.f32 0.0013020834, %v82_v0 }
 0x13e   :  { %v86_v3 = vadd.f32 1e-12, %v84_v2 }
 0x140   :  { %205 = vrsqrt.f32 %v86_v3 }
 0x146   :  { %v204_v18 = vpop.eup %203 }
 0x147   :  { %v89_v23 = vmul.f32 %v204_v18, %v263_v24  ;;  %v90_v27 = vmul.f32 %v204_v18, %v265_v25  ;;  %v91_v29 = vmul.f32 %v204_v18, %v267_v26  ;;  %v92_v30 = vmul.f32 %v204_v18, %v269_v28 }
 0x148   :  { %v93_v34 = vmul.f32 %v204_v18, %v275_v32  ;;  %v94_v39 = vmul.f32 %v204_v18, %v50_v38 }
 0x149   :  { %v132_v40 = vmul.f32 %v105_v12, %v89_v23  ;;  %v133_v42 = vmul.f32 %v109_v13, %v90_v27  ;;  %v134_v43 = vmul.f32 %v113_v14, %v91_v29  ;;  %v135_v44 = vmul.f32 %v117_v15, %v92_v30 }
 0x14a   :  { %v206_v45 = vpop.eup %205  ;;  %v136_v47 = vmul.f32 %v121_v16, %v93_v34  ;;  %v137_v48 = vmul.f32 %v125_v17, %v94_v39 }
 0x14b   :  { %v175_v49 = vadd.f32 %v148_v19, %v132_v40  ;;  %v176_v24 = vadd.f32 %v152_v20, %v133_v42  ;;  %v177_v50 = vadd.f32 %v156_v21, %v134_v43  ;;  %v178_v25 = vadd.f32 %v160_v22, %v135_v44 }
 0x14c   :  { %v179_v52 = vadd.f32 %v164_v31, %v136_v47  ;;  %v180_v26 = vadd.f32 %v168_v33, %v137_v48  ;;  %v95_v28 = vmul.f32 %v206_v45, %v279_v35  ;;  %v96_v53 = vmul.f32 %v206_v45, %v281_v36 }
 0x14d   :  { %187 = vst [vmem:[%s363_s3] sm:$0xff] %v175_v49  ;;  %188 = vst [vmem:[%s363_s3 + $0x8] sm:$0xff] %v176_v24  ;;  %v97_v32 = vmul.f32 %v206_v45, %v283_v37  ;;  %v98_v35 = vmul.f32 %v206_v45, %v287_v41  ;;  %v99_v36 = vmul.f32 %v206_v45, %v295_v46 }
 0x14e   :  { %189 = vst [vmem:[%s363_s3 + $0x10] sm:$0xff] %v177_v50  ;;  %190 = vst [vmem:[%s363_s3 + $0x18] sm:$0xff] %v178_v25  ;;  %v100_v38 = vmul.f32 %v206_v45, %v299_v51  ;;  %v138_v54 = vmul.f32 %v105_v12, %v95_v28  ;;  %v139_v55 = vmul.f32 %v109_v13, %v96_v53 }
 0x14f   :  { %191 = vst [vmem:[%s363_s3 + $0x20] sm:$0xff] %v179_v52  ;;  %192 = vst [vmem:[%s363_s3 + $0x28] sm:$0xff] %v180_v26  ;;  %v140_v56 = vmul.f32 %v113_v14, %v97_v32  ;;  %v141_v57 = vmul.f32 %v117_v15, %v98_v35  ;;  %v142_v58 = vmul.f32 %v121_v16, %v99_v36 }
 0x150   :  { %v143_v37 = vmul.f32 %v125_v17, %v100_v38  ;;  %v181_v59 = vadd.f32 %v148_v19, %v138_v54  ;;  %v182_v41 = vadd.f32 %v152_v20, %v139_v55 }
 0x151   :  { %v183_v60 = vadd.f32 %v156_v21, %v140_v56  ;;  %v184_v46 = vadd.f32 %v160_v22, %v141_v57  ;;  %v185_v61 = vadd.f32 %v164_v31, %v142_v58 }
 0x152   :  { %v186_v51 = vadd.f32 %v168_v33, %v143_v37  ;;  %193 = vst [vmem:[%s363_s3 + $0x30] sm:$0xff] %v181_v59  ;;  %194 = vst [vmem:[%s363_s3 + $0x38] sm:$0xff] %v182_v41 }
 0x153   :  { %195 = vst [vmem:[%s363_s3 + $0x40] sm:$0xff] %v183_v60  ;;  %196 = vst [vmem:[%s363_s3 + $0x48] sm:$0xff] %v184_v46 }
 0x154   :  { %197 = vst [vmem:[%s363_s3 + $0x50] sm:$0xff] %v185_v61  ;;  %198 = vst [vmem:[%s363_s3 + $0x58] sm:$0xff] %v186_v51 }

// kernel: model_forward.9
= control target key start
LH: loop header
LB: loop body
LE: loop exit
PB: predicated region body
PF: predicated region fallthrough
CT: control target
= control target key end

     0   :  { %s1776_s12 = smov 0   ;;  %s1778_s13 = smov 0   ;;  %s2174_s0 = inlined_call_operand.vmem [shape: f32[16,768], index: 0, kind: input, shape index: {}]   ;;  %s2175_s1 = inlined_call_operand.vmem [shape: bf16[768,2304], index: 1, kind: input, shape index: {}]   ;;  %s2176_s2 = inlined_call_operand.vmem [shape: f32[1,2304], index: 2, kind: input, shape index: {}]   ;;  %s2177_s3 = inlined_call_operand.vmem [shape: f32[16,2304], index: 3, kind: output, shape index: {}]  }
   0x1   :  { %s1780_s14 = smov 0  }
   0x2 LB: > { %s1792_s15 = sadd.s32 4294967295, %s1754_s14   ;;  %s1795_s16 = sadd.s32 1, %s1754_s14   ;;  %s1754_s14 = sphi %s1780_s14, %s2181_s14   ;;  %s1750_s13 = sphi %s1778_s13, %s2180_s13   ;;  %s1746_s12 = sphi %s1776_s12, %s2179_s12  }
   0x3   : > { %s38_s17 = ssub.s32 %s1754_s14, %s1795_s16  ;;  %s41_s18 = sadd.s32 1, %s1750_s13 }
   0x4   : > { %p39_p0 = scmp.eq.s32.totalorder %s38_s17, 0  ;;  %p48_p1 = scmp.ne.s32.totalorder %s1750_s13, %s1746_s12 }
   0x5   : > { %p49_p2 = scmp.eq.s32.totalorder %s1754_s14, 0  ;;  %p104_p3 = scmp.eq.s32.totalorder %s1792_s15, 8 }
   0x6   : > { %s1805_s19 = scalar_select %p39_p0, %s1750_s13, %s41_s18  }
   0x7   : > { %p50_p4 = por %p49_p2, %p48_p1  ;;  %p1807_p5 = por %p104_p3, %p48_p1 }
   0x8   : > { %p1441_p6 = scmp.ge.s32.totalorder %s1754_s14, 9 }
   0xa   : > { %129 = sbr.rel (%p1441_p6) target bundleno = 70 (0x46), region = 20 }
  0x11   : > { %132 = sbr.rel (!%p50_p4) target bundleno = 70 (0x46), region = 24  ;;  %s134_s21 = sand.u32 (%p50_p4), 1, %s1750_s13  }
  0x12   : > { %s1548_s22 = sshll.u32 (%p50_p4), %s1754_s14, 3  ;;  %s1562_s23 = smul.u32 (%p50_p4), 768, %s134_s21 }
  0x13   : > { %s1817_s26 = scalar_lea.vmem (%p50_p4), %s2175_s1, %s1548_s22 }
  0x14   : > { %v357_v0 = vld [vmem:[%s1817_s26] sm:$0xff] (%p50_p4)  ;;  %v359_v1 = vld [vmem:[%s1817_s26 + $0x48] sm:$0xff] (%p50_p4)  ;;  %v361_v2 = vld [vmem:[%s1817_s26 + $0x90] sm:$0xff] (%p50_p4)  ;;  %s1825_s27 = scalar_lea.vmem (%p50_p4), [#allocation2], %s1562_s23 }
  0x15   : > { %v363_v3 = vld [vmem:[%s1817_s26 + $0xd8] sm:$0xff] (%p50_p4)  ;;  %v365_v4 = vld [vmem:[%s1817_s26 + $0x120] sm:$0xff] (%p50_p4)  ;;  %v367_v5 = vld [vmem:[%s1817_s26 + $0x168] sm:$0xff] (%p50_p4)  ;;  %358 = vst [vmem:[%s1825_s27] sm:$0xff] (%p50_p4), %v357_v0 }
  0x16   : > { %360 = vst [vmem:[%s1825_s27 + $0x8] sm:$0xff] (%p50_p4), %v359_v1  ;;  %362 = vst [vmem:[%s1825_s27 + $0x10] sm:$0xff] (%p50_p4), %v361_v2  ;;  %v369_v6 = vld [vmem:[%s1817_s26 + $0x1b0] sm:$0xff] (%p50_p4)  ;;  %v371_v7 = vld [vmem:[%s1817_s26 + $0x1f8] sm:$0xff] (%p50_p4) }
  0x17   : > { %364 = vst [vmem:[%s1825_s27 + $0x18] sm:$0xff] (%p50_p4), %v363_v3  ;;  %366 = vst [vmem:[%s1825_s27 + $0x20] sm:$0xff] (%p50_p4), %v365_v4  ;;  %v373_v8 = vld [vmem:[%s1817_s26 + $0x240] sm:$0xff] (%p50_p4)  ;;  %v375_v9 = vld [vmem:[%s1817_s26 + $0x288] sm:$0xff] (%p50_p4) }
  0x18   : > { %368 = vst [vmem:[%s1825_s27 + $0x28] sm:$0xff] %v367_v5  ;;  %370 = vst [vmem:[%s1825_s27 + $0x30] sm:$0xff] %v369_v6  ;;  %v377_v10 = vld [vmem:[%s1817_s26 + $0x2d0] sm:$0xff]  ;;  %v379_v11 = vld [vmem:[%s1817_s26 + $0x318] sm:$0xff] }
  0x19   : > { %372 = vst [vmem:[%s1825_s27 + $0x38] sm:$0xff] %v371_v7  ;;  %374 = vst [vmem:[%s1825_s27 + $0x40] sm:$0xff] %v373_v8  ;;  %v381_v12 = vld [vmem:[%s1817_s26 + $0x360] sm:$0xff]  ;;  %v383_v13 = vld [vmem:[%s1817_s26 + $0x3a8] sm:$0xff] }
  0x1a   : > { %376 = vst [vmem:[%s1825_s27 + $0x48] sm:$0xff] %v375_v9  ;;  %378 = vst [vmem:[%s1825_s27 + $0x50] sm:$0xff] %v377_v10  ;;  %v385_v14 = vld [vmem:[%s1817_s26 + $0x3f0] sm:$0xff]  ;;  %v387_v15 = vld [vmem:[%s1817_s26 + $0x438] sm:$0xff] }
  0x1b   : > { %380 = vst [vmem:[%s1825_s27 + $0x58] sm:$0xff] %v379_v11  ;;  %382 = vst [vmem:[%s1825_s27 + $0x60] sm:$0xff] %v381_v12  ;;  %v389_v16 = vld [vmem:[%s1817_s26 + $0x480] sm:$0xff]  ;;  %v391_v17 = vld [vmem:[%s1817_s26 + $0x4c8] sm:$0xff] }
  0x1c   : > { %384 = vst [vmem:[%s1825_s27 + $0x68] sm:$0xff] %v383_v13  ;;  %386 = vst [vmem:[%s1825_s27 + $0x70] sm:$0xff] %v385_v14  ;;  %v393_v18 = vld [vmem:[%s1817_s26 + $0x510] sm:$0xff]  ;;  %v395_v19 = vld [vmem:[%s1817_s26 + $0x558] sm:$0xff] }
  0x1d   : > { %388 = vst [vmem:[%s1825_s27 + $0x78] sm:$0xff] %v387_v15  ;;  %390 = vst [vmem:[%s1825_s27 + $0x80] sm:$0xff] %v389_v16  ;;  %v397_v20 = vld [vmem:[%s1817_s26 + $0x5a0] sm:$0xff]  ;;  %v399_v21 = vld [vmem:[%s1817_s26 + $0x5e8] sm:$0xff] }
  0x1e   : > { %392 = vst [vmem:[%s1825_s27 + $0x88] sm:$0xff] %v391_v17  ;;  %394 = vst [vmem:[%s1825_s27 + $0x90] sm:$0xff] %v393_v18  ;;  %v401_v22 = vld [vmem:[%s1817_s26 + $0x630] sm:$0xff]  ;;  %v403_v23 = vld [vmem:[%s1817_s26 + $0x678] sm:$0xff] }
  0x1f   : > { %396 = vst [vmem:[%s1825_s27 + $0x98] sm:$0xff] %v395_v19  ;;  %398 = vst [vmem:[%s1825_s27 + $0xa0] sm:$0xff] %v397_v20  ;;  %v405_v24 = vld [vmem:[%s1817_s26 + $0x6c0] sm:$0xff]  ;;  %v407_v25 = vld [vmem:[%s1817_s26 + $0x708] sm:$0xff] }
  0x20   : > { %400 = vst [vmem:[%s1825_s27 + $0xa8] sm:$0xff] %v399_v21  ;;  %402 = vst [vmem:[%s1825_s27 + $0xb0] sm:$0xff] %v401_v22  ;;  %v409_v26 = vld [vmem:[%s1817_s26 + $0x750] sm:$0xff]  ;;  %v411_v27 = vld [vmem:[%s1817_s26 + $0x798] sm:$0xff] }
  0x21   : > { %404 = vst [vmem:[%s1825_s27 + $0xb8] sm:$0xff] %v403_v23  ;;  %406 = vst [vmem:[%s1825_s27 + $0xc0] sm:$0xff] %v405_v24  ;;  %v413_v28 = vld [vmem:[%s1817_s26 + $0x7e0] sm:$0xff]  ;;  %v415_v29 = vld [vmem:[%s1817_s26 + $0x828] sm:$0xff] }
  0x22   : > { %408 = vst [vmem:[%s1825_s27 + $0xc8] sm:$0xff] %v407_v25  ;;  %410 = vst [vmem:[%s1825_s27 + $0xd0] sm:$0xff] %v409_v26  ;;  %v417_v30 = vld [vmem:[%s1817_s26 + $0x870] sm:$0xff]  ;;  %v419_v31 = vld [vmem:[%s1817_s26 + $0x8b8] sm:$0xff] }
  0x23   : > { %412 = vst [vmem:[%s1825_s27 + $0xd8] sm:$0xff] %v411_v27  ;;  %414 = vst [vmem:[%s1825_s27 + $0xe0] sm:$0xff] %v413_v28  ;;  %v421_v32 = vld [vmem:[%s1817_s26 + $0x900] sm:$0xff]  ;;  %v423_v33 = vld [vmem:[%s1817_s26 + $0x948] sm:$0xff] }
  0x24   : > { %416 = vst [vmem:[%s1825_s27 + $0xe8] sm:$0xff] %v415_v29  ;;  %418 = vst [vmem:[%s1825_s27 + $0xf0] sm:$0xff] %v417_v30  ;;  %v425_v34 = vld [vmem:[%s1817_s26 + $0x990] sm:$0xff]  ;;  %v427_v35 = vld [vmem:[%s1817_s26 + $0x9d8] sm:$0xff] }
  0x25   : > { %420 = vst [vmem:[%s1825_s27 + $0xf8] sm:$0xff] %v419_v31  ;;  %422 = vst [vmem:[%s1825_s27 + $0x100] sm:$0xff] %v421_v32  ;;  %v429_v36 = vld [vmem:[%s1817_s26 + $0xa20] sm:$0xff]  ;;  %v431_v37 = vld [vmem:[%s1817_s26 + $0xa68] sm:$0xff] }
  0x26   : > { %424 = vst [vmem:[%s1825_s27 + $0x108] sm:$0xff] %v423_v33  ;;  %426 = vst [vmem:[%s1825_s27 + $0x110] sm:$0xff] %v425_v34  ;;  %v433_v38 = vld [vmem:[%s1817_s26 + $0xab0] sm:$0xff]  ;;  %v435_v39 = vld [vmem:[%s1817_s26 + $0xaf8] sm:$0xff] }
  0x27   : > { %428 = vst [vmem:[%s1825_s27 + $0x118] sm:$0xff] %v427_v35  ;;  %430 = vst [vmem:[%s1825_s27 + $0x120] sm:$0xff] %v429_v36  ;;  %v437_v40 = vld [vmem:[%s1817_s26 + $0xb40] sm:$0xff]  ;;  %v439_v41 = vld [vmem:[%s1817_s26 + $0xb88] sm:$0xff] }
  0x28   : > { %432 = vst [vmem:[%s1825_s27 + $0x128] sm:$0xff] %v431_v37  ;;  %434 = vst [vmem:[%s1825_s27 + $0x130] sm:$0xff] %v433_v38  ;;  %v441_v42 = vld [vmem:[%s1817_s26 + $0xbd0] sm:$0xff]  ;;  %v443_v43 = vld [vmem:[%s1817_s26 + $0xc18] sm:$0xff] }
  0x29   : > { %436 = vst [vmem:[%s1825_s27 + $0x138] sm:$0xff] %v435_v39  ;;  %438 = vst [vmem:[%s1825_s27 + $0x140] sm:$0xff] %v437_v40  ;;  %v445_v44 = vld [vmem:[%s1817_s26 + $0xc60] sm:$0xff]  ;;  %v447_v45 = vld [vmem:[%s1817_s26 + $0xca8] sm:$0xff] }
  0x2a   : > { %440 = vst [vmem:[%s1825_s27 + $0x148] sm:$0xff] %v439_v41  ;;  %442 = vst [vmem:[%s1825_s27 + $0x150] sm:$0xff] %v441_v42  ;;  %v449_v46 = vld [vmem:[%s1817_s26 + $0xcf0] sm:$0xff]  ;;  %v451_v47 = vld [vmem:[%s1817_s26 + $0xd38] sm:$0xff] }
  0x2b   : > { %444 = vst [vmem:[%s1825_s27 + $0x158] sm:$0xff] %v443_v43  ;;  %446 = vst [vmem:[%s1825_s27 + $0x160] sm:$0xff] %v445_v44  ;;  %v453_v48 = vld [vmem:[%s1817_s26 + $0xd80] sm:$0xff]  ;;  %v455_v49 = vld [vmem:[%s1817_s26 + $0xdc8] sm:$0xff] }
  0x2c   : > { %448 = vst [vmem:[%s1825_s27 + $0x168] sm:$0xff] %v447_v45  ;;  %450 = vst [vmem:[%s1825_s27 + $0x170] sm:$0xff] %v449_v46  ;;  %v457_v50 = vld [vmem:[%s1817_s26 + $0xe10] sm:$0xff]  ;;  %v459_v51 = vld [vmem:[%s1817_s26 + $0xe58] sm:$0xff] }
  0x2d   : > { %452 = vst [vmem:[%s1825_s27 + $0x178] sm:$0xff] %v451_v47  ;;  %454 = vst [vmem:[%s1825_s27 + $0x180] sm:$0xff] %v453_v48  ;;  %v461_v52 = vld [vmem:[%s1817_s26 + $0xea0] sm:$0xff]  ;;  %v463_v53 = vld [vmem:[%s1817_s26 + $0xee8] sm:$0xff] }
  0x2e   : > { %456 = vst [vmem:[%s1825_s27 + $0x188] sm:$0xff] %v455_v49  ;;  %458 = vst [vmem:[%s1825_s27 + $0x190] sm:$0xff] %v457_v50  ;;  %v465_v54 = vld [vmem:[%s1817_s26 + $0xf30] sm:$0xff]  ;;  %v467_v55 = vld [vmem:[%s1817_s26 + $0xf78] sm:$0xff] }
  0x2f   : > { %460 = vst [vmem:[%s1825_s27 + $0x198] sm:$0xff] %v459_v51  ;;  %462 = vst [vmem:[%s1825_s27 + $0x1a0] sm:$0xff] %v461_v52  ;;  %v469_v56 = vld [vmem:[%s1817_s26 + $0xfc0] sm:$0xff]  ;;  %v471_v57 = vld [vmem:[%s1817_s26 + $0x1008] sm:$0xff] }
  0x30   : > { %464 = vst [vmem:[%s1825_s27 + $0x1a8] sm:$0xff] %v463_v53  ;;  %466 = vst [vmem:[%s1825_s27 + $0x1b0] sm:$0xff] %v465_v54  ;;  %v473_v58 = vld [vmem:[%s1817_s26 + $0x1050] sm:$0xff]  ;;  %v475_v59 = vld [vmem:[%s1817_s26 + $0x1098] sm:$0xff] }
  0x31   : > { %468 = vst [vmem:[%s1825_s27 + $0x1b8] sm:$0xff] %v467_v55  ;;  %470 = vst [vmem:[%s1825_s27 + $0x1c0] sm:$0xff] %v469_v56  ;;  %v477_v60 = vld [vmem:[%s1817_s26 + $0x10e0] sm:$0xff]  ;;  %v479_v61 = vld [vmem:[%s1817_s26 + $0x1128] sm:$0xff] }
  0x32   : > { %472 = vst [vmem:[%s1825_s27 + $0x1c8] sm:$0xff] %v471_v57  ;;  %474 = vst [vmem:[%s1825_s27 + $0x1d0] sm:$0xff] %v473_v58  ;;  %v481_v62 = vld [vmem:[%s1817_s26 + $0x1170] sm:$0xff]  ;;  %v483_v63 = vld [vmem:[%s1817_s26 + $0x11b8] sm:$0xff] }
  0x33   : > { %476 = vst [vmem:[%s1825_s27 + $0x1d8] sm:$0xff] %v475_v59  ;;  %478 = vst [vmem:[%s1825_s27 + $0x1e0] sm:$0xff] %v477_v60  ;;  %v485_v0 = vld [vmem:[%s1817_s26 + $0x1200] sm:$0xff]  ;;  %v487_v1 = vld [vmem:[%s1817_s26 + $0x1248] sm:$0xff] }
  0x34   : > { %480 = vst [vmem:[%s1825_s27 + $0x1e8] sm:$0xff] %v479_v61  ;;  %482 = vst [vmem:[%s1825_s27 + $0x1f0] sm:$0xff] %v481_v62  ;;  %v489_v2 = vld [vmem:[%s1817_s26 + $0x1290] sm:$0xff]  ;;  %v491_v3 = vld [vmem:[%s1817_s26 + $0x12d8] sm:$0xff] }
  0x35   : > { %484 = vst [vmem:[%s1825_s27 + $0x1f8] sm:$0xff] %v483_v63  ;;  %486 = vst [vmem:[%s1825_s27 + $0x200] sm:$0xff] %v485_v0  ;;  %v493_v4 = vld [vmem:[%s1817_s26 + $0x1320] sm:$0xff]  ;;  %v495_v5 = vld [vmem:[%s1817_s26 + $0x1368] sm:$0xff] }
  0x36   : > { %488 = vst [vmem:[%s1825_s27 + $0x208] sm:$0xff] %v487_v1  ;;  %490 = vst [vmem:[%s1825_s27 + $0x210] sm:$0xff] %v489_v2  ;;  %v497_v6 = vld [vmem:[%s1817_s26 + $0x13b0] sm:$0xff]  ;;  %v499_v7 = vld [vmem:[%s1817_s26 + $0x13f8] sm:$0xff] }
  0x37   : > { %492 = vst [vmem:[%s1825_s27 + $0x218] sm:$0xff] %v491_v3  ;;  %494 = vst [vmem:[%s1825_s27 + $0x220] sm:$0xff] %v493_v4  ;;  %v501_v8 = vld [vmem:[%s1817_s26 + $0x1440] sm:$0xff]  ;;  %v503_v9 = vld [vmem:[%s1817_s26 + $0x1488] sm:$0xff] }
  0x38   : > { %496 = vst [vmem:[%s1825_s27 + $0x228] sm:$0xff] %v495_v5  ;;  %498 = vst [vmem:[%s1825_s27 + $0x230] sm:$0xff] %v497_v6  ;;  %v505_v10 = vld [vmem:[%s1817_s26 + $0x14d0] sm:$0xff]  ;;  %v507_v11 = vld [vmem:[%s1817_s26 + $0x1518] sm:$0xff] }
  0x39   : > { %500 = vst [vmem:[%s1825_s27 + $0x238] sm:$0xff] %v499_v7  ;;  %502 = vst [vmem:[%s1825_s27 + $0x240] sm:$0xff] %v501_v8  ;;  %v509_v12 = vld [vmem:[%s1817_s26 + $0x1560] sm:$0xff]  ;;  %v511_v13 = vld [vmem:[%s1817_s26 + $0x15a8] sm:$0xff] }
  0x3a   : > { %504 = vst [vmem:[%s1825_s27 + $0x248] sm:$0xff] %v503_v9  ;;  %506 = vst [vmem:[%s1825_s27 + $0x250] sm:$0xff] %v505_v10  ;;  %v513_v14 = vld [vmem:[%s1817_s26 + $0x15f0] sm:$0xff]  ;;  %v515_v15 = vld [vmem:[%s1817_s26 + $0x1638] sm:$0xff] }
  0x3b   : > { %508 = vst [vmem:[%s1825_s27 + $0x258] sm:$0xff] %v507_v11  ;;  %510 = vst [vmem:[%s1825_s27 + $0x260] sm:$0xff] %v509_v12  ;;  %v517_v16 = vld [vmem:[%s1817_s26 + $0x1680] sm:$0xff]  ;;  %v519_v17 = vld [vmem:[%s1817_s26 + $0x16c8] sm:$0xff] }
  0x3c   : > { %512 = vst [vmem:[%s1825_s27 + $0x268] sm:$0xff] %v511_v13  ;;  %514 = vst [vmem:[%s1825_s27 + $0x270] sm:$0xff] %v513_v14  ;;  %v521_v18 = vld [vmem:[%s1817_s26 + $0x1710] sm:$0xff]  ;;  %v523_v19 = vld [vmem:[%s1817_s26 + $0x1758] sm:$0xff] }
  0x3d   : > { %516 = vst [vmem:[%s1825_s27 + $0x278] sm:$0xff] %v515_v15  ;;  %518 = vst [vmem:[%s1825_s27 + $0x280] sm:$0xff] %v517_v16  ;;  %v525_v20 = vld [vmem:[%s1817_s26 + $0x17a0] sm:$0xff]  ;;  %v527_v21 = vld [vmem:[%s1817_s26 + $0x17e8] sm:$0xff] }
  0x3e   : > { %520 = vst [vmem:[%s1825_s27 + $0x288] sm:$0xff] %v519_v17  ;;  %522 = vst [vmem:[%s1825_s27 + $0x290] sm:$0xff] %v521_v18  ;;  %v529_v22 = vld [vmem:[%s1817_s26 + $0x1830] sm:$0xff]  ;;  %v531_v23 = vld [vmem:[%s1817_s26 + $0x1878] sm:$0xff] }
  0x3f   : > { %524 = vst [vmem:[%s1825_s27 + $0x298] sm:$0xff] %v523_v19  ;;  %526 = vst [vmem:[%s1825_s27 + $0x2a0] sm:$0xff] %v525_v20  ;;  %v533_v24 = vld [vmem:[%s1817_s26 + $0x18c0] sm:$0xff]  ;;  %v535_v25 = vld [vmem:[%s1817_s26 + $0x1908] sm:$0xff] }
  0x40   : > { %528 = vst [vmem:[%s1825_s27 + $0x2a8] sm:$0xff] %v527_v21  ;;  %530 = vst [vmem:[%s1825_s27 + $0x2b0] sm:$0xff] %v529_v22  ;;  %v537_v26 = vld [vmem:[%s1817_s26 + $0x1950] sm:$0xff]  ;;  %v539_v27 = vld [vmem:[%s1817_s26 + $0x1998] sm:$0xff] }
  0x41   : > { %532 = vst [vmem:[%s1825_s27 + $0x2b8] sm:$0xff] %v531_v23  ;;  %534 = vst [vmem:[%s1825_s27 + $0x2c0] sm:$0xff] %v533_v24  ;;  %v541_v28 = vld [vmem:[%s1817_s26 + $0x19e0] sm:$0xff]  ;;  %v543_v29 = vld [vmem:[%s1817_s26 + $0x1a28] sm:$0xff] }
  0x42   : > { %536 = vst [vmem:[%s1825_s27 + $0x2c8] sm:$0xff] %v535_v25  ;;  %538 = vst [vmem:[%s1825_s27 + $0x2d0] sm:$0xff] %v537_v26  ;;  %v545_v30 = vld [vmem:[%s1817_s26 + $0x1a70] sm:$0xff]  ;;  %v547_v31 = vld [vmem:[%s1817_s26 + $0x1ab8] sm:$0xff] }
  0x43   : > { %540 = vst [vmem:[%s1825_s27 + $0x2d8] sm:$0xff] %v539_v27  ;;  %542 = vst [vmem:[%s1825_s27 + $0x2e0] sm:$0xff] %v541_v28 }
  0x44   : > { %544 = vst [vmem:[%s1825_s27 + $0x2e8] sm:$0xff] %v543_v29  ;;  %546 = vst [vmem:[%s1825_s27 + $0x2f0] sm:$0xff] %v545_v30 }
  0x45   : > { %548 = vst [vmem:[%s1825_s27 + $0x2f8] sm:$0xff] %v547_v31 }
  0x46 PF: > { %p1444_p7 = scmp.ge.s32.totalorder %s1754_s14, 1  ;;  %p561_p8 = scmp.lt.s32.totalorder %s1754_s14, 10 }
  0x48   : > { %p562_p9 = pnand %p1444_p7, %p561_p8 }
  0x49   : > { %s568_s28 = sand.u32 (!%p562_p9), 1, %s1746_s12   ;;  %v604_v32 = vld [vmem:[%s2174_s0 + $0x18] sm:$0xff] (!%p562_p9)  ;;  %v610_v33 = vld [vmem:[%s2174_s0 + $0x48] sm:$0xff] (!%p562_p9)  ;;  %v603_v26 = vld [vmem:[%s2174_s0 + $0x10] sm:$0xff] (!%p562_p9)  ;;  %s1446_s8 = sshll.u32 (!%p562_p9), %s1792_s15, 1 }
  0x4a   : > { %565 = sbr.rel (%p562_p9) target bundleno = 433 (0x1b1), region = 66  ;;  %v616_v34 = vpack.c.bf16 (!%p562_p9), %v610_v33, %v604_v32  ;;  %v602_v35 = vld [vmem:[%s2174_s0 + $0x8] sm:$0xff] (!%p562_p9)  ;;  %v608_v36 = vld [vmem:[%s2174_s0 + $0x38] sm:$0xff] (!%p562_p9)  ;;  %v609_v28 = vld [vmem:[%s2174_s0 + $0x40] sm:$0xff] (!%p562_p9)  ;;  %p596_p10 = scmp.lt.s32.totalorder (!%p562_p9), %s1446_s8, 17 }
  0x4b   : > { %s1563_s6 = smul.u32 (!%p562_p9), 768, %s568_s28  ;;  %v614_v37 = vpack.c.bf16 (!%p562_p9), %v608_v36, %v602_v35  ;;  %v615_v32 = vpack.c.bf16 (!%p562_p9), %v609_v28, %v603_v26  ;;  %v606_v33 = vld [vmem:[%s2174_s0 + $0x28] sm:$0xff] (!%p562_p9)  ;;  %s1445_s14 = sshll.u32 (!%p562_p9), %s568_s28, 5 }
  0x4c   : > { %1282 = vmatprep.mubr.bf16.mxu0 (!%p562_p9), %v616_v34  ;;  %v612_v34 = vld [vmem:[%s2174_s0 + $0x58] sm:$0xff] (!%p562_p9)  ;;  %s593_s17 = scalar_lea.vmem (!%p562_p9), [#allocation3], %s1445_s14 }
  0x4d   : > { %s2030_s11 = scalar_lea.vmem (!%p562_p9), [#allocation2], %s1563_s6  ;;  %1239 = vmatprep.mubr.bf16.mxu1 (!%p562_p9), %v614_v37 }
  0x4e   : > { %v1588_v38 = vld [vmem:[%s2030_s11 + $0x104] ss:$8 sps:$4 sm:$0xff] (!%p562_p9)   ;;  %v1590_v39 = vld [vmem:[%s2030_s11 + $0x100] ss:$8 sps:$4 sm:$0xff] (!%p562_p9)   ;;  %v1591_v40 = vld [vmem:[%s2030_s11 + $0x114] ss:$8 sps:$4 sm:$0xff] (!%p562_p9)  }
  0x4f   : > { %1250 = vmatprep.subr.bf16.mxu0 (!%p562_p9), %v1588_v38  ;;  %v1593_v41 = vld [vmem:[%s2030_s11 + $0x110] ss:$8 sps:$4 sm:$0xff] (!%p562_p9)   ;;  %v1594_v42 = vld [vmem:[%s2030_s11 + $0x124] ss:$8 sps:$4 sm:$0xff] (!%p562_p9)   ;;  %v1596_v43 = vld [vmem:[%s2030_s11 + $0x120] ss:$8 sps:$4 sm:$0xff] (!%p562_p9)  }
  0x50   : > { %1251 = vmatpush1.bf16.msra.mxu0 (!%p562_p9), %v1590_v39  ;;  %v1597_v44 = vld [vmem:[%s2030_s11 + $0x134] ss:$8 sps:$4 sm:$0xff] (!%p562_p9)   ;;  %v1599_v45 = vld [vmem:[%s2030_s11 + $0x130] ss:$8 sps:$4 sm:$0xff] (!%p562_p9)   ;;  %v1600_v46 = vld [vmem:[%s2030_s11 + $0x144] ss:$8 sps:$4 sm:$0xff] (!%p562_p9)   ;;  %v618_v39 = vpack.c.bf16 (!%p562_p9), %v612_v34, %v606_v33 }
  0x51   : > { %1252 = vmatprep.subr.bf16.mxu0 %v1591_v40  ;;  %v1602_v47 = vld [vmem:[%s2030_s11 + $0x140] ss:$8 sps:$4 sm:$0xff]   ;;  %v1603_v48 = vld [vmem:[%s2030_s11 + $0x154] ss:$8 sps:$4 sm:$0xff]   ;;  %v1605_v49 = vld [vmem:[%s2030_s11 + $0x150] ss:$8 sps:$4 sm:$0xff]  }
  0x52   : > { %v1606_v50 = vld [vmem:[%s2030_s11 + $0x164] ss:$8 sps:$4 sm:$0xff]   ;;  %v1635_v52 = vld [vmem:[%s2030_s11] ss:$8 sps:$4 sm:$0xff]   ;;  %v1639_v54 = vld [vmem:[%s2030_s11 + $0x14] ss:$8 sps:$4 sm:$0xff]  }
  0x53   : > { %v1633_v51 = vld [vmem:[%s2030_s11 + $0x4] ss:$8 sps:$4 sm:$0xff]   ;;  %v1608_v53 = vld [vmem:[%s2030_s11 + $0x160] ss:$8 sps:$4 sm:$0xff]   ;;  %v1641_v55 = vld [vmem:[%s2030_s11 + $0x10] ss:$8 sps:$4 sm:$0xff]  }
  0x54   : > { %1253 = vmatpush1.bf16.msra.mxu0 %v1593_v41  ;;  %1207 = vmatprep.subr.bf16.mxu1 %v1633_v51  ;;  %v1609_v56 = vld [vmem:[%s2030_s11 + $0x174] ss:$8 sps:$4 sm:$0xff]   ;;  %v1611_v57 = vld [vmem:[%s2030_s11 + $0x170] ss:$8 sps:$4 sm:$0xff]   ;;  %v1645_v58 = vld [vmem:[%s2030_s11 + $0x24] ss:$8 sps:$4 sm:$0xff]  }
  0x55   : > { %1254 = vmatprep.subr.bf16.mxu0 %v1594_v42  ;;  %1208 = vmatpush1.bf16.msra.mxu1 %v1635_v52  ;;  %v1612_v59 = vld [vmem:[%s2030_s11 + $0x184] ss:$8 sps:$4 sm:$0xff]   ;;  %v1647_v60 = vld [vmem:[%s2030_s11 + $0x20] ss:$8 sps:$4 sm:$0xff]   ;;  %v1651_v61 = vld [vmem:[%s2030_s11 + $0x34] ss:$8 sps:$4 sm:$0xff]  }
  0x56   : > { %1209 = vmatprep.subr.bf16.mxu1 %v1639_v54  ;;  %v1614_v62 = vld [vmem:[%s2030_s11 + $0x180] ss:$8 sps:$4 sm:$0xff]   ;;  %v1615_v63 = vld [vmem:[%s2030_s11 + $0x194] ss:$8 sps:$4 sm:$0xff]   ;;  %v1653_v0 = vld [vmem:[%s2030_s11 + $0x30] ss:$8 sps:$4 sm:$0xff]  }
  0x57   : > { %v1657_v1 = vld [vmem:[%s2030_s11 + $0x44] ss:$8 sps:$4 sm:$0xff]   ;;  %v1617_v2 = vld [vmem:[%s2030_s11 + $0x190] ss:$8 sps:$4 sm:$0xff]   ;;  %v1659_v4 = vld [vmem:[%s2030_s11 + $0x40] ss:$8 sps:$4 sm:$0xff]  }
  0x58   : > { %1255 = vmatpush1.bf16.msra.mxu0 %v1596_v43  ;;  %v1618_v3 = vld [vmem:[%s2030_s11 + $0x1a4] ss:$8 sps:$4 sm:$0xff]   ;;  %v1663_v5 = vld [vmem:[%s2030_s11 + $0x54] ss:$8 sps:$4 sm:$0xff]   ;;  %v1620_v6 = vld [vmem:[%s2030_s11 + $0x1a0] ss:$8 sps:$4 sm:$0xff]  }
  0x59   : > { %1256 = vmatprep.subr.bf16.mxu0 %v1597_v44  ;;  %1210 = vmatpush1.bf16.msra.mxu1 %v1641_v55  ;;  %v1621_v7 = vld [vmem:[%s2030_s11 + $0x1b4] ss:$8 sps:$4 sm:$0xff]   ;;  %v1665_v8 = vld [vmem:[%s2030_s11 + $0x50] ss:$8 sps:$4 sm:$0xff]   ;;  %v1669_v9 = vld [vmem:[%s2030_s11 + $0x64] ss:$8 sps:$4 sm:$0xff]  }
  0x5a   : > { %1211 = vmatprep.subr.bf16.mxu1 %v1645_v58  ;;  %v1623_v10 = vld [vmem:[%s2030_s11 + $0x1b0] ss:$8 sps:$4 sm:$0xff]   ;;  %v1624_v11 = vld [vmem:[%s2030_s11 + $0x1c4] ss:$8 sps:$4 sm:$0xff]   ;;  %v1671_v12 = vld [vmem:[%s2030_s11 + $0x60] ss:$8 sps:$4 sm:$0xff]  }
  0x5b   : > { %v1675_v13 = vld [vmem:[%s2030_s11 + $0x74] ss:$8 sps:$4 sm:$0xff]   ;;  %v1626_v14 = vld [vmem:[%s2030_s11 + $0x1c0] ss:$8 sps:$4 sm:$0xff]   ;;  %v1677_v16 = vld [vmem:[%s2030_s11 + $0x70] ss:$8 sps:$4 sm:$0xff]  }
  0x5c   : > { %1257 = vmatpush1.bf16.msra.mxu0 %v1599_v45  ;;  %v1627_v15 = vld [vmem:[%s2030_s11 + $0x1d4] ss:$8 sps:$4 sm:$0xff]   ;;  %v1681_v17 = vld [vmem:[%s2030_s11 + $0x84] ss:$8 sps:$4 sm:$0xff]   ;;  %v1629_v18 = vld [vmem:[%s2030_s11 + $0x1d0] ss:$8 sps:$4 sm:$0xff]  }
  0x5d   : > { %1258 = vmatprep.subr.bf16.mxu0 %v1600_v46  ;;  %1212 = vmatpush1.bf16.msra.mxu1 %v1647_v60  ;;  %v1630_v19 = vld [vmem:[%s2030_s11 + $0x1e4] ss:$8 sps:$4 sm:$0xff]   ;;  %v1683_v20 = vld [vmem:[%s2030_s11 + $0x80] ss:$8 sps:$4 sm:$0xff]   ;;  %v1687_v21 = vld [vmem:[%s2030_s11 + $0x94] ss:$8 sps:$4 sm:$0xff]  }
  0x5e   : > { %1213 = vmatprep.subr.bf16.mxu1 %v1651_v61  ;;  %v1632_v22 = vld [vmem:[%s2030_s11 + $0x1e0] ss:$8 sps:$4 sm:$0xff]   ;;  %v1636_v23 = vld [vmem:[%s2030_s11 + $0x1f4] ss:$8 sps:$4 sm:$0xff]   ;;  %v1689_v24 = vld [vmem:[%s2030_s11 + $0x90] ss:$8 sps:$4 sm:$0xff]  }
  0x5f   : > { %v1693_v25 = vld [vmem:[%s2030_s11 + $0xa4] ss:$8 sps:$4 sm:$0xff]   ;;  %v1638_v27 = vld [vmem:[%s2030_s11 + $0x1f0] ss:$8 sps:$4 sm:$0xff]   ;;  %v1695_v30 = vld [vmem:[%s2030_s11 + $0xa0] ss:$8 sps:$4 sm:$0xff]  }
  0x60   : > { %1259 = vmatpush1.bf16.msra.mxu0 %v1602_v47  ;;  %v1644_v29 = vld [vmem:[%s2030_s11 + $0x204] ss:$8 sps:$4 sm:$0xff]   ;;  %v1699_v31 = vld [vmem:[%s2030_s11 + $0xb4] ss:$8 sps:$4 sm:$0xff]   ;;  %v1642_v35 = vld [vmem:[%s2030_s11 + $0x200] ss:$8 sps:$4 sm:$0xff]  }
  0x61   : > { %1260 = vmatprep.subr.bf16.mxu0 %v1603_v48  ;;  %1214 = vmatpush1.bf16.msra.mxu1 %v1653_v0  ;;  %v1701_v36 = vld [vmem:[%s2030_s11 + $0xb0] ss:$8 sps:$4 sm:$0xff]   ;;  %v1650_v37 = vld [vmem:[%s2030_s11 + $0x214] ss:$8 sps:$4 sm:$0xff]   ;;  %v1705_v38 = vld [vmem:[%s2030_s11 + $0xc4] ss:$8 sps:$4 sm:$0xff]  }
  0x62   : > { %1215 = vmatprep.subr.bf16.mxu1 %v1657_v1  ;;  %v1648_v40 = vld [vmem:[%s2030_s11 + $0x210] ss:$8 sps:$4 sm:$0xff]   ;;  %v1707_v41 = vld [vmem:[%s2030_s11 + $0xc0] ss:$8 sps:$4 sm:$0xff]   ;;  %v1656_v42 = vld [vmem:[%s2030_s11 + $0x224] ss:$8 sps:$4 sm:$0xff]  }
  0x63   : > { %v1711_v43 = vld [vmem:[%s2030_s11 + $0xd4] ss:$8 sps:$4 sm:$0xff]   ;;  %v1654_v44 = vld [vmem:[%s2030_s11 + $0x220] ss:$8 sps:$4 sm:$0xff]   ;;  %v1713_v45 = vld [vmem:[%s2030_s11 + $0xd0] ss:$8 sps:$4 sm:$0xff]  }
  0x64   : > { %1261 = vmatpush1.bf16.msra.mxu0 %v1605_v49  ;;  %v1662_v46 = vld [vmem:[%s2030_s11 + $0x234] ss:$8 sps:$4 sm:$0xff]   ;;  %v1717_v47 = vld [vmem:[%s2030_s11 + $0xe4] ss:$8 sps:$4 sm:$0xff]   ;;  %v1660_v48 = vld [vmem:[%s2030_s11 + $0x230] ss:$8 sps:$4 sm:$0xff]  }
  0x65   : > { %1262 = vmatprep.subr.bf16.mxu0 %v1606_v50  ;;  %1216 = vmatpush1.bf16.msra.mxu1 %v1659_v4  ;;  %v1719_v49 = vld [vmem:[%s2030_s11 + $0xe0] ss:$8 sps:$4 sm:$0xff]   ;;  %v1668_v50 = vld [vmem:[%s2030_s11 + $0x244] ss:$8 sps:$4 sm:$0xff]   ;;  %v1723_v51 = vld [vmem:[%s2030_s11 + $0xf4] ss:$8 sps:$4 sm:$0xff]  }
  0x66   : > { %1217 = vmatprep.subr.bf16.mxu1 %v1663_v5  ;;  %v601_v52 = vld [vmem:[%s2174_s0] sm:$0xff]  ;;  %v1725_v54 = vld [vmem:[%s2030_s11 + $0xf0] ss:$8 sps:$4 sm:$0xff]   ;;  %v1686_v61 = vld [vmem:[%s2030_s11 + $0x274] ss:$8 sps:$4 sm:$0xff]   ;;  %s2183_s8 = smov (!%p596_p10, %s1446_s8), 17 }
  0x67   : > { %v607_v55 = vld [vmem:[%s2174_s0 + $0x30] sm:$0xff]  ;;  %v1678_v60 = vld [vmem:[%s2030_s11 + $0x260] ss:$8 sps:$4 sm:$0xff]   ;;  %s1549_s12 = sshll.u32 (%p1807_p5), %s1792_s15, 4 }
  0x68   : > { %1263 = vmatpush1.bf16.msra.mxu0 %v1608_v53  ;;  %v1666_v53 = vld [vmem:[%s2030_s11 + $0x240] ss:$8 sps:$4 sm:$0xff]   ;;  %v1672_v58 = vld [vmem:[%s2030_s11 + $0x250] ss:$8 sps:$4 sm:$0xff]   ;;  %v1698_v1 = vld [vmem:[%s2030_s11 + $0x294] ss:$8 sps:$4 sm:$0xff]   ;;  %s1349_s21 = scalar_lea.vmem (%p1807_p5), %s2177_s3, %s1549_s12 }
  0x69   : > { %1264 = vmatprep.subr.bf16.mxu0 %v1609_v56  ;;  %1218 = vmatpush1.bf16.msra.mxu1 %v1665_v8  ;;  %v1674_v56 = vld [vmem:[%s2030_s11 + $0x254] ss:$8 sps:$4 sm:$0xff]   ;;  %v1690_v0 = vld [vmem:[%s2030_s11 + $0x280] ss:$8 sps:$4 sm:$0xff]  }
  0x6a   : > { %1219 = vmatprep.subr.bf16.mxu1 %v1669_v9  ;;  %v1702_v4 = vld [vmem:[%s2030_s11 + $0x2a0] ss:$8 sps:$4 sm:$0xff]   ;;  %v1710_v5 = vld [vmem:[%s2030_s11 + $0x2b4] ss:$8 sps:$4 sm:$0xff]  }
  0x6b   : > { %v1714_v8 = vld [vmem:[%s2030_s11 + $0x2c0] ss:$8 sps:$4 sm:$0xff]   ;;  %v1722_v9 = vld [vmem:[%s2030_s11 + $0x2d4] ss:$8 sps:$4 sm:$0xff]  }
  0x6c   : > { %1265 = vmatpush1.bf16.msra.mxu0 %v1611_v57  ;;  %v613_v57 = vpack.c.bf16 %v607_v55, %v601_v52 }
  0x6d   : > { %1266 = vmatprep.subr.bf16.mxu0 %v1612_v59  ;;  %1220 = vmatpush1.bf16.msra.mxu1 %v1671_v12  ;;  %v1680_v59 = vld [vmem:[%s2030_s11 + $0x264] ss:$8 sps:$4 sm:$0xff]   ;;  %v1726_v12 = vld [vmem:[%s2030_s11 + $0x2e0] ss:$8 sps:$4 sm:$0xff]  }
  0x6e   : > { %1221 = vmatprep.subr.bf16.mxu1 %v1675_v13  ;;  %v1731_v13 = vld [vmem:[%s2030_s11 + $0x2f4] ss:$8 sps:$4 sm:$0xff]  }
  0x70   : > { %1267 = vmatpush1.bf16.msra.mxu0 %v1614_v62  ;;  %v1684_v62 = vld [vmem:[%s2030_s11 + $0x270] ss:$8 sps:$4 sm:$0xff]  }
  0x71   : > { %1268 = vmatprep.subr.bf16.mxu0 %v1615_v63  ;;  %1222 = vmatpush1.bf16.msra.mxu1 %v1677_v16  ;;  %v1692_v63 = vld [vmem:[%s2030_s11 + $0x284] ss:$8 sps:$4 sm:$0xff]   ;;  %v611_v16 = vld [vmem:[%s2174_s0 + $0x50] sm:$0xff] }
  0x72   : > { %1223 = vmatprep.subr.bf16.mxu1 %v1681_v17 }
  0x74   : > { %1269 = vmatpush1.bf16.msra.mxu0 %v1617_v2  ;;  %v1696_v2 = vld [vmem:[%s2030_s11 + $0x290] ss:$8 sps:$4 sm:$0xff]  }
  0x75   : > { %1270 = vmatprep.subr.bf16.mxu0 %v1618_v3  ;;  %1224 = vmatpush1.bf16.msra.mxu1 %v1683_v20  ;;  %v1704_v3 = vld [vmem:[%s2030_s11 + $0x2a4] ss:$8 sps:$4 sm:$0xff]  }
  0x76   : > { %1225 = vmatprep.subr.bf16.mxu1 %v1687_v21 }
  0x78   : > { %1271 = vmatpush1.bf16.msra.mxu0 %v1620_v6  ;;  %v1708_v6 = vld [vmem:[%s2030_s11 + $0x2b0] ss:$8 sps:$4 sm:$0xff]  }
  0x79   : > { %1272 = vmatprep.subr.bf16.mxu0 %v1621_v7  ;;  %1226 = vmatpush1.bf16.msra.mxu1 %v1689_v24  ;;  %v1716_v7 = vld [vmem:[%s2030_s11 + $0x2c4] ss:$8 sps:$4 sm:$0xff]  }
  0x7a   : > { %1227 = vmatprep.subr.bf16.mxu1 %v1693_v25 }
  0x7c   : > { %1273 = vmatpush1.bf16.msra.mxu0 %v1623_v10  ;;  %v1720_v10 = vld [vmem:[%s2030_s11 + $0x2d0] ss:$8 sps:$4 sm:$0xff]  }
  0x7d   : > { %1274 = vmatprep.subr.bf16.mxu0 %v1624_v11  ;;  %1228 = vmatpush1.bf16.msra.mxu1 %v1695_v30  ;;  %v1728_v11 = vld [vmem:[%s2030_s11 + $0x2e4] ss:$8 sps:$4 sm:$0xff]  }
  0x7e   : > { %1229 = vmatprep.subr.bf16.mxu1 %v1699_v31 }
  0x80   : > { %1275 = vmatpush1.bf16.msra.mxu0 %v1626_v14  ;;  %v1729_v14 = vld [vmem:[%s2030_s11 + $0x2f0] ss:$8 sps:$4 sm:$0xff]   ;;  %s598_s11 = scalar_lea.vmem %s2176_s2, %s2183_s8 }
  0x81   : > { %1276 = vmatprep.subr.bf16.mxu0 %v1627_v15  ;;  %1230 = vmatpush1.bf16.msra.mxu1 %v1701_v36  ;;  %v605_v15 = vld [vmem:[%s2174_s0 + $0x20] sm:$0xff] }
  0x82   : > { %1231 = vmatprep.subr.bf16.mxu1 %v1705_v38  ;;  %v617_v17 = vpack.c.bf16 %v611_v16, %v605_v15  ;;  %v715_v25 = vld [vmem:[%s598_s11] sm:$0x3] }
  0x84   : > { %1277 = vmatpush1.bf16.msra.mxu0 %v1629_v18 }
  0x85   : > { %1278 = vmatprep.subr.bf16.mxu0 %v1630_v19  ;;  %1232 = vmatpush1.bf16.msra.mxu1 %v1707_v41 }
  0x86   : > { %1233 = vmatprep.subr.bf16.mxu1 %v1711_v43 }
  0x88   : > { %1279 = vmatpush1.bf16.msra.mxu0 %v1632_v22  ;;  %v717_v22 = vlaneseq }
  0x89   : > { %1280 = vmatprep.subr.bf16.mxu0 %v1636_v23  ;;  %1234 = vmatpush1.bf16.msra.mxu1 %v1713_v45 }
  0x8a   : > { %1235 = vmatprep.subr.bf16.mxu1 %v1717_v47  ;;  %v718_v23 = vshrl.u32 %v717_v22, 7 }
  0x8c   : > { %1281 = vmatpush1.bf16.msra.mxu0 %v1638_v27  ;;  %v719_v24 = vsub.s32 0, %v718_v23  ;;  %v723_v26 = vsub.s32 1, %v718_v23 }
  0x8d   : > { %1293 = vmatprep.subr.bf16.mxu0 %v1644_v29  ;;  %1236 = vmatpush1.bf16.msra.mxu1 %v1719_v49 }
  0x8e   : > { %1237 = vmatprep.subr.bf16.mxu1 %v1723_v51  ;;  %v720_v27 = vrot.slane %v715_v25, %v719_v24  ;;  %v724_v28 = vrot.slane %v715_v25, %v723_v26 }
  0x8f   : > { %1283 = vmatmul.mubr.bf16.vlgmr.msra.gmra.mrb[0].mxu0 %v615_v32 }
  0x90   : > { %1294 = vmatpush1.bf16.msra.mxu0 %v1642_v35  ;;  %1325 = vmatprep.mubr.bf16.mxu0 %v618_v39 }
  0x91   : > { %1295 = vmatprep.subr.bf16.mxu0 %v1650_v37  ;;  %1238 = vmatpush1.bf16.msra.mxu1 %v1725_v54 }
  0x94   : > { %1296 = vmatpush1.bf16.msra.mxu0 %v1648_v40  ;;  %1240 = vmatmul.mubr.bf16.vlgmr.msra.gmra.mrb[0].mxu1 %v613_v57 }
  0x95   : > { %1297 = vmatprep.subr.bf16.mxu0 %v1656_v42 }
  0x98   : > { %1298 = vmatpush1.bf16.msra.mxu0 %v1654_v44 }
  0x99   : > { %1299 = vmatprep.subr.bf16.mxu0 %v1662_v46 }
  0x9c   : > { %1300 = vmatpush1.bf16.msra.mxu0 %v1660_v48 }
  0x9d   : > { %1301 = vmatprep.subr.bf16.mxu0 %v1668_v50 }
  0xa0   : > { %1302 = vmatpush1.bf16.msra.mxu0 %v1666_v53 }
  0xa1   : > { %1303 = vmatprep.subr.bf16.mxu0 %v1674_v56 }
  0xa4   : > { %1304 = vmatpush1.bf16.msra.mxu0 %v1672_v58 }
  0xa5   : > { %1305 = vmatprep.subr.bf16.mxu0 %v1680_v59 }
  0xa8   : > { %1306 = vmatpush1.bf16.msra.mxu0 %v1678_v60 }
  0xa9   : > { %1307 = vmatprep.subr.bf16.mxu0 %v1686_v61 }
  0xac   : > { %1308 = vmatpush1.bf16.msra.mxu0 %v1684_v62 }
  0xad   : > { %1309 = vmatprep.subr.bf16.mxu0 %v1692_v63 }
  0xb0   : > { %1310 = vmatpush1.bf16.msra.mxu0 %v1690_v0 }
  0xb1   : > { %1311 = vmatprep.subr.bf16.mxu0 %v1698_v1 }
  0xb4   : > { %1312 = vmatpush1.bf16.msra.mxu0 %v1696_v2 }
  0xb5   : > { %1313 = vmatprep.subr.bf16.mxu0 %v1704_v3 }
  0xb8   : > { %1314 = vmatpush1.bf16.msra.mxu0 %v1702_v4 }
  0xb9   : > { %1315 = vmatprep.subr.bf16.mxu0 %v1710_v5 }
  0xbc   : > { %1316 = vmatpush1.bf16.msra.mxu0 %v1708_v6 }
  0xbd   : > { %1317 = vmatprep.subr.bf16.mxu0 %v1716_v7 }
  0xc0   : > { %1318 = vmatpush1.bf16.msra.mxu0 %v1714_v8 }
  0xc1   : > { %1319 = vmatprep.subr.bf16.mxu0 %v1722_v9 }
  0xc4   : > { %1320 = vmatpush1.bf16.msra.mxu0 %v1720_v10 }
  0xc5   : > { %1321 = vmatprep.subr.bf16.mxu0 %v1728_v11 }
  0xc8   : > { %1322 = vmatpush1.bf16.msra.mxu0 %v1726_v12 }
  0xc9   : > { %1323 = vmatprep.subr.bf16.mxu0 %v1731_v13 }
  0xcc   : > { %1324 = vmatpush1.bf16.msra.mxu0 %v1729_v14 }
  0xcf   : > { %1326 = vmatmul.mubr.bf16.vlgmr.msra.gmra.mrb[0].mxu0 %v617_v17 }
 0x167   : > { %v1241_v18 = vpop.f32.mrb[0].mxu1 }
 0x168   : > { %v1243_v19 = vpop.f32.mrb[1].mxu1  ;;  %v1242_v29 = vadd.f32 %v1241_v18, %v720_v27 }
 0x169   : > { %v1245_v20 = vpop.f32.mrb[2].mxu1  ;;  %v1244_v30 = vadd.f32 %v1243_v19, %v724_v28 }
 0x16a   : > { %v1247_v21 = vpop.f32.mrb[3].mxu1  ;;  %v1246_v32 = vadd.f32 %v1245_v20, %v720_v27 }
 0x16b   : > { %v1248_v35 = vadd.f32 %v1247_v21, %v724_v28 }
 0x1a2   : > { %v1327_v31 = vpop.f32.mrb[0].mxu0  ;;  %1346 = sbr.rel (!%p1807_p5) target bundleno = 433 (0x1b1), region = 74 }
 0x1a3   : > { %v1551_v33 = vadd.f32 %v1327_v31, %v1242_v29  ;;  %v1329_v34 = vpop.f32.mrb[1].mxu0 }
 0x1a4   : > { %v1553_v36 = vadd.f32 %v1329_v34, %v1244_v30  ;;  %v1331_v37 = vpop.f32.mrb[2].mxu0 }
 0x1a5   : > { %1336 = vst [vmem:[%s593_s17] sm:$0xff] %v1551_v33  ;;  %v1555_v38 = vadd.f32 %v1331_v37, %v1246_v32  ;;  %v1333_v39 = vpop.f32.mrb[3].mxu0 }
 0x1a6   : > { %1337 = vst [vmem:[%s593_s17 + $0x8] sm:$0xff] %v1553_v36  ;;  %v1557_v40 = vadd.f32 %v1333_v39, %v1248_v35 }
 0x1a7   : > { %1338 = vst [vmem:[%s593_s17 + $0x10] sm:$0xff] %v1555_v38 }
 0x1a8   : > { %1339 = vst [vmem:[%s593_s17 + $0x18] sm:$0xff] %v1557_v40 }
 0x1ac   : > { %v1362_v41 = vld [vmem:[%s593_s17] sm:$0xff] }
 0x1ad   : > { %v1364_v42 = vld [vmem:[%s593_s17 + $0x8] sm:$0xff]  ;;  %1363 = vst [vmem:[%s1349_s21] sm:$0xff] %v1362_v41 }
 0x1ae   : > { %v1366_v43 = vld [vmem:[%s593_s17 + $0x10] sm:$0xff]  ;;  %1365 = vst [vmem:[%s1349_s21 + $0x8] sm:$0xff] %v1364_v42 }
 0x1af   : > { %v1368_v44 = vld [vmem:[%s593_s17 + $0x18] sm:$0xff]  ;;  %1367 = vst [vmem:[%s1349_s21 + $0x90] sm:$0xff] %v1366_v43 }
 0x1b0   : > { %1369 = vst [vmem:[%s1349_s21 + $0x98] sm:$0xff] %v1368_v44 }
 0x1b1 PF: > { %p10_p11 = scmp.ge.s32.totalorder %s1795_s16, 11   ;;  %s2179_s12 = smov %s1750_s13 }
 0x1b2   : > { %s2180_s13 = smov %s1805_s19  ;;  %s2181_s14 = smov %s1795_s16 }
 0x1b3   :  { %12 = sbr.rel (!%p10_p11) target bundleno = 2 (0x2), region = 131 }

// kernel: model_forward.10
= control target key start
LH: loop header
LB: loop body
LE: loop exit
PB: predicated region body
PF: predicated region fallthrough
CT: control target
= control target key end

     0   :  { %s5739_s24 = smov 0   ;;  %s6964_s0 = inlined_call_operand.vmem [shape: f32[2,8,2304], index: 0, kind: input, shape index: {}]   ;;  %s6965_s1 = inlined_call_operand.vmem [shape: f32[2,1,8], index: 1, kind: input, shape index: {}]   ;;  %s6966_s2 = inlined_call_operand.vmem [shape: f32[2,8,768], index: 2, kind: input, shape index: {}]   ;;  %s6967_s3 = inlined_call_operand.vmem [shape: bf16[768,768], index: 3, kind: input, shape index: {}]   ;;  %s6968_s4 = inlined_call_operand.vmem [shape: f32[1,768], index: 4, kind: input, shape index: {}, may-alias: {4,6}]   ;;  %s6969_s5 = inlined_call_operand.vmem [shape: f32[1,768], index: 5, kind: input, shape index: {}]   ;;  %s6970_s6 = inlined_call_operand.vmem [shape: f32[1,768], index: 6, kind: input, shape index: {}, may-alias: {4,6}]   ;;  %s6971_s7 = inlined_call_operand.vmem [shape: f32[2,8,768], index: 7, kind: output, shape index: {}]  }
   0x1 LB: > { %s4676_s25 = sadd.s32 4294967295, %s5694_s24   ;;  %p4680_p0 = scmp.ge.s32.totalorder %s5694_s24, 1  ;;  %s5694_s24 = sphi %s5739_s24, %s17_s24  }
   0x2   : > { %p255_p1 = scmp.lt.s32.totalorder %s5694_s24, 3 }
   0x4   : > { %p256_p2 = pnand %p4680_p0, %p255_p1 }
   0x5   : > { %p295_p3 = scmp.lt.s32.totalorder (!%p256_p2), %s4676_s25, 1  ;;  %v5696_v0 = vmov (!%p256_p2), 0.0   ;;  %vm5697_vm0 = vmmov (!%p256_p2), 0   ;;  %vm341_vm1 = vcmask (!%p256_p2), 523264   ;;  %v336_v4 = vlaneseq (!%p256_p2)  ;;  %s5698_s10 = smov (!%p256_p2), 64  }
   0x6   : > { %259 = sbr.rel (%p256_p2) target bundleno = 5368 (0x14f8), region = 48  ;;  %5058 = vmatprep.subr.mxu0 (!%p256_p2), %v5696_v0  ;;  %5060 = vmatprep.mubr.msk.f32.mxu0 (!%p256_p2), %vm5697_vm0, %v5696_v0  ;;  %vm418_vm2 = vcmask (!%p256_p2), 64512  }
   0x7   : > { %5138 = vmatprep.subr.mxu1 (!%p256_p2), %v5696_v0  ;;  %5140 = vmatprep.mubr.msk.f32.mxu1 (!%p256_p2), %vm5697_vm0, %v5696_v0  ;;  %v5772_v7 = vshrl.u32 (!%p256_p2), %v336_v4, 7 }
   0x9   : > { %v5775_v9 = vsub.s32 (!%p256_p2), 0, %v5772_v7 }
   0xd   : > { %s6973_s25 = smov (!%p295_p3, %s4676_s25), 1 }
   0xe   : > { %s5178_s26 = smul.u32 144, %s6973_s25  ;;  %s302_s9 = scalar_lea.vmem %s6965_s1, %s6973_s25 }
   0xf   : > { %v331_v5 = vld [vmem:[%s302_s9] sm:$0x1] }
  0x10   : > { %s5759_s29 = scalar_lea.vmem %s6964_s0, %s5178_s26  ;;  %v332_v6 = vsub.f32 1.0, %v331_v5 }
  0x11   : > { %v319_v1 = vld [vmem:[%s5759_s29 + $0x30] sm:$0xff]  ;;  %v313_v2 = vld [vmem:[%s5759_s29] sm:$0xff]  ;;  %v314_v40 = vld [vmem:[%s5759_s29 + $0x8] sm:$0xff] }
  0x12   : > { %5059 = vmatpush3.xpose.msk.msra.mxu0 %vm341_vm1, %v319_v1  ;;  %v334_v3 = vmul.f32 0.125, %v313_v2  ;;  %v333_v8 = vmul.f32 -10000.0, %v332_v6  ;;  %505 = vrot.lane.b32.xlu1 %v319_v1, %s5698_s10  ;;  %v325_v20 = vld [vmem:[%s5759_s29 + $0x60] sm:$0xff]  ;;  %v320_v42 = vld [vmem:[%s5759_s29 + $0x38] sm:$0xff]  ;;  %v669_v43 = vmul.f32 0.125, %v314_v40  ;;  %v326_v55 = vld [vmem:[%s5759_s29 + $0x68] sm:$0xff] }
  0x13   : > { %5063 = vmatprep.subr.mxu0 %v5696_v0 }
  0x14   : > { %v5778_v10 = vrot.slane %v333_v8, %v5775_v9 }
  0x15   : > { %5061 = vmatmul.mubr.msk.f32.vlgmr.msra.gmra.mrb[0].mxu0 %vm341_vm1, %v334_v3 }
  0x16   : > { %5065 = vmatprep.mubr.msk.f32.mxu0 %vm5697_vm0, %v5696_v0  ;;  %503 = vrot.lane.b32.xlu1 %v334_v3, %s5698_s10 }
  0x17   : > { %5064 = vmatpush3.msra.mxu0 %v325_v20 }
  0x18   : > { %5068 = vmatprep.subr.mxu0 %v5696_v0 }
  0x84   : > { %v506_v22 = vpop.permute.xlu1 %505 }
  0x88   : > { %v504_v25 = vpop.permute.xlu1 %503 }
  0xe8   : > { %v414_v11 = vpop.f32.mrb[0].mxu0 }
  0xe9   : > { %v415_v12 = vadd.f32 %v414_v11, %v5778_v10  ;;  %v5062_v13 = vpop.f32.mrb[1].mxu0 }
  0xeb   : > { %v419_v14 = vsel %vm418_vm2, %v415_v12, -inf }
  0xec   : > { %420 = vmax.xlane.f32.xlu0 %v419_v14 }
 0x179   : > { %v421_v15 = vpop.xlane.xlu0 %420 }
 0x17a   : > { %v422_v16 = vsub.f32 %v415_v12, %v421_v15  ;;  %v315_v15 = vld [vmem:[%s5759_s29 + $0x10] sm:$0xff] }
 0x17c   : > { %v423_v17 = vmul.f32 1.442695, %v422_v16 }
 0x17e   : > { %5638 = vpow2.f32 %v423_v17  ;;  %v321_v17 = vld [vmem:[%s5759_s29 + $0x40] sm:$0xff] }
 0x188   : > { %v5639_v18 = vpop.eup %5638 }
 0x189   : > { %v425_v19 = vsel %vm418_vm2, %v5639_v18, 0.0 }
 0x18a   : > { %426 = vadd.xlane.f32.xlu0 %v425_v19 }
 0x217   : > { %v427_v21 = vpop.xlane.xlu0 %426 }
 0x218   : > { %5640 = vrcp.f32 %v427_v21 }
 0x222   : > { %v5641_v23 = vpop.eup %5640 }
 0x223   : > { %v429_v24 = vmul.f32 %v5641_v23, %v5639_v18  ;;  %v996_v18 = vmul.f32 0.125, %v315_v15 }
 0x225   : > { %5066 = vmatmul.mubr.msk.f32.vlgmr.msra.gmra.mrb[2].mxu0 %vm418_vm2, %v429_v24 }
 0x226   : > { %5069 = vmatpush3.xpose.msk.msra.mxu0 %vm341_vm1, %v506_v22  ;;  %5070 = vmatprep.mubr.msk.f32.mxu0 %vm5697_vm0, %v5696_v0 }
 0x227   : > { %5073 = vmatprep.subr.mxu0 %v5696_v0 }
 0x229   : > { %5071 = vmatmul.mubr.msk.f32.vlgmr.msra.gmra.mrb[4].mxu0 %vm341_vm1, %v504_v25 }
 0x22a   : > { %5075 = vmatprep.mubr.msk.f32.mxu0 %vm5697_vm0, %v5696_v0 }
 0x2f8   : > { %v5795_v26 = vpop.f32.mrb[2].mxu0 }
 0x2f9   : > { %v5067_v27 = vpop.f32.mrb[3].mxu0 }
 0x2fc   : > { %v577_v28 = vpop.f32.mrb[4].mxu0 }
 0x2fd   : > { %v578_v29 = vadd.f32 %v577_v28, %v5778_v10  ;;  %v5072_v30 = vpop.f32.mrb[5].mxu0 }
 0x2ff   : > { %v581_v31 = vsel %vm418_vm2, %v578_v29, -inf }
 0x300   : > { %582 = vmax.xlane.f32.xlu0 %v581_v31 }
 0x316   : > { %593 = vrot.lane.b32.xlu0 %v325_v20, %s5698_s10 }
 0x38d   : > { %v583_v32 = vpop.xlane.xlu0 %582 }
 0x38e   : > { %v584_v33 = vsub.f32 %v578_v29, %v583_v32  ;;  %v327_v32 = vld [vmem:[%s5759_s29 + $0x70] sm:$0xff] }
 0x390   : > { %v585_v34 = vmul.f32 1.442695, %v584_v33 }
 0x391   : > { %v594_v37 = vpop.permute.xlu0 %593 }
 0x392   : > { %5642 = vpow2.f32 %v585_v34  ;;  %5074 = vmatpush3.msra.mxu0 %v594_v37 }
 0x393   : > { %5078 = vmatprep.subr.mxu0 %v5696_v0 }
 0x39c   : > { %v5643_v35 = vpop.eup %5642 }
 0x39d   : > { %v587_v36 = vsel %vm418_vm2, %v5643_v35, 0.0 }
 0x39e   : > { %588 = vadd.xlane.f32.xlu1 %v587_v36 }
 0x42b   : > { %v589_v38 = vpop.xlane.xlu1 %588 }
 0x42c   : > { %5644 = vrcp.f32 %v589_v38 }
 0x436   : > { %v5645_v39 = vpop.eup %5644 }
 0x437   : > { %v591_v41 = vmul.f32 %v5645_v39, %v5643_v35 }
 0x439   : > { %5076 = vmatmul.mubr.msk.f32.vlgmr.msra.gmra.mrb[6].mxu0 %vm418_vm2, %v591_v41 }
 0x43a   : > { %5079 = vmatpush3.xpose.msk.msra.mxu0 %vm341_vm1, %v320_v42  ;;  %5080 = vmatprep.mubr.msk.f32.mxu0 %vm5697_vm0, %v5696_v0 }
 0x43b   : > { %5083 = vmatprep.subr.mxu0 %v5696_v0 }
 0x43d   : > { %5081 = vmatmul.mubr.msk.f32.vlgmr.msra.gmra.mrb[8].mxu0 %vm341_vm1, %v669_v43 }
 0x43e   : > { %5085 = vmatprep.mubr.msk.f32.mxu0 %vm5697_vm0, %v5696_v0  ;;  %5084 = vmatpush3.msra.mxu0 %v326_v55 }
 0x43f   : > { %5088 = vmatprep.subr.mxu0 %v5696_v0 }
 0x50c   : > { %v5812_v44 = vpop.f32.mrb[6].mxu0 }
 0x50d   : > { %v5077_v45 = vpop.f32.mrb[7].mxu0 }
 0x510   : > { %v742_v46 = vpop.f32.mrb[8].mxu0 }
 0x511   : > { %v743_v47 = vadd.f32 %v742_v46, %v5778_v10  ;;  %v5082_v48 = vpop.f32.mrb[9].mxu0 }
 0x513   : > { %v746_v49 = vsel %vm418_vm2, %v743_v47, -inf }
 0x514   : > { %747 = vmax.xlane.f32.xlu0 %v746_v49 }
 0x52a   : > { %830 = vrot.lane.b32.xlu0 %v669_v43, %s5698_s10 }
 0x5a1   : > { %v748_v50 = vpop.xlane.xlu0 %747 }
 0x5a2   : > { %v749_v51 = vsub.f32 %v743_v47, %v748_v50  ;;  %v322_v50 = vld [vmem:[%s5759_s29 + $0x48] sm:$0xff] }
 0x5a4   : > { %v750_v52 = vmul.f32 1.442695, %v749_v51 }
 0x5a5   : > { %v831_v60 = vpop.permute.xlu0 %830 }
 0x5a6   : > { %5646 = vpow2.f32 %v750_v52 }
 0x5b0   : > { %v5647_v53 = vpop.eup %5646 }
 0x5b1   : > { %v752_v54 = vsel %vm418_vm2, %v5647_v53, 0.0 }
 0x5b2   : > { %753 = vadd.xlane.f32.xlu1 %v752_v54  ;;  %v316_v54 = vld [vmem:[%s5759_s29 + $0x18] sm:$0xff] }
 0x5c3   : > { %832 = vrot.lane.b32.xlu1 %v320_v42, %s5698_s10 }
 0x63f   : > { %v754_v56 = vpop.xlane.xlu1 %753 }
 0x640   : > { %5648 = vrcp.f32 %v754_v56  ;;  %v1323_v56 = vmul.f32 0.125, %v316_v54 }
 0x643   : > { %v833_v59 = vpop.permute.xlu1 %832 }
 0x64a   : > { %v5649_v57 = vpop.eup %5648 }
 0x64b   : > { %v756_v58 = vmul.f32 %v5649_v57, %v5647_v53  ;;  %v323_v57 = vld [vmem:[%s5759_s29 + $0x50] sm:$0xff] }
 0x64c   : > { %5139 = vmatpush3.xpose.msk.msra.mxu1 %vm341_vm1, %v323_v57 }
 0x64d   : > { %5086 = vmatmul.mubr.msk.f32.vlgmr.msra.gmra.mrb[10].mxu0 %vm418_vm2, %v756_v58  ;;  %v317_v58 = vld [vmem:[%s5759_s29 + $0x20] sm:$0xff]  ;;  %5148 = vmatprep.subr.mxu1 %v5696_v0 }
 0x64e   : > { %5089 = vmatpush3.xpose.msk.msra.mxu0 %vm341_vm1, %v833_v59  ;;  %5090 = vmatprep.mubr.msk.f32.mxu0 %vm5697_vm0, %v5696_v0  ;;  %v1650_v59 = vmul.f32 0.125, %v317_v58  ;;  %v5208_v58 = vld [vmem:[%s6967_s3 + $0x4] ss:$24 sps:$4 sm:$0xff]  }
 0x64f   : > { %5093 = vmatprep.subr.mxu0 %v5696_v0 }
 0x650   : > { %5141 = vmatmul.mubr.msk.f32.vlgmr.msra.gmra.mrb[0].mxu1 %vm341_vm1, %v1650_v59 }
 0x651   : > { %5091 = vmatmul.mubr.msk.f32.vlgmr.msra.gmra.mrb[12].mxu0 %vm341_vm1, %v831_v60  ;;  %5150 = vmatprep.mubr.msk.f32.mxu1 %vm5697_vm0, %v5696_v0 }
 0x652   : > { %5095 = vmatprep.mubr.msk.f32.mxu0 %vm5697_vm0, %v5696_v0 }
 0x720   : > { %v5829_v61 = vpop.f32.mrb[10].mxu0 }
 0x721   : > { %v5087_v62 = vpop.f32.mrb[11].mxu0 }
 0x724   : > { %v904_v63 = vpop.f32.mrb[12].mxu0 }
 0x725   : > { %v905_v1 = vadd.f32 %v904_v63, %v5778_v10  ;;  %v5092_v2 = vpop.f32.mrb[13].mxu0 }
 0x727   : > { %v908_v3 = vsel %vm418_vm2, %v905_v1, -inf }
 0x728   : > { %909 = vmax.xlane.f32.xlu1 %v908_v3 }
 0x739   : > { %920 = vrot.lane.b32.xlu1 %v326_v55, %s5698_s10 }
 0x7b5   : > { %v910_v4 = vpop.xlane.xlu1 %909 }
 0x7b6   : > { %v911_v5 = vsub.f32 %v905_v1, %v910_v4  ;;  %v1723_v4 = vpop.f32.mrb[0].mxu1 }
 0x7b8   : > { %v912_v6 = vmul.f32 1.442695, %v911_v5  ;;  %v1724_v5 = vadd.f32 %v1723_v4, %v5778_v10  ;;  %v5218_v4 = vld [vmem:[%s6967_s3 + $0xc0] ss:$24 sps:$4 sm:$0xff]  }
 0x7b9   : > { %v921_v12 = vpop.permute.xlu1 %920 }
 0x7ba   : > { %5650 = vpow2.f32 %v912_v6  ;;  %5094 = vmatpush3.msra.mxu0 %v921_v12  ;;  %v5142_v6 = vpop.f32.mrb[1].mxu1 }
 0x7bb   : > { %5098 = vmatprep.subr.mxu0 %v5696_v0  ;;  %v5221_v6 = vld [vmem:[%s6967_s3 + $0xf0] ss:$24 sps:$4 sm:$0xff]  }
 0x7c4   : > { %v5651_v8 = vpop.eup %5650 }
 0x7c5   : > { %v914_v11 = vsel %vm418_vm2, %v5651_v8, 0.0 }
 0x7c6   : > { %915 = vadd.xlane.f32.xlu0 %v914_v11 }
 0x853   : > { %v916_v13 = vpop.xlane.xlu0 %915 }
 0x854   : > { %5652 = vrcp.f32 %v916_v13 }
 0x85e   : > { %v5653_v14 = vpop.eup %5652 }
 0x85f   : > { %v918_v16 = vmul.f32 %v5653_v14, %v5651_v8  ;;  %v1727_v8 = vsel %vm418_vm2, %v1724_v5, -inf }
 0x861   : > { %5096 = vmatmul.mubr.msk.f32.vlgmr.msra.gmra.mrb[14].mxu0 %vm418_vm2, %v918_v16  ;;  %v5899_v16 = vld [vmem:[%s5759_s29 + $0x78] sm:$0xff] }
 0x862   : > { %5099 = vmatpush3.xpose.msk.msra.mxu0 %vm341_vm1, %v321_v17  ;;  %5100 = vmatprep.mubr.msk.f32.mxu0 %vm5697_vm0, %v5696_v0 }
 0x863   : > { %5103 = vmatprep.subr.mxu0 %v5696_v0 }
 0x865   : > { %5101 = vmatmul.mubr.msk.f32.vlgmr.msra.gmra.mrb[16].mxu0 %vm341_vm1, %v996_v18 }
 0x866   : > { %5105 = vmatprep.mubr.msk.f32.mxu0 %vm5697_vm0, %v5696_v0  ;;  %5104 = vmatpush3.msra.mxu0 %v327_v32 }
 0x867   : > { %5108 = vmatprep.subr.mxu0 %v5696_v0 }
 0x934   : > { %v5846_v19 = vpop.f32.mrb[14].mxu0 }
 0x935   : > { %v5191_v20 = vpack.i.bf16 %v5812_v44, %v5846_v19  ;;  %v5097_v21 = vpop.f32.mrb[15].mxu0 }
 0x938   : > { %v1069_v22 = vpop.f32.mrb[16].mxu0 }
 0x939   : > { %v1070_v23 = vadd.f32 %v1069_v22, %v5778_v10  ;;  %v5102_v24 = vpop.f32.mrb[17].mxu0 }
 0x93b   : > { %v1073_v25 = vsel %vm418_vm2, %v1070_v23, -inf }
 0x93c   : > { %1074 = vmax.xlane.f32.xlu0 %v1073_v25 }
 0x952   : > { %1159 = vrot.lane.b32.xlu0 %v321_v17, %s5698_s10  ;;  %v324_v17 = vld [vmem:[%s5759_s29 + $0x58] sm:$0xff] }
 0x956   : > { %1157 = vrot.lane.b32.xlu0 %v996_v18, %s5698_s10  ;;  %v318_v18 = vld [vmem:[%s5759_s29 + $0x28] sm:$0xff] }
 0x957   : > { %v1977_v21 = vmul.f32 0.125, %v318_v18  ;;  %v5233_v18 = vld [vmem:[%s6967_s3 + $0x1b0] ss:$24 sps:$4 sm:$0xff]  }
 0x9c9   : > { %v1075_v27 = vpop.xlane.xlu0 %1074 }
 0x9ca   : > { %v1076_v28 = vsub.f32 %v1070_v23, %v1075_v27 }
 0x9cc   : > { %v1077_v29 = vmul.f32 1.442695, %v1076_v28 }
 0x9cd   : > { %v1160_v34 = vpop.permute.xlu0 %1159 }
 0x9ce   : > { %5654 = vpow2.f32 %v1077_v29 }
 0x9d1   : > { %v1158_v37 = vpop.permute.xlu0 %1157 }
 0x9d8   : > { %v5655_v30 = vpop.eup %5654 }
 0x9d9   : > { %v1079_v31 = vsel %vm418_vm2, %v5655_v30, 0.0 }
 0x9da   : > { %1080 = vadd.xlane.f32.xlu1 %v1079_v31 }
 0xa67   : > { %v1081_v33 = vpop.xlane.xlu1 %1080 }
 0xa68   : > { %5656 = vrcp.f32 %v1081_v33 }
 0xa72   : > { %v5657_v35 = vpop.eup %5656 }
 0xa73   : > { %v1083_v36 = vmul.f32 %v5657_v35, %v5655_v30 }
 0xa75   : > { %5106 = vmatmul.mubr.msk.f32.vlgmr.msra.gmra.mrb[18].mxu0 %vm418_vm2, %v1083_v36 }
 0xa76   : > { %5109 = vmatpush3.xpose.msk.msra.mxu0 %vm341_vm1, %v1160_v34  ;;  %5110 = vmatprep.mubr.msk.f32.mxu0 %vm5697_vm0, %v5696_v0 }
 0xa77   : > { %5113 = vmatprep.subr.mxu0 %v5696_v0 }
 0xa79   : > { %5111 = vmatmul.mubr.msk.f32.vlgmr.msra.gmra.mrb[20].mxu0 %vm341_vm1, %v1158_v37 }
 0xa7a   : > { %5115 = vmatprep.mubr.msk.f32.mxu0 %vm5697_vm0, %v5696_v0 }
 0xb48   : > { %v5865_v38 = vpop.f32.mrb[18].mxu0 }
 0xb49   : > { %v5107_v39 = vpop.f32.mrb[19].mxu0 }
 0xb4c   : > { %v1231_v40 = vpop.f32.mrb[20].mxu0 }
 0xb4d   : > { %v1232_v41 = vadd.f32 %v1231_v40, %v5778_v10  ;;  %v5112_v42 = vpop.f32.mrb[21].mxu0 }
 0xb4f   : > { %v1235_v43 = vsel %vm418_vm2, %v1232_v41, -inf }
 0xb50   : > { %1236 = vmax.xlane.f32.xlu0 %v1235_v43 }
 0xb66   : > { %1486 = vrot.lane.b32.xlu0 %v322_v50, %s5698_s10 }
 0xbdd   : > { %v1237_v45 = vpop.xlane.xlu0 %1236 }
 0xbde   : > { %v1238_v46 = vsub.f32 %v1232_v41, %v1237_v45 }
 0xbe0   : > { %v1239_v47 = vmul.f32 1.442695, %v1238_v46 }
 0xbe1   : > { %v1487_v29 = vpop.permute.xlu0 %1486 }
 0xbe2   : > { %5658 = vpow2.f32 %v1239_v47 }
 0xbec   : > { %v5659_v48 = vpop.eup %5658 }
 0xbed   : > { %v1241_v49 = vsel %vm418_vm2, %v5659_v48, 0.0 }
 0xbee   : > { %1242 = vadd.xlane.f32.xlu1 %v1241_v49 }
 0xbff   : > { %1247 = vrot.lane.b32.xlu1 %v327_v32, %s5698_s10 }
 0xc7b   : > { %v1243_v51 = vpop.xlane.xlu1 %1242 }
 0xc7c   : > { %5660 = vrcp.f32 %v1243_v51 }
 0xc7f   : > { %v1248_v52 = vpop.permute.xlu1 %1247 }
 0xc80   : > { %5114 = vmatpush3.msra.mxu0 %v1248_v52 }
 0xc81   : > { %5118 = vmatprep.subr.mxu0 %v5696_v0 }
 0xc86   : > { %v5661_v53 = vpop.eup %5660 }
 0xc87   : > { %v1245_v55 = vmul.f32 %v5661_v53, %v5659_v48 }
 0xc89   : > { %5116 = vmatmul.mubr.msk.f32.vlgmr.msra.gmra.mrb[22].mxu0 %vm418_vm2, %v1245_v55 }
 0xc8a   : > { %5119 = vmatpush3.xpose.msk.msra.mxu0 %vm341_vm1, %v322_v50  ;;  %5120 = vmatprep.mubr.msk.f32.mxu0 %vm5697_vm0, %v5696_v0 }
 0xc8b   : > { %5123 = vmatprep.subr.mxu0 %v5696_v0 }
 0xc8d   : > { %5121 = vmatmul.mubr.msk.f32.vlgmr.msra.gmra.mrb[24].mxu0 %vm341_vm1, %v1323_v56 }
 0xc8e   : > { %5125 = vmatprep.mubr.msk.f32.mxu0 %vm5697_vm0, %v5696_v0  ;;  %5124 = vmatpush3.msra.mxu0 %v5899_v16 }
 0xc8f   : > { %5128 = vmatprep.subr.mxu0 %v5696_v0 }
 0xd5c   : > { %v5890_v60 = vpop.f32.mrb[22].mxu0 }
 0xd5d   : > { %v5117_v62 = vpop.f32.mrb[23].mxu0 }
 0xd5e   : > { %v5214_v62 = vld [vmem:[%s6967_s3 + $0x64] ss:$24 sps:$4 sm:$0xff]  }
 0xd60   : > { %v1396_v63 = vpop.f32.mrb[24].mxu0 }
 0xd61   : > { %v1397_v1 = vadd.f32 %v1396_v63, %v5778_v10  ;;  %v5122_v2 = vpop.f32.mrb[25].mxu0  ;;  %v5212_v63 = vld [vmem:[%s6967_s3 + $0x60] ss:$24 sps:$4 sm:$0xff]  }
 0xd62   : > { %v5215_v2 = vld [vmem:[%s6967_s3 + $0x90] ss:$24 sps:$4 sm:$0xff]  }
 0xd63   : > { %v1400_v3 = vsel %vm418_vm2, %v1397_v1, -inf }
 0xd64   : > { %1401 = vmax.xlane.f32.xlu1 %v1400_v3  ;;  %v5220_v3 = vld [vmem:[%s6967_s3 + $0xc4] ss:$24 sps:$4 sm:$0xff]  }
 0xd75   : > { %1811 = vrot.lane.b32.xlu1 %v1650_v59, %s5698_s10  ;;  %v5209_v59 = vld [vmem:[%s6967_s3 + $0x30] ss:$24 sps:$4 sm:$0xff]  }
 0xd99   : > { %1728 = vmax.xlane.f32.xlu1 %v1727_v8  ;;  %v5226_v8 = vld [vmem:[%s6967_s3 + $0x124] ss:$24 sps:$4 sm:$0xff]  }
 0xdf1   : > { %v1402_v11 = vpop.xlane.xlu1 %1401 }
 0xdf2   : > { %v1403_v12 = vsub.f32 %v1397_v1, %v1402_v11  ;;  %v5217_v1 = vld [vmem:[%s6967_s3 + $0x94] ss:$24 sps:$4 sm:$0xff]   ;;  %v5224_v11 = vld [vmem:[%s6967_s3 + $0x120] ss:$24 sps:$4 sm:$0xff]  }
 0xdf4   : > { %v1404_v13 = vmul.f32 1.442695, %v1403_v12  ;;  %v5229_v12 = vld [vmem:[%s6967_s3 + $0x154] ss:$24 sps:$4 sm:$0xff]  }
 0xdf5   : > { %v1812_v22 = vpop.permute.xlu1 %1811 }
 0xdf6   : > { %5662 = vpow2.f32 %v1404_v13  ;;  %v5227_v13 = vld [vmem:[%s6967_s3 + $0x150] ss:$24 sps:$4 sm:$0xff]  }
 0xe00   : > { %v5663_v14 = vpop.eup %5662 }
 0xe01   : > { %v1406_v15 = vsel %vm418_vm2, %v5663_v14, 0.0 }
 0xe02   : > { %1407 = vadd.xlane.f32.xlu0 %v1406_v15  ;;  %v5230_v15 = vld [vmem:[%s6967_s3 + $0x180] ss:$24 sps:$4 sm:$0xff]  }
 0xe18   : > { %1484 = vrot.lane.b32.xlu0 %v1323_v56, %s5698_s10 }
 0xe1c   : > { %1813 = vrot.lane.b32.xlu0 %v323_v57, %s5698_s10  ;;  %v5206_v57 = vld [vmem:[%s6967_s3] ss:$24 sps:$4 sm:$0xff]  }
 0xe20   : > { %2140 = vrot.lane.b32.xlu0 %v324_v17, %s5698_s10 }
 0xe24   : > { %2138 = vrot.lane.b32.xlu0 %v1977_v21, %s5698_s10 }
 0xe26   : > { %v1729_v23 = vpop.xlane.xlu1 %1728 }
 0xe27   : > { %v1730_v24 = vsub.f32 %v1724_v5, %v1729_v23  ;;  %v5223_v5 = vld [vmem:[%s6967_s3 + $0xf4] ss:$24 sps:$4 sm:$0xff]  }
 0xe29   : > { %v1731_v25 = vmul.f32 1.442695, %v1730_v24 }
 0xe2b   : > { %5664 = vpow2.f32 %v1731_v25 }
 0xe35   : > { %v5909_v27 = vpop.eup %5664 }
 0xe36   : > { %v1733_v28 = vsel %vm418_vm2, %v5909_v27, 0.0 }
 0xe37   : > { %1734 = vadd.xlane.f32.xlu1 %v1733_v28 }
 0xe8f   : > { %v1408_v30 = vpop.xlane.xlu0 %1407 }
 0xe90   : > { %5666 = vrcp.f32 %v1408_v30 }
 0xe93   : > { %v1485_v31 = vpop.permute.xlu0 %1484 }
 0xe97   : > { %v1814_v32 = vpop.permute.xlu0 %1813 }
 0xe98   : > { %5149 = vmatpush3.xpose.msk.msra.mxu1 %vm341_vm1, %v1814_v32 }
 0xe99   : > { %5158 = vmatprep.subr.mxu1 %v5696_v0 }
 0xe9a   : > { %v5667_v33 = vpop.eup %5666 }
 0xe9b   : > { %v1410_v34 = vmul.f32 %v5667_v33, %v5663_v14  ;;  %5151 = vmatmul.mubr.msk.f32.vlgmr.msra.gmra.mrb[2].mxu1 %vm341_vm1, %v1812_v22  ;;  %v2141_v35 = vpop.permute.xlu0 %2140  ;;  %v5232_v14 = vld [vmem:[%s6967_s3 + $0x184] ss:$24 sps:$4 sm:$0xff]   ;;  %v5236_v22 = vld [vmem:[%s6967_s3 + $0x1e0] ss:$24 sps:$4 sm:$0xff]  }
 0xe9c   : > { %5159 = vmatpush3.xpose.msk.msra.mxu1 %vm341_vm1, %v324_v17  ;;  %5160 = vmatprep.mubr.msk.f32.mxu1 %vm5697_vm0, %v5696_v0  ;;  %v5235_v17 = vld [vmem:[%s6967_s3 + $0x1b4] ss:$24 sps:$4 sm:$0xff]  }
 0xe9d   : > { %5126 = vmatmul.mubr.msk.f32.vlgmr.msra.gmra.mrb[26].mxu0 %vm418_vm2, %v1410_v34  ;;  %5168 = vmatprep.subr.mxu1 %v5696_v0 }
 0xe9e   : > { %5129 = vmatpush3.xpose.msk.msra.mxu0 %vm341_vm1, %v1487_v29  ;;  %5130 = vmatprep.mubr.msk.f32.mxu0 %vm5697_vm0, %v5696_v0 }
 0xe9f   : > { %5161 = vmatmul.mubr.msk.f32.vlgmr.msra.gmra.mrb[4].mxu1 %vm341_vm1, %v1977_v21  ;;  %5133 = vmatprep.subr.mxu0 %v5696_v0  ;;  %v2139_v36 = vpop.permute.xlu0 %2138  ;;  %v5238_v21 = vld [vmem:[%s6967_s3 + $0x1e4] ss:$24 sps:$4 sm:$0xff]  }
 0xea0   : > { %5169 = vmatpush3.xpose.msk.msra.mxu1 %vm341_vm1, %v2141_v35  ;;  %5170 = vmatprep.mubr.msk.f32.mxu1 %vm5697_vm0, %v5696_v0 }
 0xea1   : > { %5131 = vmatmul.mubr.msk.f32.vlgmr.msra.gmra.mrb[28].mxu0 %vm341_vm1, %v1485_v31  ;;  %4100 = vmatprep.subr.bf16.mxu1 %v5208_v58  ;;  %v5251_v58 = vld [vmem:[%s6967_s3 + $0x2d0] ss:$24 sps:$4 sm:$0xff]  }
 0xea2   : > { %5135 = vmatprep.mubr.msk.f32.mxu0 %vm5697_vm0, %v5696_v0 }
 0xea3   : > { %5171 = vmatmul.mubr.msk.f32.vlgmr.msra.gmra.mrb[6].mxu1 %vm341_vm1, %v2139_v36 }
 0xea4   : > { %4101 = vmatpush1.bf16.msra.mxu1 %v5206_v57  ;;  %v5253_v57 = vld [vmem:[%s6967_s3 + $0x2d4] ss:$24 sps:$4 sm:$0xff]  }
 0xf6e   : > { %v1885_v37 = vpop.f32.mrb[2].mxu1 }
 0xf6f   : > { %v5152_v39 = vpop.f32.mrb[3].mxu1  ;;  %v1886_v48 = vadd.f32 %v1885_v37, %v5778_v10 }
 0xf70   : > { %v5933_v40 = vpop.f32.mrb[26].mxu0 }
 0xf71   : > { %v5127_v41 = vpop.f32.mrb[27].mxu0  ;;  %v1889_v53 = vsel %vm418_vm2, %v1886_v48, -inf }
 0xf72   : > { %v2050_v42 = vpop.f32.mrb[4].mxu1 }
 0xf73   : > { %v5162_v43 = vpop.f32.mrb[5].mxu1  ;;  %v2051_v52 = vadd.f32 %v2050_v42, %v5778_v10 }
 0xf74   : > { %v1558_v45 = vpop.f32.mrb[28].mxu0 }
 0xf75   : > { %v5936_v46 = vadd.f32 %v1558_v45, %v5778_v10  ;;  %v5132_v47 = vpop.f32.mrb[29].mxu0  ;;  %v2054_v55 = vsel %vm418_vm2, %v2051_v52, -inf }
 0xf76   : > { %v2212_v49 = vpop.f32.mrb[6].mxu1 }
 0xf77   : > { %v1562_v50 = vsel %vm418_vm2, %v5936_v46, -inf  ;;  %v5172_v51 = vpop.f32.mrb[7].mxu1  ;;  %v5944_v54 = vadd.f32 %v2212_v49, %v5778_v10  ;;  %v5211_v10 = vld [vmem:[%s6967_s3 + $0x34] ss:$24 sps:$4 sm:$0xff]   ;;  %v5239_v49 = vld [vmem:[%s6967_s3 + $0x210] ss:$24 sps:$4 sm:$0xff]  }
 0xf78   : > { %1563 = vmax.xlane.f32.xlu0 %v1562_v50  ;;  %4102 = vmatprep.subr.bf16.mxu1 %v5211_v10  ;;  %v5244_v50 = vld [vmem:[%s6967_s3 + $0x244] ss:$24 sps:$4 sm:$0xff]   ;;  %v5242_v51 = vld [vmem:[%s6967_s3 + $0x240] ss:$24 sps:$4 sm:$0xff]   ;;  %v1735_v10 = vpop.xlane.xlu1 %1734 }
 0xf79   : > { %v2216_v56 = vsel %vm418_vm2, %v5944_v54, -inf  ;;  %4103 = vmatpush1.bf16.msra.mxu1 %v5209_v59 }
 0xf7a   : > { %4104 = vmatprep.subr.bf16.mxu1 %v5214_v62 }
 0xf7c   : > { %1890 = vmax.xlane.f32.xlu0 %v1889_v53  ;;  %v5247_v53 = vld [vmem:[%s6967_s3 + $0x274] ss:$24 sps:$4 sm:$0xff]  }
 0xf7d   : > { %4105 = vmatpush1.bf16.msra.mxu1 %v5212_v63 }
 0xf7e   : > { %4106 = vmatprep.subr.bf16.mxu1 %v5217_v1 }
 0xf80   : > { %2055 = vmax.xlane.f32.xlu0 %v2054_v55  ;;  %v329_v55 = vld [vmem:[%s5759_s29 + $0x80] sm:$0xff] }
 0xf81   : > { %4107 = vmatpush1.bf16.msra.mxu1 %v5215_v2 }
 0xf82   : > { %4108 = vmatprep.subr.bf16.mxu1 %v5220_v3 }
 0xf84   : > { %2217 = vmax.xlane.f32.xlu0 %v2216_v56  ;;  %v5248_v56 = vld [vmem:[%s6967_s3 + $0x2a0] ss:$24 sps:$4 sm:$0xff]  }
 0xf85   : > { %4109 = vmatpush1.bf16.msra.mxu1 %v5218_v4 }
 0xf86   : > { %4110 = vmatprep.subr.bf16.mxu1 %v5223_v5 }
 0xf89   : > { %4111 = vmatpush1.bf16.msra.mxu1 %v5221_v6 }
 0xf8a   : > { %4112 = vmatprep.subr.bf16.mxu1 %v5226_v8 }
 0xf8d   : > { %4113 = vmatpush1.bf16.msra.mxu1 %v5224_v11 }
 0xf8e   : > { %4114 = vmatprep.subr.bf16.mxu1 %v5229_v12 }
 0xf91   : > { %4115 = vmatpush1.bf16.msra.mxu1 %v5227_v13 }
 0xf92   : > { %4116 = vmatprep.subr.bf16.mxu1 %v5232_v14 }
 0xf95   : > { %4117 = vmatpush1.bf16.msra.mxu1 %v5230_v15 }
 0xf96   : > { %4118 = vmatprep.subr.bf16.mxu1 %v5235_v17 }
 0xf99   : > { %4119 = vmatpush1.bf16.msra.mxu1 %v5233_v18 }
 0xf9a   : > { %4120 = vmatprep.subr.bf16.mxu1 %v5238_v21 }
 0xf9d   : > { %4121 = vmatpush1.bf16.msra.mxu1 %v5236_v22  ;;  %v5254_v22 = vld [vmem:[%s6967_s3 + $0x300] ss:$24 sps:$4 sm:$0xff]  }
0x1005   : > { %v1564_v23 = vpop.xlane.xlu0 %1563 }
0x1006   : > { %v1565_v24 = vsub.f32 %v5936_v46, %v1564_v23  ;;  %v5256_v23 = vld [vmem:[%s6967_s3 + $0x304] ss:$24 sps:$4 sm:$0xff]  }
0x1008   : > { %v1566_v29 = vmul.f32 1.442695, %v1565_v24  ;;  %v5259_v24 = vld [vmem:[%s6967_s3 + $0x334] ss:$24 sps:$4 sm:$0xff]  }
0x1009   : > { %v1891_v25 = vpop.xlane.xlu0 %1890 }
0x100a   : > { %v1892_v28 = vsub.f32 %v1886_v48, %v1891_v25  ;;  %v5241_v48 = vld [vmem:[%s6967_s3 + $0x214] ss:$24 sps:$4 sm:$0xff]   ;;  %v5269_v25 = vld [vmem:[%s6967_s3 + $0x600] ss:$24 sps:$4 sm:$0xff]  }
0x100b   : > { %4122 = vmatprep.subr.bf16.mxu1 %v5241_v48  ;;  %v5301_v48 = vld [vmem:[%s6967_s3 + $0x6f4] ss:$24 sps:$4 sm:$0xff]  }
0x100c   : > { %v1893_v30 = vmul.f32 1.442695, %v1892_v28  ;;  %4123 = vmatpush1.bf16.msra.mxu1 %v5239_v49  ;;  %v5271_v28 = vld [vmem:[%s6967_s3 + $0x604] ss:$24 sps:$4 sm:$0xff]  }
0x100d   : > { %v2056_v31 = vpop.xlane.xlu0 %2055  ;;  %4124 = vmatprep.subr.bf16.mxu1 %v5244_v50  ;;  %v5280_v49 = vld [vmem:[%s6967_s3 + $0x424] ss:$24 sps:$4 sm:$0xff]   ;;  %v5299_v50 = vld [vmem:[%s6967_s3 + $0x6f0] ss:$24 sps:$4 sm:$0xff]  }
0x100e   : > { %5668 = vpow2.f32 %v1893_v30  ;;  %v2057_v32 = vsub.f32 %v2051_v52, %v2056_v31  ;;  %v330_v52 = vld [vmem:[%s5759_s29 + $0x88] sm:$0xff] }
0x100f   : > { %5670 = vpow2.f32 %v1566_v29  ;;  %v5262_v29 = vld [vmem:[%s6967_s3 + $0x364] ss:$24 sps:$4 sm:$0xff]   ;;  %v5277_v30 = vld [vmem:[%s6967_s3 + $0x634] ss:$24 sps:$4 sm:$0xff]   ;;  %v5275_v31 = vld [vmem:[%s6967_s3 + $0x630] ss:$24 sps:$4 sm:$0xff]  }
0x1010   : > { %v2058_v33 = vmul.f32 1.442695, %v2057_v32  ;;  %4125 = vmatpush1.bf16.msra.mxu1 %v5242_v51  ;;  %v5260_v32 = vld [vmem:[%s6967_s3 + $0x360] ss:$24 sps:$4 sm:$0xff]  }
0x1011   : > { %v2218_v34 = vpop.xlane.xlu0 %2217  ;;  %4126 = vmatprep.subr.bf16.mxu1 %v5247_v53  ;;  %v5278_v51 = vld [vmem:[%s6967_s3 + $0x420] ss:$24 sps:$4 sm:$0xff]   ;;  %v5286_v53 = vld [vmem:[%s6967_s3 + $0x454] ss:$24 sps:$4 sm:$0xff]  }
0x1012   : > { %5672 = vpow2.f32 %v2058_v33  ;;  %v2219_v35 = vsub.f32 %v5944_v54, %v2218_v34  ;;  %v5245_v54 = vld [vmem:[%s6967_s3 + $0x270] ss:$24 sps:$4 sm:$0xff]   ;;  %v5283_v33 = vld [vmem:[%s6967_s3 + $0x664] ss:$24 sps:$4 sm:$0xff]   ;;  %v5265_v34 = vld [vmem:[%s6967_s3 + $0x394] ss:$24 sps:$4 sm:$0xff]  }
0x1014   : > { %v2220_v36 = vmul.f32 1.442695, %v2219_v35  ;;  %4127 = vmatpush1.bf16.msra.mxu1 %v5245_v54  ;;  %v5281_v35 = vld [vmem:[%s6967_s3 + $0x660] ss:$24 sps:$4 sm:$0xff]  }
0x1015   : > { %v5305_v54 = vld [vmem:[%s6967_s3 + $0x720] ss:$24 sps:$4 sm:$0xff]  }
0x1016   : > { %5674 = vpow2.f32 %v2220_v36  ;;  %v5263_v36 = vld [vmem:[%s6967_s3 + $0x390] ss:$24 sps:$4 sm:$0xff]  }
0x1018   : > { %v6017_v37 = vpop.eup %5668 }
0x1019   : > { %v1895_v39 = vsel %vm418_vm2, %v6017_v37, 0.0  ;;  %v5671_v41 = vpop.eup %5670 }
0x101a   : > { %1896 = vadd.xlane.f32.xlu0 %v1895_v39  ;;  %v1568_v43 = vsel %vm418_vm2, %v5671_v41, 0.0  ;;  %v5268_v39 = vld [vmem:[%s6967_s3 + $0x3c4] ss:$24 sps:$4 sm:$0xff]  }
0x101c   : > { %v6021_v42 = vpop.eup %5672 }
0x101d   : > { %v2060_v45 = vsel %vm418_vm2, %v6021_v42, 0.0 }
0x101e   : > { %1569 = vadd.xlane.f32.xlu0 %v1568_v43  ;;  %2061 = vadd.xlane.f32.xlu1 %v2060_v45  ;;  %v5295_v43 = vld [vmem:[%s6967_s3 + $0x6c4] ss:$24 sps:$4 sm:$0xff]   ;;  %v5274_v45 = vld [vmem:[%s6967_s3 + $0x3f4] ss:$24 sps:$4 sm:$0xff]  }
0x1020   : > { %v6026_v46 = vpop.eup %5674 }
0x1021   : > { %v2222_v47 = vsel %vm418_vm2, %v6026_v46, 0.0 }
0x1022   : > { %2223 = vadd.xlane.f32.xlu0 %v2222_v47  ;;  %v5272_v47 = vld [vmem:[%s6967_s3 + $0x3f0] ss:$24 sps:$4 sm:$0xff]  }
0x102f   : > { %1574 = vrot.lane.b32.xlu1 %v5899_v16, %s5698_s10  ;;  %v5250_v16 = vld [vmem:[%s6967_s3 + $0x2a4] ss:$24 sps:$4 sm:$0xff]  }
0x1030   : > { %4128 = vmatprep.subr.bf16.mxu1 %v5250_v16  ;;  %v5313_v16 = vld [vmem:[%s6967_s3 + $0x754] ss:$24 sps:$4 sm:$0xff]  }
0x1031   : > { %4129 = vmatpush1.bf16.msra.mxu1 %v5248_v56  ;;  %v5292_v56 = vld [vmem:[%s6967_s3 + $0x484] ss:$24 sps:$4 sm:$0xff]  }
0x1032   : > { %4130 = vmatprep.subr.bf16.mxu1 %v5253_v57  ;;  %v5311_v57 = vld [vmem:[%s6967_s3 + $0x750] ss:$24 sps:$4 sm:$0xff]  }
0x1033   : > { %2228 = vrot.lane.b32.xlu1 %v330_v52, %s5698_s10 }
0x1035   : > { %4131 = vmatpush1.bf16.msra.mxu1 %v5251_v58  ;;  %v5290_v58 = vld [vmem:[%s6967_s3 + $0x480] ss:$24 sps:$4 sm:$0xff]  }
0x1036   : > { %4182 = vmatprep.subr.bf16.mxu1 %v5271_v28 }
0x1037   : > { %5192 = vrot.lane.b32.xlu1 %v5191_v20, %s5698_s10 }
0x1038   : > { %1901 = vrot.lane.b32.xlu0 %v329_v55, %s5698_s10 }
0x10a7   : > { %v1897_v59 = vpop.xlane.xlu0 %1896 }
0x10ab   : > { %v2062_v62 = vpop.xlane.xlu1 %2061  ;;  %v1570_v63 = vpop.xlane.xlu0 %1569 }
0x10ac   : > { %5676 = vrcp.f32 %v1570_v63  ;;  %v5296_v63 = vld [vmem:[%s6967_s3 + $0x4b0] ss:$24 sps:$4 sm:$0xff]  }
0x10ad   : > { %5678 = vrcp.f32 %v1735_v10  ;;  %v5319_v10 = vld [vmem:[%s6967_s3 + $0x784] ss:$24 sps:$4 sm:$0xff]  }
0x10ae   : > { %5680 = vrcp.f32 %v1897_v59  ;;  %v5298_v59 = vld [vmem:[%s6967_s3 + $0x4b4] ss:$24 sps:$4 sm:$0xff]  }
0x10af   : > { %v1575_v44 = vpop.permute.xlu1 %1574  ;;  %5682 = vrcp.f32 %v2062_v62  ;;  %v2224_v3 = vpop.xlane.xlu0 %2223  ;;  %v5317_v62 = vld [vmem:[%s6967_s3 + $0x780] ss:$24 sps:$4 sm:$0xff]  }
0x10b0   : > { %5134 = vmatpush3.msra.mxu0 %v1575_v44  ;;  %5684 = vrcp.f32 %v2224_v3  ;;  %v5325_v44 = vld [vmem:[%s6967_s3 + $0x7b4] ss:$24 sps:$4 sm:$0xff]  }
0x10b1   : > { %5143 = vmatprep.subr.mxu0 %v5696_v0  ;;  %v5310_v3 = vld [vmem:[%s6967_s3 + $0x514] ss:$24 sps:$4 sm:$0xff]  }
0x10b3   : > { %v2229_v19 = vpop.permute.xlu1 %2228  ;;  %v1902_v15 = vpop.permute.xlu0 %1901 }
0x10b6   : > { %v5677_v20 = vpop.eup %5676 }
0x10b7   : > { %v5193_v1 = vpop.permute.xlu1 %5192  ;;  %v1572_v2 = vmul.f32 %v5677_v20, %v5671_v41  ;;  %v5679_v6 = vpop.eup %5678  ;;  %v5287_v41 = vld [vmem:[%s6967_s3 + $0x690] ss:$24 sps:$4 sm:$0xff]  }
0x10b8   : > { %v5195_v4 = vunpack.i.h.bf16 %v5193_v1  ;;  %v5194_v5 = vunpack.i.l.bf16 %v5193_v1  ;;  %v1737_v14 = vmul.f32 %v5679_v6, %v5909_v27  ;;  %v5323_v20 = vld [vmem:[%s6967_s3 + $0x7b0] ss:$24 sps:$4 sm:$0xff]   ;;  %v5302_v1 = vld [vmem:[%s6967_s3 + $0x4e0] ss:$24 sps:$4 sm:$0xff]   ;;  %v5316_v6 = vld [vmem:[%s6967_s3 + $0x544] ss:$24 sps:$4 sm:$0xff]  }
0x10b9   : > { %5136 = vmatmul.mubr.msk.f32.vlgmr.msra.gmra.mrb[30].mxu0 %vm418_vm2, %v1572_v2  ;;  %v5331_v2 = vld [vmem:[%s6967_s3 + $0x7e4] ss:$24 sps:$4 sm:$0xff]  }
0x10ba   : > { %v2328_v8 = vsel %vm341_vm1, %v5795_v26, %v5195_v4  ;;  %v2329_v11 = vsel %vm341_vm1, %v5829_v61, %v5194_v5  ;;  %5144 = vmatpush3.msra.mxu0 %v329_v55  ;;  %5145 = vmatprep.mubr.msk.f32.mxu0 %vm5697_vm0, %v5696_v0  ;;  %v5681_v26 = vpop.eup %5680  ;;  %v5284_v55 = vld [vmem:[%s6967_s3 + $0x450] ss:$24 sps:$4 sm:$0xff]   ;;  %v5329_v4 = vld [vmem:[%s6967_s3 + $0x7e0] ss:$24 sps:$4 sm:$0xff]  }
0x10bb   : > { %v6076_v12 = vpack.c.bf16 %v2328_v8, %v2328_v8  ;;  %v6080_v13 = vpack.c.bf16 %v2329_v11, %v2329_v11  ;;  %5153 = vmatprep.subr.mxu0 %v5696_v0  ;;  %v1899_v61 = vmul.f32 %v5681_v26, %v6017_v37  ;;  %v5683_v17 = vpop.eup %5682  ;;  %v5289_v37 = vld [vmem:[%s6967_s3 + $0x694] ss:$24 sps:$4 sm:$0xff]   ;;  %v5308_v5 = vld [vmem:[%s6967_s3 + $0x510] ss:$24 sps:$4 sm:$0xff]   ;;  %v5314_v8 = vld [vmem:[%s6967_s3 + $0x540] ss:$24 sps:$4 sm:$0xff]  }
0x10bc   : > { %v2064_v27 = vmul.f32 %v5683_v17, %v6021_v42  ;;  %v5685_v18 = vpop.eup %5684  ;;  %v5266_v42 = vld [vmem:[%s6967_s3 + $0x3c0] ss:$24 sps:$4 sm:$0xff]   ;;  %v5322_v11 = vld [vmem:[%s6967_s3 + $0x574] ss:$24 sps:$4 sm:$0xff]  }
0x10bd   : > { %4132 = vmatprep.mubr.bf16.mxu1 %v6080_v13  ;;  %5146 = vmatmul.mubr.msk.f32.vlgmr.msra.gmra.mrb[32].mxu0 %vm418_vm2, %v1737_v14  ;;  %v2226_v21 = vmul.f32 %v5685_v18, %v6026_v46  ;;  %v5293_v46 = vld [vmem:[%s6967_s3 + $0x6c0] ss:$24 sps:$4 sm:$0xff]   ;;  %v5320_v14 = vld [vmem:[%s6967_s3 + $0x570] ss:$24 sps:$4 sm:$0xff]   ;;  %v5337_v17 = vld [vmem:[%s6967_s3 + $0x814] ss:$24 sps:$4 sm:$0xff]  }
0x10be   : > { %4133 = vmatmul.mubr.bf16.vlgmr.msra.gmra.mrb[8].mxu1 %v6076_v12  ;;  %5154 = vmatpush3.msra.mxu0 %v1902_v15  ;;  %v5328_v15 = vld [vmem:[%s6967_s3 + $0x5a4] ss:$24 sps:$4 sm:$0xff]   ;;  %v5326_v26 = vld [vmem:[%s6967_s3 + $0x5a0] ss:$24 sps:$4 sm:$0xff]   ;;  %v5335_v18 = vld [vmem:[%s6967_s3 + $0x810] ss:$24 sps:$4 sm:$0xff]  }
0x10bf   : > { %5155 = vmatprep.mubr.msk.f32.mxu0 %vm5697_vm0, %v5696_v0  ;;  %5163 = vmatprep.subr.mxu0 %v5696_v0 }
0x10c0   : > { %4183 = vmatpush1.bf16.msra.mxu1 %v5269_v25 }
0x10c1   : > { %5156 = vmatmul.mubr.msk.f32.vlgmr.msra.gmra.mrb[34].mxu0 %vm418_vm2, %v1899_v61  ;;  %4184 = vmatprep.subr.bf16.mxu1 %v5277_v30  ;;  %v5334_v61 = vld [vmem:[%s6967_s3 + $0x5d4] ss:$24 sps:$4 sm:$0xff]   ;;  %v5350_v30 = vld [vmem:[%s6967_s3 + $0x8a0] ss:$24 sps:$4 sm:$0xff]  }
0x10c2   : > { %5164 = vmatpush3.msra.mxu0 %v330_v52  ;;  %5165 = vmatprep.mubr.msk.f32.mxu0 %vm5697_vm0, %v5696_v0  ;;  %v5307_v52 = vld [vmem:[%s6967_s3 + $0x724] ss:$24 sps:$4 sm:$0xff]  }
0x10c3   : > { %5173 = vmatprep.subr.mxu0 %v5696_v0 }
0x10c4   : > { %4185 = vmatpush1.bf16.msra.mxu1 %v5275_v31  ;;  %v5352_v31 = vld [vmem:[%s6967_s3 + $0x8a4] ss:$24 sps:$4 sm:$0xff]  }
0x10c5   : > { %5166 = vmatmul.mubr.msk.f32.vlgmr.msra.gmra.mrb[36].mxu0 %vm418_vm2, %v2064_v27  ;;  %4186 = vmatprep.subr.bf16.mxu1 %v5283_v33  ;;  %v5332_v27 = vld [vmem:[%s6967_s3 + $0x5d0] ss:$24 sps:$4 sm:$0xff]  }
0x10c6   : > { %5174 = vmatpush3.msra.mxu0 %v2229_v19  ;;  %5175 = vmatprep.mubr.msk.f32.mxu0 %vm5697_vm0, %v5696_v0  ;;  %v5257_v0 = vld [vmem:[%s6967_s3 + $0x330] ss:$24 sps:$4 sm:$0xff]   ;;  %v5304_v19 = vld [vmem:[%s6967_s3 + $0x4e4] ss:$24 sps:$4 sm:$0xff]  }
0x10c7   : > { %4141 = vmatprep.subr.bf16.mxu0 %v5256_v23  ;;  %v5338_v23 = vld [vmem:[%s6967_s3 + $0x840] ss:$24 sps:$4 sm:$0xff]  }
0x10c8   : > { %4187 = vmatpush1.bf16.msra.mxu1 %v5281_v35 }
0x10c9   : > { %5176 = vmatmul.mubr.msk.f32.vlgmr.msra.gmra.mrb[38].mxu0 %vm418_vm2, %v2226_v21  ;;  %4188 = vmatprep.subr.bf16.mxu1 %v5289_v37  ;;  %v5340_v21 = vld [vmem:[%s6967_s3 + $0x844] ss:$24 sps:$4 sm:$0xff]  }
0x10ca   : > { %4142 = vmatpush1.bf16.msra.mxu0 %v5254_v22  ;;  %v5343_v22 = vld [vmem:[%s6967_s3 + $0xc] ss:$24 sps:$4 sm:$0xff]  }
0x10cb   : > { %4143 = vmatprep.subr.bf16.mxu0 %v5259_v24  ;;  %v5344_v24 = vld [vmem:[%s6967_s3 + $0x870] ss:$24 sps:$4 sm:$0xff]  }
0x10cc   : > { %4189 = vmatpush1.bf16.msra.mxu1 %v5287_v41 }
0x10cd   : > { %4190 = vmatprep.subr.bf16.mxu1 %v5295_v43  ;;  %v5367_v43 = vld [vmem:[%s6967_s3 + $0x30c] ss:$24 sps:$4 sm:$0xff]  }
0x10ce   : > { %4144 = vmatpush1.bf16.msra.mxu0 %v5257_v0  ;;  %v5346_v0 = vld [vmem:[%s6967_s3 + $0x874] ss:$24 sps:$4 sm:$0xff]  }
0x10cf   : > { %4145 = vmatprep.subr.bf16.mxu0 %v5262_v29 }
0x10d0   : > { %4191 = vmatpush1.bf16.msra.mxu1 %v5293_v46 }
0x10d1   : > { %4192 = vmatprep.subr.bf16.mxu1 %v5301_v48 }
0x10d2   : > { %4146 = vmatpush1.bf16.msra.mxu0 %v5260_v32 }
0x10d3   : > { %4147 = vmatprep.subr.bf16.mxu0 %v5265_v34 }
0x10d4   : > { %4193 = vmatpush1.bf16.msra.mxu1 %v5299_v50 }
0x10d5   : > { %4194 = vmatprep.subr.bf16.mxu1 %v5307_v52 }
0x10d6   : > { %4148 = vmatpush1.bf16.msra.mxu0 %v5263_v36  ;;  %v5358_v36 = vld [vmem:[%s6967_s3 + $0x8d4] ss:$24 sps:$4 sm:$0xff]  }
0x10d7   : > { %4149 = vmatprep.subr.bf16.mxu0 %v5268_v39  ;;  %v5356_v39 = vld [vmem:[%s6967_s3 + $0x8d0] ss:$24 sps:$4 sm:$0xff]  }
0x10d8   : > { %4195 = vmatpush1.bf16.msra.mxu1 %v5305_v54 }
0x10d9   : > { %4196 = vmatprep.subr.bf16.mxu1 %v5313_v16 }
0x10da   : > { %4150 = vmatpush1.bf16.msra.mxu0 %v5266_v42 }
0x10db   : > { %4151 = vmatprep.subr.bf16.mxu0 %v5274_v45 }
0x10dc   : > { %4197 = vmatpush1.bf16.msra.mxu1 %v5311_v57  ;;  %v5349_v57 = vld [vmem:[%s6967_s3 + $0x3c] ss:$24 sps:$4 sm:$0xff]  }
0x10dd   : > { %4198 = vmatprep.subr.bf16.mxu1 %v5319_v10  ;;  %v5361_v10 = vld [vmem:[%s6967_s3 + $0x9c] ss:$24 sps:$4 sm:$0xff]  }
0x10de   : > { %4152 = vmatpush1.bf16.msra.mxu0 %v5272_v47 }
0x10df   : > { %4153 = vmatprep.subr.bf16.mxu0 %v5280_v49 }
0x10e0   : > { %4199 = vmatpush1.bf16.msra.mxu1 %v5317_v62  ;;  %v5359_v62 = vld [vmem:[%s6967_s3 + $0x98] ss:$24 sps:$4 sm:$0xff]  }
0x10e1   : > { %4200 = vmatprep.subr.bf16.mxu1 %v5325_v44 }
0x10e2   : > { %4154 = vmatpush1.bf16.msra.mxu0 %v5278_v51 }
0x10e3   : > { %4155 = vmatprep.subr.bf16.mxu0 %v5286_v53 }
0x10e4   : > { %4201 = vmatpush1.bf16.msra.mxu1 %v5323_v20 }
0x10e5   : > { %4202 = vmatprep.subr.bf16.mxu1 %v5331_v2 }
0x10e6   : > { %4156 = vmatpush1.bf16.msra.mxu0 %v5284_v55 }
0x10e7   : > { %4157 = vmatprep.subr.bf16.mxu0 %v5292_v56  ;;  %v5341_v56 = vld [vmem:[%s6967_s3 + $0x8] ss:$24 sps:$4 sm:$0xff]  }
0x10e8   : > { %4203 = vmatpush1.bf16.msra.mxu1 %v5329_v4  ;;  %v5362_v4 = vld [vmem:[%s6967_s3 + $0xc8] ss:$24 sps:$4 sm:$0xff]  }
0x10e9   : > { %4204 = vmatprep.subr.bf16.mxu1 %v5337_v17  ;;  %v5377_v17 = vld [vmem:[%s6967_s3 + $0x368] ss:$24 sps:$4 sm:$0xff]  }
0x10ea   : > { %4158 = vmatpush1.bf16.msra.mxu0 %v5290_v58  ;;  %v5353_v58 = vld [vmem:[%s6967_s3 + $0x68] ss:$24 sps:$4 sm:$0xff]  }
0x10eb   : > { %4159 = vmatprep.subr.bf16.mxu0 %v5298_v59 }
0x10ec   : > { %4205 = vmatpush1.bf16.msra.mxu1 %v5335_v18  ;;  %v5385_v18 = vld [vmem:[%s6967_s3 + $0x39c] ss:$24 sps:$4 sm:$0xff]  }
0x10ed   : > { %4206 = vmatprep.subr.bf16.mxu1 %v5340_v21  ;;  %v5380_v21 = vld [vmem:[%s6967_s3 + $0x158] ss:$24 sps:$4 sm:$0xff]  }
0x10ee   : > { %4160 = vmatpush1.bf16.msra.mxu0 %v5296_v63 }
0x10ef   : > { %4161 = vmatprep.subr.bf16.mxu0 %v5304_v19  ;;  %v5364_v19 = vld [vmem:[%s6967_s3 + $0xcc] ss:$24 sps:$4 sm:$0xff]  }
0x10f0   : > { %4207 = vmatpush1.bf16.msra.mxu1 %v5338_v23  ;;  %v5388_v23 = vld [vmem:[%s6967_s3 + $0x18c] ss:$24 sps:$4 sm:$0xff]  }
0x10f1   : > { %4208 = vmatprep.subr.bf16.mxu1 %v5346_v0  ;;  %v5386_v0 = vld [vmem:[%s6967_s3 + $0x188] ss:$24 sps:$4 sm:$0xff]  }
0x10f2   : > { %4162 = vmatpush1.bf16.msra.mxu0 %v5302_v1 }
0x10f3   : > { %4163 = vmatprep.subr.bf16.mxu0 %v5310_v3 }
0x10f4   : > { %4209 = vmatpush1.bf16.msra.mxu1 %v5344_v24  ;;  %v5391_v24 = vld [vmem:[%s6967_s3 + $0x3cc] ss:$24 sps:$4 sm:$0xff]  }
0x10f5   : > { %4210 = vmatprep.subr.bf16.mxu1 %v5352_v31  ;;  %v5395_v31 = vld [vmem:[%s6967_s3 + $0x3f8] ss:$24 sps:$4 sm:$0xff]  }
0x10f6   : > { %4164 = vmatpush1.bf16.msra.mxu0 %v5308_v5  ;;  %v5365_v5 = vld [vmem:[%s6967_s3 + $0x308] ss:$24 sps:$4 sm:$0xff]  }
0x10f7   : > { %4165 = vmatprep.subr.bf16.mxu0 %v5316_v6  ;;  %v5370_v6 = vld [vmem:[%s6967_s3 + $0xfc] ss:$24 sps:$4 sm:$0xff]  }
0x10f8   : > { %4211 = vmatpush1.bf16.msra.mxu1 %v5350_v30  ;;  %v5392_v30 = vld [vmem:[%s6967_s3 + $0x1b8] ss:$24 sps:$4 sm:$0xff]  }
0x10f9   : > { %4212 = vmatprep.subr.bf16.mxu1 %v5358_v36  ;;  %v5401_v36 = vld [vmem:[%s6967_s3 + $0x428] ss:$24 sps:$4 sm:$0xff]  }
0x10fa   : > { %4166 = vmatpush1.bf16.msra.mxu0 %v5314_v8  ;;  %v5373_v8 = vld [vmem:[%s6967_s3 + $0x33c] ss:$24 sps:$4 sm:$0xff]  }
0x10fb   : > { %4167 = vmatprep.subr.bf16.mxu0 %v5322_v11  ;;  %v5368_v11 = vld [vmem:[%s6967_s3 + $0xf8] ss:$24 sps:$4 sm:$0xff]  }
0x10fc   : > { %4213 = vmatpush1.bf16.msra.mxu1 %v5356_v39  ;;  %v5409_v39 = vld [vmem:[%s6967_s3 + $0x45c] ss:$24 sps:$4 sm:$0xff]  }
0x10fd   : > { %4264 = vmatprep.subr.bf16.mxu1 %v5367_v43  ;;  %v5412_v43 = vld [vmem:[%s6967_s3 + $0x24c] ss:$24 sps:$4 sm:$0xff]  }
0x10fe   : > { %4168 = vmatpush1.bf16.msra.mxu0 %v5320_v14  ;;  %v5371_v14 = vld [vmem:[%s6967_s3 + $0x338] ss:$24 sps:$4 sm:$0xff]  }
0x10ff   : > { %4169 = vmatprep.subr.bf16.mxu0 %v5328_v15  ;;  %v5376_v15 = vld [vmem:[%s6967_s3 + $0x12c] ss:$24 sps:$4 sm:$0xff]  }
0x1102   : > { %4170 = vmatpush1.bf16.msra.mxu0 %v5326_v26  ;;  %v5379_v26 = vld [vmem:[%s6967_s3 + $0x36c] ss:$24 sps:$4 sm:$0xff]  }
0x1103   : > { %4171 = vmatprep.subr.bf16.mxu0 %v5334_v61  ;;  %v5374_v61 = vld [vmem:[%s6967_s3 + $0x128] ss:$24 sps:$4 sm:$0xff]  }
0x1106   : > { %4172 = vmatpush1.bf16.msra.mxu0 %v5332_v27  ;;  %v5382_v27 = vld [vmem:[%s6967_s3 + $0x15c] ss:$24 sps:$4 sm:$0xff]  }
0x1107   : > { %4223 = vmatprep.subr.bf16.mxu0 %v5343_v22  ;;  %v5383_v22 = vld [vmem:[%s6967_s3 + $0x398] ss:$24 sps:$4 sm:$0xff]  }
0x118c   : > { %v1646_v25 = vpop.f32.mrb[30].mxu0 }
0x118d   : > { %v5196_v28 = vpack.i.bf16 %v5890_v60, %v1646_v25  ;;  %v5137_v29 = vpop.f32.mrb[31].mxu0  ;;  %v5389_v25 = vld [vmem:[%s6967_s3 + $0x3c8] ss:$24 sps:$4 sm:$0xff]  }
0x118e   : > { %v5397_v29 = vld [vmem:[%s6967_s3 + $0x3fc] ss:$24 sps:$4 sm:$0xff]  }
0x118f   : > { %5197 = vrot.lane.b32.xlu1 %v5196_v28, %s5698_s10  ;;  %v5394_v28 = vld [vmem:[%s6967_s3 + $0x1bc] ss:$24 sps:$4 sm:$0xff]  }
0x1190   : > { %v1807_v32 = vpop.f32.mrb[32].mxu0 }
0x1191   : > { %v6292_v33 = vpop.f32.mrb[8].mxu1  ;;  %v5147_v34 = vpop.f32.mrb[33].mxu0 }
0x1192   : > { %v6294_v35 = vpop.f32.mrb[9].mxu1  ;;  %v5403_v34 = vld [vmem:[%s6967_s3 + $0x42c] ss:$24 sps:$4 sm:$0xff]  }
0x1193   : > { %v4138_v60 = vpop.f32.mrb[10].mxu1 }
0x1194   : > { %v4139_v37 = vpop.f32.mrb[11].mxu1  ;;  %v1973_v41 = vpop.f32.mrb[34].mxu0  ;;  %v5398_v60 = vld [vmem:[%s6967_s3 + $0x1e8] ss:$24 sps:$4 sm:$0xff]  }
0x1195   : > { %v5157_v42 = vpop.f32.mrb[35].mxu0  ;;  %v5406_v37 = vld [vmem:[%s6967_s3 + $0x21c] ss:$24 sps:$4 sm:$0xff]  }
0x1196   : > { %v5407_v42 = vld [vmem:[%s6967_s3 + $0x458] ss:$24 sps:$4 sm:$0xff]  }
0x1198   : > { %v2134_v45 = vpop.f32.mrb[36].mxu0 }
0x1199   : > { %v5167_v46 = vpop.f32.mrb[37].mxu0 }
0x119a   : > { %v5410_v46 = vld [vmem:[%s6967_s3 + $0x248] ss:$24 sps:$4 sm:$0xff]  }
0x119c   : > { %v2300_v47 = vpop.f32.mrb[38].mxu0 }
0x119d   : > { %v5201_v48 = vpack.i.bf16 %v1973_v41, %v2300_v47  ;;  %v5177_v49 = vpop.f32.mrb[39].mxu0  ;;  %v5404_v41 = vld [vmem:[%s6967_s3 + $0x218] ss:$24 sps:$4 sm:$0xff]   ;;  %v5413_v47 = vld [vmem:[%s6967_s3 + $0x488] ss:$24 sps:$4 sm:$0xff]  }
0x119e   : > { %v5421_v49 = vld [vmem:[%s6967_s3 + $0x4bc] ss:$24 sps:$4 sm:$0xff]  }
0x119f   : > { %5202 = vrot.lane.b32.xlu0 %v5201_v48, %s5698_s10  ;;  %v5418_v48 = vld [vmem:[%s6967_s3 + $0x27c] ss:$24 sps:$4 sm:$0xff]   ;;  %s5179_s10 = smul.u32 48, %s6973_s25 }
0x11a1   : > { %s307_s29 = scalar_lea.vmem %s6966_s2, %s5179_s10  ;;  %s312_s22 = scalar_lea.vmem %s6971_s7, %s5179_s10 }
0x1201   : > { %v5198_v50 = vpop.permute.xlu1 %5197 }
0x1202   : > { %v5200_v51 = vunpack.i.h.bf16 %v5198_v50  ;;  %v5199_v52 = vunpack.i.l.bf16 %v5198_v50  ;;  %v5416_v50 = vld [vmem:[%s6967_s3 + $0x278] ss:$24 sps:$4 sm:$0xff]  }
0x1204   : > { %v2330_v53 = vsel %vm341_vm1, %v5865_v38, %v5200_v51  ;;  %v2331_v54 = vsel %vm341_vm1, %v5933_v40, %v5199_v52  ;;  %v5347_v38 = vld [vmem:[%s6967_s3 + $0x38] ss:$24 sps:$4 sm:$0xff]   ;;  %v5355_v40 = vld [vmem:[%s6967_s3 + $0x6c] ss:$24 sps:$4 sm:$0xff]  }
0x1205   : > { %v6310_v55 = vpack.c.bf16 %v2330_v53, %v2330_v53  ;;  %v6312_v16 = vpack.c.bf16 %v2331_v54, %v2331_v54  ;;  %v5419_v51 = vld [vmem:[%s6967_s3 + $0x4b8] ss:$24 sps:$4 sm:$0xff]   ;;  %v5424_v52 = vld [vmem:[%s6967_s3 + $0x2ac] ss:$24 sps:$4 sm:$0xff]   ;;  %v5422_v54 = vld [vmem:[%s6967_s3 + $0x2a8] ss:$24 sps:$4 sm:$0xff]  }
0x1206   : > { %v5427_v53 = vld [vmem:[%s6967_s3 + $0x4ec] ss:$24 sps:$4 sm:$0xff]  }
0x1207   : > { %4173 = vmatprep.mubr.bf16.mxu0 %v6312_v16 }
0x1208   : > { %4174 = vmatmul.mubr.bf16.vlgmr.msra.gmra.mrb[40].mxu0 %v6310_v55 }
0x1209   : > { %4224 = vmatpush1.bf16.msra.mxu0 %v5341_v56  ;;  %4255 = vmatprep.mubr.bf16.mxu0 %v6080_v13  ;;  %v5425_v56 = vld [vmem:[%s6967_s3 + $0x4e8] ss:$24 sps:$4 sm:$0xff]  }
0x120a   : > { %4225 = vmatprep.subr.bf16.mxu0 %v5349_v57  ;;  %v5430_v57 = vld [vmem:[%s6967_s3 + $0x2dc] ss:$24 sps:$4 sm:$0xff]  }
0x120d   : > { %4226 = vmatpush1.bf16.msra.mxu0 %v5347_v38  ;;  %v5433_v38 = vld [vmem:[%s6967_s3 + $0x51c] ss:$24 sps:$4 sm:$0xff]  }
0x120e   : > { %4227 = vmatprep.subr.bf16.mxu0 %v5355_v40  ;;  %v5428_v40 = vld [vmem:[%s6967_s3 + $0x2d8] ss:$24 sps:$4 sm:$0xff]  }
0x1211   : > { %4228 = vmatpush1.bf16.msra.mxu0 %v5353_v58  ;;  %v5203_v59 = vpop.permute.xlu0 %5202  ;;  %v5431_v58 = vld [vmem:[%s6967_s3 + $0x518] ss:$24 sps:$4 sm:$0xff]  }
0x1212   : > { %v5205_v63 = vunpack.i.h.bf16 %v5203_v59  ;;  %v5204_v44 = vunpack.i.l.bf16 %v5203_v59  ;;  %4229 = vmatprep.subr.bf16.mxu0 %v5361_v10  ;;  %v5436_v10 = vld [vmem:[%s6967_s3 + $0x54c] ss:$24 sps:$4 sm:$0xff]  }
0x1213   : > { %v5439_v59 = vld [vmem:[%s6967_s3 + $0x60c] ss:$24 sps:$4 sm:$0xff]  }
0x1214   : > { %v2332_v20 = vsel %vm341_vm1, %v1807_v32, %v5205_v63  ;;  %v2333_v1 = vsel %vm341_vm1, %v2134_v45, %v5204_v44  ;;  %v5400_v32 = vld [vmem:[%s6967_s3 + $0x1ec] ss:$24 sps:$4 sm:$0xff]   ;;  %v5437_v63 = vld [vmem:[%s6967_s3 + $0x608] ss:$24 sps:$4 sm:$0xff]   ;;  %v5442_v44 = vld [vmem:[%s6967_s3 + $0x57c] ss:$24 sps:$4 sm:$0xff]  }
0x1215   : > { %v6343_v2 = vpack.c.bf16 %v2332_v20, %v2332_v20  ;;  %4230 = vmatpush1.bf16.msra.mxu0 %v5359_v62  ;;  %v6345_v3 = vpack.c.bf16 %v2333_v1, %v2333_v1  ;;  %v5415_v45 = vld [vmem:[%s6967_s3 + $0x48c] ss:$24 sps:$4 sm:$0xff]   ;;  %v5434_v62 = vld [vmem:[%s6967_s3 + $0x548] ss:$24 sps:$4 sm:$0xff]   ;;  %v5440_v20 = vld [vmem:[%s6967_s3 + $0x578] ss:$24 sps:$4 sm:$0xff]  }
0x1216   : > { %4231 = vmatprep.subr.bf16.mxu0 %v5364_v19  ;;  %v5445_v19 = vld [vmem:[%s6967_s3 + $0x63c] ss:$24 sps:$4 sm:$0xff]   ;;  %v5443_v1 = vld [vmem:[%s6967_s3 + $0x638] ss:$24 sps:$4 sm:$0xff]  }
0x1217   : > { %4214 = vmatprep.mubr.bf16.mxu1 %v6345_v3 }
0x1218   : > { %4215 = vmatmul.mubr.bf16.vlgmr.msra.gmra.mrb[12].mxu1 %v6343_v2 }
0x1219   : > { %4232 = vmatpush1.bf16.msra.mxu0 %v5362_v4  ;;  %4265 = vmatpush1.bf16.msra.mxu1 %v5365_v5  ;;  %v5448_v4 = vld [vmem:[%s6967_s3 + $0x5ac] ss:$24 sps:$4 sm:$0xff]  }
0x121a   : > { %4296 = vmatprep.mubr.bf16.mxu1 %v6312_v16  ;;  %4233 = vmatprep.subr.bf16.mxu0 %v5370_v6  ;;  %v5451_v5 = vld [vmem:[%s6967_s3 + $0x66c] ss:$24 sps:$4 sm:$0xff]   ;;  %v5446_v6 = vld [vmem:[%s6967_s3 + $0x5a8] ss:$24 sps:$4 sm:$0xff]  }
0x121b   : > { %4266 = vmatprep.subr.bf16.mxu1 %v5373_v8  ;;  %v5449_v8 = vld [vmem:[%s6967_s3 + $0x668] ss:$24 sps:$4 sm:$0xff]  }
0x121d   : > { %4234 = vmatpush1.bf16.msra.mxu0 %v5368_v11  ;;  %4267 = vmatpush1.bf16.msra.mxu1 %v5371_v14  ;;  %v5454_v11 = vld [vmem:[%s6967_s3 + $0x5dc] ss:$24 sps:$4 sm:$0xff]  }
0x121e   : > { %4235 = vmatprep.subr.bf16.mxu0 %v5376_v15  ;;  %4268 = vmatprep.subr.bf16.mxu1 %v5379_v26  ;;  %v5457_v14 = vld [vmem:[%s6967_s3 + $0x69c] ss:$24 sps:$4 sm:$0xff]   ;;  %v5452_v15 = vld [vmem:[%s6967_s3 + $0x5d8] ss:$24 sps:$4 sm:$0xff]  }
0x121f   : > { %v5455_v26 = vld [vmem:[%s6967_s3 + $0x698] ss:$24 sps:$4 sm:$0xff]  }
0x1221   : > { %4236 = vmatpush1.bf16.msra.mxu0 %v5374_v61  ;;  %4269 = vmatpush1.bf16.msra.mxu1 %v5377_v17  ;;  %v5460_v61 = vld [vmem:[%s6967_s3 + $0x6cc] ss:$24 sps:$4 sm:$0xff]  }
0x1222   : > { %4237 = vmatprep.subr.bf16.mxu0 %v5382_v27  ;;  %4270 = vmatprep.subr.bf16.mxu1 %v5385_v18  ;;  %v5463_v17 = vld [vmem:[%s6967_s3 + $0x14] ss:$24 sps:$4 sm:$0xff]   ;;  %v5458_v27 = vld [vmem:[%s6967_s3 + $0x6c8] ss:$24 sps:$4 sm:$0xff]  }
0x1223   : > { %v5461_v18 = vld [vmem:[%s6967_s3 + $0x10] ss:$24 sps:$4 sm:$0xff]  }
0x1225   : > { %4238 = vmatpush1.bf16.msra.mxu0 %v5380_v21  ;;  %4271 = vmatpush1.bf16.msra.mxu1 %v5383_v22  ;;  %v5466_v21 = vld [vmem:[%s6967_s3 + $0x6fc] ss:$24 sps:$4 sm:$0xff]  }
0x1226   : > { %4239 = vmatprep.subr.bf16.mxu0 %v5388_v23  ;;  %4272 = vmatprep.subr.bf16.mxu1 %v5391_v24  ;;  %v5469_v22 = vld [vmem:[%s6967_s3 + $0x44] ss:$24 sps:$4 sm:$0xff]   ;;  %v5464_v23 = vld [vmem:[%s6967_s3 + $0x6f8] ss:$24 sps:$4 sm:$0xff]  }
0x1227   : > { %v5467_v24 = vld [vmem:[%s6967_s3 + $0x40] ss:$24 sps:$4 sm:$0xff]  }
0x1229   : > { %4240 = vmatpush1.bf16.msra.mxu0 %v5386_v0  ;;  %4273 = vmatpush1.bf16.msra.mxu1 %v5389_v25  ;;  %v5472_v0 = vld [vmem:[%s6967_s3 + $0x72c] ss:$24 sps:$4 sm:$0xff]  }
0x122a   : > { %4241 = vmatprep.subr.bf16.mxu0 %v5394_v28  ;;  %4274 = vmatprep.subr.bf16.mxu1 %v5397_v29  ;;  %v5475_v25 = vld [vmem:[%s6967_s3 + $0x74] ss:$24 sps:$4 sm:$0xff]   ;;  %v5470_v28 = vld [vmem:[%s6967_s3 + $0x728] ss:$24 sps:$4 sm:$0xff]  }
0x122b   : > { %v5478_v29 = vld [vmem:[%s6967_s3 + $0x75c] ss:$24 sps:$4 sm:$0xff]  }
0x122d   : > { %4242 = vmatpush1.bf16.msra.mxu0 %v5392_v30  ;;  %4275 = vmatpush1.bf16.msra.mxu1 %v5395_v31  ;;  %v5481_v30 = vld [vmem:[%s6967_s3 + $0xa4] ss:$24 sps:$4 sm:$0xff]   ;;  %v5476_v31 = vld [vmem:[%s6967_s3 + $0x758] ss:$24 sps:$4 sm:$0xff]  }
0x122e   : > { %4243 = vmatprep.subr.bf16.mxu0 %v5400_v32  ;;  %4276 = vmatprep.subr.bf16.mxu1 %v5403_v34  ;;  %v5479_v32 = vld [vmem:[%s6967_s3 + $0xa0] ss:$24 sps:$4 sm:$0xff]   ;;  %v5484_v34 = vld [vmem:[%s6967_s3 + $0x78c] ss:$24 sps:$4 sm:$0xff]  }
0x1231   : > { %4244 = vmatpush1.bf16.msra.mxu0 %v5398_v60  ;;  %4277 = vmatpush1.bf16.msra.mxu1 %v5401_v36  ;;  %v5487_v60 = vld [vmem:[%s6967_s3 + $0xd4] ss:$24 sps:$4 sm:$0xff]   ;;  %v5482_v36 = vld [vmem:[%s6967_s3 + $0x788] ss:$24 sps:$4 sm:$0xff]  }
0x1232   : > { %4245 = vmatprep.subr.bf16.mxu0 %v5406_v37  ;;  %4278 = vmatprep.subr.bf16.mxu1 %v5409_v39  ;;  %v5485_v37 = vld [vmem:[%s6967_s3 + $0xd0] ss:$24 sps:$4 sm:$0xff]   ;;  %v5490_v39 = vld [vmem:[%s6967_s3 + $0x7bc] ss:$24 sps:$4 sm:$0xff]  }
0x1235   : > { %4246 = vmatpush1.bf16.msra.mxu0 %v5404_v41  ;;  %4279 = vmatpush1.bf16.msra.mxu1 %v5407_v42  ;;  %v5493_v41 = vld [vmem:[%s6967_s3 + $0x104] ss:$24 sps:$4 sm:$0xff]   ;;  %v5488_v42 = vld [vmem:[%s6967_s3 + $0x7b8] ss:$24 sps:$4 sm:$0xff]  }
0x1236   : > { %4247 = vmatprep.subr.bf16.mxu0 %v5412_v43  ;;  %4280 = vmatprep.subr.bf16.mxu1 %v5415_v45  ;;  %v5491_v43 = vld [vmem:[%s6967_s3 + $0x100] ss:$24 sps:$4 sm:$0xff]   ;;  %v5496_v45 = vld [vmem:[%s6967_s3 + $0x7ec] ss:$24 sps:$4 sm:$0xff]  }
0x1239   : > { %4248 = vmatpush1.bf16.msra.mxu0 %v5410_v46  ;;  %4281 = vmatpush1.bf16.msra.mxu1 %v5413_v47  ;;  %v5499_v46 = vld [vmem:[%s6967_s3 + $0x134] ss:$24 sps:$4 sm:$0xff]   ;;  %v5494_v47 = vld [vmem:[%s6967_s3 + $0x7e8] ss:$24 sps:$4 sm:$0xff]  }
0x123a   : > { %4249 = vmatprep.subr.bf16.mxu0 %v5418_v48  ;;  %4282 = vmatprep.subr.bf16.mxu1 %v5421_v49  ;;  %v5497_v48 = vld [vmem:[%s6967_s3 + $0x130] ss:$24 sps:$4 sm:$0xff]   ;;  %v5502_v49 = vld [vmem:[%s6967_s3 + $0x81c] ss:$24 sps:$4 sm:$0xff]  }
0x123d   : > { %4250 = vmatpush1.bf16.msra.mxu0 %v5416_v50  ;;  %4283 = vmatpush1.bf16.msra.mxu1 %v5419_v51  ;;  %v5505_v50 = vld [vmem:[%s6967_s3 + $0x164] ss:$24 sps:$4 sm:$0xff]   ;;  %v5500_v51 = vld [vmem:[%s6967_s3 + $0x818] ss:$24 sps:$4 sm:$0xff]  }
0x123e   : > { %4251 = vmatprep.subr.bf16.mxu0 %v5424_v52  ;;  %4284 = vmatprep.subr.bf16.mxu1 %v5427_v53  ;;  %v5503_v52 = vld [vmem:[%s6967_s3 + $0x160] ss:$24 sps:$4 sm:$0xff]   ;;  %v5508_v53 = vld [vmem:[%s6967_s3 + $0x84c] ss:$24 sps:$4 sm:$0xff]  }
0x1241   : > { %4252 = vmatpush1.bf16.msra.mxu0 %v5422_v54  ;;  %4285 = vmatpush1.bf16.msra.mxu1 %v5425_v56  ;;  %v5511_v54 = vld [vmem:[%s6967_s3 + $0x194] ss:$24 sps:$4 sm:$0xff]   ;;  %v5506_v56 = vld [vmem:[%s6967_s3 + $0x848] ss:$24 sps:$4 sm:$0xff]  }
0x1242   : > { %4253 = vmatprep.subr.bf16.mxu0 %v5430_v57  ;;  %4286 = vmatprep.subr.bf16.mxu1 %v5433_v38  ;;  %v5509_v57 = vld [vmem:[%s6967_s3 + $0x190] ss:$24 sps:$4 sm:$0xff]   ;;  %v5514_v38 = vld [vmem:[%s6967_s3 + $0x87c] ss:$24 sps:$4 sm:$0xff]  }
0x1245   : > { %4254 = vmatpush1.bf16.msra.mxu0 %v5428_v40  ;;  %4287 = vmatpush1.bf16.msra.mxu1 %v5431_v58  ;;  %v5517_v40 = vld [vmem:[%s6967_s3 + $0x1c4] ss:$24 sps:$4 sm:$0xff]   ;;  %v5512_v58 = vld [vmem:[%s6967_s3 + $0x878] ss:$24 sps:$4 sm:$0xff]  }
0x1246   : > { %4288 = vmatprep.subr.bf16.mxu1 %v5436_v10  ;;  %4305 = vmatprep.subr.bf16.mxu0 %v5439_v59  ;;  %v5515_v10 = vld [vmem:[%s6967_s3 + $0x1c0] ss:$24 sps:$4 sm:$0xff]   ;;  %v5520_v59 = vld [vmem:[%s6967_s3 + $0x8ac] ss:$24 sps:$4 sm:$0xff]  }
0x1248   : > { %4256 = vmatmul.mubr.bf16.vlgmr.msra.gmra.mrb[44].mxu0 %v6076_v12 }
0x1249   : > { %4289 = vmatpush1.bf16.msra.mxu1 %v5434_v62  ;;  %4306 = vmatpush1.bf16.msra.mxu0 %v5437_v63  ;;  %v5523_v62 = vld [vmem:[%s6967_s3 + $0x1f4] ss:$24 sps:$4 sm:$0xff]   ;;  %v5518_v63 = vld [vmem:[%s6967_s3 + $0x8a8] ss:$24 sps:$4 sm:$0xff]  }
0x124a   : > { %4337 = vmatprep.mubr.bf16.mxu0 %v6345_v3  ;;  %4290 = vmatprep.subr.bf16.mxu1 %v5442_v44  ;;  %v5521_v44 = vld [vmem:[%s6967_s3 + $0x1f0] ss:$24 sps:$4 sm:$0xff]  }
0x124b   : > { %4307 = vmatprep.subr.bf16.mxu0 %v5445_v19  ;;  %v5526_v19 = vld [vmem:[%s6967_s3 + $0x8dc] ss:$24 sps:$4 sm:$0xff]  }
0x124d   : > { %4291 = vmatpush1.bf16.msra.mxu1 %v5440_v20  ;;  %4308 = vmatpush1.bf16.msra.mxu0 %v5443_v1  ;;  %v5529_v20 = vld [vmem:[%s6967_s3 + $0x224] ss:$24 sps:$4 sm:$0xff]   ;;  %v5524_v1 = vld [vmem:[%s6967_s3 + $0x8d8] ss:$24 sps:$4 sm:$0xff]  }
0x124e   : > { %4292 = vmatprep.subr.bf16.mxu1 %v5448_v4  ;;  %4309 = vmatprep.subr.bf16.mxu0 %v5451_v5  ;;  %v5527_v4 = vld [vmem:[%s6967_s3 + $0x220] ss:$24 sps:$4 sm:$0xff]   ;;  %v5532_v5 = vld [vmem:[%s6967_s3 + $0x254] ss:$24 sps:$4 sm:$0xff]  }
0x1251   : > { %4293 = vmatpush1.bf16.msra.mxu1 %v5446_v6  ;;  %4310 = vmatpush1.bf16.msra.mxu0 %v5449_v8  ;;  %v5535_v6 = vld [vmem:[%s6967_s3 + $0x314] ss:$24 sps:$4 sm:$0xff]   ;;  %v5530_v8 = vld [vmem:[%s6967_s3 + $0x250] ss:$24 sps:$4 sm:$0xff]  }
0x1252   : > { %4294 = vmatprep.subr.bf16.mxu1 %v5454_v11  ;;  %4311 = vmatprep.subr.bf16.mxu0 %v5457_v14  ;;  %v5533_v11 = vld [vmem:[%s6967_s3 + $0x310] ss:$24 sps:$4 sm:$0xff]   ;;  %v5538_v14 = vld [vmem:[%s6967_s3 + $0x284] ss:$24 sps:$4 sm:$0xff]  }
0x1255   : > { %4295 = vmatpush1.bf16.msra.mxu1 %v5452_v15  ;;  %4312 = vmatpush1.bf16.msra.mxu0 %v5455_v26  ;;  %v5541_v15 = vld [vmem:[%s6967_s3 + $0x344] ss:$24 sps:$4 sm:$0xff]   ;;  %v5536_v26 = vld [vmem:[%s6967_s3 + $0x280] ss:$24 sps:$4 sm:$0xff]  }
0x1256   : > { %4313 = vmatprep.subr.bf16.mxu0 %v5460_v61  ;;  %4346 = vmatprep.subr.bf16.mxu1 %v5463_v17  ;;  %v5539_v61 = vld [vmem:[%s6967_s3 + $0x340] ss:$24 sps:$4 sm:$0xff]   ;;  %v5544_v17 = vld [vmem:[%s6967_s3 + $0x2b4] ss:$24 sps:$4 sm:$0xff]  }
0x1258   : > { %4297 = vmatmul.mubr.bf16.vlgmr.msra.gmra.mrb[16].mxu1 %v6310_v55 }
0x1259   : > { %4314 = vmatpush1.bf16.msra.mxu0 %v5458_v27  ;;  %4347 = vmatpush1.bf16.msra.mxu1 %v5461_v18  ;;  %v5547_v27 = vld [vmem:[%s6967_s3 + $0x374] ss:$24 sps:$4 sm:$0xff]   ;;  %v5542_v18 = vld [vmem:[%s6967_s3 + $0x2b0] ss:$24 sps:$4 sm:$0xff]  }
0x125a   : > { %4378 = vmatprep.mubr.bf16.mxu1 %v6080_v13  ;;  %4315 = vmatprep.subr.bf16.mxu0 %v5466_v21  ;;  %v5473_v13 = vld [vmem:[%s6967_s3 + $0x70] ss:$24 sps:$4 sm:$0xff]   ;;  %v5550_v21 = vld [vmem:[%s6967_s3 + $0x2e4] ss:$24 sps:$4 sm:$0xff]  }
0x125b   : > { %4348 = vmatprep.subr.bf16.mxu1 %v5469_v22  ;;  %v5553_v22 = vld [vmem:[%s6967_s3 + $0x3a4] ss:$24 sps:$4 sm:$0xff]  }
0x125d   : > { %4316 = vmatpush1.bf16.msra.mxu0 %v5464_v23  ;;  %4349 = vmatpush1.bf16.msra.mxu1 %v5467_v24  ;;  %v5548_v23 = vld [vmem:[%s6967_s3 + $0x2e0] ss:$24 sps:$4 sm:$0xff]  }
0x125e   : > { %4317 = vmatprep.subr.bf16.mxu0 %v5472_v0  ;;  %4350 = vmatprep.subr.bf16.mxu1 %v5475_v25  ;;  %v5551_v24 = vld [vmem:[%s6967_s3 + $0x3a0] ss:$24 sps:$4 sm:$0xff]   ;;  %v5556_v0 = vld [vmem:[%s6967_s3 + $0x3d4] ss:$24 sps:$4 sm:$0xff]  }
0x125f   : > { %v5559_v25 = vld [vmem:[%s6967_s3 + $0x614] ss:$24 sps:$4 sm:$0xff]  }
0x1261   : > { %4318 = vmatpush1.bf16.msra.mxu0 %v5470_v28  ;;  %4351 = vmatpush1.bf16.msra.mxu1 %v5473_v13  ;;  %v5554_v28 = vld [vmem:[%s6967_s3 + $0x3d0] ss:$24 sps:$4 sm:$0xff]  }
0x1262   : > { %4319 = vmatprep.subr.bf16.mxu0 %v5478_v29  ;;  %4352 = vmatprep.subr.bf16.mxu1 %v5481_v30  ;;  %v5557_v13 = vld [vmem:[%s6967_s3 + $0x610] ss:$24 sps:$4 sm:$0xff]   ;;  %v5562_v29 = vld [vmem:[%s6967_s3 + $0x404] ss:$24 sps:$4 sm:$0xff]  }
0x1263   : > { %v5565_v30 = vld [vmem:[%s6967_s3 + $0x644] ss:$24 sps:$4 sm:$0xff]  }
0x1265   : > { %4320 = vmatpush1.bf16.msra.mxu0 %v5476_v31  ;;  %4353 = vmatpush1.bf16.msra.mxu1 %v5479_v32  ;;  %v5560_v31 = vld [vmem:[%s6967_s3 + $0x400] ss:$24 sps:$4 sm:$0xff]  }
0x1266   : > { %4321 = vmatprep.subr.bf16.mxu0 %v5484_v34  ;;  %4354 = vmatprep.subr.bf16.mxu1 %v5487_v60  ;;  %v5563_v32 = vld [vmem:[%s6967_s3 + $0x640] ss:$24 sps:$4 sm:$0xff]   ;;  %v5568_v34 = vld [vmem:[%s6967_s3 + $0x434] ss:$24 sps:$4 sm:$0xff]   ;;  %v5566_v60 = vld [vmem:[%s6967_s3 + $0x430] ss:$24 sps:$4 sm:$0xff]  }
0x1269   : > { %4322 = vmatpush1.bf16.msra.mxu0 %v5482_v36  ;;  %4355 = vmatpush1.bf16.msra.mxu1 %v5485_v37  ;;  %v5574_v36 = vld [vmem:[%s6967_s3 + $0x464] ss:$24 sps:$4 sm:$0xff]  }
0x126a   : > { %4323 = vmatprep.subr.bf16.mxu0 %v5490_v39  ;;  %4356 = vmatprep.subr.bf16.mxu1 %v5493_v41  ;;  %v5577_v37 = vld [vmem:[%s6967_s3 + $0x6a4] ss:$24 sps:$4 sm:$0xff]   ;;  %v5572_v39 = vld [vmem:[%s6967_s3 + $0x460] ss:$24 sps:$4 sm:$0xff]  }
0x126b   : > { %v5575_v41 = vld [vmem:[%s6967_s3 + $0x6a0] ss:$24 sps:$4 sm:$0xff]  }
0x126d   : > { %4324 = vmatpush1.bf16.msra.mxu0 %v5488_v42  ;;  %4357 = vmatpush1.bf16.msra.mxu1 %v5491_v43  ;;  %v5580_v42 = vld [vmem:[%s6967_s3 + $0x494] ss:$24 sps:$4 sm:$0xff]  }
0x126e   : > { %4325 = vmatprep.subr.bf16.mxu0 %v5496_v45  ;;  %4358 = vmatprep.subr.bf16.mxu1 %v5499_v46  ;;  %v5583_v43 = vld [vmem:[%s6967_s3 + $0x6d4] ss:$24 sps:$4 sm:$0xff]   ;;  %v5578_v45 = vld [vmem:[%s6967_s3 + $0x490] ss:$24 sps:$4 sm:$0xff]  }
0x126f   : > { %v5581_v46 = vld [vmem:[%s6967_s3 + $0x6d0] ss:$24 sps:$4 sm:$0xff]  }
0x1271   : > { %4326 = vmatpush1.bf16.msra.mxu0 %v5494_v47  ;;  %4359 = vmatpush1.bf16.msra.mxu1 %v5497_v48  ;;  %v5586_v47 = vld [vmem:[%s6967_s3 + $0x4c4] ss:$24 sps:$4 sm:$0xff]  }
0x1272   : > { %4327 = vmatprep.subr.bf16.mxu0 %v5502_v49  ;;  %4360 = vmatprep.subr.bf16.mxu1 %v5505_v50  ;;  %v5589_v48 = vld [vmem:[%s6967_s3 + $0x704] ss:$24 sps:$4 sm:$0xff]   ;;  %v5584_v49 = vld [vmem:[%s6967_s3 + $0x4c0] ss:$24 sps:$4 sm:$0xff]  }
0x1273   : > { %v5587_v50 = vld [vmem:[%s6967_s3 + $0x700] ss:$24 sps:$4 sm:$0xff]  }
0x1275   : > { %4328 = vmatpush1.bf16.msra.mxu0 %v5500_v51  ;;  %4361 = vmatpush1.bf16.msra.mxu1 %v5503_v52  ;;  %v5592_v51 = vld [vmem:[%s6967_s3 + $0x4f4] ss:$24 sps:$4 sm:$0xff]  }
0x1276   : > { %4329 = vmatprep.subr.bf16.mxu0 %v5508_v53  ;;  %4362 = vmatprep.subr.bf16.mxu1 %v5511_v54  ;;  %v5595_v52 = vld [vmem:[%s6967_s3 + $0x734] ss:$24 sps:$4 sm:$0xff]   ;;  %v5590_v53 = vld [vmem:[%s6967_s3 + $0x4f0] ss:$24 sps:$4 sm:$0xff]  }
0x1277   : > { %v5593_v54 = vld [vmem:[%s6967_s3 + $0x730] ss:$24 sps:$4 sm:$0xff]  }
0x1279   : > { %4330 = vmatpush1.bf16.msra.mxu0 %v5506_v56  ;;  %4363 = vmatpush1.bf16.msra.mxu1 %v5509_v57  ;;  %v5598_v56 = vld [vmem:[%s6967_s3 + $0x524] ss:$24 sps:$4 sm:$0xff]  }
0x127a   : > { %4331 = vmatprep.subr.bf16.mxu0 %v5514_v38  ;;  %4364 = vmatprep.subr.bf16.mxu1 %v5517_v40  ;;  %v5601_v57 = vld [vmem:[%s6967_s3 + $0x764] ss:$24 sps:$4 sm:$0xff]   ;;  %v5596_v38 = vld [vmem:[%s6967_s3 + $0x520] ss:$24 sps:$4 sm:$0xff]  }
0x127b   : > { %v5599_v40 = vld [vmem:[%s6967_s3 + $0x760] ss:$24 sps:$4 sm:$0xff]  }
0x127d   : > { %4332 = vmatpush1.bf16.msra.mxu0 %v5512_v58  ;;  %4365 = vmatpush1.bf16.msra.mxu1 %v5515_v10  ;;  %v5604_v58 = vld [vmem:[%s6967_s3 + $0x554] ss:$24 sps:$4 sm:$0xff]  }
0x127e   : > { %4333 = vmatprep.subr.bf16.mxu0 %v5520_v59  ;;  %4366 = vmatprep.subr.bf16.mxu1 %v5523_v62  ;;  %v5607_v10 = vld [vmem:[%s6967_s3 + $0x794] ss:$24 sps:$4 sm:$0xff]   ;;  %v5602_v59 = vld [vmem:[%s6967_s3 + $0x550] ss:$24 sps:$4 sm:$0xff]  }
0x127f   : > { %v5605_v62 = vld [vmem:[%s6967_s3 + $0x790] ss:$24 sps:$4 sm:$0xff]  }
0x1281   : > { %4334 = vmatpush1.bf16.msra.mxu0 %v5518_v63  ;;  %4367 = vmatpush1.bf16.msra.mxu1 %v5521_v44  ;;  %v5610_v63 = vld [vmem:[%s6967_s3 + $0x584] ss:$24 sps:$4 sm:$0xff]  }
0x1282   : > { %4335 = vmatprep.subr.bf16.mxu0 %v5526_v19  ;;  %4368 = vmatprep.subr.bf16.mxu1 %v5529_v20  ;;  %v5613_v44 = vld [vmem:[%s6967_s3 + $0x7c4] ss:$24 sps:$4 sm:$0xff]   ;;  %v5608_v19 = vld [vmem:[%s6967_s3 + $0x580] ss:$24 sps:$4 sm:$0xff]  }
0x1283   : > { %v5611_v20 = vld [vmem:[%s6967_s3 + $0x7c0] ss:$24 sps:$4 sm:$0xff]  }
0x1285   : > { %4336 = vmatpush1.bf16.msra.mxu0 %v5524_v1  ;;  %4369 = vmatpush1.bf16.msra.mxu1 %v5527_v4  ;;  %v5616_v1 = vld [vmem:[%s6967_s3 + $0x5b4] ss:$24 sps:$4 sm:$0xff]  }
0x1286   : > { %4370 = vmatprep.subr.bf16.mxu1 %v5532_v5  ;;  %4387 = vmatprep.subr.bf16.mxu0 %v5535_v6  ;;  %v5619_v4 = vld [vmem:[%s6967_s3 + $0x7f4] ss:$24 sps:$4 sm:$0xff]   ;;  %v5614_v5 = vld [vmem:[%s6967_s3 + $0x5b0] ss:$24 sps:$4 sm:$0xff]  }
0x1287   : > { %v5617_v6 = vld [vmem:[%s6967_s3 + $0x7f0] ss:$24 sps:$4 sm:$0xff]  }
0x1288   : > { %4338 = vmatmul.mubr.bf16.vlgmr.msra.gmra.mrb[48].mxu0 %v6343_v2 }
0x1289   : > { %4371 = vmatpush1.bf16.msra.mxu1 %v5530_v8  ;;  %4388 = vmatpush1.bf16.msra.mxu0 %v5533_v11  ;;  %v5622_v8 = vld [vmem:[%s6967_s3 + $0x5e4] ss:$24 sps:$4 sm:$0xff]  }
0x128a   : > { %4419 = vmatprep.mubr.bf16.mxu0 %v6312_v16  ;;  %4372 = vmatprep.subr.bf16.mxu1 %v5538_v14  ;;  %v5545_v16 = vld [vmem:[%s6967_s3 + $0x370] ss:$24 sps:$4 sm:$0xff]   ;;  %v5625_v11 = vld [vmem:[%s6967_s3 + $0x824] ss:$24 sps:$4 sm:$0xff]   ;;  %v5620_v14 = vld [vmem:[%s6967_s3 + $0x5e0] ss:$24 sps:$4 sm:$0xff]  }
0x128b   : > { %4389 = vmatprep.subr.bf16.mxu0 %v5541_v15  ;;  %v5623_v15 = vld [vmem:[%s6967_s3 + $0x820] ss:$24 sps:$4 sm:$0xff]  }
0x128d   : > { %4373 = vmatpush1.bf16.msra.mxu1 %v5536_v26  ;;  %4390 = vmatpush1.bf16.msra.mxu0 %v5539_v61  ;;  %v5628_v26 = vld [vmem:[%s6967_s3 + $0x854] ss:$24 sps:$4 sm:$0xff]   ;;  %v5626_v61 = vld [vmem:[%s6967_s3 + $0x850] ss:$24 sps:$4 sm:$0xff]  }
0x128e   : > { %4374 = vmatprep.subr.bf16.mxu1 %v5544_v17  ;;  %4391 = vmatprep.subr.bf16.mxu0 %v5547_v27  ;;  %v5631_v17 = vld [vmem:[%s6967_s3 + $0x884] ss:$24 sps:$4 sm:$0xff]   ;;  %v5629_v27 = vld [vmem:[%s6967_s3 + $0x880] ss:$24 sps:$4 sm:$0xff]  }
0x1291   : > { %4375 = vmatpush1.bf16.msra.mxu1 %v5542_v18  ;;  %4392 = vmatpush1.bf16.msra.mxu0 %v5545_v16  ;;  %v5634_v18 = vld [vmem:[%s6967_s3 + $0x8b4] ss:$24 sps:$4 sm:$0xff]   ;;  %v5632_v16 = vld [vmem:[%s6967_s3 + $0x8b0] ss:$24 sps:$4 sm:$0xff]  }
0x1292   : > { %4376 = vmatprep.subr.bf16.mxu1 %v5550_v21  ;;  %4393 = vmatprep.subr.bf16.mxu0 %v5553_v22  ;;  %v5635_v21 = vld [vmem:[%s6967_s3 + $0x8e0] ss:$24 sps:$4 sm:$0xff]  }
0x1293   : > { %v2628_v22 = vld [vmem:[%s6968_s4] sm:$0x3f] }
0x1295   : > { %4377 = vmatpush1.bf16.msra.mxu1 %v5548_v23  ;;  %4394 = vmatpush1.bf16.msra.mxu0 %v5551_v24  ;;  %v6909_v23 = vsub.s32 1, %v5772_v7  ;;  %v2633_v24 = vrot.slane %v2628_v22, %v5775_v9 }
0x1296   : > { %4395 = vmatprep.subr.bf16.mxu0 %v5556_v0  ;;  %4428 = vmatprep.subr.bf16.mxu1 %v5559_v25 }
0x1297   : > { %v2637_v0 = vrot.slane %v2628_v22, %v6909_v23  ;;  %v4135_v25 = vadd.f32 %v6292_v33, %v2633_v24  ;;  %v6917_v33 = vsub.s32 2, %v5772_v7 }
0x1298   : > { %4379 = vmatmul.mubr.bf16.vlgmr.msra.gmra.mrb[20].mxu1 %v6076_v12  ;;  %v5571_v12 = vld [vmem:[%s6967_s3 + $0x674] ss:$24 sps:$4 sm:$0xff]  }
0x1299   : > { %4396 = vmatpush1.bf16.msra.mxu0 %v5554_v28  ;;  %4429 = vmatpush1.bf16.msra.mxu1 %v5557_v13  ;;  %v4137_v28 = vadd.f32 %v6294_v35, %v2637_v0  ;;  %v6920_v35 = vsub.s32 3, %v5772_v7 }
0x129a   : > { %4460 = vmatprep.mubr.bf16.mxu1 %v6345_v3  ;;  %4397 = vmatprep.subr.bf16.mxu0 %v5562_v29  ;;  %v5569_v3 = vld [vmem:[%s6967_s3 + $0x670] ss:$24 sps:$4 sm:$0xff]  }
0x129b   : > { %4430 = vmatprep.subr.bf16.mxu1 %v5565_v30 }
0x129d   : > { %4398 = vmatpush1.bf16.msra.mxu0 %v5560_v31  ;;  %4431 = vmatpush1.bf16.msra.mxu1 %v5563_v32 }
0x129e   : > { %4399 = vmatprep.subr.bf16.mxu0 %v5568_v34  ;;  %4432 = vmatprep.subr.bf16.mxu1 %v5571_v12 }
0x12a1   : > { %4400 = vmatpush1.bf16.msra.mxu0 %v5566_v60  ;;  %4433 = vmatpush1.bf16.msra.mxu1 %v5569_v3 }
0x12a2   : > { %4401 = vmatprep.subr.bf16.mxu0 %v5574_v36  ;;  %4434 = vmatprep.subr.bf16.mxu1 %v5577_v37 }
0x12a5   : > { %4402 = vmatpush1.bf16.msra.mxu0 %v5572_v39  ;;  %4435 = vmatpush1.bf16.msra.mxu1 %v5575_v41 }
0x12a6   : > { %4403 = vmatprep.subr.bf16.mxu0 %v5580_v42  ;;  %4436 = vmatprep.subr.bf16.mxu1 %v5583_v43 }
0x12a9   : > { %4404 = vmatpush1.bf16.msra.mxu0 %v5578_v45  ;;  %4437 = vmatpush1.bf16.msra.mxu1 %v5581_v46  ;;  %v2641_v45 = vrot.slane %v2628_v22, %v6917_v33  ;;  %v2645_v46 = vrot.slane %v2628_v22, %v6920_v35 }
0x12aa   : > { %4405 = vmatprep.subr.bf16.mxu0 %v5586_v47  ;;  %4438 = vmatprep.subr.bf16.mxu1 %v5589_v48 }
0x12ad   : > { %4406 = vmatpush1.bf16.msra.mxu0 %v5584_v49  ;;  %4439 = vmatpush1.bf16.msra.mxu1 %v5587_v50 }
0x12ae   : > { %4407 = vmatprep.subr.bf16.mxu0 %v5592_v51  ;;  %4440 = vmatprep.subr.bf16.mxu1 %v5595_v52 }
0x12b1   : > { %4408 = vmatpush1.bf16.msra.mxu0 %v5590_v53  ;;  %4441 = vmatpush1.bf16.msra.mxu1 %v5593_v54 }
0x12b2   : > { %4409 = vmatprep.subr.bf16.mxu0 %v5598_v56  ;;  %4442 = vmatprep.subr.bf16.mxu1 %v5601_v57 }
0x12b5   : > { %4410 = vmatpush1.bf16.msra.mxu0 %v5596_v38  ;;  %4443 = vmatpush1.bf16.msra.mxu1 %v5599_v40 }
0x12b6   : > { %4411 = vmatprep.subr.bf16.mxu0 %v5604_v58  ;;  %4444 = vmatprep.subr.bf16.mxu1 %v5607_v10 }
0x12b9   : > { %4412 = vmatpush1.bf16.msra.mxu0 %v5602_v59  ;;  %4445 = vmatpush1.bf16.msra.mxu1 %v5605_v62 }
0x12ba   : > { %4413 = vmatprep.subr.bf16.mxu0 %v5610_v63  ;;  %4446 = vmatprep.subr.bf16.mxu1 %v5613_v44 }
0x12bd   : > { %4414 = vmatpush1.bf16.msra.mxu0 %v5608_v19  ;;  %4447 = vmatpush1.bf16.msra.mxu1 %v5611_v20  ;;  %v6925_v19 = vsub.s32 4, %v5772_v7  ;;  %v6928_v20 = vsub.s32 5, %v5772_v7  ;;  %v4469_v7 = vld [vmem:[%s307_s29] sm:$0xff] }
0x12be   : > { %4415 = vmatprep.subr.bf16.mxu0 %v5616_v1  ;;  %4448 = vmatprep.subr.bf16.mxu1 %v5619_v4 }
0x12bf   : > { %v2649_v1 = vrot.slane %v2628_v22, %v6925_v19  ;;  %v2653_v4 = vrot.slane %v2628_v22, %v6928_v20 }
0x12c1   : > { %4416 = vmatpush1.bf16.msra.mxu0 %v5614_v5  ;;  %4449 = vmatpush1.bf16.msra.mxu1 %v5617_v6 }
0x12c2   : > { %4417 = vmatprep.subr.bf16.mxu0 %v5622_v8  ;;  %4450 = vmatprep.subr.bf16.mxu1 %v5625_v11 }
0x12c5   : > { %4418 = vmatpush1.bf16.msra.mxu0 %v5620_v14  ;;  %4451 = vmatpush1.bf16.msra.mxu1 %v5623_v15 }
0x12c6   : > { %4452 = vmatprep.subr.bf16.mxu1 %v5628_v26 }
0x12c8   : > { %4420 = vmatmul.mubr.bf16.vlgmr.msra.gmra.mrb[52].mxu0 %v6310_v55  ;;  %v5637_v55 = vld [vmem:[%s6967_s3 + $0x8e4] ss:$24 sps:$4 sm:$0xff]  }
0x12c9   : > { %4453 = vmatpush1.bf16.msra.mxu1 %v5626_v61 }
0x12ca   : > { %4454 = vmatprep.subr.bf16.mxu1 %v5631_v17  ;;  %v4470_v17 = vld [vmem:[%s307_s29 + $0x8] sm:$0xff] }
0x12cd   : > { %4455 = vmatpush1.bf16.msra.mxu1 %v5629_v27  ;;  %v4471_v27 = vld [vmem:[%s307_s29 + $0x10] sm:$0xff] }
0x12ce   : > { %4456 = vmatprep.subr.bf16.mxu1 %v5634_v18 }
0x12d1   : > { %4457 = vmatpush1.bf16.msra.mxu1 %v5632_v16 }
0x12d2   : > { %4458 = vmatprep.subr.bf16.mxu1 %v5637_v55 }
0x12d5   : > { %4459 = vmatpush1.bf16.msra.mxu1 %v5635_v21  ;;  %v4472_v21 = vld [vmem:[%s307_s29 + $0x18] sm:$0xff] }
0x12d8   : > { %4461 = vmatmul.mubr.bf16.vlgmr.msra.gmra.mrb[24].mxu1 %v6343_v2 }
0x12db   : > { %v4175_v13 = vpop.f32.mrb[40].mxu0 }
0x12dc   : > { %v4176_v29 = vadd.f32 %v4175_v13, %v4135_v25  ;;  %v4177_v30 = vpop.f32.mrb[41].mxu0 }
0x12dd   : > { %v4178_v31 = vadd.f32 %v4177_v30, %v4137_v28  ;;  %v4179_v32 = vpop.f32.mrb[42].mxu0  ;;  %v4473_v28 = vld [vmem:[%s307_s29 + $0x20] sm:$0xff]  ;;  %v4474_v30 = vld [vmem:[%s307_s29 + $0x28] sm:$0xff] }
0x12de   : > { %v4180_v34 = vpop.f32.mrb[43].mxu0 }
0x12eb   : > { %v4216_v12 = vpop.f32.mrb[12].mxu1 }
0x12ec   : > { %v4217_v60 = vadd.f32 %v4216_v12, %v4176_v29  ;;  %v4218_v3 = vpop.f32.mrb[13].mxu1 }
0x12ed   : > { %v4219_v36 = vadd.f32 %v4218_v3, %v4178_v31  ;;  %v4220_v37 = vpop.f32.mrb[14].mxu1 }
0x12ee   : > { %v4221_v39 = vpop.f32.mrb[15].mxu1  ;;  %v4475_v18 = vadd.f32 %v4469_v7, %v4217_v60 }
0x12ef   : > { %v4476_v16 = vadd.f32 %v4470_v17, %v4219_v36 }
0x12f1   : > { %v4483_v22 = vadd.f32 %v4476_v16, %v4475_v18 }
0x131b   : > { %v4257_v41 = vpop.f32.mrb[44].mxu0 }
0x131c   : > { %v4259_v42 = vpop.f32.mrb[45].mxu0  ;;  %v4258_v47 = vadd.f32 %v4257_v41, %v2641_v45 }
0x131d   : > { %v4261_v43 = vpop.f32.mrb[46].mxu0  ;;  %v4260_v48 = vadd.f32 %v4259_v42, %v2645_v46 }
0x131e   : > { %v4262_v2 = vpop.f32.mrb[47].mxu0 }
0x132b   : > { %v4298_v49 = vpop.f32.mrb[16].mxu1 }
0x132c   : > { %v4299_v50 = vadd.f32 %v4298_v49, %v4258_v47  ;;  %v4300_v51 = vpop.f32.mrb[17].mxu1 }
0x132d   : > { %v4301_v52 = vadd.f32 %v4300_v51, %v4260_v48  ;;  %v4302_v53 = vpop.f32.mrb[18].mxu1 }
0x132e   : > { %v4303_v54 = vpop.f32.mrb[19].mxu1 }
0x135b   : > { %v4339_v56 = vpop.f32.mrb[48].mxu0 }
0x135c   : > { %v4340_v57 = vadd.f32 %v4339_v56, %v4299_v50  ;;  %v4341_v38 = vpop.f32.mrb[49].mxu0 }
0x135d   : > { %v4342_v40 = vadd.f32 %v4341_v38, %v4301_v52  ;;  %v4343_v58 = vpop.f32.mrb[50].mxu0 }
0x135e   : > { %v4344_v10 = vpop.f32.mrb[51].mxu0  ;;  %v4477_v55 = vadd.f32 %v4471_v27, %v4340_v57 }
0x135f   : > { %v4478_v0 = vadd.f32 %v4472_v21, %v4342_v40 }
0x1360   : > { %v4484_v24 = vadd.f32 %v4483_v22, %v4477_v55 }
0x1362   : > { %v4485_v34 = vadd.f32 %v4484_v24, %v4478_v0 }
0x136b   : > { %v4380_v59 = vpop.f32.mrb[20].mxu1 }
0x136c   : > { %v4382_v62 = vpop.f32.mrb[21].mxu1  ;;  %v4381_v5 = vadd.f32 %v4380_v59, %v2649_v1 }
0x136d   : > { %v4384_v63 = vpop.f32.mrb[22].mxu1  ;;  %v4383_v6 = vadd.f32 %v4382_v62, %v2653_v4  ;;  %v4481_v62 = vld [vmem:[%s6969_s5] sm:$0x3f] }
0x136e   : > { %v4385_v44 = vpop.f32.mrb[23].mxu1  ;;  %v4482_v63 = vld [vmem:[%s6970_s6] sm:$0x3f]  ;;  %v4528_v1 = vrot.slane %v4481_v62, %v6909_v23 }
0x136f   : > { %v4524_v44 = vrot.slane %v4481_v62, %v5775_v9  ;;  %v4561_v4 = vrot.slane %v4482_v63, %v5775_v9 }
0x139b   : > { %v4421_v8 = vpop.f32.mrb[52].mxu0 }
0x139c   : > { %v4422_v11 = vadd.f32 %v4421_v8, %v4381_v5  ;;  %v4423_v14 = vpop.f32.mrb[53].mxu0  ;;  %v4565_v5 = vrot.slane %v4482_v63, %v6909_v23  ;;  %v4536_v8 = vrot.slane %v4481_v62, %v6920_v35  ;;  %v4577_v23 = vrot.slane %v4482_v63, %v6925_v19 }
0x139d   : > { %v4424_v15 = vadd.f32 %v4423_v14, %v4383_v6  ;;  %v4425_v26 = vpop.f32.mrb[54].mxu0  ;;  %v4532_v6 = vrot.slane %v4481_v62, %v6917_v33  ;;  %v4569_v14 = vrot.slane %v4482_v63, %v6917_v33 }
0x139e   : > { %v4426_v61 = vpop.f32.mrb[55].mxu0  ;;  %v4540_v26 = vrot.slane %v4481_v62, %v6925_v19 }
0x139f   : > { %v4544_v61 = vrot.slane %v4481_v62, %v6928_v20 }
0x13ab   : > { %v4462_v25 = vpop.f32.mrb[24].mxu1 }
0x13ac   : > { %v4463_v13 = vadd.f32 %v4462_v25, %v4422_v11  ;;  %v4464_v29 = vpop.f32.mrb[25].mxu1 }
0x13ad   : > { %v4465_v31 = vadd.f32 %v4464_v29, %v4424_v15  ;;  %v4466_v32 = vpop.f32.mrb[26].mxu1  ;;  %v4573_v15 = vrot.slane %v4482_v63, %v6920_v35 }
0x13ae   : > { %v4479_v12 = vadd.f32 %v4473_v28, %v4463_v13  ;;  %v4467_v3 = vpop.f32.mrb[27].mxu1 }
0x13af   : > { %v4480_v37 = vadd.f32 %v4474_v30, %v4465_v31 }
0x13b0   : > { %v4486_v39 = vadd.f32 %v4485_v34, %v4479_v12 }
0x13b2   : > { %v4487_v41 = vadd.f32 %v4486_v39, %v4480_v37 }
0x13b4   : > { %4488 = vadd.xlane.f32.xlu1 %v4487_v41 }
0x1441   : > { %v4489_v60 = vpop.xlane.xlu1 %4488 }
0x1442   : > { %v4491_v36 = vmul.f32 0.0013020834, %v4489_v60 }
0x1444   : > { %v4492_v42 = vsub.f32 %v4475_v18, %v4491_v36  ;;  %v4493_v43 = vsub.f32 %v4476_v16, %v4491_v36  ;;  %v4494_v2 = vsub.f32 %v4477_v55, %v4491_v36  ;;  %v4495_v45 = vsub.f32 %v4478_v0, %v4491_v36 }
0x1445   : > { %v4496_v48 = vsub.f32 %v4479_v12, %v4491_v36  ;;  %v4497_v51 = vsub.f32 %v4480_v37, %v4491_v36  ;;  %v4581_v18 = vrot.slane %v4482_v63, %v6928_v20 }
0x1446   : > { %v4498_v46 = vmul.f32 %v4492_v42, %v4492_v42  ;;  %v4499_v47 = vmul.f32 %v4493_v43, %v4493_v43  ;;  %v4500_v49 = vmul.f32 %v4494_v2, %v4494_v2  ;;  %v4501_v52 = vmul.f32 %v4495_v45, %v4495_v45 }
0x1447   : > { %v4502_v54 = vmul.f32 %v4496_v48, %v4496_v48  ;;  %v4503_v57 = vmul.f32 %v4497_v51, %v4497_v51 }
0x1448   : > { %v4504_v50 = vadd.f32 %v4499_v47, %v4498_v46 }
0x144a   : > { %v4505_v53 = vadd.f32 %v4504_v50, %v4500_v49 }
0x144c   : > { %v4506_v56 = vadd.f32 %v4505_v53, %v4501_v52 }
0x144e   : > { %v4507_v38 = vadd.f32 %v4506_v56, %v4502_v54 }
0x1450   : > { %v4508_v40 = vadd.f32 %v4507_v38, %v4503_v57 }
0x1452   : > { %4509 = vadd.xlane.f32.xlu0 %v4508_v40 }
0x14df   : > { %v4510_v58 = vpop.xlane.xlu0 %4509 }
0x14e0   : > { %v4511_v10 = vmul.f32 0.0013020834, %v4510_v58 }
0x14e2   : > { %v4512_v59 = vadd.f32 1e-12, %v4511_v10 }
0x14e4   : > { %5686 = vrsqrt.f32 %v4512_v59 }
0x14ee   : > { %v5687_v11 = vpop.eup %5686 }
0x14ef   : > { %v4514_v7 = vmul.f32 %v5687_v11, %v4492_v42  ;;  %v4515_v17 = vmul.f32 %v5687_v11, %v4493_v43  ;;  %v4516_v27 = vmul.f32 %v5687_v11, %v4494_v2  ;;  %v4517_v9 = vmul.f32 %v5687_v11, %v4495_v45 }
0x14f0   : > { %v4518_v16 = vmul.f32 %v5687_v11, %v4496_v48  ;;  %v4519_v55 = vmul.f32 %v5687_v11, %v4497_v51 }
0x14f1   : > { %v4551_v21 = vmul.f32 %v4524_v44, %v4514_v7  ;;  %v4552_v22 = vmul.f32 %v4528_v1, %v4515_v17  ;;  %v4553_v33 = vmul.f32 %v4532_v6, %v4516_v27  ;;  %v4554_v24 = vmul.f32 %v4536_v8, %v4517_v9 }
0x14f2   : > { %v4555_v35 = vmul.f32 %v4540_v26, %v4518_v16  ;;  %v4556_v0 = vmul.f32 %v4544_v61, %v4519_v55 }
0x14f3   : > { %v4588_v25 = vadd.f32 %v4561_v4, %v4551_v21  ;;  %v4589_v28 = vadd.f32 %v4565_v5, %v4552_v22  ;;  %v4590_v13 = vadd.f32 %v4569_v14, %v4553_v33  ;;  %v4591_v29 = vadd.f32 %v4573_v15, %v4554_v24 }
0x14f4   : > { %v4592_v19 = vadd.f32 %v4577_v23, %v4555_v35  ;;  %v4593_v30 = vadd.f32 %v4581_v18, %v4556_v0 }
0x14f5   : > { %4594 = vst [vmem:[%s312_s22] sm:$0xff] %v4588_v25  ;;  %4595 = vst [vmem:[%s312_s22 + $0x8] sm:$0xff] %v4589_v28 }
0x14f6   : > { %4596 = vst [vmem:[%s312_s22 + $0x10] sm:$0xff] %v4590_v13  ;;  %4597 = vst [vmem:[%s312_s22 + $0x18] sm:$0xff] %v4591_v29 }
0x14f7   : > { %4598 = vst [vmem:[%s312_s22 + $0x20] sm:$0xff] %v4592_v19  ;;  %4599 = vst [vmem:[%s312_s22 + $0x28] sm:$0xff] %v4593_v30 }
0x14f8 PF: > { %s17_s24 = sadd.s32 1, %s5694_s24  }
0x14f9   : > { %p14_p4 = scmp.ge.s32.totalorder %s17_s24, 4  }
0x14fb   :  { %16 = sbr.rel (!%p14_p4) target bundleno = 1 (0x1), region = 84 }

// kernel: model_forward.11
= control target key start
LH: loop header
LB: loop body
LE: loop exit
PB: predicated region body
PF: predicated region fallthrough
CT: control target
= control target key end

     0   :  { %s5134_s24 = smov 0   ;;  %s5136_s25 = smov 0   ;;  %s6216_s0 = inlined_call_operand.vmem [shape: f32[16,768], index: 0, kind: input, shape index: {}]   ;;  %s6217_s1 = inlined_call_operand.vmem [shape: bf16[768,3072], index: 1, kind: input, shape index: {}]   ;;  %s6218_s2 = inlined_call_operand.vmem [shape: f32[1,3072], index: 2, kind: input, shape index: {}]   ;;  %s6219_s3 = inlined_call_operand.vmem [shape: bf16[3072,768], index: 3, kind: input, shape index: {}]   ;;  %s6220_s4 = inlined_call_operand.vmem [shape: f32[1,768], index: 4, kind: input, shape index: {}, may-alias: {4,6}]   ;;  %s6221_s5 = inlined_call_operand.vmem [shape: f32[1,768], index: 5, kind: input, shape index: {}]   ;;  %s6222_s6 = inlined_call_operand.vmem [shape: f32[1,768], index: 6, kind: input, shape index: {}, may-alias: {4,6}]   ;;  %s6223_s7 = inlined_call_operand.vmem [shape: f32[16,768], index: 7, kind: output, shape index: {}]  }
   0x1   :  { %s5138_s26 = smov 0  }
   0x2 LB: > { %s5150_s27 = sadd.s32 4294967295, %s5091_s26   ;;  %s5153_s28 = sadd.s32 1, %s5091_s26   ;;  %s5091_s26 = sphi %s5138_s26, %s6226_s26   ;;  %s5087_s25 = sphi %s5136_s25, %s6225_s25   ;;  %s5083_s24 = sphi %s5134_s24, %s6224_s24  }
   0x3   : > { %s42_s29 = ssub.s32 %s5091_s26, %s5153_s28  ;;  %s45_s30 = sadd.s32 1, %s5087_s25 }
   0x4   : > { %p43_p0 = scmp.eq.s32.totalorder %s42_s29, 0  ;;  %p52_p1 = scmp.ne.s32.totalorder %s5087_s25, %s5083_s24 }
   0x5   : > { %p53_p2 = scmp.eq.s32.totalorder %s5091_s26, 0  ;;  %p4013_p4 = scmp.ge.s32.totalorder %s5091_s26, 6 }
   0x6   : > { %s5162_s8 = scalar_select %p43_p0, %s5087_s25, %s45_s30  }
   0x7   : > { %p54_p3 = por %p53_p2, %p52_p1  ;;  %226 = sbr.rel (%p4013_p4) target bundleno = 114 (0x72), region = 32 }
   0xe   : > { %229 = sbr.rel (!%p54_p3) target bundleno = 114 (0x72), region = 36  ;;  %s231_s9 = sand.u32 (%p54_p3), 1, %s5087_s25  }
   0xf   : > { %s4408_s10 = sshll.u32 (%p54_p3), %s5091_s26, 4  ;;  %s4445_s11 = smul.u32 (%p54_p3), 1536, %s231_s9 }
  0x10   : > { %s5170_s14 = scalar_lea.vmem (%p54_p3), %s6217_s1, %s4408_s10 }
  0x11   : > { %v249_v0 = vld [vmem:[%s5170_s14] sm:$0xff] (%p54_p3)  ;;  %v251_v1 = vld [vmem:[%s5170_s14 + $0x8] sm:$0xff] (%p54_p3)  ;;  %s5178_s15 = scalar_lea.vmem (%p54_p3), [#allocation3], %s4445_s11 }
  0x12   : > { %v253_v2 = vld [vmem:[%s5170_s14 + $0x60] sm:$0xff] (%p54_p3)  ;;  %v255_v3 = vld [vmem:[%s5170_s14 + $0x68] sm:$0xff] (%p54_p3)  ;;  %250 = vst [vmem:[%s5178_s15] sm:$0xff] (%p54_p3), %v249_v0  ;;  %252 = vst [vmem:[%s5178_s15 + $0x8] sm:$0xff] (%p54_p3), %v251_v1 }
  0x13   : > { %v257_v4 = vld [vmem:[%s5170_s14 + $0xc0] sm:$0xff] (%p54_p3)  ;;  %v259_v5 = vld [vmem:[%s5170_s14 + $0xc8] sm:$0xff] (%p54_p3)  ;;  %254 = vst [vmem:[%s5178_s15 + $0x10] sm:$0xff] (%p54_p3), %v253_v2  ;;  %256 = vst [vmem:[%s5178_s15 + $0x18] sm:$0xff] (%p54_p3), %v255_v3 }
  0x14   : > { %258 = vst [vmem:[%s5178_s15 + $0x20] sm:$0xff] (%p54_p3), %v257_v4  ;;  %260 = vst [vmem:[%s5178_s15 + $0x28] sm:$0xff] (%p54_p3), %v259_v5  ;;  %v261_v6 = vld [vmem:[%s5170_s14 + $0x120] sm:$0xff] (%p54_p3)  ;;  %v263_v7 = vld [vmem:[%s5170_s14 + $0x128] sm:$0xff] (%p54_p3) }
  0x15   : > { %v265_v8 = vld [vmem:[%s5170_s14 + $0x180] sm:$0xff]  ;;  %262 = vst [vmem:[%s5178_s15 + $0x30] sm:$0xff] %v261_v6  ;;  %264 = vst [vmem:[%s5178_s15 + $0x38] sm:$0xff] %v263_v7  ;;  %v267_v9 = vld [vmem:[%s5170_s14 + $0x188] sm:$0xff] }
  0x16   : > { %266 = vst [vmem:[%s5178_s15 + $0x40] sm:$0xff] %v265_v8  ;;  %v269_v10 = vld [vmem:[%s5170_s14 + $0x1e0] sm:$0xff]  ;;  %v271_v11 = vld [vmem:[%s5170_s14 + $0x1e8] sm:$0xff]  ;;  %268 = vst [vmem:[%s5178_s15 + $0x48] sm:$0xff] %v267_v9 }
  0x17   : > { %270 = vst [vmem:[%s5178_s15 + $0x50] sm:$0xff] %v269_v10  ;;  %272 = vst [vmem:[%s5178_s15 + $0x58] sm:$0xff] %v271_v11  ;;  %v273_v12 = vld [vmem:[%s5170_s14 + $0x240] sm:$0xff]  ;;  %v275_v13 = vld [vmem:[%s5170_s14 + $0x248] sm:$0xff] }
  0x18   : > { %v277_v14 = vld [vmem:[%s5170_s14 + $0x2a0] sm:$0xff]  ;;  %274 = vst [vmem:[%s5178_s15 + $0x60] sm:$0xff] %v273_v12  ;;  %276 = vst [vmem:[%s5178_s15 + $0x68] sm:$0xff] %v275_v13  ;;  %v279_v15 = vld [vmem:[%s5170_s14 + $0x2a8] sm:$0xff] }
  0x19   : > { %278 = vst [vmem:[%s5178_s15 + $0x70] sm:$0xff] %v277_v14  ;;  %v281_v16 = vld [vmem:[%s5170_s14 + $0x300] sm:$0xff]  ;;  %v283_v17 = vld [vmem:[%s5170_s14 + $0x308] sm:$0xff]  ;;  %280 = vst [vmem:[%s5178_s15 + $0x78] sm:$0xff] %v279_v15 }
  0x1a   : > { %282 = vst [vmem:[%s5178_s15 + $0x80] sm:$0xff] %v281_v16  ;;  %284 = vst [vmem:[%s5178_s15 + $0x88] sm:$0xff] %v283_v17  ;;  %v285_v18 = vld [vmem:[%s5170_s14 + $0x360] sm:$0xff]  ;;  %v287_v19 = vld [vmem:[%s5170_s14 + $0x368] sm:$0xff] }
  0x1b   : > { %v289_v20 = vld [vmem:[%s5170_s14 + $0x3c0] sm:$0xff]  ;;  %286 = vst [vmem:[%s5178_s15 + $0x90] sm:$0xff] %v285_v18  ;;  %288 = vst [vmem:[%s5178_s15 + $0x98] sm:$0xff] %v287_v19  ;;  %v291_v21 = vld [vmem:[%s5170_s14 + $0x3c8] sm:$0xff] }
  0x1c   : > { %290 = vst [vmem:[%s5178_s15 + $0xa0] sm:$0xff] %v289_v20  ;;  %v293_v22 = vld [vmem:[%s5170_s14 + $0x420] sm:$0xff]  ;;  %v295_v23 = vld [vmem:[%s5170_s14 + $0x428] sm:$0xff]  ;;  %292 = vst [vmem:[%s5178_s15 + $0xa8] sm:$0xff] %v291_v21 }
  0x1d   : > { %294 = vst [vmem:[%s5178_s15 + $0xb0] sm:$0xff] %v293_v22  ;;  %296 = vst [vmem:[%s5178_s15 + $0xb8] sm:$0xff] %v295_v23  ;;  %v297_v24 = vld [vmem:[%s5170_s14 + $0x480] sm:$0xff]  ;;  %v299_v25 = vld [vmem:[%s5170_s14 + $0x488] sm:$0xff] }
  0x1e   : > { %v301_v26 = vld [vmem:[%s5170_s14 + $0x4e0] sm:$0xff]  ;;  %298 = vst [vmem:[%s5178_s15 + $0xc0] sm:$0xff] %v297_v24  ;;  %300 = vst [vmem:[%s5178_s15 + $0xc8] sm:$0xff] %v299_v25  ;;  %v303_v27 = vld [vmem:[%s5170_s14 + $0x4e8] sm:$0xff] }
  0x1f   : > { %302 = vst [vmem:[%s5178_s15 + $0xd0] sm:$0xff] %v301_v26  ;;  %v305_v28 = vld [vmem:[%s5170_s14 + $0x540] sm:$0xff]  ;;  %v307_v29 = vld [vmem:[%s5170_s14 + $0x548] sm:$0xff]  ;;  %304 = vst [vmem:[%s5178_s15 + $0xd8] sm:$0xff] %v303_v27 }
  0x20   : > { %306 = vst [vmem:[%s5178_s15 + $0xe0] sm:$0xff] %v305_v28  ;;  %308 = vst [vmem:[%s5178_s15 + $0xe8] sm:$0xff] %v307_v29  ;;  %v309_v30 = vld [vmem:[%s5170_s14 + $0x5a0] sm:$0xff]  ;;  %v311_v31 = vld [vmem:[%s5170_s14 + $0x5a8] sm:$0xff] }
  0x21   : > { %v313_v32 = vld [vmem:[%s5170_s14 + $0x600] sm:$0xff]  ;;  %310 = vst [vmem:[%s5178_s15 + $0xf0] sm:$0xff] %v309_v30  ;;  %312 = vst [vmem:[%s5178_s15 + $0xf8] sm:$0xff] %v311_v31  ;;  %v315_v33 = vld [vmem:[%s5170_s14 + $0x608] sm:$0xff] }
  0x22   : > { %314 = vst [vmem:[%s5178_s15 + $0x100] sm:$0xff] %v313_v32  ;;  %v317_v34 = vld [vmem:[%s5170_s14 + $0x660] sm:$0xff]  ;;  %v319_v35 = vld [vmem:[%s5170_s14 + $0x668] sm:$0xff]  ;;  %316 = vst [vmem:[%s5178_s15 + $0x108] sm:$0xff] %v315_v33 }
  0x23   : > { %318 = vst [vmem:[%s5178_s15 + $0x110] sm:$0xff] %v317_v34  ;;  %320 = vst [vmem:[%s5178_s15 + $0x118] sm:$0xff] %v319_v35  ;;  %v321_v36 = vld [vmem:[%s5170_s14 + $0x6c0] sm:$0xff]  ;;  %v323_v37 = vld [vmem:[%s5170_s14 + $0x6c8] sm:$0xff] }
  0x24   : > { %v325_v38 = vld [vmem:[%s5170_s14 + $0x720] sm:$0xff]  ;;  %322 = vst [vmem:[%s5178_s15 + $0x120] sm:$0xff] %v321_v36  ;;  %324 = vst [vmem:[%s5178_s15 + $0x128] sm:$0xff] %v323_v37  ;;  %v327_v39 = vld [vmem:[%s5170_s14 + $0x728] sm:$0xff] }
  0x25   : > { %326 = vst [vmem:[%s5178_s15 + $0x130] sm:$0xff] %v325_v38  ;;  %v329_v40 = vld [vmem:[%s5170_s14 + $0x780] sm:$0xff]  ;;  %v331_v41 = vld [vmem:[%s5170_s14 + $0x788] sm:$0xff]  ;;  %328 = vst [vmem:[%s5178_s15 + $0x138] sm:$0xff] %v327_v39 }
  0x26   : > { %330 = vst [vmem:[%s5178_s15 + $0x140] sm:$0xff] %v329_v40  ;;  %332 = vst [vmem:[%s5178_s15 + $0x148] sm:$0xff] %v331_v41  ;;  %v333_v42 = vld [vmem:[%s5170_s14 + $0x7e0] sm:$0xff]  ;;  %v335_v43 = vld [vmem:[%s5170_s14 + $0x7e8] sm:$0xff] }
  0x27   : > { %v337_v44 = vld [vmem:[%s5170_s14 + $0x840] sm:$0xff]  ;;  %334 = vst [vmem:[%s5178_s15 + $0x150] sm:$0xff] %v333_v42  ;;  %336 = vst [vmem:[%s5178_s15 + $0x158] sm:$0xff] %v335_v43  ;;  %v339_v45 = vld [vmem:[%s5170_s14 + $0x848] sm:$0xff] }
  0x28   : > { %338 = vst [vmem:[%s5178_s15 + $0x160] sm:$0xff] %v337_v44  ;;  %v341_v46 = vld [vmem:[%s5170_s14 + $0x8a0] sm:$0xff]  ;;  %v343_v47 = vld [vmem:[%s5170_s14 + $0x8a8] sm:$0xff]  ;;  %340 = vst [vmem:[%s5178_s15 + $0x168] sm:$0xff] %v339_v45 }
  0x29   : > { %342 = vst [vmem:[%s5178_s15 + $0x170] sm:$0xff] %v341_v46  ;;  %344 = vst [vmem:[%s5178_s15 + $0x178] sm:$0xff] %v343_v47  ;;  %v345_v48 = vld [vmem:[%s5170_s14 + $0x900] sm:$0xff]  ;;  %v347_v49 = vld [vmem:[%s5170_s14 + $0x908] sm:$0xff] }
  0x2a   : > { %v349_v50 = vld [vmem:[%s5170_s14 + $0x960] sm:$0xff]  ;;  %346 = vst [vmem:[%s5178_s15 + $0x180] sm:$0xff] %v345_v48  ;;  %348 = vst [vmem:[%s5178_s15 + $0x188] sm:$0xff] %v347_v49  ;;  %v351_v51 = vld [vmem:[%s5170_s14 + $0x968] sm:$0xff] }
  0x2b   : > { %350 = vst [vmem:[%s5178_s15 + $0x190] sm:$0xff] %v349_v50  ;;  %v353_v52 = vld [vmem:[%s5170_s14 + $0x9c0] sm:$0xff]  ;;  %v355_v53 = vld [vmem:[%s5170_s14 + $0x9c8] sm:$0xff]  ;;  %352 = vst [vmem:[%s5178_s15 + $0x198] sm:$0xff] %v351_v51 }
  0x2c   : > { %354 = vst [vmem:[%s5178_s15 + $0x1a0] sm:$0xff] %v353_v52  ;;  %356 = vst [vmem:[%s5178_s15 + $0x1a8] sm:$0xff] %v355_v53  ;;  %v357_v54 = vld [vmem:[%s5170_s14 + $0xa20] sm:$0xff]  ;;  %v359_v55 = vld [vmem:[%s5170_s14 + $0xa28] sm:$0xff] }
  0x2d   : > { %v361_v56 = vld [vmem:[%s5170_s14 + $0xa80] sm:$0xff]  ;;  %358 = vst [vmem:[%s5178_s15 + $0x1b0] sm:$0xff] %v357_v54  ;;  %360 = vst [vmem:[%s5178_s15 + $0x1b8] sm:$0xff] %v359_v55  ;;  %v363_v57 = vld [vmem:[%s5170_s14 + $0xa88] sm:$0xff] }
  0x2e   : > { %362 = vst [vmem:[%s5178_s15 + $0x1c0] sm:$0xff] %v361_v56  ;;  %v365_v58 = vld [vmem:[%s5170_s14 + $0xae0] sm:$0xff]  ;;  %v367_v59 = vld [vmem:[%s5170_s14 + $0xae8] sm:$0xff]  ;;  %364 = vst [vmem:[%s5178_s15 + $0x1c8] sm:$0xff] %v363_v57 }
  0x2f   : > { %366 = vst [vmem:[%s5178_s15 + $0x1d0] sm:$0xff] %v365_v58  ;;  %368 = vst [vmem:[%s5178_s15 + $0x1d8] sm:$0xff] %v367_v59  ;;  %v369_v60 = vld [vmem:[%s5170_s14 + $0xb40] sm:$0xff]  ;;  %v371_v61 = vld [vmem:[%s5170_s14 + $0xb48] sm:$0xff] }
  0x30   : > { %v373_v62 = vld [vmem:[%s5170_s14 + $0xba0] sm:$0xff]  ;;  %370 = vst [vmem:[%s5178_s15 + $0x1e0] sm:$0xff] %v369_v60  ;;  %372 = vst [vmem:[%s5178_s15 + $0x1e8] sm:$0xff] %v371_v61  ;;  %v375_v63 = vld [vmem:[%s5170_s14 + $0xba8] sm:$0xff] }
  0x31   : > { %374 = vst [vmem:[%s5178_s15 + $0x1f0] sm:$0xff] %v373_v62  ;;  %v377_v0 = vld [vmem:[%s5170_s14 + $0xc00] sm:$0xff]  ;;  %v379_v1 = vld [vmem:[%s5170_s14 + $0xc08] sm:$0xff]  ;;  %376 = vst [vmem:[%s5178_s15 + $0x1f8] sm:$0xff] %v375_v63 }
  0x32   : > { %378 = vst [vmem:[%s5178_s15 + $0x200] sm:$0xff] %v377_v0  ;;  %380 = vst [vmem:[%s5178_s15 + $0x208] sm:$0xff] %v379_v1  ;;  %v381_v2 = vld [vmem:[%s5170_s14 + $0xc60] sm:$0xff]  ;;  %v383_v3 = vld [vmem:[%s5170_s14 + $0xc68] sm:$0xff] }
  0x33   : > { %v385_v4 = vld [vmem:[%s5170_s14 + $0xcc0] sm:$0xff]  ;;  %382 = vst [vmem:[%s5178_s15 + $0x210] sm:$0xff] %v381_v2  ;;  %384 = vst [vmem:[%s5178_s15 + $0x218] sm:$0xff] %v383_v3  ;;  %v387_v5 = vld [vmem:[%s5170_s14 + $0xcc8] sm:$0xff] }
  0x34   : > { %386 = vst [vmem:[%s5178_s15 + $0x220] sm:$0xff] %v385_v4  ;;  %v389_v6 = vld [vmem:[%s5170_s14 + $0xd20] sm:$0xff]  ;;  %v391_v7 = vld [vmem:[%s5170_s14 + $0xd28] sm:$0xff]  ;;  %388 = vst [vmem:[%s5178_s15 + $0x228] sm:$0xff] %v387_v5 }
  0x35   : > { %390 = vst [vmem:[%s5178_s15 + $0x230] sm:$0xff] %v389_v6  ;;  %392 = vst [vmem:[%s5178_s15 + $0x238] sm:$0xff] %v391_v7  ;;  %v393_v8 = vld [vmem:[%s5170_s14 + $0xd80] sm:$0xff]  ;;  %v395_v9 = vld [vmem:[%s5170_s14 + $0xd88] sm:$0xff] }
  0x36   : > { %v397_v10 = vld [vmem:[%s5170_s14 + $0xde0] sm:$0xff]  ;;  %394 = vst [vmem:[%s5178_s15 + $0x240] sm:$0xff] %v393_v8  ;;  %396 = vst [vmem:[%s5178_s15 + $0x248] sm:$0xff] %v395_v9  ;;  %v399_v11 = vld [vmem:[%s5170_s14 + $0xde8] sm:$0xff] }
  0x37   : > { %398 = vst [vmem:[%s5178_s15 + $0x250] sm:$0xff] %v397_v10  ;;  %v401_v12 = vld [vmem:[%s5170_s14 + $0xe40] sm:$0xff]  ;;  %v403_v13 = vld [vmem:[%s5170_s14 + $0xe48] sm:$0xff]  ;;  %400 = vst [vmem:[%s5178_s15 + $0x258] sm:$0xff] %v399_v11 }
  0x38   : > { %402 = vst [vmem:[%s5178_s15 + $0x260] sm:$0xff] %v401_v12  ;;  %404 = vst [vmem:[%s5178_s15 + $0x268] sm:$0xff] %v403_v13  ;;  %v405_v14 = vld [vmem:[%s5170_s14 + $0xea0] sm:$0xff]  ;;  %v407_v15 = vld [vmem:[%s5170_s14 + $0xea8] sm:$0xff] }
  0x39   : > { %v409_v16 = vld [vmem:[%s5170_s14 + $0xf00] sm:$0xff]  ;;  %406 = vst [vmem:[%s5178_s15 + $0x270] sm:$0xff] %v405_v14  ;;  %408 = vst [vmem:[%s5178_s15 + $0x278] sm:$0xff] %v407_v15  ;;  %v411_v17 = vld [vmem:[%s5170_s14 + $0xf08] sm:$0xff] }
  0x3a   : > { %410 = vst [vmem:[%s5178_s15 + $0x280] sm:$0xff] %v409_v16  ;;  %v413_v18 = vld [vmem:[%s5170_s14 + $0xf60] sm:$0xff]  ;;  %v415_v19 = vld [vmem:[%s5170_s14 + $0xf68] sm:$0xff]  ;;  %412 = vst [vmem:[%s5178_s15 + $0x288] sm:$0xff] %v411_v17 }
  0x3b   : > { %414 = vst [vmem:[%s5178_s15 + $0x290] sm:$0xff] %v413_v18  ;;  %416 = vst [vmem:[%s5178_s15 + $0x298] sm:$0xff] %v415_v19  ;;  %v417_v20 = vld [vmem:[%s5170_s14 + $0xfc0] sm:$0xff]  ;;  %v419_v21 = vld [vmem:[%s5170_s14 + $0xfc8] sm:$0xff] }
  0x3c   : > { %v421_v22 = vld [vmem:[%s5170_s14 + $0x1020] sm:$0xff]  ;;  %418 = vst [vmem:[%s5178_s15 + $0x2a0] sm:$0xff] %v417_v20  ;;  %420 = vst [vmem:[%s5178_s15 + $0x2a8] sm:$0xff] %v419_v21  ;;  %v423_v23 = vld [vmem:[%s5170_s14 + $0x1028] sm:$0xff] }
  0x3d   : > { %422 = vst [vmem:[%s5178_s15 + $0x2b0] sm:$0xff] %v421_v22  ;;  %v425_v24 = vld [vmem:[%s5170_s14 + $0x1080] sm:$0xff]  ;;  %v427_v25 = vld [vmem:[%s5170_s14 + $0x1088] sm:$0xff]  ;;  %424 = vst [vmem:[%s5178_s15 + $0x2b8] sm:$0xff] %v423_v23 }
  0x3e   : > { %426 = vst [vmem:[%s5178_s15 + $0x2c0] sm:$0xff] %v425_v24  ;;  %428 = vst [vmem:[%s5178_s15 + $0x2c8] sm:$0xff] %v427_v25  ;;  %v429_v26 = vld [vmem:[%s5170_s14 + $0x10e0] sm:$0xff]  ;;  %v431_v27 = vld [vmem:[%s5170_s14 + $0x10e8] sm:$0xff] }
  0x3f   : > { %v433_v28 = vld [vmem:[%s5170_s14 + $0x1140] sm:$0xff]  ;;  %430 = vst [vmem:[%s5178_s15 + $0x2d0] sm:$0xff] %v429_v26  ;;  %432 = vst [vmem:[%s5178_s15 + $0x2d8] sm:$0xff] %v431_v27  ;;  %v435_v29 = vld [vmem:[%s5170_s14 + $0x1148] sm:$0xff] }
  0x40   : > { %434 = vst [vmem:[%s5178_s15 + $0x2e0] sm:$0xff] %v433_v28  ;;  %v437_v30 = vld [vmem:[%s5170_s14 + $0x11a0] sm:$0xff]  ;;  %v439_v31 = vld [vmem:[%s5170_s14 + $0x11a8] sm:$0xff]  ;;  %436 = vst [vmem:[%s5178_s15 + $0x2e8] sm:$0xff] %v435_v29 }
  0x41   : > { %438 = vst [vmem:[%s5178_s15 + $0x2f0] sm:$0xff] %v437_v30  ;;  %440 = vst [vmem:[%s5178_s15 + $0x2f8] sm:$0xff] %v439_v31  ;;  %v441_v32 = vld [vmem:[%s5170_s14 + $0x1200] sm:$0xff]  ;;  %v443_v33 = vld [vmem:[%s5170_s14 + $0x1208] sm:$0xff] }
  0x42   : > { %v445_v34 = vld [vmem:[%s5170_s14 + $0x1260] sm:$0xff]  ;;  %442 = vst [vmem:[%s5178_s15 + $0x300] sm:$0xff] %v441_v32  ;;  %444 = vst [vmem:[%s5178_s15 + $0x308] sm:$0xff] %v443_v33  ;;  %v447_v35 = vld [vmem:[%s5170_s14 + $0x1268] sm:$0xff] }
  0x43   : > { %446 = vst [vmem:[%s5178_s15 + $0x310] sm:$0xff] %v445_v34  ;;  %v449_v36 = vld [vmem:[%s5170_s14 + $0x12c0] sm:$0xff]  ;;  %v451_v37 = vld [vmem:[%s5170_s14 + $0x12c8] sm:$0xff]  ;;  %448 = vst [vmem:[%s5178_s15 + $0x318] sm:$0xff] %v447_v35 }
  0x44   : > { %450 = vst [vmem:[%s5178_s15 + $0x320] sm:$0xff] %v449_v36  ;;  %452 = vst [vmem:[%s5178_s15 + $0x328] sm:$0xff] %v451_v37  ;;  %v453_v38 = vld [vmem:[%s5170_s14 + $0x1320] sm:$0xff]  ;;  %v455_v39 = vld [vmem:[%s5170_s14 + $0x1328] sm:$0xff] }
  0x45   : > { %v457_v40 = vld [vmem:[%s5170_s14 + $0x1380] sm:$0xff]  ;;  %454 = vst [vmem:[%s5178_s15 + $0x330] sm:$0xff] %v453_v38  ;;  %456 = vst [vmem:[%s5178_s15 + $0x338] sm:$0xff] %v455_v39  ;;  %v459_v41 = vld [vmem:[%s5170_s14 + $0x1388] sm:$0xff] }
  0x46   : > { %458 = vst [vmem:[%s5178_s15 + $0x340] sm:$0xff] %v457_v40  ;;  %v461_v42 = vld [vmem:[%s5170_s14 + $0x13e0] sm:$0xff]  ;;  %v463_v43 = vld [vmem:[%s5170_s14 + $0x13e8] sm:$0xff]  ;;  %460 = vst [vmem:[%s5178_s15 + $0x348] sm:$0xff] %v459_v41 }
  0x47   : > { %462 = vst [vmem:[%s5178_s15 + $0x350] sm:$0xff] %v461_v42  ;;  %464 = vst [vmem:[%s5178_s15 + $0x358] sm:$0xff] %v463_v43  ;;  %v465_v44 = vld [vmem:[%s5170_s14 + $0x1440] sm:$0xff]  ;;  %v467_v45 = vld [vmem:[%s5170_s14 + $0x1448] sm:$0xff] }
  0x48   : > { %v469_v46 = vld [vmem:[%s5170_s14 + $0x14a0] sm:$0xff]  ;;  %466 = vst [vmem:[%s5178_s15 + $0x360] sm:$0xff] %v465_v44  ;;  %468 = vst [vmem:[%s5178_s15 + $0x368] sm:$0xff] %v467_v45  ;;  %v471_v47 = vld [vmem:[%s5170_s14 + $0x14a8] sm:$0xff] }
  0x49   : > { %470 = vst [vmem:[%s5178_s15 + $0x370] sm:$0xff] %v469_v46  ;;  %v473_v48 = vld [vmem:[%s5170_s14 + $0x1500] sm:$0xff]  ;;  %v475_v49 = vld [vmem:[%s5170_s14 + $0x1508] sm:$0xff]  ;;  %472 = vst [vmem:[%s5178_s15 + $0x378] sm:$0xff] %v471_v47 }
  0x4a   : > { %474 = vst [vmem:[%s5178_s15 + $0x380] sm:$0xff] %v473_v48  ;;  %476 = vst [vmem:[%s5178_s15 + $0x388] sm:$0xff] %v475_v49  ;;  %v477_v50 = vld [vmem:[%s5170_s14 + $0x1560] sm:$0xff]  ;;  %v479_v51 = vld [vmem:[%s5170_s14 + $0x1568] sm:$0xff] }
  0x4b   : > { %v481_v52 = vld [vmem:[%s5170_s14 + $0x15c0] sm:$0xff]  ;;  %478 = vst [vmem:[%s5178_s15 + $0x390] sm:$0xff] %v477_v50  ;;  %480 = vst [vmem:[%s5178_s15 + $0x398] sm:$0xff] %v479_v51  ;;  %v483_v53 = vld [vmem:[%s5170_s14 + $0x15c8] sm:$0xff] }
  0x4c   : > { %482 = vst [vmem:[%s5178_s15 + $0x3a0] sm:$0xff] %v481_v52  ;;  %v485_v54 = vld [vmem:[%s5170_s14 + $0x1620] sm:$0xff]  ;;  %v487_v55 = vld [vmem:[%s5170_s14 + $0x1628] sm:$0xff]  ;;  %484 = vst [vmem:[%s5178_s15 + $0x3a8] sm:$0xff] %v483_v53 }
  0x4d   : > { %486 = vst [vmem:[%s5178_s15 + $0x3b0] sm:$0xff] %v485_v54  ;;  %488 = vst [vmem:[%s5178_s15 + $0x3b8] sm:$0xff] %v487_v55  ;;  %v489_v56 = vld [vmem:[%s5170_s14 + $0x1680] sm:$0xff]  ;;  %v491_v57 = vld [vmem:[%s5170_s14 + $0x1688] sm:$0xff] }
  0x4e   : > { %v493_v58 = vld [vmem:[%s5170_s14 + $0x16e0] sm:$0xff]  ;;  %490 = vst [vmem:[%s5178_s15 + $0x3c0] sm:$0xff] %v489_v56  ;;  %492 = vst [vmem:[%s5178_s15 + $0x3c8] sm:$0xff] %v491_v57  ;;  %v495_v59 = vld [vmem:[%s5170_s14 + $0x16e8] sm:$0xff] }
  0x4f   : > { %494 = vst [vmem:[%s5178_s15 + $0x3d0] sm:$0xff] %v493_v58  ;;  %v497_v60 = vld [vmem:[%s5170_s14 + $0x1740] sm:$0xff]  ;;  %v499_v61 = vld [vmem:[%s5170_s14 + $0x1748] sm:$0xff]  ;;  %496 = vst [vmem:[%s5178_s15 + $0x3d8] sm:$0xff] %v495_v59 }
  0x50   : > { %498 = vst [vmem:[%s5178_s15 + $0x3e0] sm:$0xff] %v497_v60  ;;  %500 = vst [vmem:[%s5178_s15 + $0x3e8] sm:$0xff] %v499_v61  ;;  %v501_v62 = vld [vmem:[%s5170_s14 + $0x17a0] sm:$0xff]  ;;  %v503_v63 = vld [vmem:[%s5170_s14 + $0x17a8] sm:$0xff] }
  0x51   : > { %v505_v0 = vld [vmem:[%s5170_s14 + $0x1800] sm:$0xff]  ;;  %502 = vst [vmem:[%s5178_s15 + $0x3f0] sm:$0xff] %v501_v62  ;;  %504 = vst [vmem:[%s5178_s15 + $0x3f8] sm:$0xff] %v503_v63  ;;  %v507_v1 = vld [vmem:[%s5170_s14 + $0x1808] sm:$0xff] }
  0x52   : > { %506 = vst [vmem:[%s5178_s15 + $0x400] sm:$0xff] %v505_v0  ;;  %v509_v2 = vld [vmem:[%s5170_s14 + $0x1860] sm:$0xff]  ;;  %v511_v3 = vld [vmem:[%s5170_s14 + $0x1868] sm:$0xff]  ;;  %508 = vst [vmem:[%s5178_s15 + $0x408] sm:$0xff] %v507_v1 }
  0x53   : > { %510 = vst [vmem:[%s5178_s15 + $0x410] sm:$0xff] %v509_v2  ;;  %512 = vst [vmem:[%s5178_s15 + $0x418] sm:$0xff] %v511_v3  ;;  %v513_v4 = vld [vmem:[%s5170_s14 + $0x18c0] sm:$0xff]  ;;  %v515_v5 = vld [vmem:[%s5170_s14 + $0x18c8] sm:$0xff] }
  0x54   : > { %v517_v6 = vld [vmem:[%s5170_s14 + $0x1920] sm:$0xff]  ;;  %514 = vst [vmem:[%s5178_s15 + $0x420] sm:$0xff] %v513_v4  ;;  %516 = vst [vmem:[%s5178_s15 + $0x428] sm:$0xff] %v515_v5  ;;  %v519_v7 = vld [vmem:[%s5170_s14 + $0x1928] sm:$0xff] }
  0x55   : > { %518 = vst [vmem:[%s5178_s15 + $0x430] sm:$0xff] %v517_v6  ;;  %v521_v8 = vld [vmem:[%s5170_s14 + $0x1980] sm:$0xff]  ;;  %v523_v9 = vld [vmem:[%s5170_s14 + $0x1988] sm:$0xff]  ;;  %520 = vst [vmem:[%s5178_s15 + $0x438] sm:$0xff] %v519_v7 }
  0x56   : > { %522 = vst [vmem:[%s5178_s15 + $0x440] sm:$0xff] %v521_v8  ;;  %524 = vst [vmem:[%s5178_s15 + $0x448] sm:$0xff] %v523_v9  ;;  %v525_v10 = vld [vmem:[%s5170_s14 + $0x19e0] sm:$0xff]  ;;  %v527_v11 = vld [vmem:[%s5170_s14 + $0x19e8] sm:$0xff] }
  0x57   : > { %v529_v12 = vld [vmem:[%s5170_s14 + $0x1a40] sm:$0xff]  ;;  %526 = vst [vmem:[%s5178_s15 + $0x450] sm:$0xff] %v525_v10  ;;  %528 = vst [vmem:[%s5178_s15 + $0x458] sm:$0xff] %v527_v11  ;;  %v531_v13 = vld [vmem:[%s5170_s14 + $0x1a48] sm:$0xff] }
  0x58   : > { %530 = vst [vmem:[%s5178_s15 + $0x460] sm:$0xff] %v529_v12  ;;  %v533_v14 = vld [vmem:[%s5170_s14 + $0x1aa0] sm:$0xff]  ;;  %v535_v15 = vld [vmem:[%s5170_s14 + $0x1aa8] sm:$0xff]  ;;  %532 = vst [vmem:[%s5178_s15 + $0x468] sm:$0xff] %v531_v13 }
  0x59   : > { %534 = vst [vmem:[%s5178_s15 + $0x470] sm:$0xff] %v533_v14  ;;  %536 = vst [vmem:[%s5178_s15 + $0x478] sm:$0xff] %v535_v15  ;;  %v537_v16 = vld [vmem:[%s5170_s14 + $0x1b00] sm:$0xff]  ;;  %v539_v17 = vld [vmem:[%s5170_s14 + $0x1b08] sm:$0xff] }
  0x5a   : > { %v541_v18 = vld [vmem:[%s5170_s14 + $0x1b60] sm:$0xff]  ;;  %538 = vst [vmem:[%s5178_s15 + $0x480] sm:$0xff] %v537_v16  ;;  %540 = vst [vmem:[%s5178_s15 + $0x488] sm:$0xff] %v539_v17  ;;  %v543_v19 = vld [vmem:[%s5170_s14 + $0x1b68] sm:$0xff] }
  0x5b   : > { %542 = vst [vmem:[%s5178_s15 + $0x490] sm:$0xff] %v541_v18  ;;  %v545_v20 = vld [vmem:[%s5170_s14 + $0x1bc0] sm:$0xff]  ;;  %v547_v21 = vld [vmem:[%s5170_s14 + $0x1bc8] sm:$0xff]  ;;  %544 = vst [vmem:[%s5178_s15 + $0x498] sm:$0xff] %v543_v19 }
  0x5c   : > { %546 = vst [vmem:[%s5178_s15 + $0x4a0] sm:$0xff] %v545_v20  ;;  %548 = vst [vmem:[%s5178_s15 + $0x4a8] sm:$0xff] %v547_v21  ;;  %v549_v22 = vld [vmem:[%s5170_s14 + $0x1c20] sm:$0xff]  ;;  %v551_v23 = vld [vmem:[%s5170_s14 + $0x1c28] sm:$0xff] }
  0x5d   : > { %v553_v24 = vld [vmem:[%s5170_s14 + $0x1c80] sm:$0xff]  ;;  %550 = vst [vmem:[%s5178_s15 + $0x4b0] sm:$0xff] %v549_v22  ;;  %552 = vst [vmem:[%s5178_s15 + $0x4b8] sm:$0xff] %v551_v23  ;;  %v555_v25 = vld [vmem:[%s5170_s14 + $0x1c88] sm:$0xff] }
  0x5e   : > { %554 = vst [vmem:[%s5178_s15 + $0x4c0] sm:$0xff] %v553_v24  ;;  %v557_v26 = vld [vmem:[%s5170_s14 + $0x1ce0] sm:$0xff]  ;;  %v559_v27 = vld [vmem:[%s5170_s14 + $0x1ce8] sm:$0xff]  ;;  %556 = vst [vmem:[%s5178_s15 + $0x4c8] sm:$0xff] %v555_v25 }
  0x5f   : > { %558 = vst [vmem:[%s5178_s15 + $0x4d0] sm:$0xff] %v557_v26  ;;  %560 = vst [vmem:[%s5178_s15 + $0x4d8] sm:$0xff] %v559_v27  ;;  %v561_v28 = vld [vmem:[%s5170_s14 + $0x1d40] sm:$0xff]  ;;  %v563_v29 = vld [vmem:[%s5170_s14 + $0x1d48] sm:$0xff] }
  0x60   : > { %v565_v30 = vld [vmem:[%s5170_s14 + $0x1da0] sm:$0xff]  ;;  %562 = vst [vmem:[%s5178_s15 + $0x4e0] sm:$0xff] %v561_v28  ;;  %564 = vst [vmem:[%s5178_s15 + $0x4e8] sm:$0xff] %v563_v29  ;;  %v567_v31 = vld [vmem:[%s5170_s14 + $0x1da8] sm:$0xff] }
  0x61   : > { %566 = vst [vmem:[%s5178_s15 + $0x4f0] sm:$0xff] %v565_v30  ;;  %v569_v32 = vld [vmem:[%s5170_s14 + $0x1e00] sm:$0xff]  ;;  %v571_v33 = vld [vmem:[%s5170_s14 + $0x1e08] sm:$0xff]  ;;  %568 = vst [vmem:[%s5178_s15 + $0x4f8] sm:$0xff] %v567_v31 }
  0x62   : > { %570 = vst [vmem:[%s5178_s15 + $0x500] sm:$0xff] %v569_v32  ;;  %572 = vst [vmem:[%s5178_s15 + $0x508] sm:$0xff] %v571_v33  ;;  %v573_v34 = vld [vmem:[%s5170_s14 + $0x1e60] sm:$0xff]  ;;  %v575_v35 = vld [vmem:[%s5170_s14 + $0x1e68] sm:$0xff] }
  0x63   : > { %v577_v36 = vld [vmem:[%s5170_s14 + $0x1ec0] sm:$0xff]  ;;  %574 = vst [vmem:[%s5178_s15 + $0x510] sm:$0xff] %v573_v34  ;;  %576 = vst [vmem:[%s5178_s15 + $0x518] sm:$0xff] %v575_v35  ;;  %v579_v37 = vld [vmem:[%s5170_s14 + $0x1ec8] sm:$0xff] }
  0x64   : > { %578 = vst [vmem:[%s5178_s15 + $0x520] sm:$0xff] %v577_v36  ;;  %v581_v38 = vld [vmem:[%s5170_s14 + $0x1f20] sm:$0xff]  ;;  %v583_v39 = vld [vmem:[%s5170_s14 + $0x1f28] sm:$0xff]  ;;  %580 = vst [vmem:[%s5178_s15 + $0x528] sm:$0xff] %v579_v37 }
  0x65   : > { %582 = vst [vmem:[%s5178_s15 + $0x530] sm:$0xff] %v581_v38  ;;  %584 = vst [vmem:[%s5178_s15 + $0x538] sm:$0xff] %v583_v39  ;;  %v585_v40 = vld [vmem:[%s5170_s14 + $0x1f80] sm:$0xff]  ;;  %v587_v41 = vld [vmem:[%s5170_s14 + $0x1f88] sm:$0xff] }
  0x66   : > { %v589_v42 = vld [vmem:[%s5170_s14 + $0x1fe0] sm:$0xff]  ;;  %586 = vst [vmem:[%s5178_s15 + $0x540] sm:$0xff] %v585_v40  ;;  %588 = vst [vmem:[%s5178_s15 + $0x548] sm:$0xff] %v587_v41  ;;  %v591_v43 = vld [vmem:[%s5170_s14 + $0x1fe8] sm:$0xff] }
  0x67   : > { %590 = vst [vmem:[%s5178_s15 + $0x550] sm:$0xff] %v589_v42  ;;  %v593_v44 = vld [vmem:[%s5170_s14 + $0x2040] sm:$0xff]  ;;  %v595_v45 = vld [vmem:[%s5170_s14 + $0x2048] sm:$0xff]  ;;  %592 = vst [vmem:[%s5178_s15 + $0x558] sm:$0xff] %v591_v43 }
  0x68   : > { %594 = vst [vmem:[%s5178_s15 + $0x560] sm:$0xff] %v593_v44  ;;  %596 = vst [vmem:[%s5178_s15 + $0x568] sm:$0xff] %v595_v45  ;;  %v597_v46 = vld [vmem:[%s5170_s14 + $0x20a0] sm:$0xff]  ;;  %v599_v47 = vld [vmem:[%s5170_s14 + $0x20a8] sm:$0xff] }
  0x69   : > { %v601_v48 = vld [vmem:[%s5170_s14 + $0x2100] sm:$0xff]  ;;  %598 = vst [vmem:[%s5178_s15 + $0x570] sm:$0xff] %v597_v46  ;;  %600 = vst [vmem:[%s5178_s15 + $0x578] sm:$0xff] %v599_v47  ;;  %v603_v49 = vld [vmem:[%s5170_s14 + $0x2108] sm:$0xff] }
  0x6a   : > { %602 = vst [vmem:[%s5178_s15 + $0x580] sm:$0xff] %v601_v48  ;;  %v605_v50 = vld [vmem:[%s5170_s14 + $0x2160] sm:$0xff]  ;;  %v607_v51 = vld [vmem:[%s5170_s14 + $0x2168] sm:$0xff]  ;;  %604 = vst [vmem:[%s5178_s15 + $0x588] sm:$0xff] %v603_v49 }
  0x6b   : > { %606 = vst [vmem:[%s5178_s15 + $0x590] sm:$0xff] %v605_v50  ;;  %608 = vst [vmem:[%s5178_s15 + $0x598] sm:$0xff] %v607_v51  ;;  %v609_v52 = vld [vmem:[%s5170_s14 + $0x21c0] sm:$0xff]  ;;  %v611_v53 = vld [vmem:[%s5170_s14 + $0x21c8] sm:$0xff] }
  0x6c   : > { %v613_v54 = vld [vmem:[%s5170_s14 + $0x2220] sm:$0xff]  ;;  %610 = vst [vmem:[%s5178_s15 + $0x5a0] sm:$0xff] %v609_v52  ;;  %612 = vst [vmem:[%s5178_s15 + $0x5a8] sm:$0xff] %v611_v53  ;;  %v615_v55 = vld [vmem:[%s5170_s14 + $0x2228] sm:$0xff] }
  0x6d   : > { %614 = vst [vmem:[%s5178_s15 + $0x5b0] sm:$0xff] %v613_v54  ;;  %v617_v56 = vld [vmem:[%s5170_s14 + $0x2280] sm:$0xff]  ;;  %v619_v57 = vld [vmem:[%s5170_s14 + $0x2288] sm:$0xff]  ;;  %616 = vst [vmem:[%s5178_s15 + $0x5b8] sm:$0xff] %v615_v55 }
  0x6e   : > { %618 = vst [vmem:[%s5178_s15 + $0x5c0] sm:$0xff] %v617_v56  ;;  %620 = vst [vmem:[%s5178_s15 + $0x5c8] sm:$0xff] %v619_v57  ;;  %v621_v58 = vld [vmem:[%s5170_s14 + $0x22e0] sm:$0xff]  ;;  %v623_v59 = vld [vmem:[%s5170_s14 + $0x22e8] sm:$0xff] }
  0x6f   : > { %v625_v60 = vld [vmem:[%s5170_s14 + $0x2340] sm:$0xff]  ;;  %622 = vst [vmem:[%s5178_s15 + $0x5d0] sm:$0xff] %v621_v58  ;;  %624 = vst [vmem:[%s5178_s15 + $0x5d8] sm:$0xff] %v623_v59  ;;  %v627_v61 = vld [vmem:[%s5170_s14 + $0x2348] sm:$0xff] }
  0x70   : > { %626 = vst [vmem:[%s5178_s15 + $0x5e0] sm:$0xff] %v625_v60  ;;  %v629_v62 = vld [vmem:[%s5170_s14 + $0x23a0] sm:$0xff]  ;;  %v631_v63 = vld [vmem:[%s5170_s14 + $0x23a8] sm:$0xff]  ;;  %628 = vst [vmem:[%s5178_s15 + $0x5e8] sm:$0xff] %v627_v61 }
  0x71   : > { %630 = vst [vmem:[%s5178_s15 + $0x5f0] sm:$0xff] %v629_v62  ;;  %632 = vst [vmem:[%s5178_s15 + $0x5f8] sm:$0xff] %v631_v63 }
  0x72 PF: > { %p4016_p5 = scmp.ge.s32.totalorder %s5091_s26, 1  ;;  %p655_p6 = scmp.lt.s32.totalorder %s5091_s26, 7 }
  0x74   : > { %p656_p7 = pnand %p4016_p5, %p655_p6 }
  0x75   : > { %s662_s16 = sand.u32 (!%p656_p7), 1, %s5083_s24   ;;  %s4017_s17 = sshll.u32 (!%p656_p7), %s5150_s27, 2 }
  0x76   : > { %659 = sbr.rel (%p656_p7) target bundleno = 1323 (0x52b), region = 67  ;;  %p700_p8 = scmp.lt.s32.totalorder (!%p656_p7), %s4017_s17, 23 }
  0x77   : > { %s4446_s18 = smul.u32 (!%p656_p7), 1536, %s662_s16  ;;  %s4018_s19 = sshll.u32 (!%p656_p7), %s5150_s27, 6 }
  0x78   : > { %p705_p9 = scmp.lt.s32.totalorder (!%p656_p7), %s4018_s19, 383  ;;  %p4020_p10 = scmp.ne.s32.totalorder (!%p656_p7), %s5150_s27, 0 }
  0x79   : > { %s5574_s24 = scalar_lea.vmem (!%p656_p7), [#allocation3], %s4446_s18 }
  0x7d   : > { %s6228_s17 = smov (!%p700_p8, %s4017_s17), 23  ;;  %s6230_s19 = smov (!%p705_p9, %s4018_s19), 383 }
  0x7e   : > { %s702_s22 = scalar_lea.vmem %s6218_s2, %s6228_s17  ;;  %s4447_s23 = smul.u32 24, %s6230_s19  ;;  %v5093_v0 = vmov (!%p4020_p10), 0.0  }
  0x7f   : > { %714 = sbr.rel (%p4020_p10) target bundleno = 134 (0x86), region = 75  ;;  %715 = vst [vmem:[#allocation2] sm:$0xff] (!%p4020_p10), %v5093_v0  ;;  %716 = vst [vmem:[#allocation2 + $0x8] sm:$0xff] (!%p4020_p10), %v5093_v0 }
  0x80   : > { %s5572_s30 = scalar_lea.vmem %s6219_s3, %s4447_s23  ;;  %717 = vst [vmem:[#allocation2 + $0x10] sm:$0xff] (!%p4020_p10), %v5093_v0  ;;  %718 = vst [vmem:[#allocation2 + $0x18] sm:$0xff] (!%p4020_p10), %v5093_v0 }
  0x81   : > { %719 = vst [vmem:[#allocation2 + $0x20] sm:$0xff] (!%p4020_p10), %v5093_v0  ;;  %720 = vst [vmem:[#allocation2 + $0x28] sm:$0xff] (!%p4020_p10), %v5093_v0 }
  0x82   : > { %721 = vst [vmem:[#allocation2 + $0x30] sm:$0xff] (!%p4020_p10), %v5093_v0  ;;  %722 = vst [vmem:[#allocation2 + $0x38] sm:$0xff] (!%p4020_p10), %v5093_v0 }
  0x83   : > { %723 = vst [vmem:[#allocation2 + $0x40] sm:$0xff] (!%p4020_p10), %v5093_v0  ;;  %724 = vst [vmem:[#allocation2 + $0x48] sm:$0xff] (!%p4020_p10), %v5093_v0 }
  0x84   : > { %725 = vst [vmem:[#allocation2 + $0x50] sm:$0xff] (!%p4020_p10), %v5093_v0  ;;  %726 = vst [vmem:[#allocation2 + $0x58] sm:$0xff] (!%p4020_p10), %v5093_v0 }
  0x86 PF: > { %v4473_v1 = vld [vmem:[%s5574_s24 + $0x4] ss:$16 sps:$4 sm:$0xff]   ;;  %v4477_v3 = vld [vmem:[%s5574_s24] ss:$16 sps:$4 sm:$0xff]   ;;  %v728_v47 = vld [vmem:[%s6216_s0 + $0x8] sm:$0xff]  ;;  %p4405_p11 = scmp.ne.s32.totalorder %s5150_s27, 5 }
  0x87   : > { %v4475_v2 = vld [vmem:[%s5574_s24 + $0x204] ss:$16 sps:$4 sm:$0xff]   ;;  %1919 = vmatprep.subr.bf16.mxu1 %v4473_v1  ;;  %v4478_v4 = vld [vmem:[%s5574_s24 + $0x200] ss:$16 sps:$4 sm:$0xff]   ;;  %v734_v50 = vld [vmem:[%s6216_s0 + $0x38] sm:$0xff] }
  0x88   : > { %1962 = vmatprep.subr.bf16.mxu0 %v4475_v2  ;;  %v4479_v5 = vld [vmem:[%s5574_s24 + $0x24] ss:$16 sps:$4 sm:$0xff]   ;;  %1920 = vmatpush1.bf16.msra.mxu1 %v4477_v3  ;;  %v4483_v7 = vld [vmem:[%s5574_s24 + $0x20] ss:$16 sps:$4 sm:$0xff]   ;;  %v5631_v51 = vpack.c.bf16 %v734_v50, %v728_v47  ;;  %v730_v52 = vld [vmem:[%s6216_s0 + $0x18] sm:$0xff] }
  0x89   : > { %1963 = vmatpush1.bf16.msra.mxu0 %v4478_v4  ;;  %v4481_v6 = vld [vmem:[%s5574_s24 + $0x224] ss:$16 sps:$4 sm:$0xff]   ;;  %1921 = vmatprep.subr.bf16.mxu1 %v4479_v5  ;;  %v4484_v8 = vld [vmem:[%s5574_s24 + $0x220] ss:$16 sps:$4 sm:$0xff]   ;;  %v736_v53 = vld [vmem:[%s6216_s0 + $0x48] sm:$0xff] }
  0x8a   : > { %1964 = vmatprep.subr.bf16.mxu0 %v4481_v6  ;;  %v4485_v9 = vld [vmem:[%s5574_s24 + $0x44] ss:$16 sps:$4 sm:$0xff]   ;;  %v4489_v11 = vld [vmem:[%s5574_s24 + $0x40] ss:$16 sps:$4 sm:$0xff]   ;;  %v5641_v56 = vpack.c.bf16 %v736_v53, %v730_v52  ;;  %1951 = vmatprep.mubr.bf16.mxu1 %v5631_v51  ;;  %v4614_v47 = vld [vmem:[%s5574_s24 + $0xe8] ss:$16 sps:$4 sm:$0xff]  }
  0x8b   : > { %v4487_v10 = vld [vmem:[%s5574_s24 + $0x244] ss:$16 sps:$4 sm:$0xff]   ;;  %v4490_v12 = vld [vmem:[%s5574_s24 + $0x240] ss:$16 sps:$4 sm:$0xff]   ;;  %v4628_v53 = vld [vmem:[%s5574_s24 + $0x12c] ss:$16 sps:$4 sm:$0xff]  }
  0x8c   : > { %1922 = vmatpush1.bf16.msra.mxu1 %v4483_v7  ;;  %v4491_v13 = vld [vmem:[%s5574_s24 + $0x64] ss:$16 sps:$4 sm:$0xff]   ;;  %v4495_v15 = vld [vmem:[%s5574_s24 + $0x60] ss:$16 sps:$4 sm:$0xff]   ;;  %1994 = vmatprep.mubr.bf16.mxu0 %v5641_v56 }
  0x8d   : > { %1965 = vmatpush1.bf16.msra.mxu0 %v4484_v8  ;;  %1923 = vmatprep.subr.bf16.mxu1 %v4485_v9  ;;  %v4493_v14 = vld [vmem:[%s5574_s24 + $0x264] ss:$16 sps:$4 sm:$0xff]   ;;  %v4496_v16 = vld [vmem:[%s5574_s24 + $0x260] ss:$16 sps:$4 sm:$0xff]  }
  0x8e   : > { %1966 = vmatprep.subr.bf16.mxu0 %v4487_v10  ;;  %v4497_v17 = vld [vmem:[%s5574_s24 + $0x84] ss:$16 sps:$4 sm:$0xff]   ;;  %v4501_v19 = vld [vmem:[%s5574_s24 + $0x80] ss:$16 sps:$4 sm:$0xff]  }
  0x8f   : > { %v4499_v18 = vld [vmem:[%s5574_s24 + $0x284] ss:$16 sps:$4 sm:$0xff]   ;;  %v4502_v20 = vld [vmem:[%s5574_s24 + $0x280] ss:$16 sps:$4 sm:$0xff]  }
  0x90   : > { %1924 = vmatpush1.bf16.msra.mxu1 %v4489_v11  ;;  %v4503_v21 = vld [vmem:[%s5574_s24 + $0xa4] ss:$16 sps:$4 sm:$0xff]   ;;  %v4507_v23 = vld [vmem:[%s5574_s24 + $0xa0] ss:$16 sps:$4 sm:$0xff]  }
  0x91   : > { %1967 = vmatpush1.bf16.msra.mxu0 %v4490_v12  ;;  %1925 = vmatprep.subr.bf16.mxu1 %v4491_v13  ;;  %v4505_v22 = vld [vmem:[%s5574_s24 + $0x2a4] ss:$16 sps:$4 sm:$0xff]   ;;  %v4508_v24 = vld [vmem:[%s5574_s24 + $0x2a0] ss:$16 sps:$4 sm:$0xff]   ;;  %v4574_v12 = vld [vmem:[%s5574_s24 + $0xc] ss:$16 sps:$4 sm:$0xff]  }
  0x92   : > { %1968 = vmatprep.subr.bf16.mxu0 %v4493_v14  ;;  %v4509_v25 = vld [vmem:[%s5574_s24 + $0xc4] ss:$16 sps:$4 sm:$0xff]   ;;  %v4513_v27 = vld [vmem:[%s5574_s24 + $0xc0] ss:$16 sps:$4 sm:$0xff]  }
  0x93   : > { %v4511_v26 = vld [vmem:[%s5574_s24 + $0x2c4] ss:$16 sps:$4 sm:$0xff]   ;;  %v4514_v28 = vld [vmem:[%s5574_s24 + $0x2c0] ss:$16 sps:$4 sm:$0xff]  }
  0x94   : > { %1926 = vmatpush1.bf16.msra.mxu1 %v4495_v15  ;;  %v4515_v29 = vld [vmem:[%s5574_s24 + $0xe4] ss:$16 sps:$4 sm:$0xff]   ;;  %v4519_v31 = vld [vmem:[%s5574_s24 + $0xe0] ss:$16 sps:$4 sm:$0xff]   ;;  %v4572_v15 = vld [vmem:[%s5574_s24 + $0x8] ss:$16 sps:$4 sm:$0xff]  }
  0x95   : > { %1969 = vmatpush1.bf16.msra.mxu0 %v4496_v16  ;;  %1927 = vmatprep.subr.bf16.mxu1 %v4497_v17  ;;  %v4517_v30 = vld [vmem:[%s5574_s24 + $0x2e4] ss:$16 sps:$4 sm:$0xff]   ;;  %v4520_v32 = vld [vmem:[%s5574_s24 + $0x2e0] ss:$16 sps:$4 sm:$0xff]  }
  0x96   : > { %1970 = vmatprep.subr.bf16.mxu0 %v4499_v18  ;;  %v4521_v33 = vld [vmem:[%s5574_s24 + $0x104] ss:$16 sps:$4 sm:$0xff]   ;;  %v4525_v35 = vld [vmem:[%s5574_s24 + $0x100] ss:$16 sps:$4 sm:$0xff]   ;;  %v4580_v18 = vld [vmem:[%s5574_s24 + $0x2c] ss:$16 sps:$4 sm:$0xff]  }
  0x97   : > { %v4523_v34 = vld [vmem:[%s5574_s24 + $0x304] ss:$16 sps:$4 sm:$0xff]   ;;  %v4526_v36 = vld [vmem:[%s5574_s24 + $0x300] ss:$16 sps:$4 sm:$0xff]  }
  0x98   : > { %1928 = vmatpush1.bf16.msra.mxu1 %v4501_v19  ;;  %v4527_v37 = vld [vmem:[%s5574_s24 + $0x124] ss:$16 sps:$4 sm:$0xff]   ;;  %v4531_v39 = vld [vmem:[%s5574_s24 + $0x120] ss:$16 sps:$4 sm:$0xff]  }
  0x99   : > { %1971 = vmatpush1.bf16.msra.mxu0 %v4502_v20  ;;  %1929 = vmatprep.subr.bf16.mxu1 %v4503_v21  ;;  %v4529_v38 = vld [vmem:[%s5574_s24 + $0x324] ss:$16 sps:$4 sm:$0xff]   ;;  %v4532_v40 = vld [vmem:[%s5574_s24 + $0x320] ss:$16 sps:$4 sm:$0xff]   ;;  %v4578_v20 = vld [vmem:[%s5574_s24 + $0x28] ss:$16 sps:$4 sm:$0xff]  }
  0x9a   : > { %1972 = vmatprep.subr.bf16.mxu0 %v4505_v22  ;;  %v4533_v41 = vld [vmem:[%s5574_s24 + $0x144] ss:$16 sps:$4 sm:$0xff]   ;;  %v4537_v43 = vld [vmem:[%s5574_s24 + $0x140] ss:$16 sps:$4 sm:$0xff]   ;;  %v4586_v22 = vld [vmem:[%s5574_s24 + $0x4c] ss:$16 sps:$4 sm:$0xff]  }
  0x9b   : > { %v4535_v42 = vld [vmem:[%s5574_s24 + $0x344] ss:$16 sps:$4 sm:$0xff]   ;;  %v4538_v44 = vld [vmem:[%s5574_s24 + $0x340] ss:$16 sps:$4 sm:$0xff]  }
  0x9c   : > { %1930 = vmatpush1.bf16.msra.mxu1 %v4507_v23  ;;  %v4539_v45 = vld [vmem:[%s5574_s24 + $0x164] ss:$16 sps:$4 sm:$0xff]   ;;  %v4543_v48 = vld [vmem:[%s5574_s24 + $0x160] ss:$16 sps:$4 sm:$0xff]  }
  0x9d   : > { %1973 = vmatpush1.bf16.msra.mxu0 %v4508_v24  ;;  %1931 = vmatprep.subr.bf16.mxu1 %v4509_v25  ;;  %v4541_v46 = vld [vmem:[%s5574_s24 + $0x364] ss:$16 sps:$4 sm:$0xff]   ;;  %v4544_v49 = vld [vmem:[%s5574_s24 + $0x360] ss:$16 sps:$4 sm:$0xff]   ;;  %v4584_v24 = vld [vmem:[%s5574_s24 + $0x48] ss:$16 sps:$4 sm:$0xff]  }
  0x9e   : > { %1974 = vmatprep.subr.bf16.mxu0 %v4511_v26  ;;  %v4545_v54 = vld [vmem:[%s5574_s24 + $0x184] ss:$16 sps:$4 sm:$0xff]   ;;  %v4549_v57 = vld [vmem:[%s5574_s24 + $0x180] ss:$16 sps:$4 sm:$0xff]   ;;  %v4592_v26 = vld [vmem:[%s5574_s24 + $0x6c] ss:$16 sps:$4 sm:$0xff]  }
  0x9f   : > { %v4547_v55 = vld [vmem:[%s5574_s24 + $0x384] ss:$16 sps:$4 sm:$0xff]   ;;  %v4550_v58 = vld [vmem:[%s5574_s24 + $0x380] ss:$16 sps:$4 sm:$0xff]  }
  0xa0   : > { %1932 = vmatpush1.bf16.msra.mxu1 %v4513_v27  ;;  %v4551_v59 = vld [vmem:[%s5574_s24 + $0x1a4] ss:$16 sps:$4 sm:$0xff]   ;;  %v4555_v61 = vld [vmem:[%s5574_s24 + $0x1a0] ss:$16 sps:$4 sm:$0xff]  }
  0xa1   : > { %1975 = vmatpush1.bf16.msra.mxu0 %v4514_v28  ;;  %1933 = vmatprep.subr.bf16.mxu1 %v4515_v29  ;;  %v4553_v60 = vld [vmem:[%s5574_s24 + $0x3a4] ss:$16 sps:$4 sm:$0xff]   ;;  %v4556_v62 = vld [vmem:[%s5574_s24 + $0x3a0] ss:$16 sps:$4 sm:$0xff]   ;;  %v4590_v28 = vld [vmem:[%s5574_s24 + $0x68] ss:$16 sps:$4 sm:$0xff]  }
  0xa2   : > { %1976 = vmatprep.subr.bf16.mxu0 %v4517_v30  ;;  %v4557_v63 = vld [vmem:[%s5574_s24 + $0x1c4] ss:$16 sps:$4 sm:$0xff]   ;;  %v4561_v1 = vld [vmem:[%s5574_s24 + $0x1c0] ss:$16 sps:$4 sm:$0xff]   ;;  %v4598_v30 = vld [vmem:[%s5574_s24 + $0x8c] ss:$16 sps:$4 sm:$0xff]  }
  0xa3   : > { %v4559_v0 = vld [vmem:[%s5574_s24 + $0x3c4] ss:$16 sps:$4 sm:$0xff]   ;;  %v4562_v2 = vld [vmem:[%s5574_s24 + $0x3c0] ss:$16 sps:$4 sm:$0xff]  }
  0xa4   : > { %1934 = vmatpush1.bf16.msra.mxu1 %v4519_v31  ;;  %v4563_v3 = vld [vmem:[%s5574_s24 + $0x1e4] ss:$16 sps:$4 sm:$0xff]   ;;  %v4567_v5 = vld [vmem:[%s5574_s24 + $0x1e0] ss:$16 sps:$4 sm:$0xff]  }
  0xa5   : > { %1977 = vmatpush1.bf16.msra.mxu0 %v4520_v32  ;;  %1935 = vmatprep.subr.bf16.mxu1 %v4521_v33  ;;  %v4565_v4 = vld [vmem:[%s5574_s24 + $0x3e4] ss:$16 sps:$4 sm:$0xff]   ;;  %v4568_v6 = vld [vmem:[%s5574_s24 + $0x3e0] ss:$16 sps:$4 sm:$0xff]   ;;  %v4596_v32 = vld [vmem:[%s5574_s24 + $0x88] ss:$16 sps:$4 sm:$0xff]  }
  0xa6   : > { %1978 = vmatprep.subr.bf16.mxu0 %v4523_v34  ;;  %v727_v7 = vld [vmem:[%s6216_s0] sm:$0xff]  ;;  %v733_v8 = vld [vmem:[%s6216_s0 + $0x30] sm:$0xff]  ;;  %v4604_v34 = vld [vmem:[%s5574_s24 + $0xac] ss:$16 sps:$4 sm:$0xff]  }
  0xa7   : > { %v4571_v9 = vld [vmem:[%s5574_s24 + $0x404] ss:$16 sps:$4 sm:$0xff]   ;;  %v5673_v13 = vpack.c.bf16 %v733_v8, %v727_v7  ;;  %v4569_v14 = vld [vmem:[%s5574_s24 + $0x400] ss:$16 sps:$4 sm:$0xff]   ;;  %v4650_v8 = vld [vmem:[%s5574_s24 + $0x1a8] ss:$16 sps:$4 sm:$0xff]  }
  0xa8   : > { %1936 = vmatpush1.bf16.msra.mxu1 %v4525_v35  ;;  %v729_v10 = vld [vmem:[%s6216_s0 + $0x10] sm:$0xff]  ;;  %v735_v11 = vld [vmem:[%s6216_s0 + $0x40] sm:$0xff] }
  0xa9   : > { %1979 = vmatpush1.bf16.msra.mxu0 %v4526_v36  ;;  %1937 = vmatprep.subr.bf16.mxu1 %v4527_v37  ;;  %v5677_v16 = vpack.c.bf16 %v735_v11, %v729_v10  ;;  %v4577_v17 = vld [vmem:[%s5574_s24 + $0x424] ss:$16 sps:$4 sm:$0xff]   ;;  %v4575_v19 = vld [vmem:[%s5574_s24 + $0x420] ss:$16 sps:$4 sm:$0xff]   ;;  %v4602_v36 = vld [vmem:[%s5574_s24 + $0xa8] ss:$16 sps:$4 sm:$0xff]  }
  0xaa   : > { %1980 = vmatprep.subr.bf16.mxu0 %v4529_v38  ;;  %v4583_v21 = vld [vmem:[%s5574_s24 + $0x444] ss:$16 sps:$4 sm:$0xff]   ;;  %v4581_v23 = vld [vmem:[%s5574_s24 + $0x440] ss:$16 sps:$4 sm:$0xff]   ;;  %v4610_v38 = vld [vmem:[%s5574_s24 + $0xcc] ss:$16 sps:$4 sm:$0xff]  }
  0xab   : > { %v4589_v25 = vld [vmem:[%s5574_s24 + $0x464] ss:$16 sps:$4 sm:$0xff]   ;;  %v4587_v27 = vld [vmem:[%s5574_s24 + $0x460] ss:$16 sps:$4 sm:$0xff]   ;;  %v4658_v10 = vld [vmem:[%s5574_s24 + $0x1cc] ss:$16 sps:$4 sm:$0xff]  }
  0xac   : > { %1938 = vmatpush1.bf16.msra.mxu1 %v4531_v39  ;;  %v4595_v29 = vld [vmem:[%s5574_s24 + $0x484] ss:$16 sps:$4 sm:$0xff]   ;;  %v4593_v31 = vld [vmem:[%s5574_s24 + $0x480] ss:$16 sps:$4 sm:$0xff]  }
  0xad   : > { %1981 = vmatpush1.bf16.msra.mxu0 %v4532_v40  ;;  %1939 = vmatprep.subr.bf16.mxu1 %v4533_v41  ;;  %v4601_v33 = vld [vmem:[%s5574_s24 + $0x4a4] ss:$16 sps:$4 sm:$0xff]   ;;  %v4599_v35 = vld [vmem:[%s5574_s24 + $0x4a0] ss:$16 sps:$4 sm:$0xff]   ;;  %v4608_v40 = vld [vmem:[%s5574_s24 + $0xc8] ss:$16 sps:$4 sm:$0xff]  }
  0xae   : > { %1982 = vmatprep.subr.bf16.mxu0 %v4535_v42  ;;  %v4607_v37 = vld [vmem:[%s5574_s24 + $0x4c4] ss:$16 sps:$4 sm:$0xff]   ;;  %v4605_v39 = vld [vmem:[%s5574_s24 + $0x4c0] ss:$16 sps:$4 sm:$0xff]   ;;  %v732_v42 = vld [vmem:[%s6216_s0 + $0x28] sm:$0xff] }
  0xaf   : > { %v4613_v41 = vld [vmem:[%s5574_s24 + $0x4e4] ss:$16 sps:$4 sm:$0xff]   ;;  %v4617_v50 = vld [vmem:[%s5574_s24 + $0x500] ss:$16 sps:$4 sm:$0xff]  }
  0xb0   : > { %1940 = vmatpush1.bf16.msra.mxu1 %v4537_v43  ;;  %v738_v43 = vld [vmem:[%s6216_s0 + $0x58] sm:$0xff]  ;;  %v4625_v52 = vld [vmem:[%s5574_s24 + $0x524] ss:$16 sps:$4 sm:$0xff]   ;;  %v4647_v7 = vld [vmem:[%s5574_s24 + $0x5a0] ss:$16 sps:$4 sm:$0xff]  }
  0xb1   : > { %1983 = vmatpush1.bf16.msra.mxu0 %v4538_v44  ;;  %1941 = vmatprep.subr.bf16.mxu1 %v4539_v45  ;;  %v4616_v44 = vld [vmem:[%s5574_s24 + $0xec] ss:$16 sps:$4 sm:$0xff]   ;;  %v5714_v45 = vpack.c.bf16 %v738_v43, %v732_v42  ;;  %v4653_v11 = vld [vmem:[%s5574_s24 + $0x5c0] ss:$16 sps:$4 sm:$0xff]   ;;  %v4689_v42 = vld [vmem:[%s5574_s24 + $0x308] ss:$16 sps:$4 sm:$0xff]  }
  0xb2   : > { %1984 = vmatprep.subr.bf16.mxu0 %v4541_v46  ;;  %v4611_v46 = vld [vmem:[%s5574_s24 + $0x4e0] ss:$16 sps:$4 sm:$0xff]   ;;  %v4694_v43 = vld [vmem:[%s5574_s24 + $0x32c] ss:$16 sps:$4 sm:$0xff]  }
  0xb4   : > { %1942 = vmatpush1.bf16.msra.mxu1 %v4543_v48  ;;  %v4619_v48 = vld [vmem:[%s5574_s24 + $0x504] ss:$16 sps:$4 sm:$0xff]  }
  0xb5   : > { %1985 = vmatpush1.bf16.msra.mxu0 %v4544_v49  ;;  %1943 = vmatprep.subr.bf16.mxu1 %v4545_v54  ;;  %v4622_v49 = vld [vmem:[%s5574_s24 + $0x10c] ss:$16 sps:$4 sm:$0xff]   ;;  %v4623_v54 = vld [vmem:[%s5574_s24 + $0x520] ss:$16 sps:$4 sm:$0xff]  }
  0xb6   : > { %1986 = vmatprep.subr.bf16.mxu0 %v4547_v55  ;;  %v4626_v55 = vld [vmem:[%s5574_s24 + $0x128] ss:$16 sps:$4 sm:$0xff]  }
  0xb8   : > { %1944 = vmatpush1.bf16.msra.mxu1 %v4549_v57  ;;  %v4631_v57 = vld [vmem:[%s5574_s24 + $0x544] ss:$16 sps:$4 sm:$0xff]  }
  0xb9   : > { %1987 = vmatpush1.bf16.msra.mxu0 %v4550_v58  ;;  %1945 = vmatprep.subr.bf16.mxu1 %v4551_v59  ;;  %v4634_v58 = vld [vmem:[%s5574_s24 + $0x14c] ss:$16 sps:$4 sm:$0xff]   ;;  %v4629_v59 = vld [vmem:[%s5574_s24 + $0x540] ss:$16 sps:$4 sm:$0xff]  }
  0xba   : > { %1988 = vmatprep.subr.bf16.mxu0 %v4553_v60  ;;  %v4632_v60 = vld [vmem:[%s5574_s24 + $0x148] ss:$16 sps:$4 sm:$0xff]  }
  0xbc   : > { %1946 = vmatpush1.bf16.msra.mxu1 %v4555_v61  ;;  %v4637_v61 = vld [vmem:[%s5574_s24 + $0x564] ss:$16 sps:$4 sm:$0xff]  }
  0xbd   : > { %1989 = vmatpush1.bf16.msra.mxu0 %v4556_v62  ;;  %1947 = vmatprep.subr.bf16.mxu1 %v4557_v63  ;;  %v4640_v62 = vld [vmem:[%s5574_s24 + $0x16c] ss:$16 sps:$4 sm:$0xff]   ;;  %v4635_v63 = vld [vmem:[%s5574_s24 + $0x560] ss:$16 sps:$4 sm:$0xff]  }
  0xbe   : > { %1990 = vmatprep.subr.bf16.mxu0 %v4559_v0  ;;  %v4638_v0 = vld [vmem:[%s5574_s24 + $0x168] ss:$16 sps:$4 sm:$0xff]  }
  0xc0   : > { %1948 = vmatpush1.bf16.msra.mxu1 %v4561_v1  ;;  %v4643_v1 = vld [vmem:[%s5574_s24 + $0x584] ss:$16 sps:$4 sm:$0xff]  }
  0xc1   : > { %1991 = vmatpush1.bf16.msra.mxu0 %v4562_v2  ;;  %1949 = vmatprep.subr.bf16.mxu1 %v4563_v3  ;;  %v4646_v2 = vld [vmem:[%s5574_s24 + $0x18c] ss:$16 sps:$4 sm:$0xff]   ;;  %v4641_v3 = vld [vmem:[%s5574_s24 + $0x580] ss:$16 sps:$4 sm:$0xff]  }
  0xc2   : > { %1992 = vmatprep.subr.bf16.mxu0 %v4565_v4  ;;  %v4644_v4 = vld [vmem:[%s5574_s24 + $0x188] ss:$16 sps:$4 sm:$0xff]  }
  0xc4   : > { %1950 = vmatpush1.bf16.msra.mxu1 %v4567_v5  ;;  %v4649_v5 = vld [vmem:[%s5574_s24 + $0x5a4] ss:$16 sps:$4 sm:$0xff]  }
  0xc5   : > { %1993 = vmatpush1.bf16.msra.mxu0 %v4568_v6  ;;  %2048 = vmatprep.subr.bf16.mxu1 %v4574_v12  ;;  %v4652_v6 = vld [vmem:[%s5574_s24 + $0x1ac] ss:$16 sps:$4 sm:$0xff]   ;;  %v4656_v12 = vld [vmem:[%s5574_s24 + $0x1c8] ss:$16 sps:$4 sm:$0xff]  }
  0xc6   : > { %2005 = vmatprep.subr.bf16.mxu0 %v4571_v9  ;;  %v4655_v9 = vld [vmem:[%s5574_s24 + $0x5c4] ss:$16 sps:$4 sm:$0xff]  }
  0xc7   : > { %1952 = vmatmul.mubr.bf16.vlgmr.msra.gmra.mrb[0].mxu1 %v5673_v13 }
  0xc8   : > { %1995 = vmatmul.mubr.bf16.vlgmr.msra.gmra.mrb[0].mxu0 %v5677_v16  ;;  %2049 = vmatpush1.bf16.msra.mxu1 %v4572_v15  ;;  %v4664_v15 = vld [vmem:[%s5574_s24 + $0x1ec] ss:$16 sps:$4 sm:$0xff]  }
  0xc9   : > { %2006 = vmatpush1.bf16.msra.mxu0 %v4569_v14  ;;  %2050 = vmatprep.subr.bf16.mxu1 %v4580_v18  ;;  %v4661_v14 = vld [vmem:[%s5574_s24 + $0x5e4] ss:$16 sps:$4 sm:$0xff]   ;;  %v4662_v18 = vld [vmem:[%s5574_s24 + $0x1e8] ss:$16 sps:$4 sm:$0xff]  }
  0xca   : > { %2007 = vmatprep.subr.bf16.mxu0 %v4577_v17  ;;  %2080 = vmatprep.mubr.bf16.mxu1 %v5631_v51  ;;  %v4620_v51 = vld [vmem:[%s5574_s24 + $0x108] ss:$16 sps:$4 sm:$0xff]   ;;  %v4659_v17 = vld [vmem:[%s5574_s24 + $0x5e0] ss:$16 sps:$4 sm:$0xff]  }
  0xcb   : > { %2037 = vmatprep.mubr.bf16.mxu0 %v5714_v45 }
  0xcc   : > { %2051 = vmatpush1.bf16.msra.mxu1 %v4578_v20  ;;  %v737_v20 = vld [vmem:[%s6216_s0 + $0x50] sm:$0xff] }
  0xcd   : > { %2008 = vmatpush1.bf16.msra.mxu0 %v4575_v19  ;;  %2052 = vmatprep.subr.bf16.mxu1 %v4586_v22  ;;  %v731_v19 = vld [vmem:[%s6216_s0 + $0x20] sm:$0xff] }
  0xce   : > { %2009 = vmatprep.subr.bf16.mxu0 %v4583_v21  ;;  %v4667_v21 = vld [vmem:[%s5574_s24 + $0x20c] ss:$16 sps:$4 sm:$0xff]   ;;  %v5758_v22 = vpack.c.bf16 %v737_v20, %v731_v19  ;;  %v4809_v20 = vld [vmem:[%s5572_s30 + $0x180] ss:$24 sps:$4 sm:$0xff]  }
  0xcf   : > { %v4811_v19 = vld [vmem:[%s5572_s30 + $0x184] ss:$24 sps:$4 sm:$0xff]  }
  0xd0   : > { %2053 = vmatpush1.bf16.msra.mxu1 %v4584_v24  ;;  %v4670_v24 = vld [vmem:[%s5574_s24 + $0x22c] ss:$16 sps:$4 sm:$0xff]  }
  0xd1   : > { %2010 = vmatpush1.bf16.msra.mxu0 %v4581_v23  ;;  %2054 = vmatprep.subr.bf16.mxu1 %v4592_v26  ;;  %v4665_v23 = vld [vmem:[%s5574_s24 + $0x208] ss:$16 sps:$4 sm:$0xff]   ;;  %v4673_v26 = vld [vmem:[%s5574_s24 + $0x24c] ss:$16 sps:$4 sm:$0xff]  }
  0xd2   : > { %2011 = vmatprep.subr.bf16.mxu0 %v4589_v25  ;;  %v4668_v25 = vld [vmem:[%s5574_s24 + $0x228] ss:$16 sps:$4 sm:$0xff]  }
  0xd4   : > { %2055 = vmatpush1.bf16.msra.mxu1 %v4590_v28  ;;  %v4676_v28 = vld [vmem:[%s5574_s24 + $0x26c] ss:$16 sps:$4 sm:$0xff]  }
  0xd5   : > { %2012 = vmatpush1.bf16.msra.mxu0 %v4587_v27  ;;  %2056 = vmatprep.subr.bf16.mxu1 %v4598_v30  ;;  %v4671_v27 = vld [vmem:[%s5574_s24 + $0x248] ss:$16 sps:$4 sm:$0xff]   ;;  %v4679_v30 = vld [vmem:[%s5574_s24 + $0x28c] ss:$16 sps:$4 sm:$0xff]  }
  0xd6   : > { %2013 = vmatprep.subr.bf16.mxu0 %v4595_v29  ;;  %v4674_v29 = vld [vmem:[%s5574_s24 + $0x268] ss:$16 sps:$4 sm:$0xff]  }
  0xd8   : > { %2057 = vmatpush1.bf16.msra.mxu1 %v4596_v32  ;;  %v4685_v32 = vld [vmem:[%s5574_s24 + $0x2cc] ss:$16 sps:$4 sm:$0xff]  }
  0xd9   : > { %2014 = vmatpush1.bf16.msra.mxu0 %v4593_v31  ;;  %2058 = vmatprep.subr.bf16.mxu1 %v4604_v34  ;;  %v4682_v31 = vld [vmem:[%s5574_s24 + $0x2ac] ss:$16 sps:$4 sm:$0xff]  }
  0xda   : > { %2015 = vmatprep.subr.bf16.mxu0 %v4601_v33  ;;  %v4683_v33 = vld [vmem:[%s5574_s24 + $0x2c8] ss:$16 sps:$4 sm:$0xff]   ;;  %v4688_v34 = vld [vmem:[%s5574_s24 + $0x2ec] ss:$16 sps:$4 sm:$0xff]  }
  0xdc   : > { %2059 = vmatpush1.bf16.msra.mxu1 %v4602_v36  ;;  %v4763_v36 = vld [vmem:[%s5572_s30 + $0x4] ss:$24 sps:$4 sm:$0xff]  }
  0xdd   : > { %2016 = vmatpush1.bf16.msra.mxu0 %v4599_v35  ;;  %2060 = vmatprep.subr.bf16.mxu1 %v4610_v38  ;;  %v4761_v35 = vld [vmem:[%s5572_s30] ss:$24 sps:$4 sm:$0xff]  }
  0xde   : > { %2017 = vmatprep.subr.bf16.mxu0 %v4607_v37  ;;  %v4769_v37 = vld [vmem:[%s5572_s30 + $0x34] ss:$24 sps:$4 sm:$0xff]   ;;  %v4686_v38 = vld [vmem:[%s5574_s24 + $0x2e8] ss:$16 sps:$4 sm:$0xff]  }
  0xe0   : > { %2061 = vmatpush1.bf16.msra.mxu1 %v4608_v40  ;;  %v4767_v40 = vld [vmem:[%s5572_s30 + $0x30] ss:$24 sps:$4 sm:$0xff]  }
  0xe1   : > { %2018 = vmatpush1.bf16.msra.mxu0 %v4605_v39  ;;  %2062 = vmatprep.subr.bf16.mxu1 %v4616_v44  ;;  %v4691_v39 = vld [vmem:[%s5574_s24 + $0x30c] ss:$16 sps:$4 sm:$0xff]   ;;  %v4773_v44 = vld [vmem:[%s5572_s30 + $0x60] ss:$24 sps:$4 sm:$0xff]  }
  0xe2   : > { %2019 = vmatprep.subr.bf16.mxu0 %v4613_v41  ;;  %v4775_v41 = vld [vmem:[%s5572_s30 + $0x64] ss:$24 sps:$4 sm:$0xff]  }
  0xe4   : > { %2063 = vmatpush1.bf16.msra.mxu1 %v4614_v47  ;;  %v4692_v47 = vld [vmem:[%s5574_s24 + $0x328] ss:$16 sps:$4 sm:$0xff]  }
  0xe5   : > { %2020 = vmatpush1.bf16.msra.mxu0 %v4611_v46  ;;  %2064 = vmatprep.subr.bf16.mxu1 %v4622_v49  ;;  %v4781_v46 = vld [vmem:[%s5572_s30 + $0x94] ss:$24 sps:$4 sm:$0xff]   ;;  %v4779_v49 = vld [vmem:[%s5572_s30 + $0x90] ss:$24 sps:$4 sm:$0xff]  }
  0xe6   : > { %2021 = vmatprep.subr.bf16.mxu0 %v4619_v48  ;;  %v4697_v48 = vld [vmem:[%s5574_s24 + $0x34c] ss:$16 sps:$4 sm:$0xff]  }
  0xe8   : > { %2065 = vmatpush1.bf16.msra.mxu1 %v4620_v51  ;;  %v4695_v51 = vld [vmem:[%s5574_s24 + $0x348] ss:$16 sps:$4 sm:$0xff]  }
  0xe9   : > { %2022 = vmatpush1.bf16.msra.mxu0 %v4617_v50  ;;  %2066 = vmatprep.subr.bf16.mxu1 %v4628_v53  ;;  %v4787_v50 = vld [vmem:[%s5572_s30 + $0xc4] ss:$24 sps:$4 sm:$0xff]   ;;  %v4785_v53 = vld [vmem:[%s5572_s30 + $0xc0] ss:$24 sps:$4 sm:$0xff]  }
  0xea   : > { %2023 = vmatprep.subr.bf16.mxu0 %v4625_v52  ;;  %v4700_v52 = vld [vmem:[%s5574_s24 + $0x36c] ss:$16 sps:$4 sm:$0xff]  }
  0xec   : > { %2067 = vmatpush1.bf16.msra.mxu1 %v4626_v55  ;;  %v4698_v55 = vld [vmem:[%s5574_s24 + $0x368] ss:$16 sps:$4 sm:$0xff]  }
  0xed   : > { %2024 = vmatpush1.bf16.msra.mxu0 %v4623_v54  ;;  %2068 = vmatprep.subr.bf16.mxu1 %v4634_v58  ;;  %v4793_v54 = vld [vmem:[%s5572_s30 + $0xf4] ss:$24 sps:$4 sm:$0xff]   ;;  %v4791_v58 = vld [vmem:[%s5572_s30 + $0xf0] ss:$24 sps:$4 sm:$0xff]  }
  0xee   : > { %2025 = vmatprep.subr.bf16.mxu0 %v4631_v57  ;;  %v4703_v57 = vld [vmem:[%s5574_s24 + $0x38c] ss:$16 sps:$4 sm:$0xff]  }
  0xf0   : > { %2069 = vmatpush1.bf16.msra.mxu1 %v4632_v60  ;;  %v4701_v60 = vld [vmem:[%s5574_s24 + $0x388] ss:$16 sps:$4 sm:$0xff]  }
  0xf1   : > { %2026 = vmatpush1.bf16.msra.mxu0 %v4629_v59  ;;  %2070 = vmatprep.subr.bf16.mxu1 %v4640_v62  ;;  %v4799_v59 = vld [vmem:[%s5572_s30 + $0x124] ss:$24 sps:$4 sm:$0xff]   ;;  %v4797_v62 = vld [vmem:[%s5572_s30 + $0x120] ss:$24 sps:$4 sm:$0xff]  }
  0xf2   : > { %2027 = vmatprep.subr.bf16.mxu0 %v4637_v61  ;;  %v4706_v61 = vld [vmem:[%s5574_s24 + $0x3ac] ss:$16 sps:$4 sm:$0xff]  }
  0xf4   : > { %2071 = vmatpush1.bf16.msra.mxu1 %v4638_v0  ;;  %v4704_v0 = vld [vmem:[%s5574_s24 + $0x3a8] ss:$16 sps:$4 sm:$0xff]  }
  0xf5   : > { %2028 = vmatpush1.bf16.msra.mxu0 %v4635_v63  ;;  %2072 = vmatprep.subr.bf16.mxu1 %v4646_v2  ;;  %v4805_v63 = vld [vmem:[%s5572_s30 + $0x154] ss:$24 sps:$4 sm:$0xff]   ;;  %v4803_v2 = vld [vmem:[%s5572_s30 + $0x150] ss:$24 sps:$4 sm:$0xff]  }
  0xf6   : > { %2029 = vmatprep.subr.bf16.mxu0 %v4643_v1  ;;  %v4709_v1 = vld [vmem:[%s5574_s24 + $0x3cc] ss:$16 sps:$4 sm:$0xff]  }
  0xf8   : > { %2073 = vmatpush1.bf16.msra.mxu1 %v4644_v4  ;;  %v4712_v4 = vld [vmem:[%s5574_s24 + $0x3ec] ss:$16 sps:$4 sm:$0xff]  }
  0xf9   : > { %2030 = vmatpush1.bf16.msra.mxu0 %v4641_v3  ;;  %2074 = vmatprep.subr.bf16.mxu1 %v4652_v6  ;;  %v4707_v3 = vld [vmem:[%s5574_s24 + $0x3c8] ss:$16 sps:$4 sm:$0xff]   ;;  %v4715_v6 = vld [vmem:[%s5574_s24 + $0x40c] ss:$16 sps:$4 sm:$0xff]  }
  0xfa   : > { %2031 = vmatprep.subr.bf16.mxu0 %v4649_v5  ;;  %v4710_v5 = vld [vmem:[%s5574_s24 + $0x3e8] ss:$16 sps:$4 sm:$0xff]  }
  0xfc   : > { %2075 = vmatpush1.bf16.msra.mxu1 %v4650_v8  ;;  %v4718_v8 = vld [vmem:[%s5574_s24 + $0x42c] ss:$16 sps:$4 sm:$0xff]  }
  0xfd   : > { %2032 = vmatpush1.bf16.msra.mxu0 %v4647_v7  ;;  %2076 = vmatprep.subr.bf16.mxu1 %v4658_v10  ;;  %v4713_v7 = vld [vmem:[%s5574_s24 + $0x408] ss:$16 sps:$4 sm:$0xff]   ;;  %v4721_v10 = vld [vmem:[%s5574_s24 + $0x44c] ss:$16 sps:$4 sm:$0xff]  }
  0xfe   : > { %2033 = vmatprep.subr.bf16.mxu0 %v4655_v9  ;;  %v4716_v9 = vld [vmem:[%s5574_s24 + $0x428] ss:$16 sps:$4 sm:$0xff]  }
 0x100   : > { %2077 = vmatpush1.bf16.msra.mxu1 %v4656_v12  ;;  %v4724_v12 = vld [vmem:[%s5574_s24 + $0x46c] ss:$16 sps:$4 sm:$0xff]  }
 0x101   : > { %2034 = vmatpush1.bf16.msra.mxu0 %v4653_v11  ;;  %2078 = vmatprep.subr.bf16.mxu1 %v4664_v15  ;;  %v4719_v11 = vld [vmem:[%s5574_s24 + $0x448] ss:$16 sps:$4 sm:$0xff]   ;;  %v4727_v15 = vld [vmem:[%s5574_s24 + $0x48c] ss:$16 sps:$4 sm:$0xff]  }
 0x102   : > { %2035 = vmatprep.subr.bf16.mxu0 %v4661_v14  ;;  %v4722_v14 = vld [vmem:[%s5574_s24 + $0x468] ss:$16 sps:$4 sm:$0xff]  }
 0x104   : > { %2079 = vmatpush1.bf16.msra.mxu1 %v4662_v18  ;;  %v4733_v18 = vld [vmem:[%s5574_s24 + $0x4cc] ss:$16 sps:$4 sm:$0xff]  }
 0x105   : > { %2036 = vmatpush1.bf16.msra.mxu0 %v4659_v17  ;;  %2091 = vmatprep.subr.bf16.mxu1 %v4667_v21  ;;  %v4728_v17 = vld [vmem:[%s5574_s24 + $0x4a8] ss:$16 sps:$4 sm:$0xff]  }
 0x106   : > { %3417 = vmatprep.subr.bf16.mxu0 %v4763_v36  ;;  %v4731_v21 = vld [vmem:[%s5574_s24 + $0x4c8] ss:$16 sps:$4 sm:$0xff]   ;;  %v4841_v36 = vld [vmem:[%s5572_s30 + $0x274] ss:$24 sps:$4 sm:$0xff]  }
 0x107   : > { %2081 = vmatmul.mubr.bf16.vlgmr.msra.gmra.mrb[4].mxu1 %v5673_v13  ;;  %v4677_v13 = vld [vmem:[%s5574_s24 + $0x288] ss:$16 sps:$4 sm:$0xff]  }
 0x108   : > { %2038 = vmatmul.mubr.bf16.vlgmr.msra.gmra.mrb[0].mxu0 %v5758_v22  ;;  %2092 = vmatpush1.bf16.msra.mxu1 %v4665_v23  ;;  %v4736_v23 = vld [vmem:[%s5574_s24 + $0x4ec] ss:$16 sps:$4 sm:$0xff]  }
 0x109   : > { %2123 = vmatprep.mubr.bf16.mxu1 %v5641_v56  ;;  %2093 = vmatprep.subr.bf16.mxu1 %v4670_v24  ;;  %v4680_v56 = vld [vmem:[%s5574_s24 + $0x2a8] ss:$16 sps:$4 sm:$0xff]   ;;  %v4817_v24 = vld [vmem:[%s5572_s30 + $0x1b4] ss:$24 sps:$4 sm:$0xff]  }
 0x10a   : > { %3418 = vmatpush1.bf16.msra.mxu0 %v4761_v35  ;;  %v4835_v35 = vld [vmem:[%s5572_s30 + $0x244] ss:$24 sps:$4 sm:$0xff]  }
 0x10b   : > { %3419 = vmatprep.subr.bf16.mxu0 %v4769_v37  ;;  %v4743_v37 = vld [vmem:[%s5574_s24 + $0x548] ss:$16 sps:$4 sm:$0xff]  }
 0x10c   : > { %2094 = vmatpush1.bf16.msra.mxu1 %v4668_v25  ;;  %v4815_v25 = vld [vmem:[%s5572_s30 + $0x1b0] ss:$24 sps:$4 sm:$0xff]  }
 0x10d   : > { %2095 = vmatprep.subr.bf16.mxu1 %v4673_v26  ;;  %v4734_v26 = vld [vmem:[%s5574_s24 + $0x4e8] ss:$16 sps:$4 sm:$0xff]  }
 0x10e   : > { %3420 = vmatpush1.bf16.msra.mxu0 %v4767_v40  ;;  %v4847_v40 = vld [vmem:[%s5572_s30 + $0x2a4] ss:$24 sps:$4 sm:$0xff]  }
 0x10f   : > { %3421 = vmatprep.subr.bf16.mxu0 %v4775_v41  ;;  %v4746_v41 = vld [vmem:[%s5574_s24 + $0x568] ss:$16 sps:$4 sm:$0xff]  }
 0x110   : > { %2096 = vmatpush1.bf16.msra.mxu1 %v4671_v27  ;;  %v4739_v27 = vld [vmem:[%s5574_s24 + $0x50c] ss:$16 sps:$4 sm:$0xff]  }
 0x111   : > { %2097 = vmatprep.subr.bf16.mxu1 %v4676_v28  ;;  %v4823_v28 = vld [vmem:[%s5572_s30 + $0x1e4] ss:$24 sps:$4 sm:$0xff]  }
 0x112   : > { %3422 = vmatpush1.bf16.msra.mxu0 %v4773_v44  ;;  %v4853_v44 = vld [vmem:[%s5572_s30 + $0x2d4] ss:$24 sps:$4 sm:$0xff]  }
 0x113   : > { %3423 = vmatprep.subr.bf16.mxu0 %v4781_v46  ;;  %v4749_v46 = vld [vmem:[%s5574_s24 + $0x588] ss:$16 sps:$4 sm:$0xff]  }
 0x114   : > { %2098 = vmatpush1.bf16.msra.mxu1 %v4674_v29  ;;  %v4821_v29 = vld [vmem:[%s5572_s30 + $0x1e0] ss:$24 sps:$4 sm:$0xff]  }
 0x115   : > { %2099 = vmatprep.subr.bf16.mxu1 %v4679_v30  ;;  %v4737_v30 = vld [vmem:[%s5574_s24 + $0x508] ss:$16 sps:$4 sm:$0xff]  }
 0x116   : > { %3424 = vmatpush1.bf16.msra.mxu0 %v4779_v49  ;;  %v4752_v49 = vld [vmem:[%s5574_s24 + $0x5a8] ss:$16 sps:$4 sm:$0xff]  }
 0x117   : > { %3425 = vmatprep.subr.bf16.mxu0 %v4787_v50  ;;  %v4757_v50 = vld [vmem:[%s5574_s24 + $0x5cc] ss:$16 sps:$4 sm:$0xff]  }
 0x118   : > { %2100 = vmatpush1.bf16.msra.mxu1 %v4677_v13  ;;  %v4742_v13 = vld [vmem:[%s5574_s24 + $0x52c] ss:$16 sps:$4 sm:$0xff]  }
 0x119   : > { %2101 = vmatprep.subr.bf16.mxu1 %v4682_v31  ;;  %v4829_v31 = vld [vmem:[%s5572_s30 + $0x214] ss:$24 sps:$4 sm:$0xff]  }
 0x11a   : > { %3426 = vmatpush1.bf16.msra.mxu0 %v4785_v53  ;;  %v4760_v53 = vld [vmem:[%s5574_s24 + $0x5ec] ss:$16 sps:$4 sm:$0xff]  }
 0x11b   : > { %3427 = vmatprep.subr.bf16.mxu0 %v4793_v54  ;;  %v4758_v54 = vld [vmem:[%s5574_s24 + $0x5e8] ss:$16 sps:$4 sm:$0xff]  }
 0x11c   : > { %2102 = vmatpush1.bf16.msra.mxu1 %v4680_v56  ;;  %v4827_v56 = vld [vmem:[%s5572_s30 + $0x210] ss:$24 sps:$4 sm:$0xff]  }
 0x11d   : > { %2103 = vmatprep.subr.bf16.mxu1 %v4685_v32  ;;  %v4740_v32 = vld [vmem:[%s5574_s24 + $0x528] ss:$16 sps:$4 sm:$0xff]  }
 0x11e   : > { %3428 = vmatpush1.bf16.msra.mxu0 %v4791_v58  ;;  %v4772_v58 = vld [vmem:[%s5572_s30 + $0x3c] ss:$24 sps:$4 sm:$0xff]  }
 0x11f   : > { %3429 = vmatprep.subr.bf16.mxu0 %v4799_v59  ;;  %v4770_v59 = vld [vmem:[%s5572_s30 + $0x38] ss:$24 sps:$4 sm:$0xff]  }
 0x120   : > { %2104 = vmatpush1.bf16.msra.mxu1 %v4683_v33  ;;  %v4745_v33 = vld [vmem:[%s5574_s24 + $0x54c] ss:$16 sps:$4 sm:$0xff]  }
 0x121   : > { %2105 = vmatprep.subr.bf16.mxu1 %v4688_v34  ;;  %v4833_v34 = vld [vmem:[%s5572_s30 + $0x240] ss:$24 sps:$4 sm:$0xff]  }
 0x122   : > { %3430 = vmatpush1.bf16.msra.mxu0 %v4797_v62  ;;  %v4784_v62 = vld [vmem:[%s5572_s30 + $0x9c] ss:$24 sps:$4 sm:$0xff]  }
 0x123   : > { %3431 = vmatprep.subr.bf16.mxu0 %v4805_v63  ;;  %v4782_v63 = vld [vmem:[%s5572_s30 + $0x98] ss:$24 sps:$4 sm:$0xff]  }
 0x124   : > { %2106 = vmatpush1.bf16.msra.mxu1 %v4686_v38  ;;  %v4748_v38 = vld [vmem:[%s5574_s24 + $0x56c] ss:$16 sps:$4 sm:$0xff]  }
 0x125   : > { %2107 = vmatprep.subr.bf16.mxu1 %v4691_v39  ;;  %v4839_v39 = vld [vmem:[%s5572_s30 + $0x270] ss:$24 sps:$4 sm:$0xff]  }
 0x126   : > { %3432 = vmatpush1.bf16.msra.mxu0 %v4803_v2  ;;  %v4794_v2 = vld [vmem:[%s5572_s30 + $0xf8] ss:$24 sps:$4 sm:$0xff]  }
 0x127   : > { %3433 = vmatprep.subr.bf16.mxu0 %v4811_v19  ;;  %v4838_v19 = vld [vmem:[%s5572_s30 + $0x24c] ss:$24 sps:$4 sm:$0xff]  }
 0x128   : > { %2108 = vmatpush1.bf16.msra.mxu1 %v4689_v42  ;;  %v4751_v42 = vld [vmem:[%s5574_s24 + $0x58c] ss:$16 sps:$4 sm:$0xff]  }
 0x129   : > { %2109 = vmatprep.subr.bf16.mxu1 %v4694_v43  ;;  %v4845_v43 = vld [vmem:[%s5572_s30 + $0x2a0] ss:$24 sps:$4 sm:$0xff]  }
 0x12a   : > { %3434 = vmatpush1.bf16.msra.mxu0 %v4809_v20  ;;  %v4836_v20 = vld [vmem:[%s5572_s30 + $0x248] ss:$24 sps:$4 sm:$0xff]  }
 0x12b   : > { %3435 = vmatprep.subr.bf16.mxu0 %v4817_v24  ;;  %v4850_v24 = vld [vmem:[%s5572_s30 + $0x2ac] ss:$24 sps:$4 sm:$0xff]  }
 0x12c   : > { %2110 = vmatpush1.bf16.msra.mxu1 %v4692_v47  ;;  %v4754_v47 = vld [vmem:[%s5574_s24 + $0x5ac] ss:$16 sps:$4 sm:$0xff]  }
 0x12d   : > { %2111 = vmatprep.subr.bf16.mxu1 %v4697_v48  ;;  %v4851_v48 = vld [vmem:[%s5572_s30 + $0x2d0] ss:$24 sps:$4 sm:$0xff]  }
 0x12e   : > { %3436 = vmatpush1.bf16.msra.mxu0 %v4815_v25  ;;  %v4848_v25 = vld [vmem:[%s5572_s30 + $0x2a8] ss:$24 sps:$4 sm:$0xff]  }
 0x12f   : > { %3437 = vmatprep.subr.bf16.mxu0 %v4823_v28  ;;  %v4862_v28 = vld [vmem:[%s5572_s30 + $0x30c] ss:$24 sps:$4 sm:$0xff]  }
 0x130   : > { %2112 = vmatpush1.bf16.msra.mxu1 %v4695_v51  ;;  %v4755_v51 = vld [vmem:[%s5574_s24 + $0x5c8] ss:$16 sps:$4 sm:$0xff]  }
 0x131   : > { %2113 = vmatprep.subr.bf16.mxu1 %v4700_v52  ;;  %v4859_v52 = vld [vmem:[%s5572_s30 + $0x304] ss:$24 sps:$4 sm:$0xff]  }
 0x132   : > { %3438 = vmatpush1.bf16.msra.mxu0 %v4821_v29  ;;  %v939_v29 = vlaneseq }
 0x133   : > { %3439 = vmatprep.subr.bf16.mxu0 %v4829_v31  ;;  %v5905_v31 = vld [vmem:[%s702_s22] sm:$0xf] }
 0x134   : > { %2114 = vmatpush1.bf16.msra.mxu1 %v4698_v55  ;;  %v4766_v55 = vld [vmem:[%s5572_s30 + $0xc] ss:$24 sps:$4 sm:$0xff]  }
 0x135   : > { %2115 = vmatprep.subr.bf16.mxu1 %v4703_v57  ;;  %v4764_v57 = vld [vmem:[%s5572_s30 + $0x8] ss:$24 sps:$4 sm:$0xff]  }
 0x136   : > { %3440 = vmatpush1.bf16.msra.mxu0 %v4827_v56 }
 0x137   : > { %3441 = vmatprep.subr.bf16.mxu0 %v4835_v35 }
 0x138   : > { %2116 = vmatpush1.bf16.msra.mxu1 %v4701_v60  ;;  %v4778_v60 = vld [vmem:[%s5572_s30 + $0x6c] ss:$24 sps:$4 sm:$0xff]  }
 0x139   : > { %2117 = vmatprep.subr.bf16.mxu1 %v4706_v61  ;;  %v4776_v61 = vld [vmem:[%s5572_s30 + $0x68] ss:$24 sps:$4 sm:$0xff]  }
 0x13a   : > { %3442 = vmatpush1.bf16.msra.mxu0 %v4833_v34 }
 0x13b   : > { %3443 = vmatprep.subr.bf16.mxu0 %v4841_v36 }
 0x13c   : > { %2118 = vmatpush1.bf16.msra.mxu1 %v4704_v0  ;;  %v4790_v0 = vld [vmem:[%s5572_s30 + $0xcc] ss:$24 sps:$4 sm:$0xff]  }
 0x13d   : > { %2119 = vmatprep.subr.bf16.mxu1 %v4709_v1  ;;  %v4788_v1 = vld [vmem:[%s5572_s30 + $0xc8] ss:$24 sps:$4 sm:$0xff]  }
 0x13e   : > { %3444 = vmatpush1.bf16.msra.mxu0 %v4839_v39 }
 0x13f   : > { %3445 = vmatprep.subr.bf16.mxu0 %v4847_v40 }
 0x140   : > { %2120 = vmatpush1.bf16.msra.mxu1 %v4707_v3  ;;  %v4802_v3 = vld [vmem:[%s5572_s30 + $0x12c] ss:$24 sps:$4 sm:$0xff]  }
 0x141   : > { %2121 = vmatprep.subr.bf16.mxu1 %v4712_v4 }
 0x142   : > { %3446 = vmatpush1.bf16.msra.mxu0 %v4845_v43 }
 0x143   : > { %3447 = vmatprep.subr.bf16.mxu0 %v4853_v44 }
 0x144   : > { %2122 = vmatpush1.bf16.msra.mxu1 %v4710_v5 }
 0x145   : > { %2134 = vmatprep.subr.bf16.mxu1 %v4715_v6 }
 0x146   : > { %3448 = vmatpush1.bf16.msra.mxu0 %v4851_v48 }
 0x147   : > { %2124 = vmatmul.mubr.bf16.vlgmr.msra.gmra.mrb[4].mxu1 %v5677_v16  ;;  %v4725_v16 = vld [vmem:[%s5574_s24 + $0x488] ss:$16 sps:$4 sm:$0xff]   ;;  %3460 = vmatprep.subr.bf16.mxu0 %v4859_v52 }
 0x148   : > { %2135 = vmatpush1.bf16.msra.mxu1 %v4713_v7  ;;  %2166 = vmatprep.mubr.bf16.mxu1 %v5714_v45  ;;  %v4730_v45 = vld [vmem:[%s5574_s24 + $0x4ac] ss:$16 sps:$4 sm:$0xff]   ;;  %v4800_v7 = vld [vmem:[%s5572_s30 + $0x128] ss:$24 sps:$4 sm:$0xff]  }
 0x149   : > { %2136 = vmatprep.subr.bf16.mxu1 %v4718_v8 }
 0x14c   : > { %2137 = vmatpush1.bf16.msra.mxu1 %v4716_v9  ;;  %v4808_v9 = vld [vmem:[%s5572_s30 + $0x15c] ss:$24 sps:$4 sm:$0xff]  }
 0x14d   : > { %2138 = vmatprep.subr.bf16.mxu1 %v4721_v10  ;;  %v4806_v10 = vld [vmem:[%s5572_s30 + $0x158] ss:$24 sps:$4 sm:$0xff]  }
 0x150   : > { %2139 = vmatpush1.bf16.msra.mxu1 %v4719_v11  ;;  %v4814_v11 = vld [vmem:[%s5572_s30 + $0x18c] ss:$24 sps:$4 sm:$0xff]  }
 0x151   : > { %2140 = vmatprep.subr.bf16.mxu1 %v4724_v12  ;;  %v4812_v12 = vld [vmem:[%s5572_s30 + $0x188] ss:$24 sps:$4 sm:$0xff]  }
 0x154   : > { %2141 = vmatpush1.bf16.msra.mxu1 %v4722_v14  ;;  %v4820_v14 = vld [vmem:[%s5572_s30 + $0x1bc] ss:$24 sps:$4 sm:$0xff]  }
 0x155   : > { %2142 = vmatprep.subr.bf16.mxu1 %v4727_v15  ;;  %v4818_v15 = vld [vmem:[%s5572_s30 + $0x1b8] ss:$24 sps:$4 sm:$0xff]  }
 0x158   : > { %2143 = vmatpush1.bf16.msra.mxu1 %v4725_v16  ;;  %v4826_v16 = vld [vmem:[%s5572_s30 + $0x1ec] ss:$24 sps:$4 sm:$0xff]  }
 0x159   : > { %2144 = vmatprep.subr.bf16.mxu1 %v4730_v45  ;;  %v4824_v45 = vld [vmem:[%s5572_s30 + $0x1e8] ss:$24 sps:$4 sm:$0xff]  }
 0x15c   : > { %2145 = vmatpush1.bf16.msra.mxu1 %v4728_v17  ;;  %v4832_v17 = vld [vmem:[%s5572_s30 + $0x21c] ss:$24 sps:$4 sm:$0xff]  }
 0x15d   : > { %2146 = vmatprep.subr.bf16.mxu1 %v4733_v18  ;;  %v4830_v18 = vld [vmem:[%s5572_s30 + $0x218] ss:$24 sps:$4 sm:$0xff]  }
 0x160   : > { %2147 = vmatpush1.bf16.msra.mxu1 %v4731_v21  ;;  %v4844_v21 = vld [vmem:[%s5572_s30 + $0x27c] ss:$24 sps:$4 sm:$0xff]  }
 0x161   : > { %2148 = vmatprep.subr.bf16.mxu1 %v4736_v23  ;;  %v4842_v23 = vld [vmem:[%s5572_s30 + $0x278] ss:$24 sps:$4 sm:$0xff]  }
 0x164   : > { %2149 = vmatpush1.bf16.msra.mxu1 %v4734_v26  ;;  %v4856_v26 = vld [vmem:[%s5572_s30 + $0x2dc] ss:$24 sps:$4 sm:$0xff]  }
 0x165   : > { %2150 = vmatprep.subr.bf16.mxu1 %v4739_v27  ;;  %v4854_v27 = vld [vmem:[%s5572_s30 + $0x2d8] ss:$24 sps:$4 sm:$0xff]  }
 0x168   : > { %2151 = vmatpush1.bf16.msra.mxu1 %v4737_v30  ;;  %v5895_v30 = vshrl.u32 %v939_v29, 7  ;;  %v4874_v29 = vld [vmem:[%s5572_s30 + $0x36c] ss:$24 sps:$4 sm:$0xff]  }
 0x169   : > { %2152 = vmatprep.subr.bf16.mxu1 %v4742_v13 }
 0x16a   : > { %v5898_v13 = vsub.s32 0, %v5895_v30  ;;  %v5908_v56 = vsub.s32 1, %v5895_v30 }
 0x16c   : > { %2153 = vmatpush1.bf16.msra.mxu1 %v4740_v32  ;;  %v942_v32 = vrot.slane %v5905_v31, %v5898_v13 }
 0x16d   : > { %2154 = vmatprep.subr.bf16.mxu1 %v4745_v33  ;;  %v946_v33 = vrot.slane %v5905_v31, %v5908_v56 }
 0x170   : > { %2155 = vmatpush1.bf16.msra.mxu1 %v4743_v37 }
 0x171   : > { %2156 = vmatprep.subr.bf16.mxu1 %v4748_v38 }
 0x174   : > { %2157 = vmatpush1.bf16.msra.mxu1 %v4746_v41 }
 0x175   : > { %2158 = vmatprep.subr.bf16.mxu1 %v4751_v42 }
 0x178   : > { %2159 = vmatpush1.bf16.msra.mxu1 %v4749_v46 }
 0x179   : > { %2160 = vmatprep.subr.bf16.mxu1 %v4754_v47 }
 0x17c   : > { %2161 = vmatpush1.bf16.msra.mxu1 %v4752_v49 }
 0x17d   : > { %2162 = vmatprep.subr.bf16.mxu1 %v4757_v50 }
 0x180   : > { %2163 = vmatpush1.bf16.msra.mxu1 %v4755_v51 }
 0x181   : > { %2164 = vmatprep.subr.bf16.mxu1 %v4760_v53 }
 0x184   : > { %2165 = vmatpush1.bf16.msra.mxu1 %v4758_v54 }
 0x185   : > { %3503 = vmatprep.subr.bf16.mxu1 %v4766_v55 }
 0x187   : > { %2167 = vmatmul.mubr.bf16.vlgmr.msra.gmra.mrb[4].mxu1 %v5758_v22  ;;  %v4796_v22 = vld [vmem:[%s5572_s30 + $0xfc] ss:$24 sps:$4 sm:$0xff]  }
 0x188   : > { %3504 = vmatpush1.bf16.msra.mxu1 %v4764_v57 }
 0x189   : > { %3505 = vmatprep.subr.bf16.mxu1 %v4772_v58 }
 0x18c   : > { %3506 = vmatpush1.bf16.msra.mxu1 %v4770_v59 }
 0x18d   : > { %3507 = vmatprep.subr.bf16.mxu1 %v4778_v60 }
 0x190   : > { %3508 = vmatpush1.bf16.msra.mxu1 %v4776_v61 }
 0x191   : > { %3509 = vmatprep.subr.bf16.mxu1 %v4784_v62 }
 0x194   : > { %3510 = vmatpush1.bf16.msra.mxu1 %v4782_v63 }
 0x195   : > { %3511 = vmatprep.subr.bf16.mxu1 %v4790_v0 }
 0x198   : > { %3512 = vmatpush1.bf16.msra.mxu1 %v4788_v1 }
 0x199   : > { %3513 = vmatprep.subr.bf16.mxu1 %v4796_v22 }
 0x19a   : > { %v1953_v4 = vpop.f32.mrb[0].mxu1 }
 0x19b   : > { %v1955_v5 = vpop.f32.mrb[1].mxu1  ;;  %v1954_v34 = vadd.f32 %v1953_v4, %v942_v32 }
 0x19c   : > { %v1957_v6 = vpop.f32.mrb[2].mxu1  ;;  %3514 = vmatpush1.bf16.msra.mxu1 %v4794_v2  ;;  %v1956_v35 = vadd.f32 %v1955_v5, %v946_v33 }
 0x19d   : > { %v1959_v8 = vpop.f32.mrb[3].mxu1  ;;  %3515 = vmatprep.subr.bf16.mxu1 %v4802_v3  ;;  %v1958_v37 = vadd.f32 %v1957_v6, %v942_v32  ;;  %v4869_v32 = vld [vmem:[%s5572_s30 + $0x360] ss:$24 sps:$4 sm:$0xff]  }
 0x19e   : > { %v1960_v40 = vadd.f32 %v1959_v8, %v946_v33  ;;  %v4872_v33 = vld [vmem:[%s5572_s30 + $0x368] ss:$24 sps:$4 sm:$0xff]  }
 0x1a0   : > { %3516 = vmatpush1.bf16.msra.mxu1 %v4800_v7 }
 0x1a1   : > { %3517 = vmatprep.subr.bf16.mxu1 %v4808_v9 }
 0x1a4   : > { %3518 = vmatpush1.bf16.msra.mxu1 %v4806_v10 }
 0x1a5   : > { %3519 = vmatprep.subr.bf16.mxu1 %v4814_v11 }
 0x1a8   : > { %3520 = vmatpush1.bf16.msra.mxu1 %v4812_v12 }
 0x1a9   : > { %3521 = vmatprep.subr.bf16.mxu1 %v4820_v14 }
 0x1ac   : > { %3522 = vmatpush1.bf16.msra.mxu1 %v4818_v15 }
 0x1ad   : > { %3523 = vmatprep.subr.bf16.mxu1 %v4826_v16 }
 0x1b0   : > { %3524 = vmatpush1.bf16.msra.mxu1 %v4824_v45 }
 0x1b1   : > { %3525 = vmatprep.subr.bf16.mxu1 %v4832_v17 }
 0x1b4   : > { %3526 = vmatpush1.bf16.msra.mxu1 %v4830_v18 }
 0x1b5   : > { %3527 = vmatprep.subr.bf16.mxu1 %v4838_v19 }
 0x1b8   : > { %3528 = vmatpush1.bf16.msra.mxu1 %v4836_v20 }
 0x1b9   : > { %3529 = vmatprep.subr.bf16.mxu1 %v4844_v21  ;;  %v4857_v21 = vld [vmem:[%s5572_s30 + $0x300] ss:$24 sps:$4 sm:$0xff]  }
 0x1bc   : > { %3530 = vmatpush1.bf16.msra.mxu1 %v4842_v23  ;;  %v4860_v23 = vld [vmem:[%s5572_s30 + $0x308] ss:$24 sps:$4 sm:$0xff]  }
 0x1bd   : > { %3531 = vmatprep.subr.bf16.mxu1 %v4850_v24  ;;  %v4865_v24 = vld [vmem:[%s5572_s30 + $0x334] ss:$24 sps:$4 sm:$0xff]  }
 0x1c0   : > { %3532 = vmatpush1.bf16.msra.mxu1 %v4848_v25  ;;  %v4868_v25 = vld [vmem:[%s5572_s30 + $0x33c] ss:$24 sps:$4 sm:$0xff]  }
 0x1c1   : > { %3533 = vmatprep.subr.bf16.mxu1 %v4856_v26  ;;  %v4863_v26 = vld [vmem:[%s5572_s30 + $0x330] ss:$24 sps:$4 sm:$0xff]  }
 0x1c4   : > { %3534 = vmatpush1.bf16.msra.mxu1 %v4854_v27  ;;  %v4866_v27 = vld [vmem:[%s5572_s30 + $0x338] ss:$24 sps:$4 sm:$0xff]  }
 0x1c5   : > { %3546 = vmatprep.subr.bf16.mxu1 %v4862_v28  ;;  %v4871_v28 = vld [vmem:[%s5572_s30 + $0x364] ss:$24 sps:$4 sm:$0xff]  }
 0x1db   : > { %v2039_v36 = vpop.f32.mrb[0].mxu0 }
 0x1dc   : > { %v4410_v38 = vadd.f32 %v2039_v36, %v1954_v34  ;;  %v2041_v39 = vpop.f32.mrb[1].mxu0  ;;  %v4877_v34 = vld [vmem:[%s5572_s30 + $0x394] ss:$24 sps:$4 sm:$0xff]   ;;  %v4875_v36 = vld [vmem:[%s5572_s30 + $0x390] ss:$24 sps:$4 sm:$0xff]  }
 0x1dd   : > { %v4412_v41 = vadd.f32 %v2041_v39, %v1956_v35  ;;  %v2043_v42 = vpop.f32.mrb[2].mxu0  ;;  %v4880_v35 = vld [vmem:[%s5572_s30 + $0x39c] ss:$24 sps:$4 sm:$0xff]   ;;  %v4886_v39 = vld [vmem:[%s5572_s30 + $0x3cc] ss:$24 sps:$4 sm:$0xff]  }
 0x1de   : > { %v2185_v43 = vmul.f32 0.044715, %v4410_v38  ;;  %v4414_v44 = vadd.f32 %v2043_v42, %v1958_v37  ;;  %v2045_v46 = vpop.f32.mrb[3].mxu0  ;;  %v2177_v9 = vmul.f32 0.5, %v4410_v38  ;;  %v4878_v37 = vld [vmem:[%s5572_s30 + $0x398] ss:$24 sps:$4 sm:$0xff]  }
 0x1df   : > { %v2186_v47 = vmul.f32 0.044715, %v4412_v41  ;;  %v4416_v48 = vadd.f32 %v2045_v46, %v1960_v40  ;;  %v2178_v12 = vmul.f32 0.5, %v4412_v41  ;;  %v4881_v40 = vld [vmem:[%s5572_s30 + $0x3c0] ss:$24 sps:$4 sm:$0xff]  }
 0x1e0   : > { %v2193_v49 = vmul.f32 %v4410_v38, %v2185_v43  ;;  %v2189_v50 = vmul.f32 0.044715, %v4414_v44  ;;  %v2181_v10 = vmul.f32 0.5, %v4414_v44  ;;  %v4889_v42 = vld [vmem:[%s5572_s30 + $0x3f4] ss:$24 sps:$4 sm:$0xff]  }
 0x1e1   : > { %v2194_v51 = vmul.f32 %v4412_v41, %v2186_v47  ;;  %v2190_v52 = vmul.f32 0.044715, %v4416_v48  ;;  %v2182_v14 = vmul.f32 0.5, %v4416_v48  ;;  %v4892_v43 = vld [vmem:[%s5572_s30 + $0x3fc] ss:$24 sps:$4 sm:$0xff]  }
 0x1e2   : > { %v2201_v53 = vmul.f32 %v4410_v38, %v2193_v49  ;;  %v2197_v54 = vmul.f32 %v4414_v44, %v2189_v50  ;;  %v4890_v46 = vld [vmem:[%s5572_s30 + $0x3f8] ss:$24 sps:$4 sm:$0xff]   ;;  %v4895_v47 = vld [vmem:[%s5572_s30 + $0x424] ss:$24 sps:$4 sm:$0xff]   ;;  %v4896_v50 = vld [vmem:[%s5572_s30 + $0x428] ss:$24 sps:$4 sm:$0xff]  }
 0x1e3   : > { %v2202_v55 = vmul.f32 %v4412_v41, %v2194_v51  ;;  %v2198_v57 = vmul.f32 %v4416_v48, %v2190_v52  ;;  %v4893_v49 = vld [vmem:[%s5572_s30 + $0x420] ss:$24 sps:$4 sm:$0xff]   ;;  %v4901_v51 = vld [vmem:[%s5572_s30 + $0x454] ss:$24 sps:$4 sm:$0xff]  }
 0x1e4   : > { %v2209_v58 = vadd.f32 %v4410_v38, %v2201_v53  ;;  %v2205_v59 = vmul.f32 %v4414_v44, %v2197_v54  ;;  %v4883_v38 = vld [vmem:[%s5572_s30 + $0x3c4] ss:$24 sps:$4 sm:$0xff]   ;;  %v4899_v53 = vld [vmem:[%s5572_s30 + $0x450] ss:$24 sps:$4 sm:$0xff]  }
 0x1e5   : > { %v2206_v60 = vmul.f32 %v4416_v48, %v2198_v57  ;;  %v2210_v61 = vadd.f32 %v4412_v41, %v2202_v55  ;;  %v4884_v41 = vld [vmem:[%s5572_s30 + $0x3c8] ss:$24 sps:$4 sm:$0xff]   ;;  %v4904_v52 = vld [vmem:[%s5572_s30 + $0x45c] ss:$24 sps:$4 sm:$0xff]   ;;  %v4902_v54 = vld [vmem:[%s5572_s30 + $0x458] ss:$24 sps:$4 sm:$0xff]  }
 0x1e6   : > { %v2217_v62 = vmul.f32 0.7978846, %v2209_v58  ;;  %v2213_v63 = vadd.f32 %v4414_v44, %v2205_v59  ;;  %v4887_v44 = vld [vmem:[%s5572_s30 + $0x3f0] ss:$24 sps:$4 sm:$0xff]   ;;  %v4907_v55 = vld [vmem:[%s5572_s30 + $0x484] ss:$24 sps:$4 sm:$0xff]  }
 0x1e7   : > { %v2214_v0 = vadd.f32 %v4416_v48, %v2206_v60  ;;  %v2218_v1 = vmul.f32 0.7978846, %v2210_v61  ;;  %v4898_v48 = vld [vmem:[%s5572_s30 + $0x42c] ss:$24 sps:$4 sm:$0xff]   ;;  %v4905_v58 = vld [vmem:[%s5572_s30 + $0x480] ss:$24 sps:$4 sm:$0xff]  }
 0x1e8   : > { %5049 = vtanh.f32 %v2217_v62  ;;  %v2221_v22 = vmul.f32 0.7978846, %v2213_v63  ;;  %v4910_v57 = vld [vmem:[%s5572_s30 + $0x48c] ss:$24 sps:$4 sm:$0xff]   ;;  %v4908_v59 = vld [vmem:[%s5572_s30 + $0x488] ss:$24 sps:$4 sm:$0xff]  }
 0x1e9   : > { %v2222_v2 = vmul.f32 0.7978846, %v2214_v0  ;;  %5051 = vtanh.f32 %v2218_v1  ;;  %v4913_v60 = vld [vmem:[%s5572_s30 + $0x4b4] ss:$24 sps:$4 sm:$0xff]   ;;  %v4911_v62 = vld [vmem:[%s5572_s30 + $0x4b0] ss:$24 sps:$4 sm:$0xff]  }
 0x1ea   : > { %5053 = vtanh.f32 %v2221_v22  ;;  %v4916_v61 = vld [vmem:[%s5572_s30 + $0x4bc] ss:$24 sps:$4 sm:$0xff]   ;;  %v4914_v63 = vld [vmem:[%s5572_s30 + $0x4b8] ss:$24 sps:$4 sm:$0xff]   ;;  %v4922_v1 = vld [vmem:[%s5572_s30 + $0x4ec] ss:$24 sps:$4 sm:$0xff]  }
 0x1eb   : > { %5055 = vtanh.f32 %v2222_v2  ;;  %v4919_v0 = vld [vmem:[%s5572_s30 + $0x4e4] ss:$24 sps:$4 sm:$0xff]   ;;  %v4917_v22 = vld [vmem:[%s5572_s30 + $0x4e0] ss:$24 sps:$4 sm:$0xff]  }
 0x1ec   : > { %v4920_v2 = vld [vmem:[%s5572_s30 + $0x4e8] ss:$24 sps:$4 sm:$0xff]  }
 0x1f2   : > { %v5050_v3 = vpop.eup %5049 }
 0x1f3   : > { %v5052_v4 = vpop.eup %5051  ;;  %v2233_v5 = vadd.f32 1.0, %v5050_v3  ;;  %v4925_v3 = vld [vmem:[%s5572_s30 + $0x514] ss:$24 sps:$4 sm:$0xff]  }
 0x1f4   : > { %v5054_v6 = vpop.eup %5053  ;;  %v2234_v7 = vadd.f32 1.0, %v5052_v4  ;;  %v4928_v4 = vld [vmem:[%s5572_s30 + $0x51c] ss:$24 sps:$4 sm:$0xff]  }
 0x1f5   : > { %v5056_v8 = vpop.eup %5055  ;;  %v2237_v11 = vadd.f32 1.0, %v5054_v6  ;;  %v2241_v16 = vmul.f32 %v2233_v5, %v2177_v9  ;;  %v4923_v5 = vld [vmem:[%s5572_s30 + $0x510] ss:$24 sps:$4 sm:$0xff]   ;;  %v4929_v9 = vld [vmem:[%s5572_s30 + $0x540] ss:$24 sps:$4 sm:$0xff]  }
 0x1f6   : > { %v2238_v15 = vadd.f32 1.0, %v5056_v8  ;;  %v2242_v17 = vmul.f32 %v2234_v7, %v2178_v12  ;;  %v4926_v6 = vld [vmem:[%s5572_s30 + $0x518] ss:$24 sps:$4 sm:$0xff]   ;;  %v4931_v7 = vld [vmem:[%s5572_s30 + $0x544] ss:$24 sps:$4 sm:$0xff]  }
 0x1f7   : > { %v2245_v45 = vmul.f32 %v2237_v11, %v2181_v10  ;;  %v4934_v8 = vld [vmem:[%s5572_s30 + $0x54c] ss:$24 sps:$4 sm:$0xff]   ;;  %v4932_v10 = vld [vmem:[%s5572_s30 + $0x548] ss:$24 sps:$4 sm:$0xff]   ;;  %v4940_v12 = vld [vmem:[%s5572_s30 + $0x57c] ss:$24 sps:$4 sm:$0xff]  }
 0x1f8   : > { %v2246_v18 = vmul.f32 %v2238_v15, %v2182_v14  ;;  %v4937_v11 = vld [vmem:[%s5572_s30 + $0x574] ss:$24 sps:$4 sm:$0xff]   ;;  %v4935_v14 = vld [vmem:[%s5572_s30 + $0x570] ss:$24 sps:$4 sm:$0xff]  }
 0x1f9   : > { %v5914_v19 = vpack.c.bf16 %v2245_v45, %v2241_v16  ;;  %v4938_v15 = vld [vmem:[%s5572_s30 + $0x578] ss:$24 sps:$4 sm:$0xff]   ;;  %v4943_v16 = vld [vmem:[%s5572_s30 + $0x5a4] ss:$24 sps:$4 sm:$0xff]  }
 0x1fa   : > { %v5916_v20 = vpack.c.bf16 %v2246_v18, %v2242_v17  ;;  %v4946_v45 = vld [vmem:[%s5572_s30 + $0x5ac] ss:$24 sps:$4 sm:$0xff]   ;;  %v4941_v17 = vld [vmem:[%s5572_s30 + $0x5a0] ss:$24 sps:$4 sm:$0xff]  }
 0x1fb   : > { %v4944_v18 = vld [vmem:[%s5572_s30 + $0x5a8] ss:$24 sps:$4 sm:$0xff]  }
 0x1fc   : > { %3449 = vmatprep.mubr.bf16.mxu0 %v5916_v20  ;;  %3535 = vmatprep.mubr.bf16.mxu1 %v5916_v20 }
 0x1fd   : > { %3450 = vmatmul.mubr.bf16.vlgmr.msra.gmra.mrb[4].mxu0 %v5914_v19  ;;  %3536 = vmatmul.mubr.bf16.vlgmr.msra.gmra.mrb[8].mxu1 %v5914_v19 }
 0x1fe   : > { %3461 = vmatpush1.bf16.msra.mxu0 %v4857_v21  ;;  %3547 = vmatpush1.bf16.msra.mxu1 %v4860_v23  ;;  %v4949_v21 = vld [vmem:[%s5572_s30 + $0x5d4] ss:$24 sps:$4 sm:$0xff]  }
 0x1ff   : > { %3462 = vmatprep.subr.bf16.mxu0 %v4865_v24  ;;  %3548 = vmatprep.subr.bf16.mxu1 %v4868_v25  ;;  %v4952_v23 = vld [vmem:[%s5572_s30 + $0x5dc] ss:$24 sps:$4 sm:$0xff]   ;;  %v4947_v24 = vld [vmem:[%s5572_s30 + $0x5d0] ss:$24 sps:$4 sm:$0xff]  }
 0x200   : > { %v4950_v25 = vld [vmem:[%s5572_s30 + $0x5d8] ss:$24 sps:$4 sm:$0xff]  }
 0x202   : > { %3463 = vmatpush1.bf16.msra.mxu0 %v4863_v26  ;;  %3549 = vmatpush1.bf16.msra.mxu1 %v4866_v27  ;;  %v4955_v26 = vld [vmem:[%s5572_s30 + $0x14] ss:$24 sps:$4 sm:$0xff]   ;;  %v5986_v27 = vsub.s32 2, %v5895_v30 }
 0x203   : > { %3464 = vmatprep.subr.bf16.mxu0 %v4871_v28  ;;  %3550 = vmatprep.subr.bf16.mxu1 %v4874_v29  ;;  %v5989_v28 = vsub.s32 3, %v5895_v30 }
 0x204   : > { %v950_v29 = vrot.slane %v5905_v31, %v5986_v27 }
 0x206   : > { %3465 = vmatpush1.bf16.msra.mxu0 %v4869_v32  ;;  %3551 = vmatpush1.bf16.msra.mxu1 %v4872_v33  ;;  %v954_v32 = vrot.slane %v5905_v31, %v5989_v28 }
 0x207   : > { %3466 = vmatprep.subr.bf16.mxu0 %v4877_v34  ;;  %3552 = vmatprep.subr.bf16.mxu1 %v4880_v35 }
 0x20a   : > { %3467 = vmatpush1.bf16.msra.mxu0 %v4875_v36  ;;  %3553 = vmatpush1.bf16.msra.mxu1 %v4878_v37 }
 0x20b   : > { %3468 = vmatprep.subr.bf16.mxu0 %v4883_v38  ;;  %3554 = vmatprep.subr.bf16.mxu1 %v4886_v39 }
 0x20e   : > { %3469 = vmatpush1.bf16.msra.mxu0 %v4881_v40  ;;  %3555 = vmatpush1.bf16.msra.mxu1 %v4884_v41 }
 0x20f   : > { %3470 = vmatprep.subr.bf16.mxu0 %v4889_v42  ;;  %3556 = vmatprep.subr.bf16.mxu1 %v4892_v43 }
 0x212   : > { %3471 = vmatpush1.bf16.msra.mxu0 %v4887_v44  ;;  %3557 = vmatpush1.bf16.msra.mxu1 %v4890_v46 }
 0x213   : > { %3472 = vmatprep.subr.bf16.mxu0 %v4895_v47  ;;  %3558 = vmatprep.subr.bf16.mxu1 %v4898_v48 }
 0x216   : > { %3473 = vmatpush1.bf16.msra.mxu0 %v4893_v49  ;;  %3559 = vmatpush1.bf16.msra.mxu1 %v4896_v50 }
 0x217   : > { %3474 = vmatprep.subr.bf16.mxu0 %v4901_v51  ;;  %3560 = vmatprep.subr.bf16.mxu1 %v4904_v52 }
 0x21a   : > { %3475 = vmatpush1.bf16.msra.mxu0 %v4899_v53  ;;  %3561 = vmatpush1.bf16.msra.mxu1 %v4902_v54 }
 0x21b   : > { %3476 = vmatprep.subr.bf16.mxu0 %v4907_v55  ;;  %3562 = vmatprep.subr.bf16.mxu1 %v4910_v57 }
 0x21e   : > { %3477 = vmatpush1.bf16.msra.mxu0 %v4905_v58  ;;  %3563 = vmatpush1.bf16.msra.mxu1 %v4908_v59 }
 0x21f   : > { %3478 = vmatprep.subr.bf16.mxu0 %v4913_v60  ;;  %3564 = vmatprep.subr.bf16.mxu1 %v4916_v61 }
 0x222   : > { %3479 = vmatpush1.bf16.msra.mxu0 %v4911_v62  ;;  %3565 = vmatpush1.bf16.msra.mxu1 %v4914_v63 }
 0x223   : > { %3480 = vmatprep.subr.bf16.mxu0 %v4919_v0  ;;  %3566 = vmatprep.subr.bf16.mxu1 %v4922_v1 }
 0x226   : > { %3481 = vmatpush1.bf16.msra.mxu0 %v4917_v22  ;;  %3567 = vmatpush1.bf16.msra.mxu1 %v4920_v2 }
 0x227   : > { %3482 = vmatprep.subr.bf16.mxu0 %v4925_v3  ;;  %3568 = vmatprep.subr.bf16.mxu1 %v4928_v4 }
 0x22a   : > { %3483 = vmatpush1.bf16.msra.mxu0 %v4923_v5  ;;  %3569 = vmatpush1.bf16.msra.mxu1 %v4926_v6 }
 0x22b   : > { %3484 = vmatprep.subr.bf16.mxu0 %v4931_v7  ;;  %3570 = vmatprep.subr.bf16.mxu1 %v4934_v8 }
 0x22e   : > { %3485 = vmatpush1.bf16.msra.mxu0 %v4929_v9  ;;  %3571 = vmatpush1.bf16.msra.mxu1 %v4932_v10 }
 0x22f   : > { %3486 = vmatprep.subr.bf16.mxu0 %v4937_v11  ;;  %3572 = vmatprep.subr.bf16.mxu1 %v4940_v12 }
 0x232   : > { %3487 = vmatpush1.bf16.msra.mxu0 %v4935_v14  ;;  %3573 = vmatpush1.bf16.msra.mxu1 %v4938_v15 }
 0x233   : > { %3488 = vmatprep.subr.bf16.mxu0 %v4943_v16  ;;  %3574 = vmatprep.subr.bf16.mxu1 %v4946_v45  ;;  %v4953_v16 = vld [vmem:[%s5572_s30 + $0x10] ss:$24 sps:$4 sm:$0xff]   ;;  %v4958_v45 = vld [vmem:[%s5572_s30 + $0x44] ss:$24 sps:$4 sm:$0xff]  }
 0x236   : > { %3489 = vmatpush1.bf16.msra.mxu0 %v4941_v17  ;;  %3575 = vmatpush1.bf16.msra.mxu1 %v4944_v18  ;;  %v4956_v17 = vld [vmem:[%s5572_s30 + $0x40] ss:$24 sps:$4 sm:$0xff]   ;;  %v4961_v18 = vld [vmem:[%s5572_s30 + $0x74] ss:$24 sps:$4 sm:$0xff]  }
 0x237   : > { %3490 = vmatprep.subr.bf16.mxu0 %v4949_v21  ;;  %3576 = vmatprep.subr.bf16.mxu1 %v4952_v23  ;;  %v4959_v21 = vld [vmem:[%s5572_s30 + $0x70] ss:$24 sps:$4 sm:$0xff]   ;;  %v4964_v23 = vld [vmem:[%s5572_s30 + $0xa4] ss:$24 sps:$4 sm:$0xff]  }
 0x23a   : > { %3491 = vmatpush1.bf16.msra.mxu0 %v4947_v24  ;;  %3577 = vmatpush1.bf16.msra.mxu1 %v4950_v25  ;;  %v4962_v24 = vld [vmem:[%s5572_s30 + $0xa0] ss:$24 sps:$4 sm:$0xff]   ;;  %v4967_v25 = vld [vmem:[%s5572_s30 + $0xd4] ss:$24 sps:$4 sm:$0xff]  }
 0x23b   : > { %3589 = vmatprep.subr.bf16.mxu0 %v4955_v26  ;;  %v4965_v26 = vld [vmem:[%s5572_s30 + $0xd0] ss:$24 sps:$4 sm:$0xff]  }
 0x25a   : > { %v2168_v33 = vpop.f32.mrb[4].mxu1 }
 0x25b   : > { %v4417_v34 = vadd.f32 %v2168_v33, %v950_v29  ;;  %v2170_v35 = vpop.f32.mrb[5].mxu1  ;;  %v4971_v33 = vld [vmem:[%s5572_s30 + $0x130] ss:$24 sps:$4 sm:$0xff]  }
 0x25c   : > { %v4418_v36 = vadd.f32 %v2170_v35, %v954_v32  ;;  %v2172_v37 = vpop.f32.mrb[6].mxu1  ;;  %v4974_v35 = vld [vmem:[%s5572_s30 + $0x160] ss:$24 sps:$4 sm:$0xff]  }
 0x25d   : > { %v2187_v38 = vmul.f32 0.044715, %v4417_v34  ;;  %v4419_v39 = vadd.f32 %v2172_v37, %v950_v29  ;;  %v2174_v40 = vpop.f32.mrb[7].mxu1  ;;  %v2179_v3 = vmul.f32 0.5, %v4417_v34  ;;  %v4968_v29 = vld [vmem:[%s5572_s30 + $0x100] ss:$24 sps:$4 sm:$0xff]  }
 0x25e   : > { %v2188_v41 = vmul.f32 0.044715, %v4418_v36  ;;  %v4420_v42 = vadd.f32 %v2174_v40, %v954_v32  ;;  %v2180_v6 = vmul.f32 0.5, %v4418_v36  ;;  %v4973_v32 = vld [vmem:[%s5572_s30 + $0x134] ss:$24 sps:$4 sm:$0xff]  }
 0x25f   : > { %v2195_v43 = vmul.f32 %v4417_v34, %v2187_v38  ;;  %v2191_v44 = vmul.f32 0.044715, %v4419_v39  ;;  %v2183_v4 = vmul.f32 0.5, %v4419_v39  ;;  %v4977_v37 = vld [vmem:[%s5572_s30 + $0x190] ss:$24 sps:$4 sm:$0xff]  }
 0x260   : > { %v2196_v46 = vmul.f32 %v4418_v36, %v2188_v41  ;;  %v2192_v47 = vmul.f32 0.044715, %v4420_v42  ;;  %v2184_v7 = vmul.f32 0.5, %v4420_v42  ;;  %v4982_v38 = vld [vmem:[%s5572_s30 + $0x1c4] ss:$24 sps:$4 sm:$0xff]  }
 0x261   : > { %v2203_v48 = vmul.f32 %v4417_v34, %v2195_v43  ;;  %v2199_v49 = vmul.f32 %v4419_v39, %v2191_v44  ;;  %v4985_v40 = vld [vmem:[%s5572_s30 + $0x1f4] ss:$24 sps:$4 sm:$0xff]   ;;  %v4983_v41 = vld [vmem:[%s5572_s30 + $0x1f0] ss:$24 sps:$4 sm:$0xff]   ;;  %v4986_v43 = vld [vmem:[%s5572_s30 + $0x220] ss:$24 sps:$4 sm:$0xff]  }
 0x262   : > { %v2204_v50 = vmul.f32 %v4418_v36, %v2196_v46  ;;  %v2200_v51 = vmul.f32 %v4420_v42, %v2192_v47  ;;  %v4991_v44 = vld [vmem:[%s5572_s30 + $0x254] ss:$24 sps:$4 sm:$0xff]   ;;  %v4989_v46 = vld [vmem:[%s5572_s30 + $0x250] ss:$24 sps:$4 sm:$0xff]   ;;  %v4994_v47 = vld [vmem:[%s5572_s30 + $0x284] ss:$24 sps:$4 sm:$0xff]  }
 0x263   : > { %v2211_v52 = vadd.f32 %v4417_v34, %v2203_v48  ;;  %v2207_v31 = vmul.f32 %v4419_v39, %v2199_v49  ;;  %v4976_v34 = vld [vmem:[%s5572_s30 + $0x164] ss:$24 sps:$4 sm:$0xff]   ;;  %v4992_v48 = vld [vmem:[%s5572_s30 + $0x280] ss:$24 sps:$4 sm:$0xff]   ;;  %v4997_v49 = vld [vmem:[%s5572_s30 + $0x2b4] ss:$24 sps:$4 sm:$0xff]  }
 0x264   : > { %v2208_v53 = vmul.f32 %v4420_v42, %v2200_v51  ;;  %v2212_v54 = vadd.f32 %v4418_v36, %v2204_v50  ;;  %v4979_v36 = vld [vmem:[%s5572_s30 + $0x194] ss:$24 sps:$4 sm:$0xff]   ;;  %v4995_v50 = vld [vmem:[%s5572_s30 + $0x2b0] ss:$24 sps:$4 sm:$0xff]   ;;  %v5000_v51 = vld [vmem:[%s5572_s30 + $0x2e4] ss:$24 sps:$4 sm:$0xff]  }
 0x265   : > { %v2219_v55 = vmul.f32 0.7978846, %v2211_v52  ;;  %v2215_v57 = vadd.f32 %v4419_v39, %v2207_v31  ;;  %v4980_v39 = vld [vmem:[%s5572_s30 + $0x1c0] ss:$24 sps:$4 sm:$0xff]   ;;  %v5003_v31 = vld [vmem:[%s5572_s30 + $0x314] ss:$24 sps:$4 sm:$0xff]  }
 0x266   : > { %v2216_v58 = vadd.f32 %v4420_v42, %v2208_v53  ;;  %v2220_v59 = vmul.f32 0.7978846, %v2212_v54  ;;  %v4988_v42 = vld [vmem:[%s5572_s30 + $0x224] ss:$24 sps:$4 sm:$0xff]   ;;  %v4998_v52 = vld [vmem:[%s5572_s30 + $0x2e0] ss:$24 sps:$4 sm:$0xff]  }
 0x267   : > { %5057 = vtanh.f32 %v2219_v55  ;;  %v2223_v60 = vmul.f32 0.7978846, %v2215_v57  ;;  %v5001_v53 = vld [vmem:[%s5572_s30 + $0x310] ss:$24 sps:$4 sm:$0xff]   ;;  %v5006_v54 = vld [vmem:[%s5572_s30 + $0x344] ss:$24 sps:$4 sm:$0xff]  }
 0x268   : > { %v2224_v61 = vmul.f32 0.7978846, %v2216_v58  ;;  %5059 = vtanh.f32 %v2220_v59  ;;  %v5004_v55 = vld [vmem:[%s5572_s30 + $0x340] ss:$24 sps:$4 sm:$0xff]   ;;  %v5009_v57 = vld [vmem:[%s5572_s30 + $0x374] ss:$24 sps:$4 sm:$0xff]  }
 0x269   : > { %5061 = vtanh.f32 %v2223_v60  ;;  %v5007_v58 = vld [vmem:[%s5572_s30 + $0x370] ss:$24 sps:$4 sm:$0xff]   ;;  %v5012_v59 = vld [vmem:[%s5572_s30 + $0x3a4] ss:$24 sps:$4 sm:$0xff]   ;;  %v5010_v60 = vld [vmem:[%s5572_s30 + $0x3a0] ss:$24 sps:$4 sm:$0xff]  }
 0x26a   : > { %5063 = vtanh.f32 %v2224_v61  ;;  %v5013_v61 = vld [vmem:[%s5572_s30 + $0x3d0] ss:$24 sps:$4 sm:$0xff]  }
 0x271   : > { %v5058_v62 = vpop.eup %5057 }
 0x272   : > { %v5060_v63 = vpop.eup %5059  ;;  %v2235_v0 = vadd.f32 1.0, %v5058_v62  ;;  %v5018_v62 = vld [vmem:[%s5572_s30 + $0x404] ss:$24 sps:$4 sm:$0xff]  }
 0x273   : > { %v5062_v1 = vpop.eup %5061  ;;  %v2236_v22 = vadd.f32 1.0, %v5060_v63  ;;  %v5016_v63 = vld [vmem:[%s5572_s30 + $0x400] ss:$24 sps:$4 sm:$0xff]  }
 0x274   : > { %v5064_v2 = vpop.eup %5063  ;;  %v2239_v5 = vadd.f32 1.0, %v5062_v1  ;;  %v2243_v9 = vmul.f32 %v2235_v0, %v2179_v3  ;;  %v5021_v0 = vld [vmem:[%s5572_s30 + $0x434] ss:$24 sps:$4 sm:$0xff]   ;;  %v5019_v1 = vld [vmem:[%s5572_s30 + $0x430] ss:$24 sps:$4 sm:$0xff]  }
 0x275   : > { %v2240_v8 = vadd.f32 1.0, %v5064_v2  ;;  %v2244_v11 = vmul.f32 %v2236_v22, %v2180_v6  ;;  %v5024_v22 = vld [vmem:[%s5572_s30 + $0x464] ss:$24 sps:$4 sm:$0xff]   ;;  %v5022_v2 = vld [vmem:[%s5572_s30 + $0x460] ss:$24 sps:$4 sm:$0xff]  }
 0x276   : > { %v2247_v10 = vmul.f32 %v2239_v5, %v2183_v4  ;;  %v5027_v3 = vld [vmem:[%s5572_s30 + $0x494] ss:$24 sps:$4 sm:$0xff]   ;;  %v5025_v4 = vld [vmem:[%s5572_s30 + $0x490] ss:$24 sps:$4 sm:$0xff]   ;;  %v5030_v5 = vld [vmem:[%s5572_s30 + $0x4c4] ss:$24 sps:$4 sm:$0xff]  }
 0x277   : > { %v2248_v12 = vmul.f32 %v2240_v8, %v2184_v7  ;;  %v5028_v6 = vld [vmem:[%s5572_s30 + $0x4c0] ss:$24 sps:$4 sm:$0xff]   ;;  %v5033_v7 = vld [vmem:[%s5572_s30 + $0x4f4] ss:$24 sps:$4 sm:$0xff]   ;;  %v5031_v8 = vld [vmem:[%s5572_s30 + $0x4f0] ss:$24 sps:$4 sm:$0xff]  }
 0x278   : > { %v5995_v14 = vpack.c.bf16 %v2247_v10, %v2243_v9  ;;  %v5036_v9 = vld [vmem:[%s5572_s30 + $0x524] ss:$24 sps:$4 sm:$0xff]   ;;  %v5034_v10 = vld [vmem:[%s5572_s30 + $0x520] ss:$24 sps:$4 sm:$0xff]  }
 0x279   : > { %v5997_v15 = vpack.c.bf16 %v2248_v12, %v2244_v11  ;;  %v5039_v11 = vld [vmem:[%s5572_s30 + $0x554] ss:$24 sps:$4 sm:$0xff]   ;;  %v5037_v12 = vld [vmem:[%s5572_s30 + $0x550] ss:$24 sps:$4 sm:$0xff]  }
 0x27b   : > { %3492 = vmatprep.mubr.bf16.mxu0 %v5997_v15  ;;  %3578 = vmatprep.mubr.bf16.mxu1 %v5997_v15 }
 0x27c   : > { %3493 = vmatmul.mubr.bf16.vlgmr.msra.gmra.mrb[4].mxu0 %v5995_v14  ;;  %3579 = vmatmul.mubr.bf16.vlgmr.msra.gmra.mrb[8].mxu1 %v5995_v14 }
 0x27d   : > { %3590 = vmatpush1.bf16.msra.mxu0 %v4953_v16  ;;  %3621 = vmatprep.mubr.bf16.mxu0 %v5916_v20  ;;  %v4970_v20 = vld [vmem:[%s5572_s30 + $0x104] ss:$24 sps:$4 sm:$0xff]   ;;  %v5040_v16 = vld [vmem:[%s5572_s30 + $0x580] ss:$24 sps:$4 sm:$0xff]  }
 0x27e   : > { %3591 = vmatprep.subr.bf16.mxu0 %v4958_v45  ;;  %v5045_v45 = vld [vmem:[%s5572_s30 + $0x5b4] ss:$24 sps:$4 sm:$0xff]  }
 0x281   : > { %3592 = vmatpush1.bf16.msra.mxu0 %v4956_v17  ;;  %v5043_v17 = vld [vmem:[%s5572_s30 + $0x5b0] ss:$24 sps:$4 sm:$0xff]  }
 0x282   : > { %3593 = vmatprep.subr.bf16.mxu0 %v4961_v18  ;;  %v5048_v18 = vld [vmem:[%s5572_s30 + $0x5e4] ss:$24 sps:$4 sm:$0xff]  }
 0x285   : > { %3594 = vmatpush1.bf16.msra.mxu0 %v4959_v21  ;;  %v5046_v21 = vld [vmem:[%s5572_s30 + $0x5e0] ss:$24 sps:$4 sm:$0xff]  }
 0x286   : > { %3595 = vmatprep.subr.bf16.mxu0 %v4964_v23  ;;  %v2249_v23 = vld [vmem:[#allocation2] sm:$0xff] }
 0x289   : > { %3596 = vmatpush1.bf16.msra.mxu0 %v4962_v24  ;;  %v2251_v24 = vld [vmem:[#allocation2 + $0x10] sm:$0xff] }
 0x28a   : > { %3597 = vmatprep.subr.bf16.mxu0 %v4967_v25  ;;  %v2250_v25 = vld [vmem:[#allocation2 + $0x8] sm:$0xff] }
 0x28d   : > { %3598 = vmatpush1.bf16.msra.mxu0 %v4965_v26  ;;  %v2252_v26 = vld [vmem:[#allocation2 + $0x18] sm:$0xff] }
 0x28e   : > { %3599 = vmatprep.subr.bf16.mxu0 %v4970_v20 }
 0x291   : > { %3600 = vmatpush1.bf16.msra.mxu0 %v4968_v29 }
 0x292   : > { %3601 = vmatprep.subr.bf16.mxu0 %v4973_v32  ;;  %v2255_v32 = vld [vmem:[#allocation2 + $0x30] sm:$0xff] }
 0x295   : > { %3602 = vmatpush1.bf16.msra.mxu0 %v4971_v33  ;;  %v2257_v33 = vld [vmem:[#allocation2 + $0x40] sm:$0xff] }
 0x296   : > { %3603 = vmatprep.subr.bf16.mxu0 %v4976_v34 }
 0x299   : > { %3604 = vmatpush1.bf16.msra.mxu0 %v4974_v35 }
 0x29a   : > { %3605 = vmatprep.subr.bf16.mxu0 %v4979_v36 }
 0x29d   : > { %3606 = vmatpush1.bf16.msra.mxu0 %v4977_v37 }
 0x29e   : > { %3607 = vmatprep.subr.bf16.mxu0 %v4982_v38  ;;  %v2256_v38 = vld [vmem:[#allocation2 + $0x38] sm:$0xff] }
 0x2a1   : > { %3608 = vmatpush1.bf16.msra.mxu0 %v4980_v39  ;;  %v2258_v39 = vld [vmem:[#allocation2 + $0x48] sm:$0xff] }
 0x2a2   : > { %3609 = vmatprep.subr.bf16.mxu0 %v4985_v40 }
 0x2a5   : > { %3610 = vmatpush1.bf16.msra.mxu0 %v4983_v41 }
 0x2a6   : > { %3611 = vmatprep.subr.bf16.mxu0 %v4988_v42 }
 0x2a9   : > { %3612 = vmatpush1.bf16.msra.mxu0 %v4986_v43 }
 0x2aa   : > { %3613 = vmatprep.subr.bf16.mxu0 %v4991_v44 }
 0x2ad   : > { %3614 = vmatpush1.bf16.msra.mxu0 %v4989_v46 }
 0x2ae   : > { %3615 = vmatprep.subr.bf16.mxu0 %v4994_v47 }
 0x2b1   : > { %3616 = vmatpush1.bf16.msra.mxu0 %v4992_v48 }
 0x2b2   : > { %3617 = vmatprep.subr.bf16.mxu0 %v4997_v49 }
 0x2b5   : > { %3618 = vmatpush1.bf16.msra.mxu0 %v4995_v50  ;;  %v2253_v50 = vld [vmem:[#allocation2 + $0x20] sm:$0xff] }
 0x2b6   : > { %3619 = vmatprep.subr.bf16.mxu0 %v5000_v51  ;;  %v2254_v51 = vld [vmem:[#allocation2 + $0x28] sm:$0xff] }
 0x2b9   : > { %3620 = vmatpush1.bf16.msra.mxu0 %v4998_v52 }
 0x2ba   : > { %3632 = vmatprep.subr.bf16.mxu0 %v5003_v31  ;;  %v2259_v31 = vld [vmem:[#allocation2 + $0x50] sm:$0xff] }
 0x2bc   : > { %3622 = vmatmul.mubr.bf16.vlgmr.msra.gmra.mrb[8].mxu0 %v5914_v19  ;;  %v5015_v19 = vld [vmem:[%s5572_s30 + $0x3d4] ss:$24 sps:$4 sm:$0xff]  }
 0x2bd   : > { %3633 = vmatpush1.bf16.msra.mxu0 %v5001_v53  ;;  %3664 = vmatprep.mubr.bf16.mxu0 %v5997_v15  ;;  %v5042_v15 = vld [vmem:[%s5572_s30 + $0x584] ss:$24 sps:$4 sm:$0xff]  }
 0x2be   : > { %3634 = vmatprep.subr.bf16.mxu0 %v5006_v54 }
 0x2c1   : > { %3635 = vmatpush1.bf16.msra.mxu0 %v5004_v55  ;;  %v2260_v55 = vld [vmem:[#allocation2 + $0x58] sm:$0xff] }
 0x2c2   : > { %3636 = vmatprep.subr.bf16.mxu0 %v5009_v57 }
 0x2c5   : > { %3637 = vmatpush1.bf16.msra.mxu0 %v5007_v58 }
 0x2c6   : > { %3638 = vmatprep.subr.bf16.mxu0 %v5012_v59 }
 0x2c9   : > { %3639 = vmatpush1.bf16.msra.mxu0 %v5010_v60 }
 0x2ca   : > { %3640 = vmatprep.subr.bf16.mxu0 %v5015_v19 }
 0x2cd   : > { %3641 = vmatpush1.bf16.msra.mxu0 %v5013_v61  ;;  %v6072_v61 = vsub.s32 (!%p4405_p11), 4, %v5895_v30 }
 0x2ce   : > { %3642 = vmatprep.subr.bf16.mxu0 %v5018_v62  ;;  %v6075_v62 = vsub.s32 (!%p4405_p11), 5, %v5895_v30 }
 0x2d1   : > { %3643 = vmatpush1.bf16.msra.mxu0 %v5016_v63 }
 0x2d2   : > { %3644 = vmatprep.subr.bf16.mxu0 %v5021_v0 }
 0x2d5   : > { %3645 = vmatpush1.bf16.msra.mxu0 %v5019_v1 }
 0x2d6   : > { %3646 = vmatprep.subr.bf16.mxu0 %v5024_v22 }
 0x2d9   : > { %3647 = vmatpush1.bf16.msra.mxu0 %v5022_v2  ;;  %v3715_v2 = vld [vmem:[%s6220_s4] sm:$0x3f] (!%p4405_p11) }
 0x2da   : > { %3648 = vmatprep.subr.bf16.mxu0 %v5027_v3  ;;  %v3736_v30 = vrot.slane (!%p4405_p11), %v3715_v2, %v6072_v61 }
 0x2dd   : > { %3649 = vmatpush1.bf16.msra.mxu0 %v5025_v4  ;;  %v3720_v4 = vrot.slane (!%p4405_p11), %v3715_v2, %v5898_v13 }
 0x2de   : > { %3650 = vmatprep.subr.bf16.mxu0 %v5030_v5  ;;  %v3724_v5 = vrot.slane (!%p4405_p11), %v3715_v2, %v5908_v56 }
 0x2e1   : > { %3651 = vmatpush1.bf16.msra.mxu0 %v5028_v6  ;;  %v3728_v6 = vrot.slane (!%p4405_p11), %v3715_v2, %v5986_v27 }
 0x2e2   : > { %3652 = vmatprep.subr.bf16.mxu0 %v5033_v7  ;;  %v3732_v7 = vrot.slane (!%p4405_p11), %v3715_v2, %v5989_v28 }
 0x2e5   : > { %3653 = vmatpush1.bf16.msra.mxu0 %v5031_v8  ;;  %v3740_v8 = vrot.slane (!%p4405_p11), %v3715_v2, %v6075_v62 }
 0x2e6   : > { %3654 = vmatprep.subr.bf16.mxu0 %v5036_v9  ;;  %v3759_v9 = vld [vmem:[%s6216_s0] sm:$0xff] (!%p4405_p11) }
 0x2e9   : > { %3655 = vmatpush1.bf16.msra.mxu0 %v5034_v10  ;;  %v3760_v10 = vld [vmem:[%s6216_s0 + $0x8] sm:$0xff] (!%p4405_p11) }
 0x2ea   : > { %3656 = vmatprep.subr.bf16.mxu0 %v5039_v11  ;;  %v3761_v11 = vld [vmem:[%s6216_s0 + $0x10] sm:$0xff] (!%p4405_p11) }
 0x2ed   : > { %3657 = vmatpush1.bf16.msra.mxu0 %v5037_v12 }
 0x2ee   : > { %3658 = vmatprep.subr.bf16.mxu0 %v5042_v15 }
 0x2f1   : > { %3659 = vmatpush1.bf16.msra.mxu0 %v5040_v16 }
 0x2f2   : > { %3660 = vmatprep.subr.bf16.mxu0 %v5045_v45 }
 0x2f5   : > { %3661 = vmatpush1.bf16.msra.mxu0 %v5043_v17 }
 0x2f6   : > { %3662 = vmatprep.subr.bf16.mxu0 %v5048_v18  ;;  %v3762_v18 = vld [vmem:[%s6216_s0 + $0x18] sm:$0xff] (!%p4405_p11) }
 0x2f9   : > { %3663 = vmatpush1.bf16.msra.mxu0 %v5046_v21 }
 0x2fc   : > { %3665 = vmatmul.mubr.bf16.vlgmr.msra.gmra.mrb[8].mxu0 %v5995_v14 }
 0x34f   : > { %v3494_v20 = vpop.f32.mrb[4].mxu0  ;;  %v3580_v29 = vpop.f32.mrb[8].mxu1 }
 0x350   : > { %v3675_v34 = vadd.f32 %v3494_v20, %v2249_v23  ;;  %v3677_v35 = vadd.f32 %v3580_v29, %v2251_v24  ;;  %v3496_v36 = vpop.f32.mrb[5].mxu0  ;;  %v3582_v37 = vpop.f32.mrb[9].mxu1  ;;  %v3763_v20 = vld [vmem:[%s6216_s0 + $0x20] sm:$0xff] (!%p4405_p11) }
 0x351   : > { %v3676_v40 = vadd.f32 %v3496_v36, %v2250_v25  ;;  %v3678_v41 = vadd.f32 %v3582_v37, %v2252_v26  ;;  %v3498_v42 = vpop.f32.mrb[6].mxu0  ;;  %v3584_v43 = vpop.f32.mrb[10].mxu1 }
 0x352   : > { %3687 = vst [vmem:[#allocation2] sm:$0xff] %v3675_v34  ;;  %3689 = vst [vmem:[#allocation2 + $0x10] sm:$0xff] %v3677_v35  ;;  %v3681_v14 = vadd.f32 %v3498_v42, %v2255_v32  ;;  %v3683_v44 = vadd.f32 %v3584_v43, %v2257_v33  ;;  %v3500_v46 = vpop.f32.mrb[7].mxu0  ;;  %v3586_v47 = vpop.f32.mrb[11].mxu1  ;;  %v3764_v33 = vld [vmem:[%s6216_s0 + $0x28] sm:$0xff] (!%p4405_p11) }
 0x353   : > { %3688 = vst [vmem:[#allocation2 + $0x8] sm:$0xff] %v3676_v40  ;;  %3690 = vst [vmem:[#allocation2 + $0x18] sm:$0xff] %v3678_v41  ;;  %v3682_v48 = vadd.f32 %v3500_v46, %v2256_v38  ;;  %v3684_v49 = vadd.f32 %v3586_v47, %v2258_v39  ;;  %v3765_v39 = vld [vmem:[%s6216_s0 + $0x30] sm:$0xff] (!%p4405_p11)  ;;  %v3766_v40 = vld [vmem:[%s6216_s0 + $0x38] sm:$0xff] (!%p4405_p11) }
 0x354   : > { %3693 = vst [vmem:[#allocation2 + $0x30] sm:$0xff] %v3681_v14  ;;  %3695 = vst [vmem:[#allocation2 + $0x40] sm:$0xff] %v3683_v44  ;;  %v3767_v44 = vld [vmem:[%s6216_s0 + $0x40] sm:$0xff] (!%p4405_p11) }
 0x355   : > { %3694 = vst [vmem:[#allocation2 + $0x38] sm:$0xff] %v3682_v48  ;;  %3696 = vst [vmem:[#allocation2 + $0x48] sm:$0xff] %v3684_v49 }
 0x359   : > { %v3703_v63 = vld [vmem:[#allocation2] sm:$0xff] (!%p4405_p11)  ;;  %v3705_v1 = vld [vmem:[#allocation2 + $0x10] sm:$0xff] (!%p4405_p11) }
 0x35a   : > { %v3704_v0 = vld [vmem:[#allocation2 + $0x8] sm:$0xff] (!%p4405_p11)  ;;  %v3706_v22 = vld [vmem:[#allocation2 + $0x18] sm:$0xff] (!%p4405_p11)  ;;  %v3747_v15 = vadd.f32 (!%p4405_p11), %v3720_v4, %v3703_v63  ;;  %v3749_v45 = vadd.f32 (!%p4405_p11), %v3728_v6, %v3705_v1 }
 0x35b   : > { %v3748_v16 = vadd.f32 (!%p4405_p11), %v3724_v5, %v3704_v0  ;;  %v3750_v17 = vadd.f32 (!%p4405_p11), %v3732_v7, %v3706_v22  ;;  %v3709_v29 = vld [vmem:[#allocation2 + $0x30] sm:$0xff] (!%p4405_p11)  ;;  %v3711_v36 = vld [vmem:[#allocation2 + $0x40] sm:$0xff] (!%p4405_p11) }
 0x35c   : > { %v3771_v23 = vadd.f32 (!%p4405_p11), %v3759_v9, %v3747_v15  ;;  %v3773_v25 = vadd.f32 (!%p4405_p11), %v3761_v11, %v3749_v45  ;;  %v3710_v32 = vld [vmem:[#allocation2 + $0x38] sm:$0xff] (!%p4405_p11)  ;;  %v3712_v37 = vld [vmem:[#allocation2 + $0x48] sm:$0xff] (!%p4405_p11)  ;;  %v3753_v43 = vadd.f32 (!%p4405_p11), %v3720_v4, %v3709_v29  ;;  %v3755_v48 = vadd.f32 (!%p4405_p11), %v3728_v6, %v3711_v36 }
 0x35d   : > { %v3772_v24 = vadd.f32 (!%p4405_p11), %v3760_v10, %v3748_v16  ;;  %v3774_v34 = vadd.f32 (!%p4405_p11), %v3762_v18, %v3750_v17  ;;  %v3754_v14 = vadd.f32 (!%p4405_p11), %v3724_v5, %v3710_v32  ;;  %v3756_v49 = vadd.f32 (!%p4405_p11), %v3732_v7, %v3712_v37 }
 0x35f   : > { %v3785_v35 = vadd.f32 (!%p4405_p11), %v3772_v24, %v3771_v23 }
 0x361   : > { %v3786_v42 = vadd.f32 (!%p4405_p11), %v3785_v35, %v3773_v25 }
 0x3cf   : > { %v3666_v52 = vpop.f32.mrb[8].mxu0  ;;  %3702 = sbr.rel (%p4405_p11) target bundleno = 1323 (0x52b), region = 79 }
 0x3d0   : > { %v3679_v53 = vadd.f32 %v3666_v52, %v2253_v50  ;;  %v3668_v54 = vpop.f32.mrb[9].mxu0  ;;  %v3768_v50 = vld [vmem:[%s6216_s0 + $0x48] sm:$0xff] (!%p4405_p11) }
 0x3d1   : > { %v3680_v57 = vadd.f32 %v3668_v54, %v2254_v51  ;;  %v3670_v58 = vpop.f32.mrb[10].mxu0  ;;  %v3787_v51 = vadd.f32 (!%p4405_p11), %v3786_v42, %v3774_v34  ;;  %v3769_v54 = vld [vmem:[%s6216_s0 + $0x50] sm:$0xff] (!%p4405_p11) }
 0x3d2   : > { %3691 = vst [vmem:[#allocation2 + $0x20] sm:$0xff] %v3679_v53  ;;  %v3685_v59 = vadd.f32 %v3670_v58, %v2259_v31  ;;  %v3672_v60 = vpop.f32.mrb[11].mxu0  ;;  %v3777_v31 = vadd.f32 (!%p4405_p11), %v3765_v39, %v3753_v43  ;;  %v3778_v53 = vadd.f32 (!%p4405_p11), %v3766_v40, %v3754_v14 }
 0x3d3   : > { %3692 = vst [vmem:[#allocation2 + $0x28] sm:$0xff] %v3680_v57  ;;  %v3686_v19 = vadd.f32 %v3672_v60, %v2260_v55  ;;  %v3779_v55 = vadd.f32 (!%p4405_p11), %v3767_v44, %v3755_v48 }
 0x3d4   : > { %3697 = vst [vmem:[#allocation2 + $0x50] sm:$0xff] %v3685_v59  ;;  %v3780_v59 = vadd.f32 (!%p4405_p11), %v3768_v50, %v3756_v49  ;;  %v3792_v60 = vadd.f32 (!%p4405_p11), %v3778_v53, %v3777_v31 }
 0x3d5   : > { %3698 = vst [vmem:[#allocation2 + $0x58] sm:$0xff] %v3686_v19  ;;  %v3770_v19 = vld [vmem:[%s6216_s0 + $0x58] sm:$0xff] (!%p4405_p11) }
 0x3d6   : > { %v3793_v1 = vadd.f32 %v3792_v60, %v3779_v55 }
 0x3d8   : > { %v3794_v2 = vadd.f32 %v3793_v1, %v3780_v59 }
 0x3d9   : > { %v3707_v3 = vld [vmem:[#allocation2 + $0x20] sm:$0xff] }
 0x3da   : > { %v3708_v12 = vld [vmem:[#allocation2 + $0x28] sm:$0xff]  ;;  %v3751_v21 = vadd.f32 %v3736_v30, %v3707_v3 }
 0x3db   : > { %v3752_v26 = vadd.f32 %v3740_v8, %v3708_v12  ;;  %v3713_v38 = vld [vmem:[#allocation2 + $0x50] sm:$0xff] }
 0x3dc   : > { %v3775_v41 = vadd.f32 %v3763_v20, %v3751_v21  ;;  %v3714_v47 = vld [vmem:[#allocation2 + $0x58] sm:$0xff]  ;;  %v3757_v52 = vadd.f32 %v3736_v30, %v3713_v38 }
 0x3dd   : > { %v3776_v46 = vadd.f32 %v3764_v33, %v3752_v26  ;;  %v3758_v58 = vadd.f32 %v3740_v8, %v3714_v47 }
 0x3de   : > { %v3788_v57 = vadd.f32 %v3787_v51, %v3775_v41  ;;  %v3781_v0 = vadd.f32 %v3769_v54, %v3757_v52  ;;  %v3783_v54 = vld [vmem:[%s6221_s5] sm:$0x3f] }
 0x3df   : > { %v3782_v22 = vadd.f32 %v3770_v19, %v3758_v58  ;;  %v3866_v58 = vrot.slane %v3783_v54, %v5908_v56  ;;  %v3874_v60 = vrot.slane %v3783_v54, %v5989_v28  ;;  %v3878_v19 = vrot.slane %v3783_v54, %v6072_v61 }
 0x3e0   : > { %v3789_v63 = vadd.f32 %v3788_v57, %v3776_v46  ;;  %v3795_v3 = vadd.f32 %v3794_v2, %v3781_v0  ;;  %v3862_v57 = vrot.slane %v3783_v54, %v5898_v13 }
 0x3e2   : > { %3790 = vadd.xlane.f32.xlu0 %v3789_v63  ;;  %v3796_v4 = vadd.f32 %v3795_v3, %v3782_v22  ;;  %v3882_v63 = vrot.slane %v3783_v54, %v6075_v62 }
 0x3e6   : > { %3797 = vadd.xlane.f32.xlu0 %v3796_v4 }
 0x46f   : > { %v3791_v5 = vpop.xlane.xlu0 %3790 }
 0x470   : > { %v3800_v6 = vmul.f32 0.0013020834, %v3791_v5 }
 0x472   : > { %v3802_v7 = vsub.f32 %v3771_v23, %v3800_v6  ;;  %v3803_v30 = vsub.f32 %v3772_v24, %v3800_v6  ;;  %v3804_v8 = vsub.f32 %v3773_v25, %v3800_v6  ;;  %v3805_v9 = vsub.f32 %v3774_v34, %v3800_v6 }
 0x473   : > { %v3798_v12 = vpop.xlane.xlu0 %3797  ;;  %v3806_v15 = vsub.f32 %v3775_v41, %v3800_v6  ;;  %v3807_v18 = vsub.f32 %v3776_v46, %v3800_v6 }
 0x474   : > { %v3814_v10 = vmul.f32 %v3802_v7, %v3802_v7  ;;  %v3815_v11 = vmul.f32 %v3803_v30, %v3803_v30  ;;  %v3801_v16 = vmul.f32 0.0013020834, %v3798_v12  ;;  %v3816_v45 = vmul.f32 %v3804_v8, %v3804_v8 }
 0x475   : > { %v3817_v21 = vmul.f32 %v3805_v9, %v3805_v9  ;;  %v3818_v23 = vmul.f32 %v3806_v15, %v3806_v15  ;;  %v3819_v35 = vmul.f32 %v3807_v18, %v3807_v18 }
 0x476   : > { %v3826_v17 = vadd.f32 %v3815_v11, %v3814_v10  ;;  %v6122_v20 = vsub.f32 %v3777_v31, %v3801_v16  ;;  %v6124_v29 = vsub.f32 %v3778_v53, %v3801_v16  ;;  %v6126_v32 = vsub.f32 %v3779_v55, %v3801_v16  ;;  %v3784_v55 = vld [vmem:[%s6222_s6] sm:$0x3f] }
 0x477   : > { %v6128_v25 = vsub.f32 %v3780_v59, %v3801_v16  ;;  %v6134_v37 = vsub.f32 %v3781_v0, %v3801_v16  ;;  %v6138_v41 = vsub.f32 %v3782_v22, %v3801_v16  ;;  %v3870_v59 = vrot.slane %v3783_v54, %v5986_v27 }
 0x478   : > { %v3827_v26 = vadd.f32 %v3826_v17, %v3816_v45  ;;  %v3820_v33 = vmul.f32 %v6122_v20, %v6122_v20  ;;  %v3821_v34 = vmul.f32 %v6124_v29, %v6124_v29  ;;  %v3822_v38 = vmul.f32 %v6126_v32, %v6126_v32 }
 0x479   : > { %v3823_v42 = vmul.f32 %v6128_v25, %v6128_v25  ;;  %v3824_v14 = vmul.f32 %v6134_v37, %v6134_v37  ;;  %v3825_v46 = vmul.f32 %v6138_v41, %v6138_v41  ;;  %v3905_v1 = vrot.slane %v3784_v55, %v5898_v13 }
 0x47a   : > { %v3828_v24 = vadd.f32 %v3827_v26, %v3817_v21  ;;  %v3833_v39 = vadd.f32 %v3821_v34, %v3820_v33  ;;  %v3909_v22 = vrot.slane %v3784_v55, %v5908_v56  ;;  %v3913_v2 = vrot.slane %v3784_v55, %v5986_v27 }
 0x47b   : > { %v3917_v3 = vrot.slane %v3784_v55, %v5989_v28  ;;  %v3921_v11 = vrot.slane %v3784_v55, %v6072_v61  ;;  %v3925_v12 = vrot.slane %v3784_v55, %v6075_v62 }
 0x47c   : > { %v3829_v36 = vadd.f32 %v3828_v24, %v3818_v23  ;;  %v3834_v43 = vadd.f32 %v3833_v39, %v3822_v38 }
 0x47e   : > { %v3830_v40 = vadd.f32 %v3829_v36, %v3819_v35  ;;  %v3835_v44 = vadd.f32 %v3834_v43, %v3823_v42 }
 0x480   : > { %3831 = vadd.xlane.f32.xlu1 %v3830_v40  ;;  %v3836_v47 = vadd.f32 %v3835_v44, %v3824_v14 }
 0x482   : > { %v3837_v48 = vadd.f32 %v3836_v47, %v3825_v46 }
 0x484   : > { %3838 = vadd.xlane.f32.xlu1 %v3837_v48 }
 0x50d   : > { %v3832_v49 = vpop.xlane.xlu1 %3831 }
 0x50e   : > { %v3840_v50 = vmul.f32 0.0013020834, %v3832_v49 }
 0x510   : > { %v3842_v51 = vadd.f32 1e-12, %v3840_v50 }
 0x511   : > { %v3839_v52 = vpop.xlane.xlu1 %3838 }
 0x512   : > { %5065 = vrsqrt.f32 %v3842_v51  ;;  %v3841_v31 = vmul.f32 0.0013020834, %v3839_v52 }
 0x514   : > { %v3843_v53 = vadd.f32 1e-12, %v3841_v31 }
 0x516   : > { %5067 = vrsqrt.f32 %v3843_v53 }
 0x51c   : > { %v5066_v0 = vpop.eup %5065 }
 0x51d   : > { %v3846_v4 = vmul.f32 %v5066_v0, %v3802_v7  ;;  %v3847_v5 = vmul.f32 %v5066_v0, %v3803_v30  ;;  %v3848_v6 = vmul.f32 %v5066_v0, %v3804_v8  ;;  %v3849_v10 = vmul.f32 %v5066_v0, %v3805_v9 }
 0x51e   : > { %v3850_v16 = vmul.f32 %v5066_v0, %v3806_v15  ;;  %v3851_v45 = vmul.f32 %v5066_v0, %v3807_v18 }
 0x51f   : > { %v3889_v17 = vmul.f32 %v3862_v57, %v3846_v4  ;;  %v3890_v21 = vmul.f32 %v3866_v58, %v3847_v5  ;;  %v3891_v26 = vmul.f32 %v3870_v59, %v3848_v6  ;;  %v3892_v13 = vmul.f32 %v3874_v60, %v3849_v10 }
 0x520   : > { %v3893_v23 = vmul.f32 %v3878_v19, %v3850_v16  ;;  %v3894_v56 = vmul.f32 %v3882_v63, %v3851_v45  ;;  %v5068_v7 = vpop.eup %5067 }
 0x521   : > { %v3932_v24 = vadd.f32 %v3905_v1, %v3889_v17  ;;  %v3933_v27 = vadd.f32 %v3909_v22, %v3890_v21  ;;  %v3934_v33 = vadd.f32 %v3913_v2, %v3891_v26  ;;  %v3935_v28 = vadd.f32 %v3917_v3, %v3892_v13 }
 0x522   : > { %v3936_v30 = vadd.f32 %v3921_v11, %v3893_v23  ;;  %v3937_v8 = vadd.f32 %v3925_v12, %v3894_v56  ;;  %v3852_v61 = vmul.f32 %v5068_v7, %v6122_v20  ;;  %v3853_v62 = vmul.f32 %v5068_v7, %v6124_v29 }
 0x523   : > { %3944 = vst [vmem:[%s6223_s7] sm:$0xff] %v3932_v24  ;;  %3945 = vst [vmem:[%s6223_s7 + $0x8] sm:$0xff] %v3933_v27  ;;  %v3854_v9 = vmul.f32 %v5068_v7, %v6126_v32  ;;  %v3855_v15 = vmul.f32 %v5068_v7, %v6128_v25  ;;  %v3856_v18 = vmul.f32 %v5068_v7, %v6134_v37 }
 0x524   : > { %3946 = vst [vmem:[%s6223_s7 + $0x10] sm:$0xff] %v3934_v33  ;;  %3947 = vst [vmem:[%s6223_s7 + $0x18] sm:$0xff] %v3935_v28  ;;  %v3857_v34 = vmul.f32 %v5068_v7, %v6138_v41  ;;  %v3895_v35 = vmul.f32 %v3862_v57, %v3852_v61  ;;  %v3896_v20 = vmul.f32 %v3866_v58, %v3853_v62 }
 0x525   : > { %3948 = vst [vmem:[%s6223_s7 + $0x20] sm:$0xff] %v3936_v30  ;;  %3949 = vst [vmem:[%s6223_s7 + $0x28] sm:$0xff] %v3937_v8  ;;  %v3897_v36 = vmul.f32 %v3870_v59, %v3854_v9  ;;  %v3898_v29 = vmul.f32 %v3874_v60, %v3855_v15  ;;  %v3899_v38 = vmul.f32 %v3878_v19, %v3856_v18 }
 0x526   : > { %v3900_v32 = vmul.f32 %v3882_v63, %v3857_v34  ;;  %v3938_v39 = vadd.f32 %v3905_v1, %v3895_v35  ;;  %v3939_v25 = vadd.f32 %v3909_v22, %v3896_v20 }
 0x527   : > { %v3940_v40 = vadd.f32 %v3913_v2, %v3897_v36  ;;  %v3941_v42 = vadd.f32 %v3917_v3, %v3898_v29  ;;  %v3942_v43 = vadd.f32 %v3921_v11, %v3899_v38 }
 0x528   : > { %v3943_v14 = vadd.f32 %v3925_v12, %v3900_v32  ;;  %3950 = vst [vmem:[%s6223_s7 + $0x30] sm:$0xff] %v3938_v39  ;;  %3951 = vst [vmem:[%s6223_s7 + $0x38] sm:$0xff] %v3939_v25 }
 0x529   : > { %3952 = vst [vmem:[%s6223_s7 + $0x40] sm:$0xff] %v3940_v40  ;;  %3953 = vst [vmem:[%s6223_s7 + $0x48] sm:$0xff] %v3941_v42 }
 0x52a   : > { %3954 = vst [vmem:[%s6223_s7 + $0x50] sm:$0xff] %v3942_v43  ;;  %3955 = vst [vmem:[%s6223_s7 + $0x58] sm:$0xff] %v3943_v14 }
 0x52b PF: > { %p14_p12 = scmp.ge.s32.totalorder %s5153_s28, 8   ;;  %s6224_s24 = smov %s5087_s25 }
 0x52c   : > { %s6225_s25 = smov %s5162_s8  ;;  %s6226_s26 = smov %s5153_s28 }
 0x52d   :  { %16 = sbr.rel (!%p14_p12) target bundleno = 2 (0x2), region = 116 }

// kernel: model_forward.15
= control target key start
LH: loop header
LB: loop body
LE: loop exit
PB: predicated region body
PF: predicated region fallthrough
CT: control target
= control target key end

     0   :  { %v3775_v36 = vmov 1983009808   ;;  %v36_v38 = vlaneseq  ;;  %s4919_s0 = inlined_call_operand.vmem [shape: f32[2,768], index: 0, kind: input, shape index: {}]   ;;  %s4920_s1 = inlined_call_operand.vmem [shape: bf16[768,768], index: 1, kind: input, shape index: {}]   ;;  %s4921_s2 = inlined_call_operand.vmem [shape: f32[1,768], index: 2, kind: input, shape index: {}]   ;;  %s4922_s3 = inlined_call_operand.vmem [shape: bf16[768,32], index: 3, kind: input, shape index: {}]   ;;  %s4923_s4 = inlined_call_operand.vmem [shape: f32[1,32], index: 4, kind: input, shape index: {}]   ;;  %s4924_s5 = inlined_call_operand.vmem [shape: bf16[32,2], index: 5, kind: input, shape index: {}]   ;;  %s4925_s6 = inlined_call_operand.vmem [shape: f32[1,2], index: 6, kind: input, shape index: {}]   ;;  %s4926_s7 = inlined_call_operand.hbm [shape: f32[2,2], index: 7, kind: output, shape index: {}]  }
   0x1   :  { %v3256_v0 = vld [vmem:[%s4920_s1 + $0x4] ss:$24 sps:$4 sm:$0xff]   ;;  %v3260_v2 = vld [vmem:[%s4920_s1] ss:$24 sps:$4 sm:$0xff]   ;;  %v3262_v4 = vld [vmem:[%s4920_s1 + $0x34] ss:$24 sps:$4 sm:$0xff]   ;;  %v34_v37 = vunpack.c.l.s4 %v3775_v36 }
   0x2   :  { %v3258_v1 = vld [vmem:[%s4920_s1 + $0x304] ss:$24 sps:$4 sm:$0xff]   ;;  %1829 = vmatprep.subr.bf16.mxu1 %v3256_v0  ;;  %v3261_v3 = vld [vmem:[%s4920_s1 + $0x300] ss:$24 sps:$4 sm:$0xff]   ;;  %v3264_v5 = vld [vmem:[%s4920_s1 + $0x334] ss:$24 sps:$4 sm:$0xff]  }
   0x3   :  { %1870 = vmatprep.subr.bf16.mxu0 %v3258_v1  ;;  %1830 = vmatpush1.bf16.msra.mxu1 %v3260_v2  ;;  %v3266_v6 = vld [vmem:[%s4920_s1 + $0x30] ss:$24 sps:$4 sm:$0xff]   ;;  %v3268_v8 = vld [vmem:[%s4920_s1 + $0x64] ss:$24 sps:$4 sm:$0xff]   ;;  %v3272_v10 = vld [vmem:[%s4920_s1 + $0x60] ss:$24 sps:$4 sm:$0xff]   ;;  %v35_v42 = vunpack.c.0.s8 %v34_v37 }
   0x4   :  { %1871 = vmatpush1.bf16.msra.mxu0 %v3261_v3  ;;  %1831 = vmatprep.subr.bf16.mxu1 %v3262_v4  ;;  %v3267_v7 = vld [vmem:[%s4920_s1 + $0x330] ss:$24 sps:$4 sm:$0xff]   ;;  %v3270_v9 = vld [vmem:[%s4920_s1 + $0x364] ss:$24 sps:$4 sm:$0xff]   ;;  %v3273_v11 = vld [vmem:[%s4920_s1 + $0x360] ss:$24 sps:$4 sm:$0xff]  }
   0x5   :  { %1872 = vmatprep.subr.bf16.mxu0 %v3264_v5  ;;  %v3274_v12 = vld [vmem:[%s4920_s1 + $0x94] ss:$24 sps:$4 sm:$0xff]   ;;  %v3278_v14 = vld [vmem:[%s4920_s1 + $0x90] ss:$24 sps:$4 sm:$0xff]   ;;  %v3280_v16 = vld [vmem:[%s4920_s1 + $0xc4] ss:$24 sps:$4 sm:$0xff]  }
   0x6   :  { %v3276_v13 = vld [vmem:[%s4920_s1 + $0x394] ss:$24 sps:$4 sm:$0xff]   ;;  %v3279_v15 = vld [vmem:[%s4920_s1 + $0x390] ss:$24 sps:$4 sm:$0xff]   ;;  %v3282_v17 = vld [vmem:[%s4920_s1 + $0x3c4] ss:$24 sps:$4 sm:$0xff]  }
   0x7   :  { %1832 = vmatpush1.bf16.msra.mxu1 %v3266_v6  ;;  %v3284_v18 = vld [vmem:[%s4920_s1 + $0xc0] ss:$24 sps:$4 sm:$0xff]   ;;  %v3286_v20 = vld [vmem:[%s4920_s1 + $0xf4] ss:$24 sps:$4 sm:$0xff]   ;;  %v3290_v22 = vld [vmem:[%s4920_s1 + $0xf0] ss:$24 sps:$4 sm:$0xff]  }
   0x8   :  { %1873 = vmatpush1.bf16.msra.mxu0 %v3267_v7  ;;  %1833 = vmatprep.subr.bf16.mxu1 %v3268_v8  ;;  %v3285_v19 = vld [vmem:[%s4920_s1 + $0x3c0] ss:$24 sps:$4 sm:$0xff]   ;;  %v3288_v21 = vld [vmem:[%s4920_s1 + $0x3f4] ss:$24 sps:$4 sm:$0xff]   ;;  %v3291_v23 = vld [vmem:[%s4920_s1 + $0x3f0] ss:$24 sps:$4 sm:$0xff]  }
   0x9   :  { %1874 = vmatprep.subr.bf16.mxu0 %v3270_v9  ;;  %v3292_v24 = vld [vmem:[%s4920_s1 + $0x124] ss:$24 sps:$4 sm:$0xff]   ;;  %v3296_v26 = vld [vmem:[%s4920_s1 + $0x120] ss:$24 sps:$4 sm:$0xff]   ;;  %v3298_v28 = vld [vmem:[%s4920_s1 + $0x154] ss:$24 sps:$4 sm:$0xff]  }
   0xa   :  { %v3294_v25 = vld [vmem:[%s4920_s1 + $0x424] ss:$24 sps:$4 sm:$0xff]   ;;  %v3297_v27 = vld [vmem:[%s4920_s1 + $0x420] ss:$24 sps:$4 sm:$0xff]   ;;  %v3300_v29 = vld [vmem:[%s4920_s1 + $0x454] ss:$24 sps:$4 sm:$0xff]  }
   0xb   :  { %1834 = vmatpush1.bf16.msra.mxu1 %v3272_v10  ;;  %v3302_v30 = vld [vmem:[%s4920_s1 + $0x150] ss:$24 sps:$4 sm:$0xff]   ;;  %v3304_v32 = vld [vmem:[%s4920_s1 + $0x184] ss:$24 sps:$4 sm:$0xff]   ;;  %v3308_v34 = vld [vmem:[%s4920_s1 + $0x180] ss:$24 sps:$4 sm:$0xff]  }
   0xc   :  { %1875 = vmatpush1.bf16.msra.mxu0 %v3273_v11  ;;  %1835 = vmatprep.subr.bf16.mxu1 %v3274_v12  ;;  %v3303_v31 = vld [vmem:[%s4920_s1 + $0x450] ss:$24 sps:$4 sm:$0xff]   ;;  %v3306_v33 = vld [vmem:[%s4920_s1 + $0x484] ss:$24 sps:$4 sm:$0xff]   ;;  %v3309_v35 = vld [vmem:[%s4920_s1 + $0x480] ss:$24 sps:$4 sm:$0xff]  }
   0xd   :  { %1876 = vmatprep.subr.bf16.mxu0 %v3276_v13  ;;  %v3310_v39 = vld [vmem:[%s4920_s1 + $0x1b4] ss:$24 sps:$4 sm:$0xff]   ;;  %v3314_v41 = vld [vmem:[%s4920_s1 + $0x1b0] ss:$24 sps:$4 sm:$0xff]   ;;  %v3936_v43 = vshrl.u32 %v36_v38, 7  ;;  %v28_v52 = vld [vmem:[%s4919_s0] sm:$0xff] }
   0xe   :  { %v3312_v40 = vld [vmem:[%s4920_s1 + $0x4b4] ss:$24 sps:$4 sm:$0xff]   ;;  %v3315_v44 = vld [vmem:[%s4920_s1 + $0x4b0] ss:$24 sps:$4 sm:$0xff]   ;;  %v3316_v45 = vld [vmem:[%s4920_s1 + $0x1e4] ss:$24 sps:$4 sm:$0xff]   ;;  %v32_v55 = vcombine.high %v28_v52, %v28_v52 }
   0xf   :  { %1836 = vmatpush1.bf16.msra.mxu1 %v3278_v14  ;;  %v3318_v46 = vld [vmem:[%s4920_s1 + $0x4e4] ss:$24 sps:$4 sm:$0xff]   ;;  %v3320_v47 = vld [vmem:[%s4920_s1 + $0x1e0] ss:$24 sps:$4 sm:$0xff]   ;;  %v38_v49 = vsub.s32 %v35_v42, %v3936_v43  ;;  %v3322_v50 = vld [vmem:[%s4920_s1 + $0x214] ss:$24 sps:$4 sm:$0xff]  }
  0x10   :  { %1877 = vmatpush1.bf16.msra.mxu0 %v3279_v15  ;;  %1837 = vmatprep.subr.bf16.mxu1 %v3280_v16  ;;  %v3321_v48 = vld [vmem:[%s4920_s1 + $0x4e0] ss:$24 sps:$4 sm:$0xff]   ;;  %v3324_v51 = vld [vmem:[%s4920_s1 + $0x514] ss:$24 sps:$4 sm:$0xff]   ;;  %v3326_v53 = vld [vmem:[%s4920_s1 + $0x210] ss:$24 sps:$4 sm:$0xff]  }
  0x11   :  { %1878 = vmatprep.subr.bf16.mxu0 %v3282_v17  ;;  %v39_v54 = vrot.slane %v28_v52, %v38_v49  ;;  %v3327_v56 = vld [vmem:[%s4920_s1 + $0x510] ss:$24 sps:$4 sm:$0xff]   ;;  %v3328_v57 = vld [vmem:[%s4920_s1 + $0x244] ss:$24 sps:$4 sm:$0xff]   ;;  %v46_v60 = vrot.slane %v32_v55, %v38_v49  ;;  %v3332_v61 = vld [vmem:[%s4920_s1 + $0x240] ss:$24 sps:$4 sm:$0xff]  }
  0x12   :  { %v3330_v58 = vld [vmem:[%s4920_s1 + $0x544] ss:$24 sps:$4 sm:$0xff]   ;;  %v3333_v0 = vld [vmem:[%s4920_s1 + $0x540] ss:$24 sps:$4 sm:$0xff]   ;;  %v3334_v1 = vld [vmem:[%s4920_s1 + $0x274] ss:$24 sps:$4 sm:$0xff]  }
  0x13   :  { %1838 = vmatpush1.bf16.msra.mxu1 %v3284_v18  ;;  %v47_v59 = vcombine.high %v39_v54, %v39_v54  ;;  %v48_v63 = vcombine.high %v46_v60, %v46_v60  ;;  %v3336_v2 = vld [vmem:[%s4920_s1 + $0x574] ss:$24 sps:$4 sm:$0xff]   ;;  %v3338_v4 = vld [vmem:[%s4920_s1 + $0x270] ss:$24 sps:$4 sm:$0xff]   ;;  %v3340_v6 = vld [vmem:[%s4920_s1 + $0x2a4] ss:$24 sps:$4 sm:$0xff]   ;;  %v4032_v17 = vpack.c.bf16 %v39_v54, %v39_v54  ;;  %v4034_v18 = vpack.c.bf16 %v46_v60, %v46_v60 }
  0x14   :  { %1879 = vmatpush1.bf16.msra.mxu0 %v3285_v19  ;;  %1839 = vmatprep.subr.bf16.mxu1 %v3286_v20  ;;  %v3339_v5 = vld [vmem:[%s4920_s1 + $0x570] ss:$24 sps:$4 sm:$0xff]   ;;  %v3342_v7 = vld [vmem:[%s4920_s1 + $0x5a4] ss:$24 sps:$4 sm:$0xff]   ;;  %v3344_v8 = vld [vmem:[%s4920_s1 + $0x2a0] ss:$24 sps:$4 sm:$0xff]  }
  0x15   :  { %1880 = vmatprep.subr.bf16.mxu0 %v3288_v21  ;;  %v3978_v62 = vpack.c.bf16 %v47_v59, %v47_v59  ;;  %v3989_v3 = vpack.c.bf16 %v48_v63, %v48_v63  ;;  %v3345_v9 = vld [vmem:[%s4920_s1 + $0x5a0] ss:$24 sps:$4 sm:$0xff]   ;;  %v3346_v10 = vld [vmem:[%s4920_s1 + $0x2d4] ss:$24 sps:$4 sm:$0xff]   ;;  %v3350_v12 = vld [vmem:[%s4920_s1 + $0x2d0] ss:$24 sps:$4 sm:$0xff]  }
  0x16   :  { %v3348_v11 = vld [vmem:[%s4920_s1 + $0x5d4] ss:$24 sps:$4 sm:$0xff]   ;;  %v3351_v13 = vld [vmem:[%s4920_s1 + $0x5d0] ss:$24 sps:$4 sm:$0xff]   ;;  %v3355_v14 = vld [vmem:[%s4920_s1 + $0x604] ss:$24 sps:$4 sm:$0xff]  }
  0x17   :  { %1840 = vmatpush1.bf16.msra.mxu1 %v3290_v22  ;;  %1861 = vmatprep.mubr.bf16.mxu1 %v3978_v62  ;;  %v3358_v15 = vld [vmem:[%s4920_s1 + $0xc] ss:$24 sps:$4 sm:$0xff]   ;;  %v3353_v16 = vld [vmem:[%s4920_s1 + $0x600] ss:$24 sps:$4 sm:$0xff]   ;;  %v3364_v21 = vld [vmem:[%s4920_s1 + $0x3c] ss:$24 sps:$4 sm:$0xff]  }
  0x18   :  { %1881 = vmatpush1.bf16.msra.mxu0 %v3291_v23  ;;  %1841 = vmatprep.subr.bf16.mxu1 %v3292_v24  ;;  %v3356_v19 = vld [vmem:[%s4920_s1 + $0x8] ss:$24 sps:$4 sm:$0xff]   ;;  %v3361_v20 = vld [vmem:[%s4920_s1 + $0x634] ss:$24 sps:$4 sm:$0xff]   ;;  %v3362_v23 = vld [vmem:[%s4920_s1 + $0x38] ss:$24 sps:$4 sm:$0xff]  }
  0x19   :  { %1882 = vmatprep.subr.bf16.mxu0 %v3294_v25  ;;  %1902 = vmatprep.mubr.bf16.mxu0 %v3989_v3  ;;  %v3359_v22 = vld [vmem:[%s4920_s1 + $0x630] ss:$24 sps:$4 sm:$0xff]   ;;  %v3367_v24 = vld [vmem:[%s4920_s1 + $0x664] ss:$24 sps:$4 sm:$0xff]   ;;  %v3385_v36 = vld [vmem:[%s4920_s1 + $0x6f4] ss:$24 sps:$4 sm:$0xff]  }
  0x1a   :  { %v3370_v25 = vld [vmem:[%s4920_s1 + $0x6c] ss:$24 sps:$4 sm:$0xff]   ;;  %v3388_v37 = vld [vmem:[%s4920_s1 + $0xfc] ss:$24 sps:$4 sm:$0xff]   ;;  %v3383_v38 = vld [vmem:[%s4920_s1 + $0x6f0] ss:$24 sps:$4 sm:$0xff]  }
  0x1b   :  { %1842 = vmatpush1.bf16.msra.mxu1 %v3296_v26  ;;  %v3365_v26 = vld [vmem:[%s4920_s1 + $0x660] ss:$24 sps:$4 sm:$0xff]   ;;  %v4111_v42 = vld.sshfl [vmem:[%s4919_s0 + $0x8] sm:$0x33 pattern:$0x76325410] }
  0x1c   :  { %1883 = vmatpush1.bf16.msra.mxu0 %v3297_v27  ;;  %1843 = vmatprep.subr.bf16.mxu1 %v3298_v28  ;;  %v3368_v27 = vld [vmem:[%s4920_s1 + $0x68] ss:$24 sps:$4 sm:$0xff]   ;;  %v3373_v28 = vld [vmem:[%s4920_s1 + $0x694] ss:$24 sps:$4 sm:$0xff]   ;;  %v3403_v52 = vld [vmem:[%s4920_s1 + $0x784] ss:$24 sps:$4 sm:$0xff]  }
  0x1d   :  { %1884 = vmatprep.subr.bf16.mxu0 %v3300_v29  ;;  %v3376_v29 = vld [vmem:[%s4920_s1 + $0x9c] ss:$24 sps:$4 sm:$0xff]   ;;  %v3401_v54 = vld [vmem:[%s4920_s1 + $0x780] ss:$24 sps:$4 sm:$0xff]  }
  0x1e   :  { %v3404_v55 = vld [vmem:[%s4920_s1 + $0x188] ss:$24 sps:$4 sm:$0xff]   ;;  %v3410_v59 = vld [vmem:[%s4920_s1 + $0x1b8] ss:$24 sps:$4 sm:$0xff]   ;;  %v3415_v60 = vld [vmem:[%s4920_s1 + $0x7e4] ss:$24 sps:$4 sm:$0xff]  }
  0x1f   :  { %1844 = vmatpush1.bf16.msra.mxu1 %v3302_v30  ;;  %v3371_v30 = vld [vmem:[%s4920_s1 + $0x690] ss:$24 sps:$4 sm:$0xff]   ;;  %v3413_v63 = vld [vmem:[%s4920_s1 + $0x7e0] ss:$24 sps:$4 sm:$0xff]  }
  0x20   :  { %1885 = vmatpush1.bf16.msra.mxu0 %v3303_v31  ;;  %1845 = vmatprep.subr.bf16.mxu1 %v3304_v32  ;;  %v3374_v31 = vld [vmem:[%s4920_s1 + $0x98] ss:$24 sps:$4 sm:$0xff]   ;;  %v3379_v32 = vld [vmem:[%s4920_s1 + $0x6c4] ss:$24 sps:$4 sm:$0xff]  }
  0x21   :  { %1886 = vmatprep.subr.bf16.mxu0 %v3306_v33  ;;  %v3382_v33 = vld [vmem:[%s4920_s1 + $0xcc] ss:$24 sps:$4 sm:$0xff]  }
  0x23   :  { %1846 = vmatpush1.bf16.msra.mxu1 %v3308_v34  ;;  %v3377_v34 = vld [vmem:[%s4920_s1 + $0x6c0] ss:$24 sps:$4 sm:$0xff]  }
  0x24   :  { %1887 = vmatpush1.bf16.msra.mxu0 %v3309_v35  ;;  %1847 = vmatprep.subr.bf16.mxu1 %v3310_v39  ;;  %v3380_v35 = vld [vmem:[%s4920_s1 + $0xc8] ss:$24 sps:$4 sm:$0xff]   ;;  %v3386_v39 = vld [vmem:[%s4920_s1 + $0xf8] ss:$24 sps:$4 sm:$0xff]  }
  0x25   :  { %1888 = vmatprep.subr.bf16.mxu0 %v3312_v40  ;;  %v3391_v40 = vld [vmem:[%s4920_s1 + $0x724] ss:$24 sps:$4 sm:$0xff]  }
  0x27   :  { %1848 = vmatpush1.bf16.msra.mxu1 %v3314_v41  ;;  %v3394_v41 = vld [vmem:[%s4920_s1 + $0x12c] ss:$24 sps:$4 sm:$0xff]  }
  0x28   :  { %1889 = vmatpush1.bf16.msra.mxu0 %v3315_v44  ;;  %1849 = vmatprep.subr.bf16.mxu1 %v3316_v45  ;;  %v56_v44 = vcombine.high %v4111_v42, %v4111_v42  ;;  %v3389_v45 = vld [vmem:[%s4920_s1 + $0x720] ss:$24 sps:$4 sm:$0xff]  }
  0x29   :  { %1890 = vmatprep.subr.bf16.mxu0 %v3318_v46  ;;  %v3392_v46 = vld [vmem:[%s4920_s1 + $0x128] ss:$24 sps:$4 sm:$0xff]  }
  0x2a   :  { %v4127_v49 = vpack.c.bf16 %v56_v44, %v56_v44  ;;  %v3476_v44 = vld [vmem:[%s4920_s1 + $0xd0] ss:$24 sps:$4 sm:$0xff]  }
  0x2b   :  { %1850 = vmatpush1.bf16.msra.mxu1 %v3320_v47  ;;  %v3397_v47 = vld [vmem:[%s4920_s1 + $0x754] ss:$24 sps:$4 sm:$0xff]  }
  0x2c   :  { %1891 = vmatpush1.bf16.msra.mxu0 %v3321_v48  ;;  %1851 = vmatprep.subr.bf16.mxu1 %v3322_v50  ;;  %v3400_v48 = vld [vmem:[%s4920_s1 + $0x15c] ss:$24 sps:$4 sm:$0xff]   ;;  %v3395_v50 = vld [vmem:[%s4920_s1 + $0x750] ss:$24 sps:$4 sm:$0xff]  }
  0x2d   :  { %1892 = vmatprep.subr.bf16.mxu0 %v3324_v51  ;;  %v3398_v51 = vld [vmem:[%s4920_s1 + $0x158] ss:$24 sps:$4 sm:$0xff]  }
  0x2f   :  { %1852 = vmatpush1.bf16.msra.mxu1 %v3326_v53  ;;  %v3406_v53 = vld [vmem:[%s4920_s1 + $0x18c] ss:$24 sps:$4 sm:$0xff]  }
  0x30   :  { %1893 = vmatpush1.bf16.msra.mxu0 %v3327_v56  ;;  %1853 = vmatprep.subr.bf16.mxu1 %v3328_v57  ;;  %v3409_v56 = vld [vmem:[%s4920_s1 + $0x7b4] ss:$24 sps:$4 sm:$0xff]  }
  0x31   :  { %1894 = vmatprep.subr.bf16.mxu0 %v3330_v58  ;;  %v3412_v57 = vld [vmem:[%s4920_s1 + $0x1bc] ss:$24 sps:$4 sm:$0xff]   ;;  %v3407_v58 = vld [vmem:[%s4920_s1 + $0x7b0] ss:$24 sps:$4 sm:$0xff]  }
  0x33   :  { %1854 = vmatpush1.bf16.msra.mxu1 %v3332_v61  ;;  %v3418_v61 = vld [vmem:[%s4920_s1 + $0x1ec] ss:$24 sps:$4 sm:$0xff]  }
  0x34   :  { %1895 = vmatpush1.bf16.msra.mxu0 %v3333_v0  ;;  %1855 = vmatprep.subr.bf16.mxu1 %v3334_v1  ;;  %v3416_v0 = vld [vmem:[%s4920_s1 + $0x1e8] ss:$24 sps:$4 sm:$0xff]   ;;  %v3421_v1 = vld [vmem:[%s4920_s1 + $0x814] ss:$24 sps:$4 sm:$0xff]  }
  0x35   :  { %1896 = vmatprep.subr.bf16.mxu0 %v3336_v2  ;;  %v3424_v2 = vld [vmem:[%s4920_s1 + $0x21c] ss:$24 sps:$4 sm:$0xff]  }
  0x37   :  { %1856 = vmatpush1.bf16.msra.mxu1 %v3338_v4  ;;  %v3419_v4 = vld [vmem:[%s4920_s1 + $0x810] ss:$24 sps:$4 sm:$0xff]  }
  0x38   :  { %1897 = vmatpush1.bf16.msra.mxu0 %v3339_v5  ;;  %1857 = vmatprep.subr.bf16.mxu1 %v3340_v6  ;;  %v3422_v5 = vld [vmem:[%s4920_s1 + $0x218] ss:$24 sps:$4 sm:$0xff]   ;;  %v3427_v6 = vld [vmem:[%s4920_s1 + $0x844] ss:$24 sps:$4 sm:$0xff]  }
  0x39   :  { %1898 = vmatprep.subr.bf16.mxu0 %v3342_v7  ;;  %v3430_v7 = vld [vmem:[%s4920_s1 + $0x24c] ss:$24 sps:$4 sm:$0xff]  }
  0x3b   :  { %1858 = vmatpush1.bf16.msra.mxu1 %v3344_v8  ;;  %v3425_v8 = vld [vmem:[%s4920_s1 + $0x840] ss:$24 sps:$4 sm:$0xff]  }
  0x3c   :  { %1899 = vmatpush1.bf16.msra.mxu0 %v3345_v9  ;;  %1859 = vmatprep.subr.bf16.mxu1 %v3346_v10  ;;  %v3428_v9 = vld [vmem:[%s4920_s1 + $0x248] ss:$24 sps:$4 sm:$0xff]   ;;  %v3433_v10 = vld [vmem:[%s4920_s1 + $0x874] ss:$24 sps:$4 sm:$0xff]  }
  0x3d   :  { %1900 = vmatprep.subr.bf16.mxu0 %v3348_v11  ;;  %v3436_v11 = vld [vmem:[%s4920_s1 + $0x27c] ss:$24 sps:$4 sm:$0xff]  }
  0x3f   :  { %1860 = vmatpush1.bf16.msra.mxu1 %v3350_v12  ;;  %v3431_v12 = vld [vmem:[%s4920_s1 + $0x870] ss:$24 sps:$4 sm:$0xff]  }
  0x40   :  { %1901 = vmatpush1.bf16.msra.mxu0 %v3351_v13  ;;  %1952 = vmatprep.subr.bf16.mxu1 %v3358_v15  ;;  %v3434_v13 = vld [vmem:[%s4920_s1 + $0x278] ss:$24 sps:$4 sm:$0xff]   ;;  %v3442_v15 = vld [vmem:[%s4920_s1 + $0x2ac] ss:$24 sps:$4 sm:$0xff]  }
  0x41   :  { %1911 = vmatprep.subr.bf16.mxu0 %v3355_v14  ;;  %v3439_v14 = vld [vmem:[%s4920_s1 + $0x8a4] ss:$24 sps:$4 sm:$0xff]  }
  0x42   :  { %1862 = vmatmul.mubr.bf16.vlgmr.msra.gmra.mrb[0].mxu1 %v4032_v17 }
  0x43   :  { %1903 = vmatmul.mubr.bf16.vlgmr.msra.gmra.mrb[0].mxu0 %v4034_v18  ;;  %1953 = vmatpush1.bf16.msra.mxu1 %v3356_v19  ;;  %v3440_v19 = vld [vmem:[%s4920_s1 + $0x2a8] ss:$24 sps:$4 sm:$0xff]  }
  0x44   :  { %1912 = vmatpush1.bf16.msra.mxu0 %v3353_v16  ;;  %1954 = vmatprep.subr.bf16.mxu1 %v3364_v21  ;;  %v3437_v16 = vld [vmem:[%s4920_s1 + $0x8a0] ss:$24 sps:$4 sm:$0xff]   ;;  %v3448_v21 = vld [vmem:[%s4920_s1 + $0x2dc] ss:$24 sps:$4 sm:$0xff]  }
  0x45   :  { %1913 = vmatprep.subr.bf16.mxu0 %v3361_v20  ;;  %1984 = vmatprep.mubr.bf16.mxu1 %v3978_v62  ;;  %v3445_v20 = vld [vmem:[%s4920_s1 + $0x8d4] ss:$24 sps:$4 sm:$0xff]  }
  0x46   :  { %1943 = vmatprep.mubr.bf16.mxu0 %v4127_v49 }
  0x47   :  { %1955 = vmatpush1.bf16.msra.mxu1 %v3362_v23  ;;  %v3446_v23 = vld [vmem:[%s4920_s1 + $0x2d8] ss:$24 sps:$4 sm:$0xff]  }
  0x48   :  { %1914 = vmatpush1.bf16.msra.mxu0 %v3359_v22  ;;  %1956 = vmatprep.subr.bf16.mxu1 %v3370_v25  ;;  %v3443_v22 = vld [vmem:[%s4920_s1 + $0x8d0] ss:$24 sps:$4 sm:$0xff]   ;;  %v3454_v25 = vld [vmem:[%s4920_s1 + $0x14] ss:$24 sps:$4 sm:$0xff]  }
  0x49   :  { %1915 = vmatprep.subr.bf16.mxu0 %v3367_v24  ;;  %v3451_v24 = vld [vmem:[%s4920_s1 + $0x30c] ss:$24 sps:$4 sm:$0xff]  }
  0x4b   :  { %1957 = vmatpush1.bf16.msra.mxu1 %v3368_v27  ;;  %v3449_v27 = vld [vmem:[%s4920_s1 + $0x308] ss:$24 sps:$4 sm:$0xff]  }
  0x4c   :  { %1916 = vmatpush1.bf16.msra.mxu0 %v3365_v26  ;;  %1958 = vmatprep.subr.bf16.mxu1 %v3376_v29  ;;  %v4240_v26 = vpack.c.bf16 %v4111_v42, %v4111_v42  ;;  %v3457_v29 = vld [vmem:[%s4920_s1 + $0x33c] ss:$24 sps:$4 sm:$0xff]   ;;  %v3473_v42 = vld [vmem:[%s4920_s1 + $0x3c8] ss:$24 sps:$4 sm:$0xff]  }
  0x4d   :  { %1917 = vmatprep.subr.bf16.mxu0 %v3373_v28  ;;  %v3452_v28 = vld [vmem:[%s4920_s1 + $0x10] ss:$24 sps:$4 sm:$0xff]  }
  0x4f   :  { %1959 = vmatpush1.bf16.msra.mxu1 %v3374_v31  ;;  %v3455_v31 = vld [vmem:[%s4920_s1 + $0x338] ss:$24 sps:$4 sm:$0xff]  }
  0x50   :  { %1918 = vmatpush1.bf16.msra.mxu0 %v3371_v30  ;;  %1960 = vmatprep.subr.bf16.mxu1 %v3382_v33  ;;  %v3460_v30 = vld [vmem:[%s4920_s1 + $0x44] ss:$24 sps:$4 sm:$0xff]  }
  0x51   :  { %1919 = vmatprep.subr.bf16.mxu0 %v3379_v32  ;;  %v3458_v32 = vld [vmem:[%s4920_s1 + $0x40] ss:$24 sps:$4 sm:$0xff]   ;;  %v3463_v33 = vld [vmem:[%s4920_s1 + $0x36c] ss:$24 sps:$4 sm:$0xff]  }
  0x53   :  { %1961 = vmatpush1.bf16.msra.mxu1 %v3380_v35  ;;  %v3461_v35 = vld [vmem:[%s4920_s1 + $0x368] ss:$24 sps:$4 sm:$0xff]  }
  0x54   :  { %1920 = vmatpush1.bf16.msra.mxu0 %v3377_v34  ;;  %1962 = vmatprep.subr.bf16.mxu1 %v3388_v37  ;;  %v3466_v34 = vld [vmem:[%s4920_s1 + $0x74] ss:$24 sps:$4 sm:$0xff]  }
  0x55   :  { %1921 = vmatprep.subr.bf16.mxu0 %v3385_v36  ;;  %v3464_v36 = vld [vmem:[%s4920_s1 + $0x70] ss:$24 sps:$4 sm:$0xff]   ;;  %v3469_v37 = vld [vmem:[%s4920_s1 + $0x39c] ss:$24 sps:$4 sm:$0xff]  }
  0x57   :  { %1963 = vmatpush1.bf16.msra.mxu1 %v3386_v39  ;;  %v3470_v39 = vld [vmem:[%s4920_s1 + $0xa0] ss:$24 sps:$4 sm:$0xff]  }
  0x58   :  { %1922 = vmatpush1.bf16.msra.mxu0 %v3383_v38  ;;  %1964 = vmatprep.subr.bf16.mxu1 %v3394_v41  ;;  %v3467_v38 = vld [vmem:[%s4920_s1 + $0x398] ss:$24 sps:$4 sm:$0xff]   ;;  %v3478_v41 = vld [vmem:[%s4920_s1 + $0xd4] ss:$24 sps:$4 sm:$0xff]  }
  0x59   :  { %1923 = vmatprep.subr.bf16.mxu0 %v3391_v40  ;;  %v3475_v40 = vld [vmem:[%s4920_s1 + $0x3cc] ss:$24 sps:$4 sm:$0xff]  }
  0x5b   :  { %1965 = vmatpush1.bf16.msra.mxu1 %v3392_v46  ;;  %v3484_v46 = vld [vmem:[%s4920_s1 + $0x104] ss:$24 sps:$4 sm:$0xff]  }
  0x5c   :  { %1924 = vmatpush1.bf16.msra.mxu0 %v3389_v45  ;;  %1966 = vmatprep.subr.bf16.mxu1 %v3400_v48  ;;  %v3481_v45 = vld [vmem:[%s4920_s1 + $0x3fc] ss:$24 sps:$4 sm:$0xff]   ;;  %v3482_v48 = vld [vmem:[%s4920_s1 + $0x100] ss:$24 sps:$4 sm:$0xff]  }
  0x5d   :  { %1925 = vmatprep.subr.bf16.mxu0 %v3397_v47  ;;  %v3479_v47 = vld [vmem:[%s4920_s1 + $0x3f8] ss:$24 sps:$4 sm:$0xff]  }
  0x5f   :  { %1967 = vmatpush1.bf16.msra.mxu1 %v3398_v51  ;;  %v3490_v51 = vld [vmem:[%s4920_s1 + $0x134] ss:$24 sps:$4 sm:$0xff]  }
  0x60   :  { %1926 = vmatpush1.bf16.msra.mxu0 %v3395_v50  ;;  %1968 = vmatprep.subr.bf16.mxu1 %v3406_v53  ;;  %v3487_v50 = vld [vmem:[%s4920_s1 + $0x42c] ss:$24 sps:$4 sm:$0xff]   ;;  %v3488_v53 = vld [vmem:[%s4920_s1 + $0x130] ss:$24 sps:$4 sm:$0xff]  }
  0x61   :  { %1927 = vmatprep.subr.bf16.mxu0 %v3403_v52  ;;  %v3485_v52 = vld [vmem:[%s4920_s1 + $0x428] ss:$24 sps:$4 sm:$0xff]  }
  0x63   :  { %1969 = vmatpush1.bf16.msra.mxu1 %v3404_v55  ;;  %v3496_v55 = vld [vmem:[%s4920_s1 + $0x164] ss:$24 sps:$4 sm:$0xff]  }
  0x64   :  { %1928 = vmatpush1.bf16.msra.mxu0 %v3401_v54  ;;  %1970 = vmatprep.subr.bf16.mxu1 %v3412_v57  ;;  %v3493_v54 = vld [vmem:[%s4920_s1 + $0x45c] ss:$24 sps:$4 sm:$0xff]   ;;  %v3494_v57 = vld [vmem:[%s4920_s1 + $0x160] ss:$24 sps:$4 sm:$0xff]  }
  0x65   :  { %1929 = vmatprep.subr.bf16.mxu0 %v3409_v56  ;;  %v3491_v56 = vld [vmem:[%s4920_s1 + $0x458] ss:$24 sps:$4 sm:$0xff]  }
  0x67   :  { %1971 = vmatpush1.bf16.msra.mxu1 %v3410_v59  ;;  %v3502_v59 = vld [vmem:[%s4920_s1 + $0x194] ss:$24 sps:$4 sm:$0xff]  }
  0x68   :  { %1930 = vmatpush1.bf16.msra.mxu0 %v3407_v58  ;;  %1972 = vmatprep.subr.bf16.mxu1 %v3418_v61  ;;  %v3499_v58 = vld [vmem:[%s4920_s1 + $0x48c] ss:$24 sps:$4 sm:$0xff]   ;;  %v3500_v61 = vld [vmem:[%s4920_s1 + $0x190] ss:$24 sps:$4 sm:$0xff]  }
  0x69   :  { %1931 = vmatprep.subr.bf16.mxu0 %v3415_v60  ;;  %v3497_v60 = vld [vmem:[%s4920_s1 + $0x488] ss:$24 sps:$4 sm:$0xff]  }
  0x6b   :  { %1973 = vmatpush1.bf16.msra.mxu1 %v3416_v0  ;;  %v3508_v0 = vld [vmem:[%s4920_s1 + $0x1c4] ss:$24 sps:$4 sm:$0xff]  }
  0x6c   :  { %1932 = vmatpush1.bf16.msra.mxu0 %v3413_v63  ;;  %1974 = vmatprep.subr.bf16.mxu1 %v3424_v2  ;;  %v3505_v63 = vld [vmem:[%s4920_s1 + $0x4bc] ss:$24 sps:$4 sm:$0xff]   ;;  %v3506_v2 = vld [vmem:[%s4920_s1 + $0x1c0] ss:$24 sps:$4 sm:$0xff]  }
  0x6d   :  { %1933 = vmatprep.subr.bf16.mxu0 %v3421_v1  ;;  %v3503_v1 = vld [vmem:[%s4920_s1 + $0x4b8] ss:$24 sps:$4 sm:$0xff]  }
  0x6f   :  { %1975 = vmatpush1.bf16.msra.mxu1 %v3422_v5  ;;  %v3514_v5 = vld [vmem:[%s4920_s1 + $0x1f4] ss:$24 sps:$4 sm:$0xff]  }
  0x70   :  { %1934 = vmatpush1.bf16.msra.mxu0 %v3419_v4  ;;  %1976 = vmatprep.subr.bf16.mxu1 %v3430_v7  ;;  %v3511_v4 = vld [vmem:[%s4920_s1 + $0x4ec] ss:$24 sps:$4 sm:$0xff]   ;;  %v3512_v7 = vld [vmem:[%s4920_s1 + $0x1f0] ss:$24 sps:$4 sm:$0xff]  }
  0x71   :  { %1935 = vmatprep.subr.bf16.mxu0 %v3427_v6  ;;  %v3509_v6 = vld [vmem:[%s4920_s1 + $0x4e8] ss:$24 sps:$4 sm:$0xff]  }
  0x73   :  { %1977 = vmatpush1.bf16.msra.mxu1 %v3428_v9  ;;  %v3520_v9 = vld [vmem:[%s4920_s1 + $0x224] ss:$24 sps:$4 sm:$0xff]  }
  0x74   :  { %1936 = vmatpush1.bf16.msra.mxu0 %v3425_v8  ;;  %1978 = vmatprep.subr.bf16.mxu1 %v3436_v11  ;;  %v3517_v8 = vld [vmem:[%s4920_s1 + $0x51c] ss:$24 sps:$4 sm:$0xff]   ;;  %v3518_v11 = vld [vmem:[%s4920_s1 + $0x220] ss:$24 sps:$4 sm:$0xff]  }
  0x75   :  { %1937 = vmatprep.subr.bf16.mxu0 %v3433_v10  ;;  %v3515_v10 = vld [vmem:[%s4920_s1 + $0x518] ss:$24 sps:$4 sm:$0xff]  }
  0x77   :  { %1979 = vmatpush1.bf16.msra.mxu1 %v3434_v13  ;;  %v3526_v13 = vld [vmem:[%s4920_s1 + $0x254] ss:$24 sps:$4 sm:$0xff]  }
  0x78   :  { %1938 = vmatpush1.bf16.msra.mxu0 %v3431_v12  ;;  %1980 = vmatprep.subr.bf16.mxu1 %v3442_v15  ;;  %v3523_v12 = vld [vmem:[%s4920_s1 + $0x54c] ss:$24 sps:$4 sm:$0xff]   ;;  %v3524_v15 = vld [vmem:[%s4920_s1 + $0x250] ss:$24 sps:$4 sm:$0xff]  }
  0x79   :  { %1939 = vmatprep.subr.bf16.mxu0 %v3439_v14  ;;  %v3521_v14 = vld [vmem:[%s4920_s1 + $0x548] ss:$24 sps:$4 sm:$0xff]  }
  0x7b   :  { %1981 = vmatpush1.bf16.msra.mxu1 %v3440_v19  ;;  %v3532_v19 = vld [vmem:[%s4920_s1 + $0x284] ss:$24 sps:$4 sm:$0xff]  }
  0x7c   :  { %1940 = vmatpush1.bf16.msra.mxu0 %v3437_v16  ;;  %1982 = vmatprep.subr.bf16.mxu1 %v3448_v21  ;;  %v3529_v16 = vld [vmem:[%s4920_s1 + $0x57c] ss:$24 sps:$4 sm:$0xff]   ;;  %v3530_v21 = vld [vmem:[%s4920_s1 + $0x280] ss:$24 sps:$4 sm:$0xff]  }
  0x7d   :  { %1941 = vmatprep.subr.bf16.mxu0 %v3445_v20  ;;  %v3527_v20 = vld [vmem:[%s4920_s1 + $0x578] ss:$24 sps:$4 sm:$0xff]  }
  0x7f   :  { %1983 = vmatpush1.bf16.msra.mxu1 %v3446_v23  ;;  %v3538_v23 = vld [vmem:[%s4920_s1 + $0x2b4] ss:$24 sps:$4 sm:$0xff]  }
  0x80   :  { %1942 = vmatpush1.bf16.msra.mxu0 %v3443_v22  ;;  %1993 = vmatprep.subr.bf16.mxu1 %v3451_v24  ;;  %v3535_v22 = vld [vmem:[%s4920_s1 + $0x5ac] ss:$24 sps:$4 sm:$0xff]   ;;  %v3533_v24 = vld [vmem:[%s4920_s1 + $0x5a8] ss:$24 sps:$4 sm:$0xff]  }
  0x81   :  { %2075 = vmatprep.subr.bf16.mxu0 %v3454_v25  ;;  %v3536_v25 = vld [vmem:[%s4920_s1 + $0x2b0] ss:$24 sps:$4 sm:$0xff]  }
  0x82   :  { %1985 = vmatmul.mubr.bf16.vlgmr.msra.gmra.mrb[4].mxu1 %v4032_v17 }
  0x83   :  { %1944 = vmatmul.mubr.bf16.vlgmr.msra.gmra.mrb[0].mxu0 %v4240_v26  ;;  %1994 = vmatpush1.bf16.msra.mxu1 %v3449_v27  ;;  %v3541_v27 = vld [vmem:[%s4920_s1 + $0x5dc] ss:$24 sps:$4 sm:$0xff]  }
  0x84   :  { %2076 = vmatpush1.bf16.msra.mxu0 %v3452_v28  ;;  %1995 = vmatprep.subr.bf16.mxu1 %v3457_v29  ;;  %v3544_v28 = vld [vmem:[%s4920_s1 + $0x2e4] ss:$24 sps:$4 sm:$0xff]   ;;  %v3539_v29 = vld [vmem:[%s4920_s1 + $0x5d8] ss:$24 sps:$4 sm:$0xff]  }
  0x85   :  { %2077 = vmatprep.subr.bf16.mxu0 %v3460_v30  ;;  %2025 = vmatprep.mubr.bf16.mxu1 %v3989_v3  ;;  %v3542_v30 = vld [vmem:[%s4920_s1 + $0x2e0] ss:$24 sps:$4 sm:$0xff]  }
  0x86   :  { %2107 = vmatprep.mubr.bf16.mxu0 %v3978_v62  ;;  %v3472_v62 = vld [vmem:[%s4920_s1 + $0xa4] ss:$24 sps:$4 sm:$0xff]  }
  0x87   :  { %1996 = vmatpush1.bf16.msra.mxu1 %v3455_v31  ;;  %v3547_v31 = vld [vmem:[%s4920_s1 + $0x60c] ss:$24 sps:$4 sm:$0xff]  }
  0x88   :  { %2078 = vmatpush1.bf16.msra.mxu0 %v3458_v32  ;;  %1997 = vmatprep.subr.bf16.mxu1 %v3463_v33  ;;  %v3550_v32 = vld [vmem:[%s4920_s1 + $0x314] ss:$24 sps:$4 sm:$0xff]   ;;  %v3545_v33 = vld [vmem:[%s4920_s1 + $0x608] ss:$24 sps:$4 sm:$0xff]  }
  0x89   :  { %2079 = vmatprep.subr.bf16.mxu0 %v3466_v34  ;;  %v3548_v34 = vld [vmem:[%s4920_s1 + $0x310] ss:$24 sps:$4 sm:$0xff]  }
  0x8b   :  { %1998 = vmatpush1.bf16.msra.mxu1 %v3461_v35  ;;  %v3553_v35 = vld [vmem:[%s4920_s1 + $0x63c] ss:$24 sps:$4 sm:$0xff]  }
  0x8c   :  { %2080 = vmatpush1.bf16.msra.mxu0 %v3464_v36  ;;  %1999 = vmatprep.subr.bf16.mxu1 %v3469_v37  ;;  %v3556_v36 = vld [vmem:[%s4920_s1 + $0x344] ss:$24 sps:$4 sm:$0xff]   ;;  %v3551_v37 = vld [vmem:[%s4920_s1 + $0x638] ss:$24 sps:$4 sm:$0xff]  }
  0x8d   :  { %2081 = vmatprep.subr.bf16.mxu0 %v3472_v62  ;;  %v3554_v62 = vld [vmem:[%s4920_s1 + $0x340] ss:$24 sps:$4 sm:$0xff]  }
  0x8f   :  { %2000 = vmatpush1.bf16.msra.mxu1 %v3467_v38  ;;  %v3559_v38 = vld [vmem:[%s4920_s1 + $0x66c] ss:$24 sps:$4 sm:$0xff]  }
  0x90   :  { %2082 = vmatpush1.bf16.msra.mxu0 %v3470_v39  ;;  %2001 = vmatprep.subr.bf16.mxu1 %v3475_v40  ;;  %v3557_v39 = vld [vmem:[%s4920_s1 + $0x668] ss:$24 sps:$4 sm:$0xff]  }
  0x91   :  { %2083 = vmatprep.subr.bf16.mxu0 %v3478_v41  ;;  %v3560_v40 = vld [vmem:[%s4920_s1 + $0x370] ss:$24 sps:$4 sm:$0xff]   ;;  %v3565_v41 = vld [vmem:[%s4920_s1 + $0x69c] ss:$24 sps:$4 sm:$0xff]  }
  0x93   :  { %2002 = vmatpush1.bf16.msra.mxu1 %v3473_v42  ;;  %v3568_v42 = vld [vmem:[%s4920_s1 + $0x3a4] ss:$24 sps:$4 sm:$0xff]  }
  0x94   :  { %2084 = vmatpush1.bf16.msra.mxu0 %v3476_v44  ;;  %2003 = vmatprep.subr.bf16.mxu1 %v3481_v45  ;;  %v3563_v44 = vld [vmem:[%s4920_s1 + $0x698] ss:$24 sps:$4 sm:$0xff]   ;;  %v3571_v45 = vld [vmem:[%s4920_s1 + $0x6cc] ss:$24 sps:$4 sm:$0xff]  }
  0x95   :  { %2085 = vmatprep.subr.bf16.mxu0 %v3484_v46  ;;  %v3574_v46 = vld [vmem:[%s4920_s1 + $0x3d4] ss:$24 sps:$4 sm:$0xff]  }
  0x97   :  { %2004 = vmatpush1.bf16.msra.mxu1 %v3479_v47  ;;  %v3569_v47 = vld [vmem:[%s4920_s1 + $0x6c8] ss:$24 sps:$4 sm:$0xff]  }
  0x98   :  { %2086 = vmatpush1.bf16.msra.mxu0 %v3482_v48  ;;  %2005 = vmatprep.subr.bf16.mxu1 %v3487_v50  ;;  %v3572_v48 = vld [vmem:[%s4920_s1 + $0x3d0] ss:$24 sps:$4 sm:$0xff]   ;;  %v3577_v50 = vld [vmem:[%s4920_s1 + $0x6fc] ss:$24 sps:$4 sm:$0xff]  }
  0x99   :  { %2087 = vmatprep.subr.bf16.mxu0 %v3490_v51  ;;  %v3580_v51 = vld [vmem:[%s4920_s1 + $0x404] ss:$24 sps:$4 sm:$0xff]  }
  0x9b   :  { %2006 = vmatpush1.bf16.msra.mxu1 %v3485_v52  ;;  %v3575_v52 = vld [vmem:[%s4920_s1 + $0x6f8] ss:$24 sps:$4 sm:$0xff]  }
  0x9c   :  { %2088 = vmatpush1.bf16.msra.mxu0 %v3488_v53  ;;  %2007 = vmatprep.subr.bf16.mxu1 %v3493_v54  ;;  %v3578_v53 = vld [vmem:[%s4920_s1 + $0x400] ss:$24 sps:$4 sm:$0xff]   ;;  %v3583_v54 = vld [vmem:[%s4920_s1 + $0x72c] ss:$24 sps:$4 sm:$0xff]  }
  0x9d   :  { %2089 = vmatprep.subr.bf16.mxu0 %v3496_v55  ;;  %v3586_v55 = vld [vmem:[%s4920_s1 + $0x434] ss:$24 sps:$4 sm:$0xff]  }
  0x9f   :  { %2008 = vmatpush1.bf16.msra.mxu1 %v3491_v56  ;;  %v3581_v56 = vld [vmem:[%s4920_s1 + $0x728] ss:$24 sps:$4 sm:$0xff]  }
  0xa0   :  { %2090 = vmatpush1.bf16.msra.mxu0 %v3494_v57  ;;  %2009 = vmatprep.subr.bf16.mxu1 %v3499_v58  ;;  %v3584_v57 = vld [vmem:[%s4920_s1 + $0x430] ss:$24 sps:$4 sm:$0xff]   ;;  %v3589_v58 = vld [vmem:[%s4920_s1 + $0x75c] ss:$24 sps:$4 sm:$0xff]  }
  0xa1   :  { %2091 = vmatprep.subr.bf16.mxu0 %v3502_v59  ;;  %v3592_v59 = vld [vmem:[%s4920_s1 + $0x464] ss:$24 sps:$4 sm:$0xff]  }
  0xa3   :  { %2010 = vmatpush1.bf16.msra.mxu1 %v3497_v60  ;;  %v3587_v60 = vld [vmem:[%s4920_s1 + $0x758] ss:$24 sps:$4 sm:$0xff]  }
  0xa4   :  { %2092 = vmatpush1.bf16.msra.mxu0 %v3500_v61  ;;  %2011 = vmatprep.subr.bf16.mxu1 %v3505_v63  ;;  %v3590_v61 = vld [vmem:[%s4920_s1 + $0x460] ss:$24 sps:$4 sm:$0xff]   ;;  %v3595_v63 = vld [vmem:[%s4920_s1 + $0x78c] ss:$24 sps:$4 sm:$0xff]  }
  0xa5   :  { %2093 = vmatprep.subr.bf16.mxu0 %v3508_v0  ;;  %v3598_v0 = vld [vmem:[%s4920_s1 + $0x494] ss:$24 sps:$4 sm:$0xff]  }
  0xa7   :  { %2012 = vmatpush1.bf16.msra.mxu1 %v3503_v1  ;;  %v3593_v1 = vld [vmem:[%s4920_s1 + $0x788] ss:$24 sps:$4 sm:$0xff]  }
  0xa8   :  { %2094 = vmatpush1.bf16.msra.mxu0 %v3506_v2  ;;  %2013 = vmatprep.subr.bf16.mxu1 %v3511_v4  ;;  %v3596_v2 = vld [vmem:[%s4920_s1 + $0x490] ss:$24 sps:$4 sm:$0xff]   ;;  %v3601_v4 = vld [vmem:[%s4920_s1 + $0x7bc] ss:$24 sps:$4 sm:$0xff]  }
  0xa9   :  { %2095 = vmatprep.subr.bf16.mxu0 %v3514_v5  ;;  %v3604_v5 = vld [vmem:[%s4920_s1 + $0x4c4] ss:$24 sps:$4 sm:$0xff]  }
  0xab   :  { %2014 = vmatpush1.bf16.msra.mxu1 %v3509_v6  ;;  %v3599_v6 = vld [vmem:[%s4920_s1 + $0x7b8] ss:$24 sps:$4 sm:$0xff]  }
  0xac   :  { %2096 = vmatpush1.bf16.msra.mxu0 %v3512_v7  ;;  %2015 = vmatprep.subr.bf16.mxu1 %v3517_v8  ;;  %v3602_v7 = vld [vmem:[%s4920_s1 + $0x4c0] ss:$24 sps:$4 sm:$0xff]   ;;  %v3607_v8 = vld [vmem:[%s4920_s1 + $0x7ec] ss:$24 sps:$4 sm:$0xff]  }
  0xad   :  { %2097 = vmatprep.subr.bf16.mxu0 %v3520_v9  ;;  %v3610_v9 = vld [vmem:[%s4920_s1 + $0x4f4] ss:$24 sps:$4 sm:$0xff]  }
  0xaf   :  { %2016 = vmatpush1.bf16.msra.mxu1 %v3515_v10 }
  0xb0   :  { %2098 = vmatpush1.bf16.msra.mxu0 %v3518_v11  ;;  %2017 = vmatprep.subr.bf16.mxu1 %v3523_v12 }
  0xb1   :  { %2099 = vmatprep.subr.bf16.mxu0 %v3526_v13 }
  0xb3   :  { %2018 = vmatpush1.bf16.msra.mxu1 %v3521_v14 }
  0xb4   :  { %2100 = vmatpush1.bf16.msra.mxu0 %v3524_v15  ;;  %2019 = vmatprep.subr.bf16.mxu1 %v3529_v16 }
  0xb5   :  { %2101 = vmatprep.subr.bf16.mxu0 %v3532_v19 }
  0xb7   :  { %2020 = vmatpush1.bf16.msra.mxu1 %v3527_v20 }
  0xb8   :  { %2102 = vmatpush1.bf16.msra.mxu0 %v3530_v21  ;;  %2021 = vmatprep.subr.bf16.mxu1 %v3535_v22 }
  0xb9   :  { %2103 = vmatprep.subr.bf16.mxu0 %v3538_v23 }
  0xbb   :  { %2022 = vmatpush1.bf16.msra.mxu1 %v3533_v24 }
  0xbc   :  { %2104 = vmatpush1.bf16.msra.mxu0 %v3536_v25  ;;  %2023 = vmatprep.subr.bf16.mxu1 %v3541_v27 }
  0xbd   :  { %2105 = vmatprep.subr.bf16.mxu0 %v3544_v28 }
  0xbf   :  { %2024 = vmatpush1.bf16.msra.mxu1 %v3539_v29 }
  0xc0   :  { %2106 = vmatpush1.bf16.msra.mxu0 %v3542_v30  ;;  %2034 = vmatprep.subr.bf16.mxu1 %v3547_v31 }
  0xc1   :  { %2116 = vmatprep.subr.bf16.mxu0 %v3550_v32 }
  0xc2   :  { %2026 = vmatmul.mubr.bf16.vlgmr.msra.gmra.mrb[4].mxu1 %v4034_v18 }
  0xc3   :  { %2108 = vmatmul.mubr.bf16.vlgmr.msra.gmra.mrb[4].mxu0 %v4032_v17  ;;  %2035 = vmatpush1.bf16.msra.mxu1 %v3545_v33  ;;  %v3562_v17 = vld [vmem:[%s4920_s1 + $0x374] ss:$24 sps:$4 sm:$0xff]  }
  0xc4   :  { %2117 = vmatpush1.bf16.msra.mxu0 %v3548_v34  ;;  %2036 = vmatprep.subr.bf16.mxu1 %v3553_v35 }
  0xc5   :  { %2118 = vmatprep.subr.bf16.mxu0 %v3556_v36  ;;  %2066 = vmatprep.mubr.bf16.mxu1 %v4127_v49 }
  0xc6   :  { %2148 = vmatprep.mubr.bf16.mxu0 %v3989_v3  ;;  %v3566_v3 = vld [vmem:[%s4920_s1 + $0x3a0] ss:$24 sps:$4 sm:$0xff]  }
  0xc7   :  { %2037 = vmatpush1.bf16.msra.mxu1 %v3551_v37 }
  0xc8   :  { %2119 = vmatpush1.bf16.msra.mxu0 %v3554_v62  ;;  %2038 = vmatprep.subr.bf16.mxu1 %v3559_v38 }
  0xc9   :  { %2120 = vmatprep.subr.bf16.mxu0 %v3562_v17 }
  0xcb   :  { %2039 = vmatpush1.bf16.msra.mxu1 %v3557_v39 }
  0xcc   :  { %2121 = vmatpush1.bf16.msra.mxu0 %v3560_v40  ;;  %2040 = vmatprep.subr.bf16.mxu1 %v3565_v41 }
  0xcd   :  { %2122 = vmatprep.subr.bf16.mxu0 %v3568_v42 }
  0xcf   :  { %2041 = vmatpush1.bf16.msra.mxu1 %v3563_v44 }
  0xd0   :  { %2123 = vmatpush1.bf16.msra.mxu0 %v3566_v3  ;;  %2042 = vmatprep.subr.bf16.mxu1 %v3571_v45 }
  0xd1   :  { %2124 = vmatprep.subr.bf16.mxu0 %v3574_v46 }
  0xd3   :  { %2043 = vmatpush1.bf16.msra.mxu1 %v3569_v47 }
  0xd4   :  { %2125 = vmatpush1.bf16.msra.mxu0 %v3572_v48  ;;  %2044 = vmatprep.subr.bf16.mxu1 %v3577_v50 }
  0xd5   :  { %2126 = vmatprep.subr.bf16.mxu0 %v3580_v51 }
  0xd7   :  { %2045 = vmatpush1.bf16.msra.mxu1 %v3575_v52 }
  0xd8   :  { %2127 = vmatpush1.bf16.msra.mxu0 %v3578_v53  ;;  %2046 = vmatprep.subr.bf16.mxu1 %v3583_v54 }
  0xd9   :  { %2128 = vmatprep.subr.bf16.mxu0 %v3586_v55 }
  0xdb   :  { %2047 = vmatpush1.bf16.msra.mxu1 %v3581_v56 }
  0xdc   :  { %2129 = vmatpush1.bf16.msra.mxu0 %v3584_v57  ;;  %2048 = vmatprep.subr.bf16.mxu1 %v3589_v58 }
  0xdd   :  { %2130 = vmatprep.subr.bf16.mxu0 %v3592_v59 }
  0xdf   :  { %2049 = vmatpush1.bf16.msra.mxu1 %v3587_v60 }
  0xe0   :  { %2131 = vmatpush1.bf16.msra.mxu0 %v3590_v61  ;;  %2050 = vmatprep.subr.bf16.mxu1 %v3595_v63 }
  0xe1   :  { %2132 = vmatprep.subr.bf16.mxu0 %v3598_v0 }
  0xe3   :  { %2051 = vmatpush1.bf16.msra.mxu1 %v3593_v1 }
  0xe4   :  { %2133 = vmatpush1.bf16.msra.mxu0 %v3596_v2  ;;  %2052 = vmatprep.subr.bf16.mxu1 %v3601_v4 }
  0xe5   :  { %2134 = vmatprep.subr.bf16.mxu0 %v3604_v5 }
  0xe6   :  { %12 = vsyncpa [#allocation3], 0  ;;  %v3605_v10 = vld [vmem:[%s4920_s1 + $0x7e8] ss:$24 sps:$4 sm:$0xff]   ;;  %v3613_v12 = vld [vmem:[%s4920_s1 + $0x81c] ss:$24 sps:$4 sm:$0xff]  }
  0xe7   :  { %2053 = vmatpush1.bf16.msra.mxu1 %v3599_v6  ;;  %v3608_v11 = vld [vmem:[%s4920_s1 + $0x4f0] ss:$24 sps:$4 sm:$0xff]   ;;  %v3616_v13 = vld [vmem:[%s4920_s1 + $0x524] ss:$24 sps:$4 sm:$0xff]   ;;  %v3614_v15 = vld [vmem:[%s4920_s1 + $0x520] ss:$24 sps:$4 sm:$0xff]  }
  0xe8   :  { %2135 = vmatpush1.bf16.msra.mxu0 %v3602_v7  ;;  %2054 = vmatprep.subr.bf16.mxu1 %v3607_v8  ;;  %v3611_v14 = vld [vmem:[%s4920_s1 + $0x818] ss:$24 sps:$4 sm:$0xff]   ;;  %v3619_v16 = vld [vmem:[%s4920_s1 + $0x84c] ss:$24 sps:$4 sm:$0xff]   ;;  %v3617_v20 = vld [vmem:[%s4920_s1 + $0x848] ss:$24 sps:$4 sm:$0xff]  }
  0xe9   :  { %2136 = vmatprep.subr.bf16.mxu0 %v3610_v9  ;;  %v3622_v19 = vld [vmem:[%s4920_s1 + $0x554] ss:$24 sps:$4 sm:$0xff]   ;;  %v3620_v21 = vld [vmem:[%s4920_s1 + $0x550] ss:$24 sps:$4 sm:$0xff]   ;;  %v3628_v23 = vld [vmem:[%s4920_s1 + $0x584] ss:$24 sps:$4 sm:$0xff]  }
  0xea   :  { %v3625_v22 = vld [vmem:[%s4920_s1 + $0x87c] ss:$24 sps:$4 sm:$0xff]   ;;  %v3623_v24 = vld [vmem:[%s4920_s1 + $0x878] ss:$24 sps:$4 sm:$0xff]   ;;  %v3631_v27 = vld [vmem:[%s4920_s1 + $0x8ac] ss:$24 sps:$4 sm:$0xff]  }
  0xeb   :  { %2055 = vmatpush1.bf16.msra.mxu1 %v3605_v10  ;;  %v3626_v25 = vld [vmem:[%s4920_s1 + $0x580] ss:$24 sps:$4 sm:$0xff]   ;;  %v3634_v28 = vld [vmem:[%s4920_s1 + $0x5b4] ss:$24 sps:$4 sm:$0xff]   ;;  %v3632_v30 = vld [vmem:[%s4920_s1 + $0x5b0] ss:$24 sps:$4 sm:$0xff]  }
  0xec   :  { %2137 = vmatpush1.bf16.msra.mxu0 %v3608_v11  ;;  %2056 = vmatprep.subr.bf16.mxu1 %v3613_v12  ;;  %v3629_v29 = vld [vmem:[%s4920_s1 + $0x8a8] ss:$24 sps:$4 sm:$0xff]   ;;  %v3637_v31 = vld [vmem:[%s4920_s1 + $0x8dc] ss:$24 sps:$4 sm:$0xff]   ;;  %v3635_v33 = vld [vmem:[%s4920_s1 + $0x8d8] ss:$24 sps:$4 sm:$0xff]  }
  0xed   :  { %2138 = vmatprep.subr.bf16.mxu0 %v3616_v13  ;;  %v3640_v32 = vld [vmem:[%s4920_s1 + $0x5e4] ss:$24 sps:$4 sm:$0xff]   ;;  %v3638_v34 = vld [vmem:[%s4920_s1 + $0x5e0] ss:$24 sps:$4 sm:$0xff]   ;;  %v3643_v35 = vld [vmem:[%s4920_s1 + $0x614] ss:$24 sps:$4 sm:$0xff]  }
  0xee   :  { %v3705_v36 = vld [vmem:[%s4922_s3 + $0xc0] sm:$0xff]   ;;  %v3641_v37 = vld [vmem:[%s4920_s1 + $0x610] ss:$24 sps:$4 sm:$0xff]   ;;  %v3649_v40 = vld [vmem:[%s4920_s1 + $0x674] ss:$24 sps:$4 sm:$0xff]   ;;  %vm3777_vm0 = vmmov 0  }
  0xef   :  { %2057 = vmatpush1.bf16.msra.mxu1 %v3611_v14  ;;  %v3646_v62 = vld [vmem:[%s4920_s1 + $0x644] ss:$24 sps:$4 sm:$0xff]   ;;  %v3707_v17 = vld [vmem:[%s4922_s3 + $0xc8] sm:$0xff]   ;;  %v3644_v39 = vld [vmem:[%s4920_s1 + $0x640] ss:$24 sps:$4 sm:$0xff]   ;;  %vm2745_vm1 = vcmask 261120  }
  0xf0   :  { %2139 = vmatpush1.bf16.msra.mxu0 %v3614_v15  ;;  %2058 = vmatprep.subr.bf16.mxu1 %v3619_v16  ;;  %v3706_v38 = vld [vmem:[%s4922_s3 + $0x80] sm:$0xff]   ;;  %v3708_v41 = vld [vmem:[%s4922_s3 + $0x88] sm:$0xff]   ;;  %v3710_v44 = vld [vmem:[%s4922_s3 + $0x90] sm:$0xff]   ;;  %vm2789_vm2 = vcmask 9216  }
  0xf1   :  { %2140 = vmatprep.subr.bf16.mxu0 %v3622_v19  ;;  %v3652_v42 = vld [vmem:[%s4920_s1 + $0x6a4] ss:$24 sps:$4 sm:$0xff]   ;;  %v3650_v45 = vld [vmem:[%s4920_s1 + $0x6a0] ss:$24 sps:$4 sm:$0xff]   ;;  %v3655_v46 = vld [vmem:[%s4920_s1 + $0x6d4] ss:$24 sps:$4 sm:$0xff]  }
  0xf2   :  { %v3711_v3 = vld [vmem:[%s4922_s3 + $0xd8] sm:$0xff]   ;;  %v3653_v48 = vld [vmem:[%s4920_s1 + $0x6d0] ss:$24 sps:$4 sm:$0xff]   ;;  %v3661_v52 = vld [vmem:[%s4920_s1 + $0x734] ss:$24 sps:$4 sm:$0xff]  }
  0xf3   :  { %2059 = vmatpush1.bf16.msra.mxu1 %v3617_v20  ;;  %v3712_v47 = vld [vmem:[%s4922_s3 + $0x98] sm:$0xff]   ;;  %v3659_v55 = vld [vmem:[%s4920_s1 + $0x730] ss:$24 sps:$4 sm:$0xff]   ;;  %v3667_v60 = vld [vmem:[%s4920_s1 + $0x794] ss:$24 sps:$4 sm:$0xff]  }
  0xf4   :  { %2141 = vmatpush1.bf16.msra.mxu0 %v3620_v21  ;;  %2060 = vmatprep.subr.bf16.mxu1 %v3625_v22  ;;  %v3658_v50 = vld [vmem:[%s4920_s1 + $0x704] ss:$24 sps:$4 sm:$0xff]   ;;  %v3656_v51 = vld [vmem:[%s4920_s1 + $0x700] ss:$24 sps:$4 sm:$0xff]   ;;  %v3665_v61 = vld [vmem:[%s4920_s1 + $0x790] ss:$24 sps:$4 sm:$0xff]  }
  0xf5   :  { %2142 = vmatprep.subr.bf16.mxu0 %v3628_v23  ;;  %v3664_v57 = vld [vmem:[%s4920_s1 + $0x764] ss:$24 sps:$4 sm:$0xff]   ;;  %v3662_v59 = vld [vmem:[%s4920_s1 + $0x760] ss:$24 sps:$4 sm:$0xff]   ;;  %v3673_v1 = vld [vmem:[%s4920_s1 + $0x7f4] ss:$24 sps:$4 sm:$0xff]  }
  0xf6   :  { %v3670_v63 = vld [vmem:[%s4920_s1 + $0x7c4] ss:$24 sps:$4 sm:$0xff]   ;;  %v3668_v0 = vld [vmem:[%s4920_s1 + $0x7c0] ss:$24 sps:$4 sm:$0xff]   ;;  %v3671_v2 = vld [vmem:[%s4920_s1 + $0x7f0] ss:$24 sps:$4 sm:$0xff]  }
  0xf7   :  { %2061 = vmatpush1.bf16.msra.mxu1 %v3623_v24  ;;  %v3676_v4 = vld [vmem:[%s4920_s1 + $0x824] ss:$24 sps:$4 sm:$0xff]   ;;  %v3674_v5 = vld [vmem:[%s4920_s1 + $0x820] ss:$24 sps:$4 sm:$0xff]   ;;  %v3679_v6 = vld [vmem:[%s4920_s1 + $0x854] ss:$24 sps:$4 sm:$0xff]  }
  0xf8   :  { %2143 = vmatpush1.bf16.msra.mxu0 %v3626_v25  ;;  %2062 = vmatprep.subr.bf16.mxu1 %v3631_v27  ;;  %v3677_v7 = vld [vmem:[%s4920_s1 + $0x850] ss:$24 sps:$4 sm:$0xff]   ;;  %v3682_v8 = vld [vmem:[%s4920_s1 + $0x884] ss:$24 sps:$4 sm:$0xff]   ;;  %v3680_v9 = vld [vmem:[%s4920_s1 + $0x880] ss:$24 sps:$4 sm:$0xff]  }
  0xf9   :  { %2144 = vmatprep.subr.bf16.mxu0 %v3634_v28  ;;  %v3685_v10 = vld [vmem:[%s4920_s1 + $0x8b4] ss:$24 sps:$4 sm:$0xff]   ;;  %v3683_v11 = vld [vmem:[%s4920_s1 + $0x8b0] ss:$24 sps:$4 sm:$0xff]   ;;  %v3688_v12 = vld [vmem:[%s4920_s1 + $0x8e4] ss:$24 sps:$4 sm:$0xff]  }
  0xfa   :  { %v3686_v13 = vld [vmem:[%s4920_s1 + $0x8e0] ss:$24 sps:$4 sm:$0xff]   ;;  %v3691_v16 = vld [vmem:[%s4922_s3 + $0x48] sm:$0xff]   ;;  %v3693_v20 = vld [vmem:[%s4922_s3 + $0x50] sm:$0xff]   ;;  %v361_v23 = vsub.s32 0, %v3936_v43  ;;  %v365_v27 = vsub.s32 1, %v3936_v43 }
  0xfb   :  { %2063 = vmatpush1.bf16.msra.mxu1 %v3629_v29  ;;  %v3689_v14 = vld [vmem:[%s4922_s3 + $0x40] sm:$0xff]   ;;  %v3692_v19 = vld [vmem:[%s4922_s3 + $0x8] sm:$0xff]   ;;  %v3694_v21 = vld [vmem:[%s4922_s3 + $0x10] sm:$0xff]  }
  0xfc   :  { %2145 = vmatpush1.bf16.msra.mxu0 %v3632_v30  ;;  %2064 = vmatprep.subr.bf16.mxu1 %v3637_v31  ;;  %v3690_v15 = vld [vmem:[%s4922_s3] sm:$0xff]   ;;  %v3696_v22 = vld [vmem:[%s4922_s3 + $0x18] sm:$0xff]   ;;  %v3699_v30 = vld [vmem:[%s4922_s3 + $0x68] sm:$0xff]  }
  0xfd   :  { %2146 = vmatprep.subr.bf16.mxu0 %v3640_v32  ;;  %v3697_v24 = vld [vmem:[%s4922_s3 + $0x60] sm:$0xff]   ;;  %v3700_v32 = vld [vmem:[%s4922_s3 + $0x28] sm:$0xff]  }
  0xfe   :  { %v4787_v25 = vld [vmem:[%s4921_s2] sm:$0x3f] }
  0xff   :  { %2065 = vmatpush1.bf16.msra.mxu1 %v3635_v33  ;;  %v3698_v28 = vld [vmem:[%s4922_s3 + $0x20] sm:$0xff]   ;;  %v362_v29 = vrot.slane %v4787_v25, %v361_v23  ;;  %v366_v31 = vrot.slane %v4787_v25, %v365_v27  ;;  %v377_v23 = vsub.s32 4, %v3936_v43 }
 0x100   :  { %2147 = vmatpush1.bf16.msra.mxu0 %v3638_v34  ;;  %3169 = vmatprep.subr.bf16.mxu1 %v3705_v36  ;;  %v3701_v34 = vld [vmem:[%s4922_s3 + $0x70] sm:$0xff]  }
 0x101   :  { %2157 = vmatprep.subr.bf16.mxu0 %v3643_v35  ;;  %v378_v27 = vrot.slane %v4787_v25, %v377_v23 }
 0x102   :  { %2067 = vmatmul.mubr.bf16.vlgmr.msra.gmra.mrb[4].mxu1 %v4240_v26 }
 0x103   :  { %2149 = vmatmul.mubr.bf16.vlgmr.msra.gmra.mrb[4].mxu0 %v4034_v18  ;;  %3170 = vmatpush3.bf16.msra.mxu1 %v3706_v38  ;;  %v3709_v18 = vld [vmem:[%s4922_s3 + $0xd0] sm:$0xff]  }
 0x104   :  { %2158 = vmatpush1.bf16.msra.mxu0 %v3641_v37  ;;  %2189 = vmatprep.mubr.bf16.mxu0 %v4127_v49  ;;  %v3647_v49 = vld [vmem:[%s4920_s1 + $0x670] ss:$24 sps:$4 sm:$0xff]   ;;  %v3713_v37 = vld [vmem:[%s4922_s3 + $0xe0] sm:$0xff]  }
 0x105   :  { %2159 = vmatprep.subr.bf16.mxu0 %v3646_v62  ;;  %3171 = vmatprep.subr.bf16.mxu1 %v3707_v17  ;;  %v3714_v17 = vld [vmem:[%s4922_s3 + $0xa0] sm:$0xff]  }
 0x107   :  { %3172 = vmatpush3.bf16.msra.mxu1 %v3708_v41  ;;  %v3702_v41 = vld [vmem:[%s4922_s3 + $0x30] sm:$0xff]  }
 0x108   :  { %2160 = vmatpush1.bf16.msra.mxu0 %v3644_v39  ;;  %3173 = vmatprep.subr.bf16.mxu1 %v3709_v18 }
 0x109   :  { %2161 = vmatprep.subr.bf16.mxu0 %v3649_v40 }
 0x10b   :  { %3174 = vmatpush3.bf16.msra.mxu1 %v3710_v44  ;;  %v3716_v44 = vld [vmem:[%s4922_s3 + $0xa8] sm:$0xff]  }
 0x10c   :  { %2162 = vmatpush1.bf16.msra.mxu0 %v3647_v49  ;;  %3175 = vmatprep.subr.bf16.mxu1 %v3711_v3  ;;  %v3703_v49 = vld [vmem:[%s4922_s3 + $0x78] sm:$0xff]  }
 0x10d   :  { %2163 = vmatprep.subr.bf16.mxu0 %v3652_v42  ;;  %v3715_v42 = vld [vmem:[%s4922_s3 + $0xe8] sm:$0xff]   ;;  %v3704_v3 = vld [vmem:[%s4922_s3 + $0x38] sm:$0xff]  }
 0x10f   :  { %3176 = vmatpush3.bf16.msra.mxu1 %v3712_v47  ;;  %v3719_v47 = vld [vmem:[%s4922_s3 + $0xf8] sm:$0xff]  }
 0x110   :  { %2164 = vmatpush1.bf16.msra.mxu0 %v3650_v45  ;;  %3177 = vmatprep.subr.bf16.mxu1 %v3713_v37  ;;  %v3717_v45 = vld [vmem:[%s4922_s3 + $0xf0] sm:$0xff]  }
 0x111   :  { %2165 = vmatprep.subr.bf16.mxu0 %v3655_v46  ;;  %v3718_v46 = vld [vmem:[%s4922_s3 + $0xb0] sm:$0xff]  }
 0x113   :  { %3178 = vmatpush3.bf16.msra.mxu1 %v3714_v17 }
 0x114   :  { %2166 = vmatpush1.bf16.msra.mxu0 %v3653_v48  ;;  %3179 = vmatprep.subr.bf16.mxu1 %v3715_v42 }
 0x115   :  { %2167 = vmatprep.subr.bf16.mxu0 %v3658_v50  ;;  %v4694_v53 = vpop.f32.mrb[0].mxu1  ;;  %v3720_v50 = vld [vmem:[%s4922_s3 + $0xb8] sm:$0xff]  }
 0x116   :  { %v4696_v54 = vpop.f32.mrb[1].mxu1  ;;  %v1864_v33 = vadd.f32 %v4694_v53, %v362_v29 }
 0x117   :  { %v1867_v56 = vpop.f32.mrb[2].mxu1  ;;  %v1866_v35 = vadd.f32 %v4696_v54, %v366_v31  ;;  %3180 = vmatpush3.bf16.msra.mxu1 %v3716_v44  ;;  %v3721_v54 = vld [vmem:[%s4922_s3 + $0x140] sm:$0xff]  }
 0x118   :  { %2168 = vmatpush1.bf16.msra.mxu0 %v3656_v51  ;;  %v1868_v58 = vpop.f32.mrb[3].mxu1  ;;  %3181 = vmatprep.subr.bf16.mxu1 %v3717_v45  ;;  %v373_v56 = vsub.s32 3, %v3936_v43 }
 0x119   :  { %2169 = vmatprep.subr.bf16.mxu0 %v3661_v52 }
 0x11a   :  { %v374_v58 = vrot.slane %v4787_v25, %v373_v56 }
 0x11b   :  { %3182 = vmatpush3.bf16.msra.mxu1 %v3718_v46 }
 0x11c   :  { %2170 = vmatpush1.bf16.msra.mxu0 %v3659_v55  ;;  %3183 = vmatprep.subr.bf16.mxu1 %v3719_v47  ;;  %v369_v55 = vsub.s32 2, %v3936_v43 }
 0x11d   :  { %2171 = vmatprep.subr.bf16.mxu0 %v3664_v57 }
 0x11e   :  { %v370_v57 = vrot.slane %v4787_v25, %v369_v55 }
 0x11f   :  { %3184 = vmatpush3.bf16.msra.mxu1 %v3720_v50 }
 0x120   :  { %2172 = vmatpush1.bf16.msra.mxu0 %v3662_v59  ;;  %3191 = vmatprep.subr.bf16.mxu1 %v3721_v54 }
 0x121   :  { %2173 = vmatprep.subr.bf16.mxu0 %v3667_v60 }
 0x124   :  { %2174 = vmatpush1.bf16.msra.mxu0 %v3665_v61 }
 0x125   :  { %2175 = vmatprep.subr.bf16.mxu0 %v3670_v63 }
 0x128   :  { %2176 = vmatpush1.bf16.msra.mxu0 %v3668_v0 }
 0x129   :  { %2177 = vmatprep.subr.bf16.mxu0 %v3673_v1 }
 0x12c   :  { %2178 = vmatpush1.bf16.msra.mxu0 %v3671_v2 }
 0x12d   :  { %2179 = vmatprep.subr.bf16.mxu0 %v3676_v4 }
 0x130   :  { %2180 = vmatpush1.bf16.msra.mxu0 %v3674_v5 }
 0x131   :  { %2181 = vmatprep.subr.bf16.mxu0 %v3679_v6  ;;  %v3722_v6 = vld [vmem:[%s4922_s3 + $0x100] sm:$0xff]  }
 0x134   :  { %2182 = vmatpush1.bf16.msra.mxu0 %v3677_v7 }
 0x135   :  { %2183 = vmatprep.subr.bf16.mxu0 %v3682_v8  ;;  %v3723_v8 = vld [vmem:[%s4922_s3 + $0x148] sm:$0xff]  }
 0x138   :  { %2184 = vmatpush1.bf16.msra.mxu0 %v3680_v9  ;;  %v3724_v9 = vld [vmem:[%s4922_s3 + $0x108] sm:$0xff]  }
 0x139   :  { %2185 = vmatprep.subr.bf16.mxu0 %v3685_v10  ;;  %v3725_v10 = vld [vmem:[%s4922_s3 + $0x150] sm:$0xff]  }
 0x13c   :  { %2186 = vmatpush1.bf16.msra.mxu0 %v3683_v11  ;;  %v3726_v11 = vld [vmem:[%s4922_s3 + $0x110] sm:$0xff]  }
 0x13d   :  { %2187 = vmatprep.subr.bf16.mxu0 %v3688_v12  ;;  %v3727_v12 = vld [vmem:[%s4922_s3 + $0x158] sm:$0xff]  }
 0x140   :  { %2188 = vmatpush1.bf16.msra.mxu0 %v3686_v13  ;;  %v3728_v13 = vld [vmem:[%s4922_s3 + $0x118] sm:$0xff]  }
 0x141   :  { %3147 = vmatprep.subr.bf16.mxu0 %v3689_v14  ;;  %v3729_v14 = vld [vmem:[%s4922_s3 + $0x160] sm:$0xff]  }
 0x143   :  { %2190 = vmatmul.mubr.bf16.vlgmr.msra.gmra.mrb[4].mxu0 %v4240_v26  ;;  %v3695_v26 = vld [vmem:[%s4922_s3 + $0x58] sm:$0xff]  }
 0x144   :  { %3148 = vmatpush3.bf16.msra.mxu0 %v3690_v15  ;;  %v3730_v15 = vld [vmem:[%s4922_s3 + $0x120] sm:$0xff]  }
 0x145   :  { %3149 = vmatprep.subr.bf16.mxu0 %v3691_v16  ;;  %v3731_v16 = vld [vmem:[%s4922_s3 + $0x168] sm:$0xff]  }
 0x148   :  { %3150 = vmatpush3.bf16.msra.mxu0 %v3692_v19  ;;  %v3732_v19 = vld [vmem:[%s4922_s3 + $0x128] sm:$0xff]  }
 0x149   :  { %3151 = vmatprep.subr.bf16.mxu0 %v3693_v20  ;;  %v3733_v20 = vld [vmem:[%s4922_s3 + $0x170] sm:$0xff]  }
 0x14c   :  { %3152 = vmatpush3.bf16.msra.mxu0 %v3694_v21  ;;  %v3734_v21 = vld [vmem:[%s4922_s3 + $0x130] sm:$0xff]  }
 0x14d   :  { %3153 = vmatprep.subr.bf16.mxu0 %v3695_v26  ;;  %v3735_v26 = vld [vmem:[%s4922_s3 + $0x178] sm:$0xff]  }
 0x150   :  { %3154 = vmatpush3.bf16.msra.mxu0 %v3696_v22  ;;  %v3736_v22 = vld [vmem:[%s4922_s3 + $0x138] sm:$0xff]  }
 0x151   :  { %3155 = vmatprep.subr.bf16.mxu0 %v3697_v24  ;;  %v381_v24 = vsub.s32 5, %v3936_v43 }
 0x154   :  { %3156 = vmatpush3.bf16.msra.mxu0 %v3698_v28  ;;  %v382_v28 = vrot.slane %v4787_v25, %v381_v24  ;;  %v3776_v25 = vmov 0.0  }
 0x155   :  { %3157 = vmatprep.subr.bf16.mxu0 %v3699_v30 }
 0x156   :  { %v1945_v36 = vpop.f32.mrb[0].mxu0 }
 0x157   :  { %v3225_v62 = vadd.f32 %v1945_v36, %v1864_v33  ;;  %v1947_v38 = vpop.f32.mrb[1].mxu0 }
 0x158   :  { %v3227_v39 = vadd.f32 %v1947_v38, %v1866_v35  ;;  %v1949_v40 = vpop.f32.mrb[2].mxu0  ;;  %3158 = vmatpush3.bf16.msra.mxu0 %v3700_v32 }
 0x159   :  { %3739 = vtanh.f32 %v3225_v62  ;;  %v1950_v18 = vpop.f32.mrb[3].mxu0  ;;  %3159 = vmatprep.subr.bf16.mxu0 %v3701_v34 }
 0x15a   :  { %3741 = vtanh.f32 %v3227_v39  ;;  %v3738_v18 = vld [vmem:[%s4924_s5 + $0x8] sm:$0xff]  }
 0x15c   :  { %3160 = vmatpush3.bf16.msra.mxu0 %v3702_v41  ;;  %v3737_v41 = vld [vmem:[%s4924_s5] sm:$0xff]  }
 0x15d   :  { %3161 = vmatprep.subr.bf16.mxu0 %v3703_v49  ;;  %v3094_v49 = vld [vmem:[%s4923_s4] ss:$0 sm:$0xff]  ;;  %s3778_s4 = smov [#allocation2]  }
 0x15e   :  { %s2797_s13 = sshll.u32 %s3778_s4, 4  ;;  %s2798_s13 = int_to_ptr.vmem [resolvable:$true] %s2797_s13 }
 0x15f   :  { %s3751_s14 = scalar_lea.vmem %s2798_s13, 32  ;;  %p3756_p1 = scmp.lt.s32.totalorder %s2798_s13, %s2798_s13 }
 0x160   :  { %3162 = vmatpush3.bf16.msra.mxu0 %v3704_v3  ;;  %p3752_p0 = scmp.ne.s32.totalorder %s2798_s13, %s3751_s14  ;;  %p3757_p2 = scmp.lt.s32.totalorder %s3751_s14, %s3751_s14 }
 0x162   :  { %p3758_p3 = por %p3757_p2, %p3756_p1 }
 0x163   :  { %v3740_v48 = vpop.eup %3739 }
 0x164   :  { %v3742_v51 = vpop.eup %3741  ;;  %v2204_v53 = vpack.c.bf16 %v3740_v48, %v3740_v48  ;;  %p3759_p4 = pnand %p3758_p3, %p3752_p0 }
 0x165   :  { %v2205_v52 = vpack.c.bf16 %v3742_v51, %v3742_v51 }
 0x167   :  { %2633 = vmatprep.mubr.bf16.mxu0 %v2205_v52 }
 0x168   :  { %2634 = vmatmul.mubr.bf16.vlgmr.msra.gmra.mrb[8].mxu0 %v2204_v53 }
 0x1d5   :  { %v2068_v59 = vpop.f32.mrb[4].mxu1 }
 0x1d6   :  { %v3228_v60 = vadd.f32 %v2068_v59, %v370_v57  ;;  %v2070_v61 = vpop.f32.mrb[5].mxu1  ;;  %v3143_v57 = vld [vmem:[%s4925_s6] ss:$0 sm:$0xff] }
 0x1d7   :  { %v3229_v63 = vadd.f32 %v2070_v61, %v374_v58  ;;  %v2072_v0 = vpop.f32.mrb[6].mxu1 }
 0x1d8   :  { %3743 = vtanh.f32 %v3228_v60  ;;  %v2073_v1 = vpop.f32.mrb[7].mxu1 }
 0x1d9   :  { %3745 = vtanh.f32 %v3229_v63 }
 0x1e2   :  { %v3744_v2 = vpop.eup %3743 }
 0x1e3   :  { %v3746_v4 = vpop.eup %3745  ;;  %v2206_v7 = vpack.c.bf16 %v3744_v2, %v3744_v2 }
 0x1e4   :  { %v2207_v5 = vpack.c.bf16 %v3746_v4, %v3746_v4 }
 0x1e6   :  { %2673 = vmatprep.mubr.bf16.mxu1 %v2207_v5 }
 0x1e7   :  { %2674 = vmatmul.mubr.bf16.vlgmr.msra.gmra.mrb[8].mxu1 %v2206_v7 }
 0x1e8   :  { %3192 = vmatpush3.bf16.msra.mxu1 %v3722_v6 }
 0x1e9   :  { %3193 = vmatprep.subr.bf16.mxu1 %v3723_v8 }
 0x1ec   :  { %3194 = vmatpush3.bf16.msra.mxu1 %v3724_v9 }
 0x1ed   :  { %3195 = vmatprep.subr.bf16.mxu1 %v3725_v10 }
 0x1f0   :  { %3196 = vmatpush3.bf16.msra.mxu1 %v3726_v11 }
 0x1f1   :  { %3197 = vmatprep.subr.bf16.mxu1 %v3727_v12 }
 0x1f4   :  { %3198 = vmatpush3.bf16.msra.mxu1 %v3728_v13 }
 0x1f5   :  { %3199 = vmatprep.subr.bf16.mxu1 %v3729_v14 }
 0x1f8   :  { %3200 = vmatpush3.bf16.msra.mxu1 %v3730_v15 }
 0x1f9   :  { %3201 = vmatprep.subr.bf16.mxu1 %v3731_v16 }
 0x1fc   :  { %3202 = vmatpush3.bf16.msra.mxu1 %v3732_v19 }
 0x1fd   :  { %3203 = vmatprep.subr.bf16.mxu1 %v3733_v20 }
 0x200   :  { %3204 = vmatpush3.bf16.msra.mxu1 %v3734_v21 }
 0x201   :  { %3205 = vmatprep.subr.bf16.mxu1 %v3735_v26 }
 0x204   :  { %3206 = vmatpush3.bf16.msra.mxu1 %v3736_v22 }
 0x205   :  { %3216 = vmatprep.subr.bf16.mxu1 %v3776_v25 }
 0x216   :  { %v2191_v29 = vpop.f32.mrb[4].mxu0 }
 0x217   :  { %v3230_v30 = vadd.f32 %v2191_v29, %v378_v27  ;;  %v2193_v31 = vpop.f32.mrb[5].mxu0 }
 0x218   :  { %v3231_v32 = vadd.f32 %v2193_v31, %v382_v28  ;;  %v2195_v33 = vpop.f32.mrb[6].mxu0 }
 0x219   :  { %3747 = vtanh.f32 %v3230_v30  ;;  %v2196_v34 = vpop.f32.mrb[7].mxu0 }
 0x21a   :  { %3749 = vtanh.f32 %v3231_v32 }
 0x223   :  { %v3748_v35 = vpop.eup %3747 }
 0x224   :  { %v3750_v36 = vpop.eup %3749  ;;  %v2208_v62 = vpack.c.bf16 %v3748_v35, %v3748_v35 }
 0x225   :  { %v2209_v37 = vpack.c.bf16 %v3750_v36, %v3750_v36 }
 0x227   :  { %2713 = vmatprep.mubr.bf16.mxu1 %v2209_v37 }
 0x228   :  { %2714 = vmatmul.mubr.bf16.vlgmr.msra.gmra.mrb[12].mxu1 %v2208_v62 }
 0x229   :  { %3217 = vmatpush3.bf16.msra.mxu1 %v3737_v41  ;;  %3220 = vmatprep.mubr.msk.bf16.mxu1 %vm3777_vm0, %v3776_v25 }
 0x22a   :  { %3218 = vmatprep.subr.bf16.mxu1 %v3776_v25 }
 0x22d   :  { %3219 = vmatpush3.bf16.msra.mxu1 %v3738_v18 }
 0x23b   :  { %v3163_v38 = vpop.f32.mrb[8].mxu0 }
 0x23c   :  { %v3164_v43 = vpop.f32.mrb[9].mxu0 }
 0x23d   :  { %v3165_v17 = vadd.f32 %v3164_v43, %v3163_v38  ;;  %v3166_v39 = vpop.f32.mrb[10].mxu0 }
 0x23e   :  { %v3167_v40 = vpop.f32.mrb[11].mxu0 }
 0x23f   :  { %v2636_v3 = vadd.f32 %v3165_v17, %v3094_v49 }
 0x2ba   :  { %v3185_v42 = vpop.f32.mrb[8].mxu1 }
 0x2bb   :  { %v3186_v44 = vpop.f32.mrb[9].mxu1 }
 0x2bc   :  { %v3187_v45 = vadd.f32 %v3186_v44, %v3185_v42  ;;  %v3188_v46 = vpop.f32.mrb[10].mxu1 }
 0x2bd   :  { %v3189_v47 = vpop.f32.mrb[11].mxu1 }
 0x2be   :  { %v2676_v48 = vadd.f32 %v3187_v45, %v2636_v3 }
 0x2fb   :  { %v3207_v50 = vpop.f32.mrb[12].mxu1 }
 0x2fc   :  { %v3208_v51 = vpop.f32.mrb[13].mxu1 }
 0x2fd   :  { %v3209_v52 = vadd.f32 %v3208_v51, %v3207_v50  ;;  %v3210_v53 = vpop.f32.mrb[14].mxu1 }
 0x2fe   :  { %v3211_v54 = vpop.f32.mrb[15].mxu1 }
 0x2ff   :  { %v2716_v55 = vadd.f32 %v3209_v52, %v2676_v48 }
 0x301   :  { %v2721_v56 = vpack.c.bf16 %v2716_v55, %v2716_v55 }
 0x303   :  { %3221 = vmatmul.mubr.msk.bf16.vlgmr.msra.gmra.mrb[16].mxu1 %vm2745_vm1, %v2721_v56 }
 0x3d6   :  { %v2783_v58 = vpop.f32.mrb[16].mxu1 }
 0x3d7   :  { %v2784_v59 = vadd.f32 %v3143_v57, %v2783_v58  ;;  %v3222_v60 = vpop.f32.mrb[17].mxu1 }
 0x3d8   :  { %v2786_v61 = vpop.f32.mrb[18].mxu1 }
 0x3d9   :  { %v3223_v63 = vpop.f32.mrb[19].mxu1  ;;  %2790 = vst.msk [vmem:[#allocation2] sm:$0x3] %vm2789_vm2, %v2784_v59 }
 0x3da   :  { %3762 = shalt.err (!%p3759_p4)
}
 0x3db   :  { %s3763_s6 = scalar_lea.hbm %s4926_s7, 32 }
 0x3dc   :  { %p3764_p5 = scmp.ne.s32.totalorder %s4926_s7, %s3763_s6  ;;  %p3767_p6 = scmp.lt.u32.totalorder %s3763_s6, %s4926_s7 }
 0x3de   :  { %p3769_p7 = pnand %p3767_p6, %p3764_p5 }
 0x3e0   :  { %3772 = shalt.err (!%p3769_p7)
}
 0x3e1   :  { %2800 = dma.vmem_to_hbm [thread:$0]  %s2798_s13, 32, %s4926_s7, [#allocation3]  }
 0x3e2   :  { %3773 = dma.done.wait [#allocation3], 32  }
 0x3e3   :  { %3774 = vsyncadd [#allocation3], 4294967264 }
 0x3e4   :  { %2804 = vsyncpa [#allocation3], 1 }

</bundles_post_ra>
